<compile_context>
chip_gen: v5e
topology: v5e:2x2
jax: 0.10.0
libtpu: 0.0.40
codegen_flags: <defaults>
</compile_context>

<pallas_src>
import functools

import jax
import jax.numpy as jnp
from jax.experimental import pallas as pl
from jax.experimental.pallas import tpu as pltpu

# ----------------------------- model config (small) -----------------------------
BATCH = 2
IMG_C = 3
IMG_HW = 32
PATCH = 8                        # -> 4x4 = 16 patches, 17 tokens with CLS
WIDTH = 64                       # transformer width
HEADS = 4
HEAD_DIM = WIDTH // HEADS
LAYERS = 2
EMBED_DIM = 32                   # CLIP image-feature dim (CHANNELS[name] analog)
NUM_CLASSES = 1
LN_EPS = 1e-5

N_TOKENS = (IMG_HW // PATCH) ** 2 + 1    # 17 real tokens
N_PAD = 24                               # padded token count (multiple of 8 sublanes)


# --------------------------------- shared helpers ---------------------------------
def _layernorm(x, g, b, eps):
    mu = jnp.mean(x, axis=-1, keepdims=True)
    var = jnp.mean((x - mu) * (x - mu), axis=-1, keepdims=True)
    return (x - mu) * jax.lax.rsqrt(var + eps) * g + b


# ------------------------------ fully fused CLIP kernel ---------------------------
def _clip_fused_kernel(patches_ref, patch_w_ref, ext_emb_ref, lnpre_g_ref, lnpre_b_ref,
                       ln1_g_ref, ln1_b_ref, qkv_w_ref, qkv_b_ref, out_w_ref, out_b_ref,
                       ln2_g_ref, ln2_b_ref, fc1_w_ref, fc1_b_ref, fc2_w_ref, fc2_b_ref,
                       lnpost_g_ref, lnpost_b_ref, proj_ref, fcw_ref, fcb_ref,
                       feat_ref, logit_ref, *,
                       batch, n_pad, n_real, heads, head_dim, layers, eps):
    d = patch_w_ref.shape[-1]

    # ---------------- stem: patch-embed matmul + (cls|pos) add + ln_pre ----------------
    pe = jnp.dot(patches_ref[...].reshape(batch * n_pad, -1).astype(jnp.bfloat16),
                 patch_w_ref[...], preferred_element_type=jnp.float32)   # (B*Np, D)
    h = pe.reshape(batch, n_pad, d) + ext_emb_ref[...][None]             # (B, Np, D)
    h = _layernorm(h, lnpre_g_ref[...], lnpre_b_ref[...], eps)

    # hoisted key padding mask (padded key columns -> -1e9), computed once
    key_idx = jax.lax.broadcasted_iota(jnp.int32, (1, 1, n_pad), 2)
    key_mask = jnp.where(key_idx < n_real, jnp.float32(0.0), jnp.float32(-1e9))
    scale = 1.0 / (head_dim ** 0.5)

    # ---------------- transformer blocks (static unroll, everything VMEM-resident) -----
    for l in range(layers):
        # ---- pre-LN multi-head attention ----
        x = _layernorm(h, ln1_g_ref[l], ln1_b_ref[l], eps)
        x2d = x.reshape(batch * n_pad, d)
        qkv = jnp.dot(x2d.astype(jnp.bfloat16), qkv_w_ref[l],
                      preferred_element_type=jnp.float32) + qkv_b_ref[l]  # (B*Np, 3D)
        q = qkv[:, 0:d].reshape(batch, n_pad, d)
        k = qkv[:, d:2 * d].reshape(batch, n_pad, d)
        v = qkv[:, 2 * d:3 * d].reshape(batch, n_pad, d)

        out_w_l = out_w_ref[l]                              # (D, D) bf16
        attn2d = jnp.zeros((batch * n_pad, d), jnp.float32)
        for hh in range(heads):                             # tiny static unroll
            sl = slice(hh * head_dim, (hh + 1) * head_dim)
            qh = q[:, :, sl].astype(jnp.bfloat16)
            kh = k[:, :, sl].astype(jnp.bfloat16)
            vh = v[:, :, sl].astype(jnp.bfloat16)
            s = jax.lax.dot_general(qh, kh, (((2,), (2,)), ((0,), (0,))),
                                    preferred_element_type=jnp.float32)
            s = s * scale + key_mask                        # f32 mask add (keep in f32)
            s = s - jnp.max(s, axis=-1, keepdims=True)
            p = jnp.exp(s)
            p = p * pl.reciprocal(jnp.sum(p, axis=-1, keepdims=True), approx=True)
            pv = jax.lax.dot_general(p.astype(jnp.bfloat16), vh,
                                     (((2,), (1,)), ((0,), (0,))),
                                     preferred_element_type=jnp.float32)  # (B, Np, hd)
            # fold the head "concat" into the output projection: sublane slice of out_w
            attn2d = attn2d + jnp.dot(
                pv.reshape(batch * n_pad, head_dim).astype(jnp.bfloat16),
                out_w_l[sl, :], preferred_element_type=jnp.float32)
        h = h + (attn2d + out_b_ref[l]).reshape(batch, n_pad, d)

        # ---- pre-LN MLP with QuickGELU ----
        x2 = _layernorm(h, ln2_g_ref[l], ln2_b_ref[l], eps).reshape(batch * n_pad, d)
        m = jnp.dot(x2.astype(jnp.bfloat16), fc1_w_ref[l],
                    preferred_element_type=jnp.float32) + fc1_b_ref[l]
        m = m * jax.nn.sigmoid(1.702 * m)                   # QuickGELU, f32 elementwise
        m = jnp.dot(m.astype(jnp.bfloat16), fc2_w_ref[l],
                    preferred_element_type=jnp.float32) + fc2_b_ref[l]
        h = h + m.reshape(batch, n_pad, d)

    # ---------------- head: ln_post on CLS + visual projection + fc --------------------
    cls = h[:, 0, :]                                        # (B, D) CLS token
    xn = _layernorm(cls, lnpost_g_ref[...], lnpost_b_ref[...], eps)
    feats = jnp.dot(xn.astype(jnp.bfloat16), proj_ref[...],
                    preferred_element_type=jnp.float32)     # (B, E)
    feat_ref[...] = feats
    logit_ref[...] = jnp.dot(feats.astype(jnp.bfloat16), fcw_ref[...],
                             preferred_element_type=jnp.float32) + fcb_ref[...]


def clip_fused(patches_pad, params):
    blk = params["blocks"]
    b_sz, n_pad, cpp = patches_pad.shape
    d, e, nc = WIDTH, EMBED_DIM, NUM_CLASSES

    kern = functools.partial(_clip_fused_kernel, batch=b_sz, n_pad=n_pad,
                             n_real=N_TOKENS, heads=HEADS, head_dim=HEAD_DIM,
                             layers=LAYERS, eps=LN_EPS)

    def full(shape):
        zeros = (0,) * len(shape)
        return pl.BlockSpec(shape, lambda i: zeros)

    return pl.pallas_call(
        kern,
        out_shape=(jax.ShapeDtypeStruct((b_sz, e), jnp.float32),
                   jax.ShapeDtypeStruct((b_sz, nc), jnp.float32)),
        grid=(1,),
        in_specs=[
            full((b_sz, n_pad, cpp)),                        # patches (im2col, padded)
            full((cpp, d)),                                  # patch-embed weight
            full((n_pad, d)),                                # cls+pos embedding slab
            full((1, d)), full((1, d)),                      # ln_pre g, b
            full((LAYERS, 1, d)), full((LAYERS, 1, d)),      # ln1 g, b
            full((LAYERS, d, 3 * d)), full((LAYERS, 1, 3 * d)),  # qkv w, b
            full((LAYERS, d, d)), full((LAYERS, 1, d)),      # out proj w, b
            full((LAYERS, 1, d)), full((LAYERS, 1, d)),      # ln2 g, b
            full((LAYERS, d, 4 * d)), full((LAYERS, 1, 4 * d)),  # fc1 w, b
            full((LAYERS, 4 * d, d)), full((LAYERS, 1, d)),  # fc2 w, b
            full((1, d)), full((1, d)),                      # ln_post g, b
            full((d, e)),                                    # visual projection
            full((e, nc)), full((1, nc)),                    # fc w, b
        ],
        out_specs=(full((b_sz, e)), full((b_sz, nc))),
    )(patches_pad, params["patch_w"], params["ext_emb"],
      params["ln_pre_g"], params["ln_pre_b"],
      blk["ln1_g"], blk["ln1_b"], blk["qkv_w"], blk["qkv_b"],
      blk["out_w"], blk["out_b"], blk["ln2_g"], blk["ln2_b"],
      blk["fc1_w"], blk["fc1_b"], blk["fc2_w"], blk["fc2_b"],
      params["ln_post_g"], params["ln_post_b"],
      params["proj"], params["fc_w"], params["fc_b"])


# ---------------------------------- parameters ------------------------------------
def init_params(key):
    def nrm(k, shape, scale=0.02, dtype=jnp.float32):
        return (scale * jax.random.normal(k, shape, dtype=jnp.float32)).astype(dtype)

    keys = jax.random.split(key, 9)
    g_tokens = N_TOKENS - 1

    class_emb = nrm(keys[1], (WIDTH,))
    pos_emb = nrm(keys[2], (N_TOKENS, WIDTH))
    # precomputed token-embedding slab: row 0 = cls+pos[0], rows 1..g = pos[1:], pad rows = 0
    ext_emb = jnp.zeros((N_PAD, WIDTH), jnp.float32)
    ext_emb = ext_emb.at[0].set(class_emb + pos_emb[0])
    ext_emb = ext_emb.at[1:1 + g_tokens].set(pos_emb[1:])

    return {
        "patch_w": nrm(keys[0], (IMG_C * PATCH * PATCH, WIDTH), dtype=jnp.bfloat16),
        "ext_emb": ext_emb,
        "ln_pre_g": jnp.ones((1, WIDTH), jnp.float32),
        "ln_pre_b": jnp.zeros((1, WIDTH), jnp.float32),
        "ln_post_g": jnp.ones((1, WIDTH), jnp.float32),
        "ln_post_b": jnp.zeros((1, WIDTH), jnp.float32),
        "proj": nrm(keys[3], (WIDTH, EMBED_DIM), dtype=jnp.bfloat16),
        "fc_w": nrm(keys[4], (EMBED_DIM, NUM_CLASSES), dtype=jnp.bfloat16),
        "fc_b": jnp.zeros((1, NUM_CLASSES), jnp.float32),
        "blocks": {
            "ln1_g": jnp.ones((LAYERS, 1, WIDTH), jnp.float32),
            "ln1_b": jnp.zeros((LAYERS, 1, WIDTH), jnp.float32),
            "qkv_w": nrm(keys[5], (LAYERS, WIDTH, 3 * WIDTH), dtype=jnp.bfloat16),
            "qkv_b": jnp.zeros((LAYERS, 1, 3 * WIDTH), jnp.float32),
            "out_w": nrm(keys[6], (LAYERS, WIDTH, WIDTH), dtype=jnp.bfloat16),
            "out_b": jnp.zeros((LAYERS, 1, WIDTH), jnp.float32),
            "ln2_g": jnp.ones((LAYERS, 1, WIDTH), jnp.float32),
            "ln2_b": jnp.zeros((LAYERS, 1, WIDTH), jnp.float32),
            "fc1_w": nrm(keys[7], (LAYERS, WIDTH, 4 * WIDTH), dtype=jnp.bfloat16),
            "fc1_b": jnp.zeros((LAYERS, 1, 4 * WIDTH), jnp.float32),
            "fc2_w": nrm(keys[8], (LAYERS, 4 * WIDTH, WIDTH), dtype=jnp.bfloat16),
            "fc2_b": jnp.zeros((LAYERS, 1, WIDTH), jnp.float32),
        },
    }


# ----------------------------------- forward --------------------------------------
@functools.partial(jax.jit, static_argnames=("return_feature",))
def clip_forward(x, params, return_feature=False):
    """x: NCHW float32 image batch (matches the PyTorch conv input layout)."""
    b_sz, c, hgt, wid = x.shape
    gh, gw = hgt // PATCH, wid // PATCH
    g = gh * gw
    cpp = c * PATCH * PATCH

    # im2col for the stride==kernel conv1 (pure layout glue; no compute)
    patches = (x.reshape(b_sz, c, gh, PATCH, gw, PATCH)
                 .transpose(0, 2, 4, 1, 3, 5)
                 .reshape(b_sz, g, cpp))
    # single pad HLO: row 0 = CLS slot (zero patch), rows g+1.. = sublane padding
    patches_pad = jnp.pad(patches, ((0, 0), (1, N_PAD - 1 - g), (0, 0)))

    feats, logits = clip_fused(patches_pad, params)
    return feats if return_feature else logits


if __name__ == "__main__":
    key = jax.random.PRNGKey(0)
    pkey, xkey = jax.random.split(key)
    params = init_params(pkey)
    x = jax.random.normal(xkey, (BATCH, IMG_C, IMG_HW, IMG_HW), dtype=jnp.float32)

    logits = clip_forward(x, params, return_feature=False)
    feats = clip_forward(x, params, return_feature=True)
    jax.block_until_ready((logits, feats))

    assert logits.shape == (BATCH, NUM_CLASSES)
    assert feats.shape == (BATCH, EMBED_DIM)
    assert bool(jnp.all(jnp.isfinite(logits))) and bool(jnp.all(jnp.isfinite(feats)))
    print("KERNEL_OK")
</pallas_src>

<mosaic_0001>
module attributes {stable_mosaic.version = 11 : i64} {
  func.func @_clip_fused_kernel(%arg0: i32, %arg1: memref<2x24x192xf32, #tpu.memory_space<vmem>>, %arg2: memref<192x64xbf16, #tpu.memory_space<vmem>>, %arg3: memref<24x64xf32, #tpu.memory_space<vmem>>, %arg4: memref<1x64xf32, #tpu.memory_space<vmem>>, %arg5: memref<1x64xf32, #tpu.memory_space<vmem>>, %arg6: memref<2x1x64xf32, #tpu.memory_space<vmem>>, %arg7: memref<2x1x64xf32, #tpu.memory_space<vmem>>, %arg8: memref<2x64x192xbf16, #tpu.memory_space<vmem>>, %arg9: memref<2x1x192xf32, #tpu.memory_space<vmem>>, %arg10: memref<2x64x64xbf16, #tpu.memory_space<vmem>>, %arg11: memref<2x1x64xf32, #tpu.memory_space<vmem>>, %arg12: memref<2x1x64xf32, #tpu.memory_space<vmem>>, %arg13: memref<2x1x64xf32, #tpu.memory_space<vmem>>, %arg14: memref<2x64x256xbf16, #tpu.memory_space<vmem>>, %arg15: memref<2x1x256xf32, #tpu.memory_space<vmem>>, %arg16: memref<2x256x64xbf16, #tpu.memory_space<vmem>>, %arg17: memref<2x1x64xf32, #tpu.memory_space<vmem>>, %arg18: memref<1x64xf32, #tpu.memory_space<vmem>>, %arg19: memref<1x64xf32, #tpu.memory_space<vmem>>, %arg20: memref<64x32xbf16, #tpu.memory_space<vmem>>, %arg21: memref<32x1xbf16, #tpu.memory_space<vmem>>, %arg22: memref<1x1xf32, #tpu.memory_space<vmem>>, %arg23: memref<2x32xf32, #tpu.memory_space<vmem>>, %arg24: memref<2x1xf32, #tpu.memory_space<vmem>>) attributes {dimension_semantics = [#tpu.dimension_semantics<arbitrary>], iteration_bounds = array<i64: 1>, scalar_prefetch = 0 : i64, scratch_operands = 0 : i64, tpu.core_type = #tpu.core_type<tc>, window_params = [{pipeline_mode = #tpu.pipeline_mode<synchronous>, transform_indices = @transform_0, window_bounds = array<i64: 2, 24, 192>}, {pipeline_mode = #tpu.pipeline_mode<synchronous>, transform_indices = @transform_1, window_bounds = array<i64: 192, 64>}, {pipeline_mode = #tpu.pipeline_mode<synchronous>, transform_indices = @transform_2, window_bounds = array<i64: 24, 64>}, {pipeline_mode = #tpu.pipeline_mode<synchronous>, transform_indices = @transform_3, window_bounds = array<i64: 1, 64>}, {pipeline_mode = #tpu.pipeline_mode<synchronous>, transform_indices = @transform_4, window_bounds = array<i64: 1, 64>}, {pipeline_mode = #tpu.pipeline_mode<synchronous>, transform_indices = @transform_5, window_bounds = array<i64: 2, 1, 64>}, {pipeline_mode = #tpu.pipeline_mode<synchronous>, transform_indices = @transform_6, window_bounds = array<i64: 2, 1, 64>}, {pipeline_mode = #tpu.pipeline_mode<synchronous>, transform_indices = @transform_7, window_bounds = array<i64: 2, 64, 192>}, {pipeline_mode = #tpu.pipeline_mode<synchronous>, transform_indices = @transform_8, window_bounds = array<i64: 2, 1, 192>}, {pipeline_mode = #tpu.pipeline_mode<synchronous>, transform_indices = @transform_9, window_bounds = array<i64: 2, 64, 64>}, {pipeline_mode = #tpu.pipeline_mode<synchronous>, transform_indices = @transform_10, window_bounds = array<i64: 2, 1, 64>}, {pipeline_mode = #tpu.pipeline_mode<synchronous>, transform_indices = @transform_11, window_bounds = array<i64: 2, 1, 64>}, {pipeline_mode = #tpu.pipeline_mode<synchronous>, transform_indices = @transform_12, window_bounds = array<i64: 2, 1, 64>}, {pipeline_mode = #tpu.pipeline_mode<synchronous>, transform_indices = @transform_13, window_bounds = array<i64: 2, 64, 256>}, {pipeline_mode = #tpu.pipeline_mode<synchronous>, transform_indices = @transform_14, window_bounds = array<i64: 2, 1, 256>}, {pipeline_mode = #tpu.pipeline_mode<synchronous>, transform_indices = @transform_15, window_bounds = array<i64: 2, 256, 64>}, {pipeline_mode = #tpu.pipeline_mode<synchronous>, transform_indices = @transform_16, window_bounds = array<i64: 2, 1, 64>}, {pipeline_mode = #tpu.pipeline_mode<synchronous>, transform_indices = @transform_17, window_bounds = array<i64: 1, 64>}, {pipeline_mode = #tpu.pipeline_mode<synchronous>, transform_indices = @transform_18, window_bounds = array<i64: 1, 64>}, {pipeline_mode = #tpu.pipeline_mode<synchronous>, transform_indices = @transform_19, window_bounds = array<i64: 64, 32>}, {pipeline_mode = #tpu.pipeline_mode<synchronous>, transform_indices = @transform_20, window_bounds = array<i64: 32, 1>}, {pipeline_mode = #tpu.pipeline_mode<synchronous>, transform_indices = @transform_21, window_bounds = array<i64: 1, 1>}, {pipeline_mode = #tpu.pipeline_mode<synchronous>, transform_indices = @transform_22, window_bounds = array<i64: 2, 32>}, {pipeline_mode = #tpu.pipeline_mode<synchronous>, transform_indices = @transform_23, window_bounds = array<i64: 2, 1>}]} {
    %c0 = arith.constant 0 : index
    %c0_0 = arith.constant 0 : index
    %c0_1 = arith.constant 0 : index
    %0 = vector.load %arg1[%c0, %c0_0, %c0_1] : memref<2x24x192xf32, #tpu.memory_space<vmem>>, vector<2x24x192xf32>
    %1 = vector.shape_cast %0 : vector<2x24x192xf32> to vector<48x192xf32>
    %2 = arith.truncf %1 : vector<48x192xf32> to vector<48x192xbf16>
    %c0_2 = arith.constant 0 : index
    %c0_3 = arith.constant 0 : index
    %3 = vector.load %arg2[%c0_2, %c0_3] : memref<192x64xbf16, #tpu.memory_space<vmem>>, vector<192x64xbf16>
    %cst = arith.constant dense<0.000000e+00> : vector<48x64xf32>
    %4 = tpu.matmul %2, %3, %cst {dimension_numbers = #tpu.dot_dimension_numbers<[1], [0], [0], [1], [0, 0, 1, 1], [], []>} : vector<48x192xbf16>, vector<192x64xbf16>, vector<48x64xf32> -> vector<48x64xf32>
    %5 = vector.shape_cast %4 : vector<48x64xf32> to vector<2x24x64xf32>
    %c0_4 = arith.constant 0 : index
    %c0_5 = arith.constant 0 : index
    %6 = vector.load %arg3[%c0_4, %c0_5] : memref<24x64xf32, #tpu.memory_space<vmem>>, vector<24x64xf32>
    %7 = vector.shape_cast %6 : vector<24x64xf32> to vector<1x24x64xf32>
    %8 = vector.broadcast %7 : vector<1x24x64xf32> to vector<2x24x64xf32>
    %9 = arith.addf %5, %8 : vector<2x24x64xf32>
    %c0_6 = arith.constant 0 : index
    %c0_7 = arith.constant 0 : index
    %10 = vector.load %arg4[%c0_6, %c0_7] : memref<1x64xf32, #tpu.memory_space<vmem>>, vector<1x64xf32>
    %c0_8 = arith.constant 0 : index
    %c0_9 = arith.constant 0 : index
    %11 = vector.load %arg5[%c0_8, %c0_9] : memref<1x64xf32, #tpu.memory_space<vmem>>, vector<1x64xf32>
    %cst_10 = arith.constant dense<0.000000e+00> : vector<2x24xf32>
    %12 = vector.multi_reduction <add>, %9, %cst_10 [2] : vector<2x24x64xf32> to vector<2x24xf32>
    %13 = vector.shape_cast %12 : vector<2x24xf32> to vector<2x24x1xf32>
    %cst_11 = arith.constant 6.400000e+01 : f32
    %14 = vector.broadcast %cst_11 : f32 to vector<2x24x1xf32>
    %15 = arith.divf %13, %14 : vector<2x24x1xf32>
    %16 = vector.broadcast %15 : vector<2x24x1xf32> to vector<2x24x64xf32>
    %17 = arith.subf %9, %16 : vector<2x24x64xf32>
    %18 = vector.broadcast %15 : vector<2x24x1xf32> to vector<2x24x64xf32>
    %19 = arith.subf %9, %18 : vector<2x24x64xf32>
    %20 = arith.mulf %17, %19 : vector<2x24x64xf32>
    %cst_12 = arith.constant dense<0.000000e+00> : vector<2x24xf32>
    %21 = vector.multi_reduction <add>, %20, %cst_12 [2] : vector<2x24x64xf32> to vector<2x24xf32>
    %22 = vector.shape_cast %21 : vector<2x24xf32> to vector<2x24x1xf32>
    %cst_13 = arith.constant 6.400000e+01 : f32
    %23 = vector.broadcast %cst_13 : f32 to vector<2x24x1xf32>
    %24 = arith.divf %22, %23 : vector<2x24x1xf32>
    %25 = vector.broadcast %15 : vector<2x24x1xf32> to vector<2x24x64xf32>
    %26 = arith.subf %9, %25 : vector<2x24x64xf32>
    %cst_14 = arith.constant 9.99999974E-6 : f32
    %27 = vector.broadcast %cst_14 : f32 to vector<2x24x1xf32>
    %28 = arith.addf %24, %27 : vector<2x24x1xf32>
    %29 = math.rsqrt %28 : vector<2x24x1xf32>
    %30 = vector.broadcast %29 : vector<2x24x1xf32> to vector<2x24x64xf32>
    %31 = arith.mulf %26, %30 : vector<2x24x64xf32>
    %32 = vector.shape_cast %10 : vector<1x64xf32> to vector<1x1x64xf32>
    %33 = vector.broadcast %32 : vector<1x1x64xf32> to vector<2x24x64xf32>
    %34 = arith.mulf %31, %33 : vector<2x24x64xf32>
    %35 = vector.shape_cast %11 : vector<1x64xf32> to vector<1x1x64xf32>
    %36 = vector.broadcast %35 : vector<1x1x64xf32> to vector<2x24x64xf32>
    %37 = arith.addf %34, %36 : vector<2x24x64xf32>
    %38 = tpu.iota {dimensions = array<i32: 2>} : vector<1x1x24xi32>
    %c17_i32 = arith.constant 17 : i32
    %39 = vector.broadcast %c17_i32 : i32 to vector<1x1x24xi32>
    %40 = arith.cmpi slt, %38, %39 : vector<1x1x24xi32>
    %cst_15 = arith.constant 0.000000e+00 : f32
    %cst_16 = arith.constant -1.000000e+09 : f32
    %41 = vector.broadcast %cst_15 : f32 to vector<1x1x24xf32>
    %42 = vector.broadcast %cst_16 : f32 to vector<1x1x24xf32>
    %43 = arith.select %40, %41, %42 : vector<1x1x24xi1>, vector<1x1x24xf32>
    %c0_17 = arith.constant 0 : index
    %c0_18 = arith.constant 0 : index
    %c0_19 = arith.constant 0 : index
    %44 = vector.load %arg6[%c0_17, %c0_18, %c0_19] : memref<2x1x64xf32, #tpu.memory_space<vmem>>, vector<1x1x64xf32>
    %45 = vector.shape_cast %44 : vector<1x1x64xf32> to vector<1x64xf32>
    %c0_20 = arith.constant 0 : index
    %c0_21 = arith.constant 0 : index
    %c0_22 = arith.constant 0 : index
    %46 = vector.load %arg7[%c0_20, %c0_21, %c0_22] : memref<2x1x64xf32, #tpu.memory_space<vmem>>, vector<1x1x64xf32>
    %47 = vector.shape_cast %46 : vector<1x1x64xf32> to vector<1x64xf32>
    %cst_23 = arith.constant dense<0.000000e+00> : vector<2x24xf32>
    %48 = vector.multi_reduction <add>, %37, %cst_23 [2] : vector<2x24x64xf32> to vector<2x24xf32>
    %49 = vector.shape_cast %48 : vector<2x24xf32> to vector<2x24x1xf32>
    %cst_24 = arith.constant 6.400000e+01 : f32
    %50 = vector.broadcast %cst_24 : f32 to vector<2x24x1xf32>
    %51 = arith.divf %49, %50 : vector<2x24x1xf32>
    %52 = vector.broadcast %51 : vector<2x24x1xf32> to vector<2x24x64xf32>
    %53 = arith.subf %37, %52 : vector<2x24x64xf32>
    %54 = vector.broadcast %51 : vector<2x24x1xf32> to vector<2x24x64xf32>
    %55 = arith.subf %37, %54 : vector<2x24x64xf32>
    %56 = arith.mulf %53, %55 : vector<2x24x64xf32>
    %cst_25 = arith.constant dense<0.000000e+00> : vector<2x24xf32>
    %57 = vector.multi_reduction <add>, %56, %cst_25 [2] : vector<2x24x64xf32> to vector<2x24xf32>
    %58 = vector.shape_cast %57 : vector<2x24xf32> to vector<2x24x1xf32>
    %cst_26 = arith.constant 6.400000e+01 : f32
    %59 = vector.broadcast %cst_26 : f32 to vector<2x24x1xf32>
    %60 = arith.divf %58, %59 : vector<2x24x1xf32>
    %61 = vector.broadcast %51 : vector<2x24x1xf32> to vector<2x24x64xf32>
    %62 = arith.subf %37, %61 : vector<2x24x64xf32>
    %cst_27 = arith.constant 9.99999974E-6 : f32
    %63 = vector.broadcast %cst_27 : f32 to vector<2x24x1xf32>
    %64 = arith.addf %60, %63 : vector<2x24x1xf32>
    %65 = math.rsqrt %64 : vector<2x24x1xf32>
    %66 = vector.broadcast %65 : vector<2x24x1xf32> to vector<2x24x64xf32>
    %67 = arith.mulf %62, %66 : vector<2x24x64xf32>
    %68 = vector.shape_cast %45 : vector<1x64xf32> to vector<1x1x64xf32>
    %69 = vector.broadcast %68 : vector<1x1x64xf32> to vector<2x24x64xf32>
    %70 = arith.mulf %67, %69 : vector<2x24x64xf32>
    %71 = vector.shape_cast %47 : vector<1x64xf32> to vector<1x1x64xf32>
    %72 = vector.broadcast %71 : vector<1x1x64xf32> to vector<2x24x64xf32>
    %73 = arith.addf %70, %72 : vector<2x24x64xf32>
    %74 = vector.shape_cast %73 : vector<2x24x64xf32> to vector<48x64xf32>
    %75 = arith.truncf %74 : vector<48x64xf32> to vector<48x64xbf16>
    %c0_28 = arith.constant 0 : index
    %c0_29 = arith.constant 0 : index
    %c0_30 = arith.constant 0 : index
    %76 = vector.load %arg8[%c0_28, %c0_29, %c0_30] : memref<2x64x192xbf16, #tpu.memory_space<vmem>>, vector<1x64x192xbf16>
    %77 = vector.shape_cast %76 : vector<1x64x192xbf16> to vector<64x192xbf16>
    %cst_31 = arith.constant dense<0.000000e+00> : vector<48x192xf32>
    %78 = tpu.matmul %75, %77, %cst_31 {dimension_numbers = #tpu.dot_dimension_numbers<[1], [0], [0], [1], [0, 0, 1, 1], [], []>} : vector<48x64xbf16>, vector<64x192xbf16>, vector<48x192xf32> -> vector<48x192xf32>
    %c0_32 = arith.constant 0 : index
    %c0_33 = arith.constant 0 : index
    %c0_34 = arith.constant 0 : index
    %79 = vector.load %arg9[%c0_32, %c0_33, %c0_34] : memref<2x1x192xf32, #tpu.memory_space<vmem>>, vector<1x1x192xf32>
    %80 = vector.shape_cast %79 : vector<1x1x192xf32> to vector<1x192xf32>
    %81 = vector.broadcast %80 : vector<1x192xf32> to vector<48x192xf32>
    %82 = arith.addf %78, %81 : vector<48x192xf32>
    %83 = vector.extract_strided_slice %82 {offsets = [0, 0], sizes = [48, 64], strides = [1, 1]} : vector<48x192xf32> to vector<48x64xf32>
    %84 = vector.shape_cast %83 : vector<48x64xf32> to vector<2x24x64xf32>
    %85 = vector.extract_strided_slice %82 {offsets = [0, 64], sizes = [48, 64], strides = [1, 1]} : vector<48x192xf32> to vector<48x64xf32>
    %86 = vector.shape_cast %85 : vector<48x64xf32> to vector<2x24x64xf32>
    %87 = vector.extract_strided_slice %82 {offsets = [0, 128], sizes = [48, 64], strides = [1, 1]} : vector<48x192xf32> to vector<48x64xf32>
    %88 = vector.shape_cast %87 : vector<48x64xf32> to vector<2x24x64xf32>
    %c0_35 = arith.constant 0 : index
    %c0_36 = arith.constant 0 : index
    %c0_37 = arith.constant 0 : index
    %89 = vector.load %arg10[%c0_35, %c0_36, %c0_37] : memref<2x64x64xbf16, #tpu.memory_space<vmem>>, vector<1x64x64xbf16>
    %90 = vector.shape_cast %89 : vector<1x64x64xbf16> to vector<64x64xbf16>
    %cst_38 = arith.constant 0.000000e+00 : f32
    %91 = vector.broadcast %cst_38 : f32 to vector<48x64xf32>
    %92 = vector.extract_strided_slice %84 {offsets = [0, 0, 0], sizes = [2, 24, 16], strides = [1, 1, 1]} : vector<2x24x64xf32> to vector<2x24x16xf32>
    %93 = arith.truncf %92 : vector<2x24x16xf32> to vector<2x24x16xbf16>
    %94 = vector.extract_strided_slice %86 {offsets = [0, 0, 0], sizes = [2, 24, 16], strides = [1, 1, 1]} : vector<2x24x64xf32> to vector<2x24x16xf32>
    %95 = arith.truncf %94 : vector<2x24x16xf32> to vector<2x24x16xbf16>
    %96 = vector.extract_strided_slice %88 {offsets = [0, 0, 0], sizes = [2, 24, 16], strides = [1, 1, 1]} : vector<2x24x64xf32> to vector<2x24x16xf32>
    %97 = arith.truncf %96 : vector<2x24x16xf32> to vector<2x24x16xbf16>
    %cst_39 = arith.constant dense<0.000000e+00> : vector<2x24x24xf32>
    %98 = tpu.matmul %93, %95, %cst_39 {dimension_numbers = #tpu.dot_dimension_numbers<[2], [2], [1], [1], [0, 0, 0, 1, 1, 1], [0], [0]>} : vector<2x24x16xbf16>, vector<2x24x16xbf16>, vector<2x24x24xf32> -> vector<2x24x24xf32>
    %cst_40 = arith.constant 2.500000e-01 : f32
    %99 = vector.broadcast %cst_40 : f32 to vector<2x24x24xf32>
    %100 = arith.mulf %98, %99 : vector<2x24x24xf32>
    %101 = vector.broadcast %43 : vector<1x1x24xf32> to vector<2x24x24xf32>
    %102 = arith.addf %100, %101 : vector<2x24x24xf32>
    %cst_41 = arith.constant dense<0xFF800000> : vector<2x24xf32>
    %103 = vector.multi_reduction <maximumf>, %102, %cst_41 [2] : vector<2x24x24xf32> to vector<2x24xf32>
    %104 = vector.shape_cast %103 : vector<2x24xf32> to vector<2x24x1xf32>
    %105 = vector.broadcast %104 : vector<2x24x1xf32> to vector<2x24x24xf32>
    %106 = arith.subf %102, %105 : vector<2x24x24xf32>
    %107 = math.exp %106 : vector<2x24x24xf32>
    %cst_42 = arith.constant dense<0.000000e+00> : vector<2x24xf32>
    %108 = vector.multi_reduction <add>, %107, %cst_42 [2] : vector<2x24x24xf32> to vector<2x24xf32>
    %109 = vector.shape_cast %108 : vector<2x24xf32> to vector<2x24x1xf32>
    %110 = tpu.reciprocal %109 {approx = true} : vector<2x24x1xf32> -> vector<2x24x1xf32>
    %111 = vector.broadcast %110 : vector<2x24x1xf32> to vector<2x24x24xf32>
    %112 = arith.mulf %107, %111 : vector<2x24x24xf32>
    %113 = arith.truncf %112 : vector<2x24x24xf32> to vector<2x24x24xbf16>
    %cst_43 = arith.constant dense<0.000000e+00> : vector<2x24x16xf32>
    %114 = tpu.matmul %113, %97, %cst_43 {dimension_numbers = #tpu.dot_dimension_numbers<[2], [1], [1], [2], [0, 0, 0, 1, 1, 2], [0], [0]>} : vector<2x24x24xbf16>, vector<2x24x16xbf16>, vector<2x24x16xf32> -> vector<2x24x16xf32>
    %115 = vector.shape_cast %114 : vector<2x24x16xf32> to vector<48x16xf32>
    %116 = arith.truncf %115 : vector<48x16xf32> to vector<48x16xbf16>
    %117 = vector.extract_strided_slice %90 {offsets = [0, 0], sizes = [16, 64], strides = [1, 1]} : vector<64x64xbf16> to vector<16x64xbf16>
    %cst_44 = arith.constant dense<0.000000e+00> : vector<48x64xf32>
    %118 = tpu.matmul %116, %117, %cst_44 {dimension_numbers = #tpu.dot_dimension_numbers<[1], [0], [0], [1], [0, 0, 1, 1], [], []>} : vector<48x16xbf16>, vector<16x64xbf16>, vector<48x64xf32> -> vector<48x64xf32>
    %119 = arith.addf %91, %118 : vector<48x64xf32>
    %120 = vector.extract_strided_slice %84 {offsets = [0, 0, 16], sizes = [2, 24, 16], strides = [1, 1, 1]} : vector<2x24x64xf32> to vector<2x24x16xf32>
    %121 = arith.truncf %120 : vector<2x24x16xf32> to vector<2x24x16xbf16>
    %122 = vector.extract_strided_slice %86 {offsets = [0, 0, 16], sizes = [2, 24, 16], strides = [1, 1, 1]} : vector<2x24x64xf32> to vector<2x24x16xf32>
    %123 = arith.truncf %122 : vector<2x24x16xf32> to vector<2x24x16xbf16>
    %124 = vector.extract_strided_slice %88 {offsets = [0, 0, 16], sizes = [2, 24, 16], strides = [1, 1, 1]} : vector<2x24x64xf32> to vector<2x24x16xf32>
    %125 = arith.truncf %124 : vector<2x24x16xf32> to vector<2x24x16xbf16>
    %cst_45 = arith.constant dense<0.000000e+00> : vector<2x24x24xf32>
    %126 = tpu.matmul %121, %123, %cst_45 {dimension_numbers = #tpu.dot_dimension_numbers<[2], [2], [1], [1], [0, 0, 0, 1, 1, 1], [0], [0]>} : vector<2x24x16xbf16>, vector<2x24x16xbf16>, vector<2x24x24xf32> -> vector<2x24x24xf32>
    %cst_46 = arith.constant 2.500000e-01 : f32
    %127 = vector.broadcast %cst_46 : f32 to vector<2x24x24xf32>
    %128 = arith.mulf %126, %127 : vector<2x24x24xf32>
    %129 = vector.broadcast %43 : vector<1x1x24xf32> to vector<2x24x24xf32>
    %130 = arith.addf %128, %129 : vector<2x24x24xf32>
    %cst_47 = arith.constant dense<0xFF800000> : vector<2x24xf32>
    %131 = vector.multi_reduction <maximumf>, %130, %cst_47 [2] : vector<2x24x24xf32> to vector<2x24xf32>
    %132 = vector.shape_cast %131 : vector<2x24xf32> to vector<2x24x1xf32>
    %133 = vector.broadcast %132 : vector<2x24x1xf32> to vector<2x24x24xf32>
    %134 = arith.subf %130, %133 : vector<2x24x24xf32>
    %135 = math.exp %134 : vector<2x24x24xf32>
    %cst_48 = arith.constant dense<0.000000e+00> : vector<2x24xf32>
    %136 = vector.multi_reduction <add>, %135, %cst_48 [2] : vector<2x24x24xf32> to vector<2x24xf32>
    %137 = vector.shape_cast %136 : vector<2x24xf32> to vector<2x24x1xf32>
    %138 = tpu.reciprocal %137 {approx = true} : vector<2x24x1xf32> -> vector<2x24x1xf32>
    %139 = vector.broadcast %138 : vector<2x24x1xf32> to vector<2x24x24xf32>
    %140 = arith.mulf %135, %139 : vector<2x24x24xf32>
    %141 = arith.truncf %140 : vector<2x24x24xf32> to vector<2x24x24xbf16>
    %cst_49 = arith.constant dense<0.000000e+00> : vector<2x24x16xf32>
    %142 = tpu.matmul %141, %125, %cst_49 {dimension_numbers = #tpu.dot_dimension_numbers<[2], [1], [1], [2], [0, 0, 0, 1, 1, 2], [0], [0]>} : vector<2x24x24xbf16>, vector<2x24x16xbf16>, vector<2x24x16xf32> -> vector<2x24x16xf32>
    %143 = vector.shape_cast %142 : vector<2x24x16xf32> to vector<48x16xf32>
    %144 = arith.truncf %143 : vector<48x16xf32> to vector<48x16xbf16>
    %145 = vector.extract_strided_slice %90 {offsets = [16, 0], sizes = [16, 64], strides = [1, 1]} : vector<64x64xbf16> to vector<16x64xbf16>
    %cst_50 = arith.constant dense<0.000000e+00> : vector<48x64xf32>
    %146 = tpu.matmul %144, %145, %cst_50 {dimension_numbers = #tpu.dot_dimension_numbers<[1], [0], [0], [1], [0, 0, 1, 1], [], []>} : vector<48x16xbf16>, vector<16x64xbf16>, vector<48x64xf32> -> vector<48x64xf32>
    %147 = arith.addf %119, %146 : vector<48x64xf32>
    %148 = vector.extract_strided_slice %84 {offsets = [0, 0, 32], sizes = [2, 24, 16], strides = [1, 1, 1]} : vector<2x24x64xf32> to vector<2x24x16xf32>
    %149 = arith.truncf %148 : vector<2x24x16xf32> to vector<2x24x16xbf16>
    %150 = vector.extract_strided_slice %86 {offsets = [0, 0, 32], sizes = [2, 24, 16], strides = [1, 1, 1]} : vector<2x24x64xf32> to vector<2x24x16xf32>
    %151 = arith.truncf %150 : vector<2x24x16xf32> to vector<2x24x16xbf16>
    %152 = vector.extract_strided_slice %88 {offsets = [0, 0, 32], sizes = [2, 24, 16], strides = [1, 1, 1]} : vector<2x24x64xf32> to vector<2x24x16xf32>
    %153 = arith.truncf %152 : vector<2x24x16xf32> to vector<2x24x16xbf16>
    %cst_51 = arith.constant dense<0.000000e+00> : vector<2x24x24xf32>
    %154 = tpu.matmul %149, %151, %cst_51 {dimension_numbers = #tpu.dot_dimension_numbers<[2], [2], [1], [1], [0, 0, 0, 1, 1, 1], [0], [0]>} : vector<2x24x16xbf16>, vector<2x24x16xbf16>, vector<2x24x24xf32> -> vector<2x24x24xf32>
    %cst_52 = arith.constant 2.500000e-01 : f32
    %155 = vector.broadcast %cst_52 : f32 to vector<2x24x24xf32>
    %156 = arith.mulf %154, %155 : vector<2x24x24xf32>
    %157 = vector.broadcast %43 : vector<1x1x24xf32> to vector<2x24x24xf32>
    %158 = arith.addf %156, %157 : vector<2x24x24xf32>
    %cst_53 = arith.constant dense<0xFF800000> : vector<2x24xf32>
    %159 = vector.multi_reduction <maximumf>, %158, %cst_53 [2] : vector<2x24x24xf32> to vector<2x24xf32>
    %160 = vector.shape_cast %159 : vector<2x24xf32> to vector<2x24x1xf32>
    %161 = vector.broadcast %160 : vector<2x24x1xf32> to vector<2x24x24xf32>
    %162 = arith.subf %158, %161 : vector<2x24x24xf32>
    %163 = math.exp %162 : vector<2x24x24xf32>
    %cst_54 = arith.constant dense<0.000000e+00> : vector<2x24xf32>
    %164 = vector.multi_reduction <add>, %163, %cst_54 [2] : vector<2x24x24xf32> to vector<2x24xf32>
    %165 = vector.shape_cast %164 : vector<2x24xf32> to vector<2x24x1xf32>
    %166 = tpu.reciprocal %165 {approx = true} : vector<2x24x1xf32> -> vector<2x24x1xf32>
    %167 = vector.broadcast %166 : vector<2x24x1xf32> to vector<2x24x24xf32>
    %168 = arith.mulf %163, %167 : vector<2x24x24xf32>
    %169 = arith.truncf %168 : vector<2x24x24xf32> to vector<2x24x24xbf16>
    %cst_55 = arith.constant dense<0.000000e+00> : vector<2x24x16xf32>
    %170 = tpu.matmul %169, %153, %cst_55 {dimension_numbers = #tpu.dot_dimension_numbers<[2], [1], [1], [2], [0, 0, 0, 1, 1, 2], [0], [0]>} : vector<2x24x24xbf16>, vector<2x24x16xbf16>, vector<2x24x16xf32> -> vector<2x24x16xf32>
    %171 = vector.shape_cast %170 : vector<2x24x16xf32> to vector<48x16xf32>
    %172 = arith.truncf %171 : vector<48x16xf32> to vector<48x16xbf16>
    %173 = vector.extract_strided_slice %90 {offsets = [32, 0], sizes = [16, 64], strides = [1, 1]} : vector<64x64xbf16> to vector<16x64xbf16>
    %cst_56 = arith.constant dense<0.000000e+00> : vector<48x64xf32>
    %174 = tpu.matmul %172, %173, %cst_56 {dimension_numbers = #tpu.dot_dimension_numbers<[1], [0], [0], [1], [0, 0, 1, 1], [], []>} : vector<48x16xbf16>, vector<16x64xbf16>, vector<48x64xf32> -> vector<48x64xf32>
    %175 = arith.addf %147, %174 : vector<48x64xf32>
    %176 = vector.extract_strided_slice %84 {offsets = [0, 0, 48], sizes = [2, 24, 16], strides = [1, 1, 1]} : vector<2x24x64xf32> to vector<2x24x16xf32>
    %177 = arith.truncf %176 : vector<2x24x16xf32> to vector<2x24x16xbf16>
    %178 = vector.extract_strided_slice %86 {offsets = [0, 0, 48], sizes = [2, 24, 16], strides = [1, 1, 1]} : vector<2x24x64xf32> to vector<2x24x16xf32>
    %179 = arith.truncf %178 : vector<2x24x16xf32> to vector<2x24x16xbf16>
    %180 = vector.extract_strided_slice %88 {offsets = [0, 0, 48], sizes = [2, 24, 16], strides = [1, 1, 1]} : vector<2x24x64xf32> to vector<2x24x16xf32>
    %181 = arith.truncf %180 : vector<2x24x16xf32> to vector<2x24x16xbf16>
    %cst_57 = arith.constant dense<0.000000e+00> : vector<2x24x24xf32>
    %182 = tpu.matmul %177, %179, %cst_57 {dimension_numbers = #tpu.dot_dimension_numbers<[2], [2], [1], [1], [0, 0, 0, 1, 1, 1], [0], [0]>} : vector<2x24x16xbf16>, vector<2x24x16xbf16>, vector<2x24x24xf32> -> vector<2x24x24xf32>
    %cst_58 = arith.constant 2.500000e-01 : f32
    %183 = vector.broadcast %cst_58 : f32 to vector<2x24x24xf32>
    %184 = arith.mulf %182, %183 : vector<2x24x24xf32>
    %185 = vector.broadcast %43 : vector<1x1x24xf32> to vector<2x24x24xf32>
    %186 = arith.addf %184, %185 : vector<2x24x24xf32>
    %cst_59 = arith.constant dense<0xFF800000> : vector<2x24xf32>
    %187 = vector.multi_reduction <maximumf>, %186, %cst_59 [2] : vector<2x24x24xf32> to vector<2x24xf32>
    %188 = vector.shape_cast %187 : vector<2x24xf32> to vector<2x24x1xf32>
    %189 = vector.broadcast %188 : vector<2x24x1xf32> to vector<2x24x24xf32>
    %190 = arith.subf %186, %189 : vector<2x24x24xf32>
    %191 = math.exp %190 : vector<2x24x24xf32>
    %cst_60 = arith.constant dense<0.000000e+00> : vector<2x24xf32>
    %192 = vector.multi_reduction <add>, %191, %cst_60 [2] : vector<2x24x24xf32> to vector<2x24xf32>
    %193 = vector.shape_cast %192 : vector<2x24xf32> to vector<2x24x1xf32>
    %194 = tpu.reciprocal %193 {approx = true} : vector<2x24x1xf32> -> vector<2x24x1xf32>
    %195 = vector.broadcast %194 : vector<2x24x1xf32> to vector<2x24x24xf32>
    %196 = arith.mulf %191, %195 : vector<2x24x24xf32>
    %197 = arith.truncf %196 : vector<2x24x24xf32> to vector<2x24x24xbf16>
    %cst_61 = arith.constant dense<0.000000e+00> : vector<2x24x16xf32>
    %198 = tpu.matmul %197, %181, %cst_61 {dimension_numbers = #tpu.dot_dimension_numbers<[2], [1], [1], [2], [0, 0, 0, 1, 1, 2], [0], [0]>} : vector<2x24x24xbf16>, vector<2x24x16xbf16>, vector<2x24x16xf32> -> vector<2x24x16xf32>
    %199 = vector.shape_cast %198 : vector<2x24x16xf32> to vector<48x16xf32>
    %200 = arith.truncf %199 : vector<48x16xf32> to vector<48x16xbf16>
    %201 = vector.extract_strided_slice %90 {offsets = [48, 0], sizes = [16, 64], strides = [1, 1]} : vector<64x64xbf16> to vector<16x64xbf16>
    %cst_62 = arith.constant dense<0.000000e+00> : vector<48x64xf32>
    %202 = tpu.matmul %200, %201, %cst_62 {dimension_numbers = #tpu.dot_dimension_numbers<[1], [0], [0], [1], [0, 0, 1, 1], [], []>} : vector<48x16xbf16>, vector<16x64xbf16>, vector<48x64xf32> -> vector<48x64xf32>
    %203 = arith.addf %175, %202 : vector<48x64xf32>
    %c0_63 = arith.constant 0 : index
    %c0_64 = arith.constant 0 : index
    %c0_65 = arith.constant 0 : index
    %204 = vector.load %arg11[%c0_63, %c0_64, %c0_65] : memref<2x1x64xf32, #tpu.memory_space<vmem>>, vector<1x1x64xf32>
    %205 = vector.shape_cast %204 : vector<1x1x64xf32> to vector<1x64xf32>
    %206 = vector.broadcast %205 : vector<1x64xf32> to vector<48x64xf32>
    %207 = arith.addf %203, %206 : vector<48x64xf32>
    %208 = vector.shape_cast %207 : vector<48x64xf32> to vector<2x24x64xf32>
    %209 = arith.addf %37, %208 : vector<2x24x64xf32>
    %c0_66 = arith.constant 0 : index
    %c0_67 = arith.constant 0 : index
    %c0_68 = arith.constant 0 : index
    %210 = vector.load %arg12[%c0_66, %c0_67, %c0_68] : memref<2x1x64xf32, #tpu.memory_space<vmem>>, vector<1x1x64xf32>
    %211 = vector.shape_cast %210 : vector<1x1x64xf32> to vector<1x64xf32>
    %c0_69 = arith.constant 0 : index
    %c0_70 = arith.constant 0 : index
    %c0_71 = arith.constant 0 : index
    %212 = vector.load %arg13[%c0_69, %c0_70, %c0_71] : memref<2x1x64xf32, #tpu.memory_space<vmem>>, vector<1x1x64xf32>
    %213 = vector.shape_cast %212 : vector<1x1x64xf32> to vector<1x64xf32>
    %cst_72 = arith.constant dense<0.000000e+00> : vector<2x24xf32>
    %214 = vector.multi_reduction <add>, %209, %cst_72 [2] : vector<2x24x64xf32> to vector<2x24xf32>
    %215 = vector.shape_cast %214 : vector<2x24xf32> to vector<2x24x1xf32>
    %cst_73 = arith.constant 6.400000e+01 : f32
    %216 = vector.broadcast %cst_73 : f32 to vector<2x24x1xf32>
    %217 = arith.divf %215, %216 : vector<2x24x1xf32>
    %218 = vector.broadcast %217 : vector<2x24x1xf32> to vector<2x24x64xf32>
    %219 = arith.subf %209, %218 : vector<2x24x64xf32>
    %220 = vector.broadcast %217 : vector<2x24x1xf32> to vector<2x24x64xf32>
    %221 = arith.subf %209, %220 : vector<2x24x64xf32>
    %222 = arith.mulf %219, %221 : vector<2x24x64xf32>
    %cst_74 = arith.constant dense<0.000000e+00> : vector<2x24xf32>
    %223 = vector.multi_reduction <add>, %222, %cst_74 [2] : vector<2x24x64xf32> to vector<2x24xf32>
    %224 = vector.shape_cast %223 : vector<2x24xf32> to vector<2x24x1xf32>
    %cst_75 = arith.constant 6.400000e+01 : f32
    %225 = vector.broadcast %cst_75 : f32 to vector<2x24x1xf32>
    %226 = arith.divf %224, %225 : vector<2x24x1xf32>
    %227 = vector.broadcast %217 : vector<2x24x1xf32> to vector<2x24x64xf32>
    %228 = arith.subf %209, %227 : vector<2x24x64xf32>
    %cst_76 = arith.constant 9.99999974E-6 : f32
    %229 = vector.broadcast %cst_76 : f32 to vector<2x24x1xf32>
    %230 = arith.addf %226, %229 : vector<2x24x1xf32>
    %231 = math.rsqrt %230 : vector<2x24x1xf32>
    %232 = vector.broadcast %231 : vector<2x24x1xf32> to vector<2x24x64xf32>
    %233 = arith.mulf %228, %232 : vector<2x24x64xf32>
    %234 = vector.shape_cast %211 : vector<1x64xf32> to vector<1x1x64xf32>
    %235 = vector.broadcast %234 : vector<1x1x64xf32> to vector<2x24x64xf32>
    %236 = arith.mulf %233, %235 : vector<2x24x64xf32>
    %237 = vector.shape_cast %213 : vector<1x64xf32> to vector<1x1x64xf32>
    %238 = vector.broadcast %237 : vector<1x1x64xf32> to vector<2x24x64xf32>
    %239 = arith.addf %236, %238 : vector<2x24x64xf32>
    %240 = vector.shape_cast %239 : vector<2x24x64xf32> to vector<48x64xf32>
    %241 = arith.truncf %240 : vector<48x64xf32> to vector<48x64xbf16>
    %c0_77 = arith.constant 0 : index
    %c0_78 = arith.constant 0 : index
    %c0_79 = arith.constant 0 : index
    %242 = vector.load %arg14[%c0_77, %c0_78, %c0_79] : memref<2x64x256xbf16, #tpu.memory_space<vmem>>, vector<1x64x256xbf16>
    %243 = vector.shape_cast %242 : vector<1x64x256xbf16> to vector<64x256xbf16>
    %cst_80 = arith.constant dense<0.000000e+00> : vector<48x256xf32>
    %244 = tpu.matmul %241, %243, %cst_80 {dimension_numbers = #tpu.dot_dimension_numbers<[1], [0], [0], [1], [0, 0, 1, 1], [], []>} : vector<48x64xbf16>, vector<64x256xbf16>, vector<48x256xf32> -> vector<48x256xf32>
    %c0_81 = arith.constant 0 : index
    %c0_82 = arith.constant 0 : index
    %c0_83 = arith.constant 0 : index
    %245 = vector.load %arg15[%c0_81, %c0_82, %c0_83] : memref<2x1x256xf32, #tpu.memory_space<vmem>>, vector<1x1x256xf32>
    %246 = vector.shape_cast %245 : vector<1x1x256xf32> to vector<1x256xf32>
    %247 = vector.broadcast %246 : vector<1x256xf32> to vector<48x256xf32>
    %248 = arith.addf %244, %247 : vector<48x256xf32>
    %cst_84 = arith.constant 1.702000e+00 : f32
    %249 = vector.broadcast %cst_84 : f32 to vector<48x256xf32>
    %250 = arith.mulf %249, %248 : vector<48x256xf32>
    %251 = arith.negf %250 : vector<48x256xf32>
    %252 = math.exp %251 : vector<48x256xf32>
    %cst_85 = arith.constant 1.000000e+00 : f32
    %253 = vector.broadcast %cst_85 : f32 to vector<48x256xf32>
    %254 = arith.addf %253, %252 : vector<48x256xf32>
    %255 = arith.divf %253, %254 : vector<48x256xf32>
    %256 = arith.mulf %248, %255 : vector<48x256xf32>
    %257 = arith.truncf %256 : vector<48x256xf32> to vector<48x256xbf16>
    %c0_86 = arith.constant 0 : index
    %c0_87 = arith.constant 0 : index
    %c0_88 = arith.constant 0 : index
    %258 = vector.load %arg16[%c0_86, %c0_87, %c0_88] : memref<2x256x64xbf16, #tpu.memory_space<vmem>>, vector<1x256x64xbf16>
    %259 = vector.shape_cast %258 : vector<1x256x64xbf16> to vector<256x64xbf16>
    %cst_89 = arith.constant dense<0.000000e+00> : vector<48x64xf32>
    %260 = tpu.matmul %257, %259, %cst_89 {dimension_numbers = #tpu.dot_dimension_numbers<[1], [0], [0], [1], [0, 0, 1, 1], [], []>} : vector<48x256xbf16>, vector<256x64xbf16>, vector<48x64xf32> -> vector<48x64xf32>
    %c0_90 = arith.constant 0 : index
    %c0_91 = arith.constant 0 : index
    %c0_92 = arith.constant 0 : index
    %261 = vector.load %arg17[%c0_90, %c0_91, %c0_92] : memref<2x1x64xf32, #tpu.memory_space<vmem>>, vector<1x1x64xf32>
    %262 = vector.shape_cast %261 : vector<1x1x64xf32> to vector<1x64xf32>
    %263 = vector.broadcast %262 : vector<1x64xf32> to vector<48x64xf32>
    %264 = arith.addf %260, %263 : vector<48x64xf32>
    %265 = vector.shape_cast %264 : vector<48x64xf32> to vector<2x24x64xf32>
    %266 = arith.addf %209, %265 : vector<2x24x64xf32>
    %c1 = arith.constant 1 : index
    %c0_93 = arith.constant 0 : index
    %c0_94 = arith.constant 0 : index
    %267 = vector.load %arg6[%c1, %c0_93, %c0_94] : memref<2x1x64xf32, #tpu.memory_space<vmem>>, vector<1x1x64xf32>
    %268 = vector.shape_cast %267 : vector<1x1x64xf32> to vector<1x64xf32>
    %c1_95 = arith.constant 1 : index
    %c0_96 = arith.constant 0 : index
    %c0_97 = arith.constant 0 : index
    %269 = vector.load %arg7[%c1_95, %c0_96, %c0_97] : memref<2x1x64xf32, #tpu.memory_space<vmem>>, vector<1x1x64xf32>
    %270 = vector.shape_cast %269 : vector<1x1x64xf32> to vector<1x64xf32>
    %cst_98 = arith.constant dense<0.000000e+00> : vector<2x24xf32>
    %271 = vector.multi_reduction <add>, %266, %cst_98 [2] : vector<2x24x64xf32> to vector<2x24xf32>
    %272 = vector.shape_cast %271 : vector<2x24xf32> to vector<2x24x1xf32>
    %cst_99 = arith.constant 6.400000e+01 : f32
    %273 = vector.broadcast %cst_99 : f32 to vector<2x24x1xf32>
    %274 = arith.divf %272, %273 : vector<2x24x1xf32>
    %275 = vector.broadcast %274 : vector<2x24x1xf32> to vector<2x24x64xf32>
    %276 = arith.subf %266, %275 : vector<2x24x64xf32>
    %277 = vector.broadcast %274 : vector<2x24x1xf32> to vector<2x24x64xf32>
    %278 = arith.subf %266, %277 : vector<2x24x64xf32>
    %279 = arith.mulf %276, %278 : vector<2x24x64xf32>
    %cst_100 = arith.constant dense<0.000000e+00> : vector<2x24xf32>
    %280 = vector.multi_reduction <add>, %279, %cst_100 [2] : vector<2x24x64xf32> to vector<2x24xf32>
    %281 = vector.shape_cast %280 : vector<2x24xf32> to vector<2x24x1xf32>
    %cst_101 = arith.constant 6.400000e+01 : f32
    %282 = vector.broadcast %cst_101 : f32 to vector<2x24x1xf32>
    %283 = arith.divf %281, %282 : vector<2x24x1xf32>
    %284 = vector.broadcast %274 : vector<2x24x1xf32> to vector<2x24x64xf32>
    %285 = arith.subf %266, %284 : vector<2x24x64xf32>
    %cst_102 = arith.constant 9.99999974E-6 : f32
    %286 = vector.broadcast %cst_102 : f32 to vector<2x24x1xf32>
    %287 = arith.addf %283, %286 : vector<2x24x1xf32>
    %288 = math.rsqrt %287 : vector<2x24x1xf32>
    %289 = vector.broadcast %288 : vector<2x24x1xf32> to vector<2x24x64xf32>
    %290 = arith.mulf %285, %289 : vector<2x24x64xf32>
    %291 = vector.shape_cast %268 : vector<1x64xf32> to vector<1x1x64xf32>
    %292 = vector.broadcast %291 : vector<1x1x64xf32> to vector<2x24x64xf32>
    %293 = arith.mulf %290, %292 : vector<2x24x64xf32>
    %294 = vector.shape_cast %270 : vector<1x64xf32> to vector<1x1x64xf32>
    %295 = vector.broadcast %294 : vector<1x1x64xf32> to vector<2x24x64xf32>
    %296 = arith.addf %293, %295 : vector<2x24x64xf32>
    %297 = vector.shape_cast %296 : vector<2x24x64xf32> to vector<48x64xf32>
    %298 = arith.truncf %297 : vector<48x64xf32> to vector<48x64xbf16>
    %c1_103 = arith.constant 1 : index
    %c0_104 = arith.constant 0 : index
    %c0_105 = arith.constant 0 : index
    %299 = vector.load %arg8[%c1_103, %c0_104, %c0_105] : memref<2x64x192xbf16, #tpu.memory_space<vmem>>, vector<1x64x192xbf16>
    %300 = vector.shape_cast %299 : vector<1x64x192xbf16> to vector<64x192xbf16>
    %cst_106 = arith.constant dense<0.000000e+00> : vector<48x192xf32>
    %301 = tpu.matmul %298, %300, %cst_106 {dimension_numbers = #tpu.dot_dimension_numbers<[1], [0], [0], [1], [0, 0, 1, 1], [], []>} : vector<48x64xbf16>, vector<64x192xbf16>, vector<48x192xf32> -> vector<48x192xf32>
    %c1_107 = arith.constant 1 : index
    %c0_108 = arith.constant 0 : index
    %c0_109 = arith.constant 0 : index
    %302 = vector.load %arg9[%c1_107, %c0_108, %c0_109] : memref<2x1x192xf32, #tpu.memory_space<vmem>>, vector<1x1x192xf32>
    %303 = vector.shape_cast %302 : vector<1x1x192xf32> to vector<1x192xf32>
    %304 = vector.broadcast %303 : vector<1x192xf32> to vector<48x192xf32>
    %305 = arith.addf %301, %304 : vector<48x192xf32>
    %306 = vector.extract_strided_slice %305 {offsets = [0, 0], sizes = [48, 64], strides = [1, 1]} : vector<48x192xf32> to vector<48x64xf32>
    %307 = vector.shape_cast %306 : vector<48x64xf32> to vector<2x24x64xf32>
    %308 = vector.extract_strided_slice %305 {offsets = [0, 64], sizes = [48, 64], strides = [1, 1]} : vector<48x192xf32> to vector<48x64xf32>
    %309 = vector.shape_cast %308 : vector<48x64xf32> to vector<2x24x64xf32>
    %310 = vector.extract_strided_slice %305 {offsets = [0, 128], sizes = [48, 64], strides = [1, 1]} : vector<48x192xf32> to vector<48x64xf32>
    %311 = vector.shape_cast %310 : vector<48x64xf32> to vector<2x24x64xf32>
    %c1_110 = arith.constant 1 : index
    %c0_111 = arith.constant 0 : index
    %c0_112 = arith.constant 0 : index
    %312 = vector.load %arg10[%c1_110, %c0_111, %c0_112] : memref<2x64x64xbf16, #tpu.memory_space<vmem>>, vector<1x64x64xbf16>
    %313 = vector.shape_cast %312 : vector<1x64x64xbf16> to vector<64x64xbf16>
    %cst_113 = arith.constant 0.000000e+00 : f32
    %314 = vector.broadcast %cst_113 : f32 to vector<48x64xf32>
    %315 = vector.extract_strided_slice %307 {offsets = [0, 0, 0], sizes = [2, 24, 16], strides = [1, 1, 1]} : vector<2x24x64xf32> to vector<2x24x16xf32>
    %316 = arith.truncf %315 : vector<2x24x16xf32> to vector<2x24x16xbf16>
    %317 = vector.extract_strided_slice %309 {offsets = [0, 0, 0], sizes = [2, 24, 16], strides = [1, 1, 1]} : vector<2x24x64xf32> to vector<2x24x16xf32>
    %318 = arith.truncf %317 : vector<2x24x16xf32> to vector<2x24x16xbf16>
    %319 = vector.extract_strided_slice %311 {offsets = [0, 0, 0], sizes = [2, 24, 16], strides = [1, 1, 1]} : vector<2x24x64xf32> to vector<2x24x16xf32>
    %320 = arith.truncf %319 : vector<2x24x16xf32> to vector<2x24x16xbf16>
    %cst_114 = arith.constant dense<0.000000e+00> : vector<2x24x24xf32>
    %321 = tpu.matmul %316, %318, %cst_114 {dimension_numbers = #tpu.dot_dimension_numbers<[2], [2], [1], [1], [0, 0, 0, 1, 1, 1], [0], [0]>} : vector<2x24x16xbf16>, vector<2x24x16xbf16>, vector<2x24x24xf32> -> vector<2x24x24xf32>
    %cst_115 = arith.constant 2.500000e-01 : f32
    %322 = vector.broadcast %cst_115 : f32 to vector<2x24x24xf32>
    %323 = arith.mulf %321, %322 : vector<2x24x24xf32>
    %324 = vector.broadcast %43 : vector<1x1x24xf32> to vector<2x24x24xf32>
    %325 = arith.addf %323, %324 : vector<2x24x24xf32>
    %cst_116 = arith.constant dense<0xFF800000> : vector<2x24xf32>
    %326 = vector.multi_reduction <maximumf>, %325, %cst_116 [2] : vector<2x24x24xf32> to vector<2x24xf32>
    %327 = vector.shape_cast %326 : vector<2x24xf32> to vector<2x24x1xf32>
    %328 = vector.broadcast %327 : vector<2x24x1xf32> to vector<2x24x24xf32>
    %329 = arith.subf %325, %328 : vector<2x24x24xf32>
    %330 = math.exp %329 : vector<2x24x24xf32>
    %cst_117 = arith.constant dense<0.000000e+00> : vector<2x24xf32>
    %331 = vector.multi_reduction <add>, %330, %cst_117 [2] : vector<2x24x24xf32> to vector<2x24xf32>
    %332 = vector.shape_cast %331 : vector<2x24xf32> to vector<2x24x1xf32>
    %333 = tpu.reciprocal %332 {approx = true} : vector<2x24x1xf32> -> vector<2x24x1xf32>
    %334 = vector.broadcast %333 : vector<2x24x1xf32> to vector<2x24x24xf32>
    %335 = arith.mulf %330, %334 : vector<2x24x24xf32>
    %336 = arith.truncf %335 : vector<2x24x24xf32> to vector<2x24x24xbf16>
    %cst_118 = arith.constant dense<0.000000e+00> : vector<2x24x16xf32>
    %337 = tpu.matmul %336, %320, %cst_118 {dimension_numbers = #tpu.dot_dimension_numbers<[2], [1], [1], [2], [0, 0, 0, 1, 1, 2], [0], [0]>} : vector<2x24x24xbf16>, vector<2x24x16xbf16>, vector<2x24x16xf32> -> vector<2x24x16xf32>
    %338 = vector.shape_cast %337 : vector<2x24x16xf32> to vector<48x16xf32>
    %339 = arith.truncf %338 : vector<48x16xf32> to vector<48x16xbf16>
    %340 = vector.extract_strided_slice %313 {offsets = [0, 0], sizes = [16, 64], strides = [1, 1]} : vector<64x64xbf16> to vector<16x64xbf16>
    %cst_119 = arith.constant dense<0.000000e+00> : vector<48x64xf32>
    %341 = tpu.matmul %339, %340, %cst_119 {dimension_numbers = #tpu.dot_dimension_numbers<[1], [0], [0], [1], [0, 0, 1, 1], [], []>} : vector<48x16xbf16>, vector<16x64xbf16>, vector<48x64xf32> -> vector<48x64xf32>
    %342 = arith.addf %314, %341 : vector<48x64xf32>
    %343 = vector.extract_strided_slice %307 {offsets = [0, 0, 16], sizes = [2, 24, 16], strides = [1, 1, 1]} : vector<2x24x64xf32> to vector<2x24x16xf32>
    %344 = arith.truncf %343 : vector<2x24x16xf32> to vector<2x24x16xbf16>
    %345 = vector.extract_strided_slice %309 {offsets = [0, 0, 16], sizes = [2, 24, 16], strides = [1, 1, 1]} : vector<2x24x64xf32> to vector<2x24x16xf32>
    %346 = arith.truncf %345 : vector<2x24x16xf32> to vector<2x24x16xbf16>
    %347 = vector.extract_strided_slice %311 {offsets = [0, 0, 16], sizes = [2, 24, 16], strides = [1, 1, 1]} : vector<2x24x64xf32> to vector<2x24x16xf32>
    %348 = arith.truncf %347 : vector<2x24x16xf32> to vector<2x24x16xbf16>
    %cst_120 = arith.constant dense<0.000000e+00> : vector<2x24x24xf32>
    %349 = tpu.matmul %344, %346, %cst_120 {dimension_numbers = #tpu.dot_dimension_numbers<[2], [2], [1], [1], [0, 0, 0, 1, 1, 1], [0], [0]>} : vector<2x24x16xbf16>, vector<2x24x16xbf16>, vector<2x24x24xf32> -> vector<2x24x24xf32>
    %cst_121 = arith.constant 2.500000e-01 : f32
    %350 = vector.broadcast %cst_121 : f32 to vector<2x24x24xf32>
    %351 = arith.mulf %349, %350 : vector<2x24x24xf32>
    %352 = vector.broadcast %43 : vector<1x1x24xf32> to vector<2x24x24xf32>
    %353 = arith.addf %351, %352 : vector<2x24x24xf32>
    %cst_122 = arith.constant dense<0xFF800000> : vector<2x24xf32>
    %354 = vector.multi_reduction <maximumf>, %353, %cst_122 [2] : vector<2x24x24xf32> to vector<2x24xf32>
    %355 = vector.shape_cast %354 : vector<2x24xf32> to vector<2x24x1xf32>
    %356 = vector.broadcast %355 : vector<2x24x1xf32> to vector<2x24x24xf32>
    %357 = arith.subf %353, %356 : vector<2x24x24xf32>
    %358 = math.exp %357 : vector<2x24x24xf32>
    %cst_123 = arith.constant dense<0.000000e+00> : vector<2x24xf32>
    %359 = vector.multi_reduction <add>, %358, %cst_123 [2] : vector<2x24x24xf32> to vector<2x24xf32>
    %360 = vector.shape_cast %359 : vector<2x24xf32> to vector<2x24x1xf32>
    %361 = tpu.reciprocal %360 {approx = true} : vector<2x24x1xf32> -> vector<2x24x1xf32>
    %362 = vector.broadcast %361 : vector<2x24x1xf32> to vector<2x24x24xf32>
    %363 = arith.mulf %358, %362 : vector<2x24x24xf32>
    %364 = arith.truncf %363 : vector<2x24x24xf32> to vector<2x24x24xbf16>
    %cst_124 = arith.constant dense<0.000000e+00> : vector<2x24x16xf32>
    %365 = tpu.matmul %364, %348, %cst_124 {dimension_numbers = #tpu.dot_dimension_numbers<[2], [1], [1], [2], [0, 0, 0, 1, 1, 2], [0], [0]>} : vector<2x24x24xbf16>, vector<2x24x16xbf16>, vector<2x24x16xf32> -> vector<2x24x16xf32>
    %366 = vector.shape_cast %365 : vector<2x24x16xf32> to vector<48x16xf32>
    %367 = arith.truncf %366 : vector<48x16xf32> to vector<48x16xbf16>
    %368 = vector.extract_strided_slice %313 {offsets = [16, 0], sizes = [16, 64], strides = [1, 1]} : vector<64x64xbf16> to vector<16x64xbf16>
    %cst_125 = arith.constant dense<0.000000e+00> : vector<48x64xf32>
    %369 = tpu.matmul %367, %368, %cst_125 {dimension_numbers = #tpu.dot_dimension_numbers<[1], [0], [0], [1], [0, 0, 1, 1], [], []>} : vector<48x16xbf16>, vector<16x64xbf16>, vector<48x64xf32> -> vector<48x64xf32>
    %370 = arith.addf %342, %369 : vector<48x64xf32>
    %371 = vector.extract_strided_slice %307 {offsets = [0, 0, 32], sizes = [2, 24, 16], strides = [1, 1, 1]} : vector<2x24x64xf32> to vector<2x24x16xf32>
    %372 = arith.truncf %371 : vector<2x24x16xf32> to vector<2x24x16xbf16>
    %373 = vector.extract_strided_slice %309 {offsets = [0, 0, 32], sizes = [2, 24, 16], strides = [1, 1, 1]} : vector<2x24x64xf32> to vector<2x24x16xf32>
    %374 = arith.truncf %373 : vector<2x24x16xf32> to vector<2x24x16xbf16>
    %375 = vector.extract_strided_slice %311 {offsets = [0, 0, 32], sizes = [2, 24, 16], strides = [1, 1, 1]} : vector<2x24x64xf32> to vector<2x24x16xf32>
    %376 = arith.truncf %375 : vector<2x24x16xf32> to vector<2x24x16xbf16>
    %cst_126 = arith.constant dense<0.000000e+00> : vector<2x24x24xf32>
    %377 = tpu.matmul %372, %374, %cst_126 {dimension_numbers = #tpu.dot_dimension_numbers<[2], [2], [1], [1], [0, 0, 0, 1, 1, 1], [0], [0]>} : vector<2x24x16xbf16>, vector<2x24x16xbf16>, vector<2x24x24xf32> -> vector<2x24x24xf32>
    %cst_127 = arith.constant 2.500000e-01 : f32
    %378 = vector.broadcast %cst_127 : f32 to vector<2x24x24xf32>
    %379 = arith.mulf %377, %378 : vector<2x24x24xf32>
    %380 = vector.broadcast %43 : vector<1x1x24xf32> to vector<2x24x24xf32>
    %381 = arith.addf %379, %380 : vector<2x24x24xf32>
    %cst_128 = arith.constant dense<0xFF800000> : vector<2x24xf32>
    %382 = vector.multi_reduction <maximumf>, %381, %cst_128 [2] : vector<2x24x24xf32> to vector<2x24xf32>
    %383 = vector.shape_cast %382 : vector<2x24xf32> to vector<2x24x1xf32>
    %384 = vector.broadcast %383 : vector<2x24x1xf32> to vector<2x24x24xf32>
    %385 = arith.subf %381, %384 : vector<2x24x24xf32>
    %386 = math.exp %385 : vector<2x24x24xf32>
    %cst_129 = arith.constant dense<0.000000e+00> : vector<2x24xf32>
    %387 = vector.multi_reduction <add>, %386, %cst_129 [2] : vector<2x24x24xf32> to vector<2x24xf32>
    %388 = vector.shape_cast %387 : vector<2x24xf32> to vector<2x24x1xf32>
    %389 = tpu.reciprocal %388 {approx = true} : vector<2x24x1xf32> -> vector<2x24x1xf32>
    %390 = vector.broadcast %389 : vector<2x24x1xf32> to vector<2x24x24xf32>
    %391 = arith.mulf %386, %390 : vector<2x24x24xf32>
    %392 = arith.truncf %391 : vector<2x24x24xf32> to vector<2x24x24xbf16>
    %cst_130 = arith.constant dense<0.000000e+00> : vector<2x24x16xf32>
    %393 = tpu.matmul %392, %376, %cst_130 {dimension_numbers = #tpu.dot_dimension_numbers<[2], [1], [1], [2], [0, 0, 0, 1, 1, 2], [0], [0]>} : vector<2x24x24xbf16>, vector<2x24x16xbf16>, vector<2x24x16xf32> -> vector<2x24x16xf32>
    %394 = vector.shape_cast %393 : vector<2x24x16xf32> to vector<48x16xf32>
    %395 = arith.truncf %394 : vector<48x16xf32> to vector<48x16xbf16>
    %396 = vector.extract_strided_slice %313 {offsets = [32, 0], sizes = [16, 64], strides = [1, 1]} : vector<64x64xbf16> to vector<16x64xbf16>
    %cst_131 = arith.constant dense<0.000000e+00> : vector<48x64xf32>
    %397 = tpu.matmul %395, %396, %cst_131 {dimension_numbers = #tpu.dot_dimension_numbers<[1], [0], [0], [1], [0, 0, 1, 1], [], []>} : vector<48x16xbf16>, vector<16x64xbf16>, vector<48x64xf32> -> vector<48x64xf32>
    %398 = arith.addf %370, %397 : vector<48x64xf32>
    %399 = vector.extract_strided_slice %307 {offsets = [0, 0, 48], sizes = [2, 24, 16], strides = [1, 1, 1]} : vector<2x24x64xf32> to vector<2x24x16xf32>
    %400 = arith.truncf %399 : vector<2x24x16xf32> to vector<2x24x16xbf16>
    %401 = vector.extract_strided_slice %309 {offsets = [0, 0, 48], sizes = [2, 24, 16], strides = [1, 1, 1]} : vector<2x24x64xf32> to vector<2x24x16xf32>
    %402 = arith.truncf %401 : vector<2x24x16xf32> to vector<2x24x16xbf16>
    %403 = vector.extract_strided_slice %311 {offsets = [0, 0, 48], sizes = [2, 24, 16], strides = [1, 1, 1]} : vector<2x24x64xf32> to vector<2x24x16xf32>
    %404 = arith.truncf %403 : vector<2x24x16xf32> to vector<2x24x16xbf16>
    %cst_132 = arith.constant dense<0.000000e+00> : vector<2x24x24xf32>
    %405 = tpu.matmul %400, %402, %cst_132 {dimension_numbers = #tpu.dot_dimension_numbers<[2], [2], [1], [1], [0, 0, 0, 1, 1, 1], [0], [0]>} : vector<2x24x16xbf16>, vector<2x24x16xbf16>, vector<2x24x24xf32> -> vector<2x24x24xf32>
    %cst_133 = arith.constant 2.500000e-01 : f32
    %406 = vector.broadcast %cst_133 : f32 to vector<2x24x24xf32>
    %407 = arith.mulf %405, %406 : vector<2x24x24xf32>
    %408 = vector.broadcast %43 : vector<1x1x24xf32> to vector<2x24x24xf32>
    %409 = arith.addf %407, %408 : vector<2x24x24xf32>
    %cst_134 = arith.constant dense<0xFF800000> : vector<2x24xf32>
    %410 = vector.multi_reduction <maximumf>, %409, %cst_134 [2] : vector<2x24x24xf32> to vector<2x24xf32>
    %411 = vector.shape_cast %410 : vector<2x24xf32> to vector<2x24x1xf32>
    %412 = vector.broadcast %411 : vector<2x24x1xf32> to vector<2x24x24xf32>
    %413 = arith.subf %409, %412 : vector<2x24x24xf32>
    %414 = math.exp %413 : vector<2x24x24xf32>
    %cst_135 = arith.constant dense<0.000000e+00> : vector<2x24xf32>
    %415 = vector.multi_reduction <add>, %414, %cst_135 [2] : vector<2x24x24xf32> to vector<2x24xf32>
    %416 = vector.shape_cast %415 : vector<2x24xf32> to vector<2x24x1xf32>
    %417 = tpu.reciprocal %416 {approx = true} : vector<2x24x1xf32> -> vector<2x24x1xf32>
    %418 = vector.broadcast %417 : vector<2x24x1xf32> to vector<2x24x24xf32>
    %419 = arith.mulf %414, %418 : vector<2x24x24xf32>
    %420 = arith.truncf %419 : vector<2x24x24xf32> to vector<2x24x24xbf16>
    %cst_136 = arith.constant dense<0.000000e+00> : vector<2x24x16xf32>
    %421 = tpu.matmul %420, %404, %cst_136 {dimension_numbers = #tpu.dot_dimension_numbers<[2], [1], [1], [2], [0, 0, 0, 1, 1, 2], [0], [0]>} : vector<2x24x24xbf16>, vector<2x24x16xbf16>, vector<2x24x16xf32> -> vector<2x24x16xf32>
    %422 = vector.shape_cast %421 : vector<2x24x16xf32> to vector<48x16xf32>
    %423 = arith.truncf %422 : vector<48x16xf32> to vector<48x16xbf16>
    %424 = vector.extract_strided_slice %313 {offsets = [48, 0], sizes = [16, 64], strides = [1, 1]} : vector<64x64xbf16> to vector<16x64xbf16>
    %cst_137 = arith.constant dense<0.000000e+00> : vector<48x64xf32>
    %425 = tpu.matmul %423, %424, %cst_137 {dimension_numbers = #tpu.dot_dimension_numbers<[1], [0], [0], [1], [0, 0, 1, 1], [], []>} : vector<48x16xbf16>, vector<16x64xbf16>, vector<48x64xf32> -> vector<48x64xf32>
    %426 = arith.addf %398, %425 : vector<48x64xf32>
    %c1_138 = arith.constant 1 : index
    %c0_139 = arith.constant 0 : index
    %c0_140 = arith.constant 0 : index
    %427 = vector.load %arg11[%c1_138, %c0_139, %c0_140] : memref<2x1x64xf32, #tpu.memory_space<vmem>>, vector<1x1x64xf32>
    %428 = vector.shape_cast %427 : vector<1x1x64xf32> to vector<1x64xf32>
    %429 = vector.broadcast %428 : vector<1x64xf32> to vector<48x64xf32>
    %430 = arith.addf %426, %429 : vector<48x64xf32>
    %431 = vector.shape_cast %430 : vector<48x64xf32> to vector<2x24x64xf32>
    %432 = arith.addf %266, %431 : vector<2x24x64xf32>
    %c1_141 = arith.constant 1 : index
    %c0_142 = arith.constant 0 : index
    %c0_143 = arith.constant 0 : index
    %433 = vector.load %arg12[%c1_141, %c0_142, %c0_143] : memref<2x1x64xf32, #tpu.memory_space<vmem>>, vector<1x1x64xf32>
    %434 = vector.shape_cast %433 : vector<1x1x64xf32> to vector<1x64xf32>
    %c1_144 = arith.constant 1 : index
    %c0_145 = arith.constant 0 : index
    %c0_146 = arith.constant 0 : index
    %435 = vector.load %arg13[%c1_144, %c0_145, %c0_146] : memref<2x1x64xf32, #tpu.memory_space<vmem>>, vector<1x1x64xf32>
    %436 = vector.shape_cast %435 : vector<1x1x64xf32> to vector<1x64xf32>
    %cst_147 = arith.constant dense<0.000000e+00> : vector<2x24xf32>
    %437 = vector.multi_reduction <add>, %432, %cst_147 [2] : vector<2x24x64xf32> to vector<2x24xf32>
    %438 = vector.shape_cast %437 : vector<2x24xf32> to vector<2x24x1xf32>
    %cst_148 = arith.constant 6.400000e+01 : f32
    %439 = vector.broadcast %cst_148 : f32 to vector<2x24x1xf32>
    %440 = arith.divf %438, %439 : vector<2x24x1xf32>
    %441 = vector.broadcast %440 : vector<2x24x1xf32> to vector<2x24x64xf32>
    %442 = arith.subf %432, %441 : vector<2x24x64xf32>
    %443 = vector.broadcast %440 : vector<2x24x1xf32> to vector<2x24x64xf32>
    %444 = arith.subf %432, %443 : vector<2x24x64xf32>
    %445 = arith.mulf %442, %444 : vector<2x24x64xf32>
    %cst_149 = arith.constant dense<0.000000e+00> : vector<2x24xf32>
    %446 = vector.multi_reduction <add>, %445, %cst_149 [2] : vector<2x24x64xf32> to vector<2x24xf32>
    %447 = vector.shape_cast %446 : vector<2x24xf32> to vector<2x24x1xf32>
    %cst_150 = arith.constant 6.400000e+01 : f32
    %448 = vector.broadcast %cst_150 : f32 to vector<2x24x1xf32>
    %449 = arith.divf %447, %448 : vector<2x24x1xf32>
    %450 = vector.broadcast %440 : vector<2x24x1xf32> to vector<2x24x64xf32>
    %451 = arith.subf %432, %450 : vector<2x24x64xf32>
    %cst_151 = arith.constant 9.99999974E-6 : f32
    %452 = vector.broadcast %cst_151 : f32 to vector<2x24x1xf32>
    %453 = arith.addf %449, %452 : vector<2x24x1xf32>
    %454 = math.rsqrt %453 : vector<2x24x1xf32>
    %455 = vector.broadcast %454 : vector<2x24x1xf32> to vector<2x24x64xf32>
    %456 = arith.mulf %451, %455 : vector<2x24x64xf32>
    %457 = vector.shape_cast %434 : vector<1x64xf32> to vector<1x1x64xf32>
    %458 = vector.broadcast %457 : vector<1x1x64xf32> to vector<2x24x64xf32>
    %459 = arith.mulf %456, %458 : vector<2x24x64xf32>
    %460 = vector.shape_cast %436 : vector<1x64xf32> to vector<1x1x64xf32>
    %461 = vector.broadcast %460 : vector<1x1x64xf32> to vector<2x24x64xf32>
    %462 = arith.addf %459, %461 : vector<2x24x64xf32>
    %463 = vector.shape_cast %462 : vector<2x24x64xf32> to vector<48x64xf32>
    %464 = arith.truncf %463 : vector<48x64xf32> to vector<48x64xbf16>
    %c1_152 = arith.constant 1 : index
    %c0_153 = arith.constant 0 : index
    %c0_154 = arith.constant 0 : index
    %465 = vector.load %arg14[%c1_152, %c0_153, %c0_154] : memref<2x64x256xbf16, #tpu.memory_space<vmem>>, vector<1x64x256xbf16>
    %466 = vector.shape_cast %465 : vector<1x64x256xbf16> to vector<64x256xbf16>
    %cst_155 = arith.constant dense<0.000000e+00> : vector<48x256xf32>
    %467 = tpu.matmul %464, %466, %cst_155 {dimension_numbers = #tpu.dot_dimension_numbers<[1], [0], [0], [1], [0, 0, 1, 1], [], []>} : vector<48x64xbf16>, vector<64x256xbf16>, vector<48x256xf32> -> vector<48x256xf32>
    %c1_156 = arith.constant 1 : index
    %c0_157 = arith.constant 0 : index
    %c0_158 = arith.constant 0 : index
    %468 = vector.load %arg15[%c1_156, %c0_157, %c0_158] : memref<2x1x256xf32, #tpu.memory_space<vmem>>, vector<1x1x256xf32>
    %469 = vector.shape_cast %468 : vector<1x1x256xf32> to vector<1x256xf32>
    %470 = vector.broadcast %469 : vector<1x256xf32> to vector<48x256xf32>
    %471 = arith.addf %467, %470 : vector<48x256xf32>
    %cst_159 = arith.constant 1.702000e+00 : f32
    %472 = vector.broadcast %cst_159 : f32 to vector<48x256xf32>
    %473 = arith.mulf %472, %471 : vector<48x256xf32>
    %474 = arith.negf %473 : vector<48x256xf32>
    %475 = math.exp %474 : vector<48x256xf32>
    %cst_160 = arith.constant 1.000000e+00 : f32
    %476 = vector.broadcast %cst_160 : f32 to vector<48x256xf32>
    %477 = arith.addf %476, %475 : vector<48x256xf32>
    %478 = arith.divf %476, %477 : vector<48x256xf32>
    %479 = arith.mulf %471, %478 : vector<48x256xf32>
    %480 = arith.truncf %479 : vector<48x256xf32> to vector<48x256xbf16>
    %c1_161 = arith.constant 1 : index
    %c0_162 = arith.constant 0 : index
    %c0_163 = arith.constant 0 : index
    %481 = vector.load %arg16[%c1_161, %c0_162, %c0_163] : memref<2x256x64xbf16, #tpu.memory_space<vmem>>, vector<1x256x64xbf16>
    %482 = vector.shape_cast %481 : vector<1x256x64xbf16> to vector<256x64xbf16>
    %cst_164 = arith.constant dense<0.000000e+00> : vector<48x64xf32>
    %483 = tpu.matmul %480, %482, %cst_164 {dimension_numbers = #tpu.dot_dimension_numbers<[1], [0], [0], [1], [0, 0, 1, 1], [], []>} : vector<48x256xbf16>, vector<256x64xbf16>, vector<48x64xf32> -> vector<48x64xf32>
    %c1_165 = arith.constant 1 : index
    %c0_166 = arith.constant 0 : index
    %c0_167 = arith.constant 0 : index
    %484 = vector.load %arg17[%c1_165, %c0_166, %c0_167] : memref<2x1x64xf32, #tpu.memory_space<vmem>>, vector<1x1x64xf32>
    %485 = vector.shape_cast %484 : vector<1x1x64xf32> to vector<1x64xf32>
    %486 = vector.broadcast %485 : vector<1x64xf32> to vector<48x64xf32>
    %487 = arith.addf %483, %486 : vector<48x64xf32>
    %488 = vector.shape_cast %487 : vector<48x64xf32> to vector<2x24x64xf32>
    %489 = arith.addf %432, %488 : vector<2x24x64xf32>
    %490 = vector.extract_strided_slice %489 {offsets = [0, 0, 0], sizes = [2, 1, 64], strides = [1, 1, 1]} : vector<2x24x64xf32> to vector<2x1x64xf32>
    %491 = vector.shape_cast %490 : vector<2x1x64xf32> to vector<2x64xf32>
    %c0_168 = arith.constant 0 : index
    %c0_169 = arith.constant 0 : index
    %492 = vector.load %arg18[%c0_168, %c0_169] : memref<1x64xf32, #tpu.memory_space<vmem>>, vector<1x64xf32>
    %c0_170 = arith.constant 0 : index
    %c0_171 = arith.constant 0 : index
    %493 = vector.load %arg19[%c0_170, %c0_171] : memref<1x64xf32, #tpu.memory_space<vmem>>, vector<1x64xf32>
    %cst_172 = arith.constant dense<0.000000e+00> : vector<2xf32>
    %494 = vector.multi_reduction <add>, %491, %cst_172 [1] : vector<2x64xf32> to vector<2xf32>
    %495 = vector.shape_cast %494 : vector<2xf32> to vector<2x1xf32>
    %cst_173 = arith.constant 6.400000e+01 : f32
    %496 = vector.broadcast %cst_173 : f32 to vector<2x1xf32>
    %497 = arith.divf %495, %496 : vector<2x1xf32>
    %498 = vector.broadcast %497 : vector<2x1xf32> to vector<2x64xf32>
    %499 = arith.subf %491, %498 : vector<2x64xf32>
    %500 = vector.broadcast %497 : vector<2x1xf32> to vector<2x64xf32>
    %501 = arith.subf %491, %500 : vector<2x64xf32>
    %502 = arith.mulf %499, %501 : vector<2x64xf32>
    %cst_174 = arith.constant dense<0.000000e+00> : vector<2xf32>
    %503 = vector.multi_reduction <add>, %502, %cst_174 [1] : vector<2x64xf32> to vector<2xf32>
    %504 = vector.shape_cast %503 : vector<2xf32> to vector<2x1xf32>
    %cst_175 = arith.constant 6.400000e+01 : f32
    %505 = vector.broadcast %cst_175 : f32 to vector<2x1xf32>
    %506 = arith.divf %504, %505 : vector<2x1xf32>
    %507 = vector.broadcast %497 : vector<2x1xf32> to vector<2x64xf32>
    %508 = arith.subf %491, %507 : vector<2x64xf32>
    %cst_176 = arith.constant 9.99999974E-6 : f32
    %509 = vector.broadcast %cst_176 : f32 to vector<2x1xf32>
    %510 = arith.addf %506, %509 : vector<2x1xf32>
    %511 = math.rsqrt %510 : vector<2x1xf32>
    %512 = vector.broadcast %511 : vector<2x1xf32> to vector<2x64xf32>
    %513 = arith.mulf %508, %512 : vector<2x64xf32>
    %514 = vector.broadcast %492 : vector<1x64xf32> to vector<2x64xf32>
    %515 = arith.mulf %513, %514 : vector<2x64xf32>
    %516 = vector.broadcast %493 : vector<1x64xf32> to vector<2x64xf32>
    %517 = arith.addf %515, %516 : vector<2x64xf32>
    %518 = arith.truncf %517 : vector<2x64xf32> to vector<2x64xbf16>
    %c0_177 = arith.constant 0 : index
    %c0_178 = arith.constant 0 : index
    %519 = vector.load %arg20[%c0_177, %c0_178] : memref<64x32xbf16, #tpu.memory_space<vmem>>, vector<64x32xbf16>
    %cst_179 = arith.constant dense<0.000000e+00> : vector<2x32xf32>
    %520 = tpu.matmul %518, %519, %cst_179 {dimension_numbers = #tpu.dot_dimension_numbers<[1], [0], [0], [1], [0, 0, 1, 1], [], []>} : vector<2x64xbf16>, vector<64x32xbf16>, vector<2x32xf32> -> vector<2x32xf32>
    %c0_180 = arith.constant 0 : index
    %c0_181 = arith.constant 0 : index
    %521 = vector.load %arg23[%c0_180, %c0_181] : memref<2x32xf32, #tpu.memory_space<vmem>>, vector<2x32xf32>
    tpu.vector_store %arg23[%c0_180, %c0_181], %520 {strides = array<i32>} : memref<2x32xf32, #tpu.memory_space<vmem>>, vector<2x32xf32>,
    %522 = arith.truncf %520 : vector<2x32xf32> to vector<2x32xbf16>
    %c0_182 = arith.constant 0 : index
    %c0_183 = arith.constant 0 : index
    %523 = vector.load %arg21[%c0_182, %c0_183] : memref<32x1xbf16, #tpu.memory_space<vmem>>, vector<32x1xbf16>
    %cst_184 = arith.constant dense<0.000000e+00> : vector<2x1xf32>
    %524 = tpu.matmul %522, %523, %cst_184 {dimension_numbers = #tpu.dot_dimension_numbers<[1], [0], [0], [1], [0, 0, 1, 1], [], []>} : vector<2x32xbf16>, vector<32x1xbf16>, vector<2x1xf32> -> vector<2x1xf32>
    %c0_185 = arith.constant 0 : index
    %c0_186 = arith.constant 0 : index
    %525 = vector.load %arg22[%c0_185, %c0_186] : memref<1x1xf32, #tpu.memory_space<vmem>>, vector<1x1xf32>
    %526 = vector.broadcast %525 : vector<1x1xf32> to vector<2x1xf32>
    %527 = arith.addf %524, %526 : vector<2x1xf32>
    %c0_187 = arith.constant 0 : index
    %c0_188 = arith.constant 0 : index
    %528 = vector.load %arg24[%c0_187, %c0_188] : memref<2x1xf32, #tpu.memory_space<vmem>>, vector<2x1xf32>
    tpu.vector_store %arg24[%c0_187, %c0_188], %527 {strides = array<i32>} : memref<2x1xf32, #tpu.memory_space<vmem>>, vector<2x1xf32>,
    return
  }
  func.func @transform_0(%arg0: i32) -> (i32, i32, i32) {
    %c0_i32 = arith.constant 0 : i32
    %c0_i32_0 = arith.constant 0 : i32
    %c0_i32_1 = arith.constant 0 : i32
    %c0_i32_2 = arith.constant 0 : i32
    return %c0_i32, %c0_i32_0, %c0_i32_1 : i32, i32, i32
  }
  func.func @transform_1(%arg0: i32) -> (i32, i32) {
    %c0_i32 = arith.constant 0 : i32
    %c0_i32_0 = arith.constant 0 : i32
    %c0_i32_1 = arith.constant 0 : i32
    return %c0_i32, %c0_i32_0 : i32, i32
  }
  func.func @transform_2(%arg0: i32) -> (i32, i32) {
    %c0_i32 = arith.constant 0 : i32
    %c0_i32_0 = arith.constant 0 : i32
    %c0_i32_1 = arith.constant 0 : i32
    return %c0_i32, %c0_i32_0 : i32, i32
  }
  func.func @transform_3(%arg0: i32) -> (i32, i32) {
    %c0_i32 = arith.constant 0 : i32
    %c0_i32_0 = arith.constant 0 : i32
    %c0_i32_1 = arith.constant 0 : i32
    return %c0_i32, %c0_i32_0 : i32, i32
  }
  func.func @transform_4(%arg0: i32) -> (i32, i32) {
    %c0_i32 = arith.constant 0 : i32
    %c0_i32_0 = arith.constant 0 : i32
    %c0_i32_1 = arith.constant 0 : i32
    return %c0_i32, %c0_i32_0 : i32, i32
  }
  func.func @transform_5(%arg0: i32) -> (i32, i32, i32) {
    %c0_i32 = arith.constant 0 : i32
    %c0_i32_0 = arith.constant 0 : i32
    %c0_i32_1 = arith.constant 0 : i32
    %c0_i32_2 = arith.constant 0 : i32
    return %c0_i32, %c0_i32_0, %c0_i32_1 : i32, i32, i32
  }
  func.func @transform_6(%arg0: i32) -> (i32, i32, i32) {
    %c0_i32 = arith.constant 0 : i32
    %c0_i32_0 = arith.constant 0 : i32
    %c0_i32_1 = arith.constant 0 : i32
    %c0_i32_2 = arith.constant 0 : i32
    return %c0_i32, %c0_i32_0, %c0_i32_1 : i32, i32, i32
  }
  func.func @transform_7(%arg0: i32) -> (i32, i32, i32) {
    %c0_i32 = arith.constant 0 : i32
    %c0_i32_0 = arith.constant 0 : i32
    %c0_i32_1 = arith.constant 0 : i32
    %c0_i32_2 = arith.constant 0 : i32
    return %c0_i32, %c0_i32_0, %c0_i32_1 : i32, i32, i32
  }
  func.func @transform_8(%arg0: i32) -> (i32, i32, i32) {
    %c0_i32 = arith.constant 0 : i32
    %c0_i32_0 = arith.constant 0 : i32
    %c0_i32_1 = arith.constant 0 : i32
    %c0_i32_2 = arith.constant 0 : i32
    return %c0_i32, %c0_i32_0, %c0_i32_1 : i32, i32, i32
  }
  func.func @transform_9(%arg0: i32) -> (i32, i32, i32) {
    %c0_i32 = arith.constant 0 : i32
    %c0_i32_0 = arith.constant 0 : i32
    %c0_i32_1 = arith.constant 0 : i32
    %c0_i32_2 = arith.constant 0 : i32
    return %c0_i32, %c0_i32_0, %c0_i32_1 : i32, i32, i32
  }
  func.func @transform_10(%arg0: i32) -> (i32, i32, i32) {
    %c0_i32 = arith.constant 0 : i32
    %c0_i32_0 = arith.constant 0 : i32
    %c0_i32_1 = arith.constant 0 : i32
    %c0_i32_2 = arith.constant 0 : i32
    return %c0_i32, %c0_i32_0, %c0_i32_1 : i32, i32, i32
  }
  func.func @transform_11(%arg0: i32) -> (i32, i32, i32) {
    %c0_i32 = arith.constant 0 : i32
    %c0_i32_0 = arith.constant 0 : i32
    %c0_i32_1 = arith.constant 0 : i32
    %c0_i32_2 = arith.constant 0 : i32
    return %c0_i32, %c0_i32_0, %c0_i32_1 : i32, i32, i32
  }
  func.func @transform_12(%arg0: i32) -> (i32, i32, i32) {
    %c0_i32 = arith.constant 0 : i32
    %c0_i32_0 = arith.constant 0 : i32
    %c0_i32_1 = arith.constant 0 : i32
    %c0_i32_2 = arith.constant 0 : i32
    return %c0_i32, %c0_i32_0, %c0_i32_1 : i32, i32, i32
  }
  func.func @transform_13(%arg0: i32) -> (i32, i32, i32) {
    %c0_i32 = arith.constant 0 : i32
    %c0_i32_0 = arith.constant 0 : i32
    %c0_i32_1 = arith.constant 0 : i32
    %c0_i32_2 = arith.constant 0 : i32
    return %c0_i32, %c0_i32_0, %c0_i32_1 : i32, i32, i32
  }
  func.func @transform_14(%arg0: i32) -> (i32, i32, i32) {
    %c0_i32 = arith.constant 0 : i32
    %c0_i32_0 = arith.constant 0 : i32
    %c0_i32_1 = arith.constant 0 : i32
    %c0_i32_2 = arith.constant 0 : i32
    return %c0_i32, %c0_i32_0, %c0_i32_1 : i32, i32, i32
  }
  func.func @transform_15(%arg0: i32) -> (i32, i32, i32) {
    %c0_i32 = arith.constant 0 : i32
    %c0_i32_0 = arith.constant 0 : i32
    %c0_i32_1 = arith.constant 0 : i32
    %c0_i32_2 = arith.constant 0 : i32
    return %c0_i32, %c0_i32_0, %c0_i32_1 : i32, i32, i32
  }
  func.func @transform_16(%arg0: i32) -> (i32, i32, i32) {
    %c0_i32 = arith.constant 0 : i32
    %c0_i32_0 = arith.constant 0 : i32
    %c0_i32_1 = arith.constant 0 : i32
    %c0_i32_2 = arith.constant 0 : i32
    return %c0_i32, %c0_i32_0, %c0_i32_1 : i32, i32, i32
  }
  func.func @transform_17(%arg0: i32) -> (i32, i32) {
    %c0_i32 = arith.constant 0 : i32
    %c0_i32_0 = arith.constant 0 : i32
    %c0_i32_1 = arith.constant 0 : i32
    return %c0_i32, %c0_i32_0 : i32, i32
  }
  func.func @transform_18(%arg0: i32) -> (i32, i32) {
    %c0_i32 = arith.constant 0 : i32
    %c0_i32_0 = arith.constant 0 : i32
    %c0_i32_1 = arith.constant 0 : i32
    return %c0_i32, %c0_i32_0 : i32, i32
  }
  func.func @transform_19(%arg0: i32) -> (i32, i32) {
    %c0_i32 = arith.constant 0 : i32
    %c0_i32_0 = arith.constant 0 : i32
    %c0_i32_1 = arith.constant 0 : i32
    return %c0_i32, %c0_i32_0 : i32, i32
  }
  func.func @transform_20(%arg0: i32) -> (i32, i32) {
    %c0_i32 = arith.constant 0 : i32
    %c0_i32_0 = arith.constant 0 : i32
    %c0_i32_1 = arith.constant 0 : i32
    return %c0_i32, %c0_i32_0 : i32, i32
  }
  func.func @transform_21(%arg0: i32) -> (i32, i32) {
    %c0_i32 = arith.constant 0 : i32
    %c0_i32_0 = arith.constant 0 : i32
    %c0_i32_1 = arith.constant 0 : i32
    return %c0_i32, %c0_i32_0 : i32, i32
  }
  func.func @transform_22(%arg0: i32) -> (i32, i32) {
    %c0_i32 = arith.constant 0 : i32
    %c0_i32_0 = arith.constant 0 : i32
    %c0_i32_1 = arith.constant 0 : i32
    return %c0_i32, %c0_i32_0 : i32, i32
  }
  func.func @transform_23(%arg0: i32) -> (i32, i32) {
    %c0_i32 = arith.constant 0 : i32
    %c0_i32_0 = arith.constant 0 : i32
    %c0_i32_1 = arith.constant 0 : i32
    return %c0_i32, %c0_i32_0 : i32, i32
  }
}

</mosaic_0001>

<bundles_post_ra>
// kernel: clip_forward.1
= control target key start
LH: loop header
LB: loop body
LE: loop exit
PB: predicated region body
PF: predicated region fallthrough
CT: control target
= control target key end

     0   :  { %s8065_s0 = inlined_call_operand.vmem [shape: f32[2,24,192], index: 0, kind: input, shape index: {}]   ;;  %s8066_s1 = inlined_call_operand.vmem [shape: bf16[192,64], index: 1, kind: input, shape index: {}]   ;;  %s8067_s2 = inlined_call_operand.vmem [shape: f32[24,64], index: 2, kind: input, shape index: {}]   ;;  %s8068_s3 = inlined_call_operand.vmem [shape: f32[1,64], index: 3, kind: input, shape index: {}]   ;;  %s8069_s4 = inlined_call_operand.vmem [shape: f32[1,64], index: 4, kind: input, shape index: {}]   ;;  %s8070_s5 = inlined_call_operand.vmem [shape: f32[2,1,64], index: 5, kind: input, shape index: {}]   ;;  %s8071_s6 = inlined_call_operand.vmem [shape: f32[2,1,64], index: 6, kind: input, shape index: {}]   ;;  %s8072_s7 = inlined_call_operand.vmem [shape: bf16[2,64,192], index: 7, kind: input, shape index: {}]   ;;  %s8073_s8 = inlined_call_operand.vmem [shape: f32[2,1,192], index: 8, kind: input, shape index: {}]   ;;  %s8074_s9 = inlined_call_operand.vmem [shape: bf16[2,64,64], index: 9, kind: input, shape index: {}]   ;;  %s8075_s10 = inlined_call_operand.vmem [shape: f32[2,1,64], index: 10, kind: input, shape index: {}]   ;;  %s8076_s11 = inlined_call_operand.vmem [shape: f32[2,1,64], index: 11, kind: input, shape index: {}]   ;;  %s8077_s12 = inlined_call_operand.vmem [shape: f32[2,1,64], index: 12, kind: input, shape index: {}]   ;;  %s8078_s13 = inlined_call_operand.vmem [shape: bf16[2,64,256], index: 13, kind: input, shape index: {}]   ;;  %s8079_s14 = inlined_call_operand.vmem [shape: f32[2,1,256], index: 14, kind: input, shape index: {}]   ;;  %s8080_s15 = inlined_call_operand.vmem [shape: bf16[2,256,64], index: 15, kind: input, shape index: {}]   ;;  %s8081_s16 = inlined_call_operand.vmem [shape: f32[2,1,64], index: 16, kind: input, shape index: {}]   ;;  %s8082_s17 = inlined_call_operand.vmem [shape: f32[1,64], index: 17, kind: input, shape index: {}]   ;;  %s8083_s18 = inlined_call_operand.vmem [shape: f32[1,64], index: 18, kind: input, shape index: {}]   ;;  %s8084_s19 = inlined_call_operand.vmem [shape: bf16[64,32], index: 19, kind: input, shape index: {}]   ;;  %s8085_s20 = inlined_call_operand.vmem [shape: bf16[32,1], index: 20, kind: input, shape index: {}]   ;;  %s8086_s21 = inlined_call_operand.<no memory space> [shape: f32[1,1], index: 21, kind: input, shape index: {}]   ;;  %s8087_s22 = inlined_call_operand.hbm [shape: f32[2,32], index: 22, kind: output, shape index: {0}]   ;;  %s8088_s23 = inlined_call_operand.vmem [shape: f32[2,1], index: 23, kind: output, shape index: {1}]  }
   0x1   :  { %8103 = sst [smem:[#allocation6_spill]] %s8065_s0  ;;  %v29_v0 = vstv %s8086_s21 }
   0x2   :  { %8104 = sst [smem:[#allocation7_spill]] %s8066_s1  ;;  %30 = vst [vmem:[#allocation2] sm:$0x1] %v29_v0 }
   0x3   :  { %8105 = sst [smem:[#allocation8_spill]] %s8067_s2 }
   0x4   :  { %8106 = sst [smem:[#allocation9_spill]] %s8068_s3 }
   0x5   :  { %8107 = sst [smem:[#allocation10_spill]] %s8069_s4 }
   0x6   :  { %8108 = sst [smem:[#allocation11_spill]] %s8070_s5 }
   0x7   :  { %8109 = sst [smem:[#allocation12_spill]] %s8071_s6 }
   0x8   :  { %8110 = sst [smem:[#allocation13_spill]] %s8072_s7 }
   0x9   :  { %s8111_s5 = sld [smem:[#allocation7_spill]] }
   0xa   :  { %s8112_s26 = sld [smem:[#allocation6_spill]] }
   0xf   :  { %v5508_v1 = vld [vmem:[%s8111_s5 + $0x38] sm:$0xff]  ;;  %v5507_v3 = vld [vmem:[%s8111_s5 + $0x30] sm:$0xff]  ;;  %v5506_v5 = vld [vmem:[%s8111_s5 + $0x28] sm:$0xff] }
  0x10   :  { %v5512_v2 = vld [vmem:[%s8111_s5 + $0x58] sm:$0xff]  ;;  %201 = vmatpush.bf16.msra.mxu0 %v5508_v1  ;;  %v5511_v4 = vld [vmem:[%s8111_s5 + $0x50] sm:$0xff]  ;;  %v5510_v6 = vld [vmem:[%s8111_s5 + $0x48] sm:$0xff] }
  0x11   :  { %229 = vmatpush.bf16.msra.mxu1 %v5512_v2  ;;  %v5505_v7 = vld [vmem:[%s8111_s5 + $0x20] sm:$0xff]  ;;  %v78_v9 = vld [vmem:[%s8112_s26 + $0x8] sm:$0xff]  ;;  %v80_v10 = vld [vmem:[%s8112_s26 + $0x18] sm:$0xff] }
  0x12   :  { %v5509_v8 = vld [vmem:[%s8111_s5 + $0x40] sm:$0xff] }
  0x14   :  { %202 = vmatpush.bf16.msra.mxu0 %v5507_v3 }
  0x15   :  { %230 = vmatpush.bf16.msra.mxu1 %v5511_v4 }
  0x18   :  { %203 = vmatpush.bf16.msra.mxu0 %v5506_v5 }
  0x19   :  { %231 = vmatpush.bf16.msra.mxu1 %v5510_v6 }
  0x1a   :  { %31 = vsyncpa [#allocation4], 0  ;;  %v5504_v11 = vld [vmem:[%s8111_s5 + $0x18] sm:$0xff]  ;;  %v90_v12 = vpack.c.bf16 %v80_v10, %v78_v9  ;;  %vm191_vm0 = vcmask 523264   ;;  %v5503_v13 = vld [vmem:[%s8111_s5 + $0x10] sm:$0xff]  ;;  %s8113_s4 = sld [smem:[#allocation8_spill]] }
  0x1b   :  { %v5502_v14 = vld [vmem:[%s8111_s5 + $0x8] sm:$0xff]  ;;  %v5501_v15 = vld [vmem:[%s8111_s5] sm:$0xff]  ;;  %v79_v17 = vld [vmem:[%s8112_s26 + $0x10] sm:$0xff]  ;;  %v5996_v48 = vmov 64.0   ;;  %s8114_s0 = sld [smem:[#allocation9_spill]]  ;;  %s5997_s3 = smov 64  }
  0x1c   :  { %204 = vmatpush.bf16.msra.mxu0 %v5505_v7  ;;  %v77_v16 = vld [vmem:[%s8112_s26] sm:$0xff]  ;;  %v82_v18 = vld [vmem:[%s8112_s26 + $0x28] sm:$0xff]  ;;  %v84_v19 = vld [vmem:[%s8112_s26 + $0x38] sm:$0xff]  ;;  %5618 = vrcp.f32 %v5996_v48  ;;  %s8115_s24 = sld [smem:[#allocation10_spill]]  ;;  %s8101_s30 = smov 32  }
  0x1d   :  { %232 = vmatpush.bf16.msra.mxu1 %v5509_v8  ;;  %v89_v20 = vpack.c.bf16 %v79_v17, %v77_v16  ;;  %v92_v21 = vpack.c.bf16 %v84_v19, %v82_v18  ;;  %v81_v22 = vld [vmem:[%s8112_s26 + $0x20] sm:$0xff]  ;;  %v83_v23 = vld [vmem:[%s8112_s26 + $0x30] sm:$0xff]  ;;  %v86_v58 = vld [vmem:[%s8112_s26 + $0x48] sm:$0xff]  ;;  %s8116_s2 = sld [smem:[#allocation13_spill]]  ;;  %s8097_s5 = smov 16  }
  0x1e   :  { %v91_v24 = vpack.c.bf16 %v83_v23, %v81_v22  ;;  %v85_v56 = vld [vmem:[%s8112_s26 + $0x40] sm:$0xff]  ;;  %v87_v57 = vld [vmem:[%s8112_s26 + $0x50] sm:$0xff]  ;;  %v88_v61 = vld [vmem:[%s8112_s26 + $0x58] sm:$0xff]  ;;  %s8117_s7 = sld [smem:[#allocation11_spill]]  ;;  %s8095_s21 = smov 80  }
  0x1f   :  { %v93_v60 = vpack.c.bf16 %v87_v57, %v85_v56  ;;  %v94_v62 = vpack.c.bf16 %v88_v61, %v86_v58  ;;  %s8118_s28 = sld [smem:[#allocation12_spill]]  ;;  %s8134_s29 = smov 80  }
  0x20   :  { %205 = vmatpush.bf16.msra.mxu0 %v5504_v11  ;;  %4984 = vmatmul.msk.bf16.vlgmr.msra.gmra.mxu1 %vm191_vm0, %v90_v12  ;;  %v249_v27 = vld [vmem:[%s8113_s4] sm:$0xff]  ;;  %v6198_v33 = vld [vmem:[%s8113_s4 + $0x8] sm:$0xff]  ;;  %v6205_v39 = vld [vmem:[%s8113_s4 + $0x10] sm:$0xff]  ;;  %s5999_s4 = smov 112  }
  0x22   :  { %v5619_v49 = vpop.eup %5618 }
  0x23   :  { %v279_v50 = vmul.f32 64.0, %v5619_v49  ;;  %vm283_vm1 = vweird.f32 %v5619_v49 }
  0x24   :  { %206 = vmatpush.bf16.msra.mxu0 %v5503_v13 }
  0x25   :  { %v280_v51 = vsub.f32 1.0, %v279_v50 }
  0x27   :  { %v281_v52 = vmul.f32 %v5619_v49, %v280_v51 }
  0x28   :  { %207 = vmatpush.bf16.msra.mxu0 %v5502_v14 }
  0x29   :  { %v282_v53 = vadd.f32 %v5619_v49, %v281_v52 }
  0x2b   :  { %v6210_v54 = vsel %vm283_vm1, %v5619_v49, %v282_v53 }
  0x2c   :  { %208 = vmatpush.bf16.msra.mxu0 %v5501_v15 }
  0x2f   :  { %209 = vmatmul.bf16.vlgmr.msra.gmra.mxu0 %v89_v20 }
  0x30   :  { %4985 = vmatmul.msk.bf16.gmra.mxu1 %vm191_vm0, %v92_v21 }
  0x3f   :  { %214 = vmatmul.bf16.gmra.mxu0 %v91_v24 }
  0x40   :  { %4986 = vmatmul.msk.bf16.gmra.mxu1 %vm191_vm0, %v94_v62 }
  0x4f   :  { %219 = vmatmul.bf16.gmra.mxu0 %v93_v60 }
  0x9d   :  { %v234_v25 = vpop.f32.mrf.mxu1 }
  0xa5   :  { %v236_v30 = vpop.f32.mrf.mxu1 }
  0xac   :  { %v210_v26 = vpop.f32.mrf.mxu0 }
  0xad   :  { %v235_v28 = vadd.f32 %v234_v25, %v210_v26  ;;  %v239_v36 = vpop.f32.mrf.mxu1 }
  0xaf   :  { %v252_v29 = vadd.f32 %v249_v27, %v235_v28 }
  0xb1   :  { %v260_v31 = vsel %vm191_vm0, %v252_v29, 0.0 }
  0xb2   :  { %261 = vadd.xlane.f32.xlu0 %v260_v31 }
  0xb4   :  { %v212_v32 = vpop.f32.mrf.mxu0 }
  0xb5   :  { %v237_v34 = vadd.f32 %v236_v30, %v212_v32  ;;  %v241_v43 = vpop.f32.mrf.mxu1 }
  0xb7   :  { %v253_v35 = vadd.f32 %v6198_v33, %v237_v34 }
  0xb9   :  { %v263_v37 = vsel %vm191_vm0, %v253_v35, 0.0 }
  0xba   :  { %264 = vadd.xlane.f32.xlu0 %v263_v37 }
  0xbc   :  { %v215_v38 = vpop.f32.mrf.mxu0 }
  0xbd   :  { %v240_v40 = vadd.f32 %v239_v36, %v215_v38 }
  0xbf   :  { %v254_v41 = vadd.f32 %v6205_v39, %v240_v40  ;;  %v6256_v40 = vld [vmem:[%s8115_s24] ss:$0 sm:$0xff]  ;;  %s8099_s24 = smov 96  }
  0xc1   :  { %v266_v42 = vsel %vm191_vm0, %v254_v41, 0.0 }
  0xc2   :  { %267 = vadd.xlane.f32.xlu1 %v266_v42 }
  0xc4   :  { %v217_v44 = vpop.f32.mrf.mxu0 }
  0xc5   :  { %v242_v45 = vadd.f32 %v241_v43, %v217_v44 }
  0xc7   :  { %v255_v46 = vadd.f32 %v249_v27, %v242_v45 }
  0xc9   :  { %v269_v47 = vsel %vm191_vm0, %v255_v46, 0.0 }
  0xca   :  { %270 = vadd.xlane.f32.xlu1 %v269_v47 }
 0x125   :  { %v262_v55 = vpop.xlane.xlu0 %261 }
 0x126   :  { %v285_v59 = vmul.f32 %v6210_v54, %v262_v55 }
 0x128   :  { %v291_v63 = vsub.f32 %v252_v29, %v285_v59 }
 0x12a   :  { %v297_v0 = vmul.f32 %v291_v63, %v291_v63 }
 0x12c   :  { %v303_v1 = vsel %vm191_vm0, %v297_v0, 0.0 }
 0x12d   :  { %304 = vadd.xlane.f32.xlu2 %v303_v1  ;;  %v265_v2 = vpop.xlane.xlu0 %264 }
 0x12e   :  { %v286_v3 = vmul.f32 %v6210_v54, %v265_v2 }
 0x130   :  { %v6228_v4 = vsub.f32 %v253_v35, %v286_v3  ;;  %v6251_v35 = vld [vmem:[%s8114_s0] ss:$0 sm:$0xff]  ;;  %s5998_s0 = smov 48  }
 0x132   :  { %v298_v5 = vmul.f32 %v6228_v4, %v6228_v4 }
 0x134   :  { %v306_v6 = vsel %vm191_vm0, %v298_v5, 0.0 }
 0x135   :  { %307 = vadd.xlane.f32.xlu2 %v306_v6  ;;  %v268_v7 = vpop.xlane.xlu1 %267 }
 0x136   :  { %v287_v8 = vmul.f32 %v6210_v54, %v268_v7 }
 0x138   :  { %v6234_v9 = vsub.f32 %v254_v41, %v287_v8 }
 0x13a   :  { %v299_v10 = vmul.f32 %v6234_v9, %v6234_v9 }
 0x13c   :  { %v309_v11 = vsel %vm191_vm0, %v299_v10, 0.0 }
 0x13d   :  { %310 = vadd.xlane.f32.xlu0 %v309_v11  ;;  %v271_v12 = vpop.xlane.xlu1 %270 }
 0x13e   :  { %v288_v13 = vmul.f32 %v6210_v54, %v271_v12  ;;  %v220_v12 = vpop.f32.mrf.mxu0 }
 0x140   :  { %v6240_v14 = vsub.f32 %v255_v46, %v288_v13 }
 0x142   :  { %v300_v15 = vmul.f32 %v6240_v14, %v6240_v14 }
 0x144   :  { %v312_v16 = vsel %vm191_vm0, %v300_v15, 0.0 }
 0x145   :  { %313 = vadd.xlane.f32.xlu1 %v312_v16 }
 0x1a0   :  { %v305_v17 = vpop.xlane.xlu2 %304 }
 0x1a1   :  { %v321_v18 = vmul.f32 %v305_v17, %v6210_v54 }
 0x1a3   :  { %v327_v19 = vadd.f32 1e-05, %v321_v18 }
 0x1a5   :  { %5620 = vrsqrt.f32 %v327_v19  ;;  %vm339_vm3 = vweird.f32 %v327_v19 }
 0x1a8   :  { %v308_v20 = vpop.xlane.xlu2 %307 }
 0x1a9   :  { %v322_v21 = vmul.f32 %v308_v20, %v6210_v54 }
 0x1ab   :  { %v5621_v22 = vpop.eup %5620  ;;  %v328_v23 = vadd.f32 1e-05, %v322_v21 }
 0x1ac   :  { %v334_v24 = vmul.f32 %v5621_v22, %v327_v19  ;;  %vm340_vm2 = vweird.f32 %v5621_v22 }
 0x1ad   :  { %5622 = vrsqrt.f32 %v328_v23  ;;  %vm341_vm4 = vmor %vm339_vm3, %vm340_vm2  ;;  %vm349_vm6 = vweird.f32 %v328_v23 }
 0x1ae   :  { %v335_v25 = vmul.f32 %v5621_v22, %v334_v24 }
 0x1b0   :  { %v336_v26 = vmul.f32 0.5, %v335_v25  ;;  %v311_v27 = vpop.xlane.xlu0 %310 }
 0x1b1   :  { %v323_v28 = vmul.f32 %v311_v27, %v6210_v54 }
 0x1b2   :  { %v337_v29 = vsub.f32 1.5, %v336_v26 }
 0x1b3   :  { %v5623_v30 = vpop.eup %5622  ;;  %v329_v31 = vadd.f32 1e-05, %v323_v28 }
 0x1b4   :  { %v338_v32 = vmul.f32 %v5621_v22, %v337_v29  ;;  %v344_v34 = vmul.f32 %v5623_v30, %v328_v23  ;;  %vm350_vm5 = vweird.f32 %v5623_v30 }
 0x1b5   :  { %5624 = vrsqrt.f32 %v329_v31  ;;  %vm351_vm7 = vmor %vm349_vm6, %vm350_vm5  ;;  %vm359_vm9 = vweird.f32 %v329_v31 }
 0x1b6   :  { %v345_v36 = vmul.f32 %v5623_v30, %v344_v34  ;;  %v342_v37 = vsel %vm341_vm4, %v5621_v22, %v338_v32  ;;  %v222_v22 = vpop.f32.mrf.mxu0 }
 0x1b7   :  { %v393_v38 = vmul.f32 %v342_v37, %v291_v63 }
 0x1b8   :  { %v346_v41 = vmul.f32 0.5, %v345_v36  ;;  %v314_v42 = vpop.xlane.xlu1 %313 }
 0x1b9   :  { %v324_v43 = vmul.f32 %v314_v42, %v6210_v54  ;;  %v402_v44 = vmul.f32 %v6251_v35, %v393_v38 }
 0x1ba   :  { %v347_v45 = vsub.f32 1.5, %v346_v41 }
 0x1bb   :  { %v5625_v46 = vpop.eup %5624  ;;  %v330_v47 = vadd.f32 1e-05, %v324_v43  ;;  %v6261_v48 = vadd.f32 %v6256_v40, %v402_v44 }
 0x1bc   :  { %v348_v49 = vmul.f32 %v5623_v30, %v347_v45  ;;  %v354_v50 = vmul.f32 %v5625_v46, %v329_v31  ;;  %vm360_vm8 = vweird.f32 %v5625_v46 }
 0x1bd   :  { %5626 = vrsqrt.f32 %v330_v47  ;;  %v423_v51 = vsel %vm191_vm0, %v6261_v48, 0.0  ;;  %vm361_vm10 = vmor %vm359_vm9, %vm360_vm8  ;;  %vm369_vm12 = vweird.f32 %v330_v47 }
 0x1be   :  { %v355_v52 = vmul.f32 %v5625_v46, %v354_v50  ;;  %424 = vadd.xlane.f32.xlu2 %v423_v51  ;;  %v352_v53 = vsel %vm351_vm7, %v5623_v30, %v348_v49 }
 0x1bf   :  { %v394_v55 = vmul.f32 %v352_v53, %v6228_v4  ;;  %v5520_v53 = vld [vmem:[%s8116_s2 + $0x34] sm:$0xf0] }
 0x1c0   :  { %v356_v56 = vmul.f32 0.5, %v355_v52  ;;  %v5013_v52 = vld [vmem:[%s8116_s2 + $0x30] sm:$0xf] }
 0x1c1   :  { %v403_v57 = vmul.f32 %v6251_v35, %v394_v55  ;;  %v5519_v55 = vld [vmem:[%s8116_s2 + $0x34] sm:$0xf] }
 0x1c2   :  { %v357_v58 = vsub.f32 1.5, %v356_v56  ;;  %v5014_v56 = vor.u32 %v5520_v53, %v5013_v52 }
 0x1c3   :  { %v5627_v59 = vpop.eup %5626  ;;  %v6268_v60 = vadd.f32 %v6256_v40, %v403_v57  ;;  %v5015_v57 = vld [vmem:[%s8116_s2 + $0x38] sm:$0xf0] }
 0x1c4   :  { %v358_v61 = vmul.f32 %v5625_v46, %v357_v58  ;;  %v364_v62 = vmul.f32 %v5627_v59, %v330_v47  ;;  %vm370_vm11 = vweird.f32 %v5627_v59  ;;  %v5018_v58 = vor.u32 %v5519_v55, %v5015_v57  ;;  %643 = vmatpush.bf16.msra.mxu2 %v5014_v56  ;;  %v6390_v56 = vld [vmem:[%s8117_s7] ss:$0 sm:$0xff] }
 0x1c5   :  { %v426_v63 = vsel %vm191_vm0, %v6268_v60, 0.0  ;;  %vm371_vm13 = vmor %vm369_vm12, %vm370_vm11 }
 0x1c6   :  { %v365_v0 = vmul.f32 %v5627_v59, %v364_v62  ;;  %427 = vadd.xlane.f32.xlu0 %v426_v63  ;;  %v362_v1 = vsel %vm361_vm10, %v5625_v46, %v358_v61  ;;  %667 = vmatpush.bf16.msra.mxu3 %v5018_v58  ;;  %v5518_v61 = vld [vmem:[%s8116_s2 + $0x24] sm:$0xf0]  ;;  %v5517_v62 = vld [vmem:[%s8116_s2 + $0x24] sm:$0xf] }
 0x1c7   :  { %v395_v2 = vmul.f32 %v362_v1, %v6234_v9  ;;  %v244_v9 = vpop.f32.mrf.mxu1 }
 0x1c8   :  { %v366_v3 = vmul.f32 0.5, %v365_v0  ;;  %v245_v16 = vadd.f32 %v244_v9, %v220_v12  ;;  %v5007_v0 = vld [vmem:[%s8116_s2 + $0x28] sm:$0xf0]  ;;  %v4989_v12 = vld [vmem:[%s8116_s2] sm:$0xf] }
 0x1c9   :  { %v404_v4 = vmul.f32 %v6251_v35, %v395_v2  ;;  %v5010_v1 = vor.u32 %v5517_v62, %v5007_v0  ;;  %v4997_v2 = vld [vmem:[%s8116_s2 + $0x10] sm:$0xf]  ;;  %v5514_v9 = vld [vmem:[%s8116_s2 + $0x4] sm:$0xf0] }
 0x1ca   :  { %v367_v5 = vsub.f32 1.5, %v366_v3  ;;  %v256_v18 = vadd.f32 %v6198_v33, %v245_v16  ;;  %v5516_v3 = vld [vmem:[%s8116_s2 + $0x14] sm:$0xf0]  ;;  %v4990_v16 = vor.u32 %v5514_v9, %v4989_v12 }
 0x1cb   :  { %v6275_v6 = vadd.f32 %v6256_v40, %v404_v4  ;;  %668 = vmatpush.bf16.msra.mxu3 %v5010_v1  ;;  %v5515_v4 = vld [vmem:[%s8116_s2 + $0x14] sm:$0xf] }
 0x1cc   :  { %v368_v7 = vmul.f32 %v5627_v59, %v367_v5  ;;  %v272_v19 = vsel %vm191_vm0, %v256_v18, 0.0  ;;  %v4998_v5 = vor.u32 %v5516_v3, %v4997_v2 }
 0x1cd   :  { %v429_v8 = vsel %vm191_vm0, %v6275_v6, 0.0 }
 0x1ce   :  { %430 = vadd.xlane.f32.xlu1 %v429_v8  ;;  %v372_v10 = vsel %vm371_vm13, %v5627_v59, %v368_v7  ;;  %v5005_v59 = vld [vmem:[%s8116_s2 + $0x20] sm:$0xf]  ;;  %v4999_v7 = vld [vmem:[%s8116_s2 + $0x18] sm:$0xf0] }
 0x1cf   :  { %v396_v11 = vmul.f32 %v372_v10, %v6240_v14  ;;  %v246_v23 = vpop.f32.mrf.mxu1  ;;  %v5006_v63 = vor.u32 %v5518_v61, %v5005_v59  ;;  %v5002_v8 = vor.u32 %v5515_v4, %v4999_v7 }
 0x1d0   :  { %v247_v25 = vadd.f32 %v246_v23, %v222_v22 }
 0x1d1   :  { %v405_v13 = vmul.f32 %v6251_v35, %v396_v11  ;;  %644 = vmatpush.bf16.msra.mxu2 %v5006_v63  ;;  %669 = vmatpush.bf16.msra.mxu3 %v5002_v8 }
 0x1d2   :  { %v6300_v29 = vadd.f32 %v6205_v39, %v247_v25 }
 0x1d3   :  { %v6282_v15 = vadd.f32 %v6256_v40, %v405_v13  ;;  %v5513_v13 = vld [vmem:[%s8116_s2 + $0x4] sm:$0xf] }
 0x1d4   :  { %v275_v32 = vsel %vm191_vm0, %v6300_v29, 0.0 }
 0x1d5   :  { %v432_v17 = vsel %vm191_vm0, %v6282_v15, 0.0  ;;  %645 = vmatpush.bf16.msra.mxu2 %v4998_v5 }
 0x1d6   :  { %433 = vadd.xlane.f32.xlu2 %v432_v17  ;;  %v4991_v17 = vld [vmem:[%s8116_s2 + $0x8] sm:$0xf0] }
 0x1d9   :  { %646 = vmatpush.bf16.msra.mxu2 %v4990_v16 }
 0x1de   :  { %273 = vadd.xlane.f32.xlu2 %v272_v19  ;;  %v4994_v19 = vor.u32 %v5513_v13, %v4991_v17 }
 0x1e0   :  { %670 = vmatpush.bf16.msra.mxu3 %v4994_v19 }
 0x231   :  { %v425_v20 = vpop.xlane.xlu2 %424 }
 0x232   :  { %v441_v14 = vmul.f32 %v425_v20, %v6210_v54 }
 0x234   :  { %v6290_v21 = vsub.f32 %v6261_v48, %v441_v14 }
 0x236   :  { %v453_v24 = vmul.f32 %v6290_v21, %v6290_v21 }
 0x238   :  { %v459_v26 = vsel %vm191_vm0, %v453_v24, 0.0 }
 0x239   :  { %460 = vadd.xlane.f32.xlu0 %v459_v26  ;;  %v428_v27 = vpop.xlane.xlu0 %427 }
 0x23a   :  { %v442_v33 = vmul.f32 %v428_v27, %v6210_v54 }
 0x23c   :  { %v6297_v28 = vsub.f32 %v6268_v60, %v442_v33 }
 0x23e   :  { %v454_v30 = vmul.f32 %v6297_v28, %v6297_v28 }
 0x240   :  { %v462_v31 = vsel %vm191_vm0, %v454_v30, 0.0 }
 0x241   :  { %463 = vadd.xlane.f32.xlu1 %v462_v31  ;;  %v431_v34 = vpop.xlane.xlu1 %430  ;;  %276 = vadd.xlane.f32.xlu0 %v275_v32 }
 0x242   :  { %v443_v36 = vmul.f32 %v431_v34, %v6210_v54 }
 0x244   :  { %v6309_v37 = vsub.f32 %v6275_v6, %v443_v36 }
 0x246   :  { %v455_v39 = vmul.f32 %v6309_v37, %v6309_v37 }
 0x248   :  { %v465_v38 = vsel %vm191_vm0, %v455_v39, 0.0 }
 0x249   :  { %v434_v41 = vpop.xlane.xlu2 %433  ;;  %466 = vadd.xlane.f32.xlu1 %v465_v38 }
 0x24a   :  { %v444_v42 = vmul.f32 %v434_v41, %v6210_v54 }
 0x24c   :  { %v6316_v43 = vsub.f32 %v6282_v15, %v444_v42 }
 0x24e   :  { %v456_v44 = vmul.f32 %v6316_v43, %v6316_v43 }
 0x250   :  { %v468_v45 = vsel %vm191_vm0, %v456_v44, 0.0 }
 0x251   :  { %469 = vadd.xlane.f32.xlu2 %v468_v45  ;;  %v274_v46 = vpop.xlane.xlu2 %273 }
 0x252   :  { %v289_v47 = vmul.f32 %v6210_v54, %v274_v46 }
 0x254   :  { %v6322_v49 = vsub.f32 %v256_v18, %v289_v47 }
 0x256   :  { %v301_v50 = vmul.f32 %v6322_v49, %v6322_v49 }
 0x258   :  { %v315_v51 = vsel %vm191_vm0, %v301_v50, 0.0 }
 0x259   :  { %316 = vadd.xlane.f32.xlu0 %v315_v51 }
 0x2ac   :  { %v461_v10 = vpop.xlane.xlu0 %460 }
 0x2ad   :  { %v477_v11 = vmul.f32 %v461_v10, %v6210_v54 }
 0x2af   :  { %v483_v18 = vadd.f32 1e-05, %v477_v11 }
 0x2b1   :  { %5628 = vrsqrt.f32 %v483_v18  ;;  %vm495_vm15 = vweird.f32 %v483_v18 }
 0x2b4   :  { %v464_v20 = vpop.xlane.xlu1 %463  ;;  %v277_v14 = vpop.xlane.xlu0 %276 }
 0x2b5   :  { %v478_v22 = vmul.f32 %v464_v20, %v6210_v54  ;;  %v290_v23 = vmul.f32 %v6210_v54, %v277_v14 }
 0x2b7   :  { %v5629_v24 = vpop.eup %5628  ;;  %v484_v25 = vadd.f32 1e-05, %v478_v22  ;;  %v6379_v26 = vsub.f32 %v6300_v29, %v290_v23 }
 0x2b8   :  { %v490_v27 = vmul.f32 %v5629_v24, %v483_v18  ;;  %vm496_vm14 = vweird.f32 %v5629_v24 }
 0x2b9   :  { %5630 = vrsqrt.f32 %v484_v25  ;;  %v302_v33 = vmul.f32 %v6379_v26, %v6379_v26  ;;  %vm497_vm1 = vmor %vm495_vm15, %vm496_vm14  ;;  %vm505_vm3 = vweird.f32 %v484_v25 }
 0x2ba   :  { %v491_v30 = vmul.f32 %v5629_v24, %v490_v27 }
 0x2bb   :  { %v318_v31 = vsel %vm191_vm0, %v302_v33, 0.0 }
 0x2bc   :  { %v492_v32 = vmul.f32 0.5, %v491_v30  ;;  %v467_v34 = vpop.xlane.xlu1 %466  ;;  %319 = vadd.xlane.f32.xlu1 %v318_v31 }
 0x2bd   :  { %v479_v36 = vmul.f32 %v467_v34, %v6210_v54 }
 0x2be   :  { %v493_v39 = vsub.f32 1.5, %v492_v32 }
 0x2bf   :  { %v5631_v38 = vpop.eup %5630  ;;  %v485_v41 = vadd.f32 1e-05, %v479_v36 }
 0x2c0   :  { %v494_v42 = vmul.f32 %v5629_v24, %v493_v39  ;;  %v500_v29 = vmul.f32 %v5631_v38, %v484_v25  ;;  %vm506_vm2 = vweird.f32 %v5631_v38 }
 0x2c1   :  { %5632 = vrsqrt.f32 %v485_v41  ;;  %vm507_vm4 = vmor %vm505_vm3, %vm506_vm2  ;;  %vm515_vm6 = vweird.f32 %v485_v41  ;;  %vm900_vm2 = vcmask 1043456   ;;  %vm719_vm3 = vcmask 130048  }
 0x2c2   :  { %v501_v44 = vmul.f32 %v5631_v38, %v500_v29  ;;  %v498_v45 = vsel %vm497_vm1, %v5629_v24, %v494_v42 }
 0x2c3   :  { %v549_v55 = vmul.f32 %v498_v45, %v6290_v21  ;;  %v6397_v21 = vld [vmem:[%s8118_s28] ss:$0 sm:$0xff] }
 0x2c4   :  { %v502_v46 = vmul.f32 0.5, %v501_v44  ;;  %v470_v47 = vpop.xlane.xlu2 %469 }
 0x2c5   :  { %v480_v50 = vmul.f32 %v470_v47, %v6210_v54  ;;  %v558_v63 = vmul.f32 %v6390_v56, %v549_v55 }
 0x2c6   :  { %v503_v51 = vsub.f32 1.5, %v502_v46 }
 0x2c7   :  { %v5633_v52 = vpop.eup %5632  ;;  %v486_v53 = vadd.f32 1e-05, %v480_v50  ;;  %v567_v8 = vadd.f32 %v6397_v21, %v558_v63 }
 0x2c8   :  { %v504_v57 = vmul.f32 %v5631_v38, %v503_v51  ;;  %v510_v58 = vmul.f32 %v5633_v52, %v485_v41  ;;  %vm516_vm5 = vweird.f32 %v5633_v52 }
 0x2c9   :  { %5634 = vrsqrt.f32 %v486_v53  ;;  %vm517_vm7 = vmor %vm515_vm6, %vm516_vm5  ;;  %vm525_vm9 = vweird.f32 %v486_v53 }
 0x2ca   :  { %v508_v59 = vsel %vm507_vm4, %v5631_v38, %v504_v57  ;;  %v511_v61 = vmul.f32 %v5633_v52, %v510_v58 }
 0x2cb   :  { %v550_v62 = vmul.f32 %v508_v59, %v6297_v28 }
 0x2cc   :  { %v512_v0 = vmul.f32 0.5, %v511_v61  ;;  %v317_v1 = vpop.xlane.xlu0 %316 }
 0x2cd   :  { %v325_v2 = vmul.f32 %v317_v1, %v6210_v54  ;;  %v559_v3 = vmul.f32 %v6390_v56, %v550_v62 }
 0x2ce   :  { %v513_v4 = vsub.f32 1.5, %v512_v0 }
 0x2cf   :  { %v5635_v5 = vpop.eup %5634  ;;  %v331_v7 = vadd.f32 1e-05, %v325_v2  ;;  %v568_v28 = vadd.f32 %v6397_v21, %v559_v3 }
 0x2d0   :  { %v514_v10 = vmul.f32 %v5633_v52, %v513_v4  ;;  %v520_v11 = vmul.f32 %v5635_v5, %v486_v53  ;;  %vm526_vm8 = vweird.f32 %v5635_v5 }
 0x2d1   :  { %5636 = vrsqrt.f32 %v331_v7  ;;  %v573_v12 = vpack.c.bf16 %v568_v28, %v567_v8  ;;  %vm527_vm10 = vmor %vm525_vm9, %vm526_vm8  ;;  %vm379_vm12 = vweird.f32 %v331_v7 }
 0x2d2   :  { %v521_v9 = vmul.f32 %v5635_v5, %v520_v11  ;;  %v518_v13 = vsel %vm517_vm7, %v5633_v52, %v514_v10 }
 0x2d3   :  { %5019 = vmatmul.msk.bf16.vlgmr.msra.gmra.mxu2 %vm191_vm0, %v573_v12  ;;  %5022 = vmatmul.msk.bf16.vlgmr.msra.gmra.mxu3 %vm191_vm0, %v573_v12  ;;  %v551_v19 = vmul.f32 %v518_v13, %v6309_v37 }
 0x2d4   :  { %v522_v16 = vmul.f32 0.5, %v521_v9 }
 0x2d5   :  { %v560_v25 = vmul.f32 %v6390_v56, %v551_v19 }
 0x2d6   :  { %v523_v17 = vsub.f32 1.5, %v522_v16 }
 0x2d7   :  { %v5637_v18 = vpop.eup %5636  ;;  %v569_v31 = vadd.f32 %v6397_v21, %v560_v25 }
 0x2d8   :  { %v524_v20 = vmul.f32 %v5635_v5, %v523_v17  ;;  %v374_v14 = vmul.f32 %v5637_v18, %v331_v7  ;;  %vm380_vm11 = vweird.f32 %v5637_v18 }
 0x2d9   :  { %vm381_vm13 = vmor %vm379_vm12, %vm380_vm11  ;;  %vm804_vm11 = vcmask 195584  }
 0x2da   :  { %v528_v22 = vsel %vm527_vm10, %v5635_v5, %v524_v20  ;;  %v375_v23 = vmul.f32 %v5637_v18, %v374_v14 }
 0x2db   :  { %v552_v24 = vmul.f32 %v528_v22, %v6316_v43 }
 0x2dc   :  { %v376_v27 = vmul.f32 0.5, %v375_v23 }
 0x2dd   :  { %v561_v33 = vmul.f32 %v6390_v56, %v552_v24 }
 0x2de   :  { %v377_v30 = vsub.f32 1.5, %v376_v27 }
 0x2df   :  { %v570_v32 = vadd.f32 %v6397_v21, %v561_v33 }
 0x2e0   :  { %v378_v37 = vmul.f32 %v5637_v18, %v377_v30 }
 0x2e1   :  { %v574_v34 = vpack.c.bf16 %v570_v32, %v569_v31 }
 0x2e2   :  { %v382_v36 = vsel %vm381_vm13, %v5637_v18, %v378_v37 }
 0x2e3   :  { %5020 = vmatmul.msk.bf16.gmra.mxu2 %vm191_vm0, %v574_v34  ;;  %5023 = vmatmul.msk.bf16.gmra.mxu3 %vm191_vm0, %v574_v34  ;;  %v397_v43 = vmul.f32 %v382_v36, %v6322_v49 }
 0x2e5   :  { %v406_v39 = vmul.f32 %v6251_v35, %v397_v43 }
 0x2e7   :  { %v6416_v38 = vadd.f32 %v6256_v40, %v406_v39 }
 0x2e9   :  { %v435_v41 = vsel %vm191_vm0, %v6416_v38, 0.0 }
 0x2ea   :  { %436 = vadd.xlane.f32.xlu2 %v435_v41 }
 0x32f   :  { %v320_v42 = vpop.xlane.xlu1 %319 }
 0x330   :  { %v326_v29 = vmul.f32 %v320_v42, %v6210_v54 }
 0x332   :  { %v332_v44 = vadd.f32 1e-05, %v326_v29 }
 0x334   :  { %5638 = vrsqrt.f32 %v332_v44  ;;  %vm389_vm15 = vweird.f32 %v332_v44 }
 0x33a   :  { %v5639_v45 = vpop.eup %5638 }
 0x33b   :  { %v384_v46 = vmul.f32 %v5639_v45, %v332_v44  ;;  %vm390_vm14 = vweird.f32 %v5639_v45 }
 0x33c   :  { %vm391_vm1 = vmor %vm389_vm15, %vm390_vm14 }
 0x33d   :  { %v385_v47 = vmul.f32 %v5639_v45, %v384_v46 }
 0x33f   :  { %v386_v50 = vmul.f32 0.5, %v385_v47 }
 0x341   :  { %v387_v51 = vsub.f32 1.5, %v386_v50 }
 0x343   :  { %v388_v49 = vmul.f32 %v5639_v45, %v387_v51 }
 0x345   :  { %v392_v52 = vsel %vm391_vm1, %v5639_v45, %v388_v49 }
 0x346   :  { %v398_v53 = vmul.f32 %v392_v52, %v6379_v26 }
 0x348   :  { %v407_v55 = vmul.f32 %v6251_v35, %v398_v53  ;;  %v584_v35 = vld [vmem:[%s8073_s8] sm:$0x3] }
 0x349   :  { %v6437_v26 = vperm.slane %v584_v35, 1  ;;  %v6440_v4 = vperm.slane %v584_v35, 0 }
 0x34a   :  { %v6424_v57 = vadd.f32 %v6256_v40, %v407_v55 }
 0x34c   :  { %v438_v58 = vsel %vm191_vm0, %v6424_v57, 0.0 }
 0x34d   :  { %439 = vadd.xlane.f32.xlu0 %v438_v58 }
 0x356   :  { %v648_v59 = vpop.f32.mrf.mxu2  ;;  %v672_v61 = vpop.f32.mrf.mxu3 }
 0x357   :  { %v673_v11 = vadd.f32 %v672_v61, %v6437_v26  ;;  %v649_v17 = vadd.f32 %v648_v59, %v6440_v4 }
 0x359   :  { %v701_v20 = vpack.c.bf16 %v673_v11, %v673_v11  ;;  %v695_v25 = vpack.c.bf16 %v649_v17, %v649_v17 }
 0x35b   :  { %v888_v33 = vunpack.c.l.b16 %v701_v20  ;;  %v710_v32 = vunpack.c.l.b16 %v695_v25 }
 0x35d   :  { %v437_v62 = vpop.xlane.xlu2 %436 }
 0x35e   :  { %v445_v63 = vmul.f32 %v437_v62, %v6210_v54  ;;  %v650_v0 = vpop.f32.mrf.mxu2  ;;  %v674_v1 = vpop.f32.mrf.mxu3 }
 0x35f   :  { %v675_v5 = vadd.f32 %v674_v1, %v6437_v26  ;;  %v651_v12 = vadd.f32 %v650_v0, %v6440_v4 }
 0x360   :  { %v6430_v2 = vsub.f32 %v6416_v38, %v445_v63 }
 0x361   :  { %v702_v16 = vpack.c.bf16 %v675_v5, %v675_v5  ;;  %v696_v14 = vpack.c.bf16 %v651_v12, %v651_v12 }
 0x362   :  { %v457_v40 = vmul.f32 %v6430_v2, %v6430_v2 }
 0x363   :  { %v889_v24 = vunpack.c.l.b16 %v702_v16  ;;  %v711_v30 = vunpack.c.l.b16 %v696_v14  ;;  %v417_v14 = vlaneseq }
 0x364   :  { %v471_v3 = vsel %vm191_vm0, %v457_v40, 0.0 }
 0x365   :  { %472 = vadd.xlane.f32.xlu1 %v471_v3  ;;  %v6456_v31 = vpack.c.b16 %v889_v24, %v888_v33  ;;  %v6459_v37 = vpack.c.b16 %v711_v30, %v710_v32  ;;  %v418_v24 = vand.u32 127, %v417_v14 }
 0x366   :  { %v653_v7 = vpop.f32.mrf.mxu2  ;;  %v677_v8 = vpop.f32.mrf.mxu3 }
 0x367   :  { %v654_v28 = vadd.f32 %v653_v7, %v6440_v4  ;;  %v678_v10 = vadd.f32 %v677_v8, %v6437_v26  ;;  %vm419_vm10 = vcmp.lt.s32.totalorder %v418_v24, 17 }
 0x369   :  { %v697_v9 = vpack.c.bf16 %v654_v28, %v654_v28  ;;  %v703_v13 = vpack.c.bf16 %v678_v10, %v678_v10 }
 0x36b   :  { %v712_v18 = vunpack.c.l.b16 %v697_v9  ;;  %v890_v19 = vunpack.c.l.b16 %v703_v13 }
 0x36d   :  { %v6448_v22 = vpack.c.b16 %v712_v18, %v712_v18  ;;  %v6450_v23 = vpack.c.b16 %v890_v19, %v890_v19 }
 0x36f   :  { %717 = vrot.lane.b32.xlu0 %v6448_v22, %s5997_s3  ;;  %v902_v27 = vsel %vm900_vm2, %v6450_v23, 0 }
 0x370   :  { %910 = vmatpush.bf16.msrb.mxu3 %v902_v27  ;;  %v6000_v27 = vmov -1e+09  }
 0x371   :  { %v6493_v33 = vsel %vm419_vm10, 0.0, %v6000_v27 }
 0x374   :  { %911 = vmatpush.bf16.msrb.mxu3 %v6456_v31 }
 0x377   :  { %973 = vrot.lane.b32.xlu0 %v6459_v37, %s5998_s0 }
 0x37e   :  { %715 = vrot.lane.b32.xlu1 %v6459_v37, %s5997_s3 }
 0x386   :  { %971 = vrot.lane.b32.xlu1 %v6448_v22, %s5999_s4 }
 0x3c0   :  { %v440_v34 = vpop.xlane.xlu0 %439 }
 0x3c1   :  { %v446_v36 = vmul.f32 %v440_v34, %v6210_v54 }
 0x3c3   :  { %v452_v43 = vsub.f32 %v6424_v57, %v446_v36 }
 0x3c5   :  { %v458_v39 = vmul.f32 %v452_v43, %v452_v43 }
 0x3c7   :  { %v474_v41 = vsel %vm191_vm0, %v458_v39, 0.0 }
 0x3c8   :  { %475 = vadd.xlane.f32.xlu2 %v474_v41 }
 0x3d8   :  { %v473_v44 = vpop.xlane.xlu1 %472 }
 0x3d9   :  { %v481_v47 = vmul.f32 %v473_v44, %v6210_v54 }
 0x3db   :  { %v487_v50 = vadd.f32 1e-05, %v481_v47 }
 0x3dd   :  { %5640 = vrsqrt.f32 %v487_v50  ;;  %vm535_vm5 = vweird.f32 %v487_v50 }
 0x3e0   :  { %975 = vrot.lane.b32.xlu2 %v6448_v22, %s5998_s0 }
 0x3e1   :  { %v718_v42 = vpop.permute.xlu0 %717 }
 0x3e2   :  { %v730_v29 = vsel %vm719_vm3, %v718_v42, 0  ;;  %v655_v42 = vpop.f32.mrf.mxu2 }
 0x3e3   :  { %738 = vmatpush.bf16.xpose.msrb.mxu1 %v730_v29  ;;  %v5641_v51 = vpop.eup %5640  ;;  %v679_v29 = vpop.f32.mrf.mxu3 }
 0x3e4   :  { %v530_v49 = vmul.f32 %v5641_v51, %v487_v50  ;;  %vm536_vm4 = vweird.f32 %v5641_v51 }
 0x3e5   :  { %vm537_vm6 = vmor %vm535_vm5, %vm536_vm4 }
 0x3e6   :  { %v531_v52 = vmul.f32 %v5641_v51, %v530_v49 }
 0x3e8   :  { %969 = vrot.lane.b32.xlu2 %v6459_v37, %s5999_s4  ;;  %v532_v59 = vmul.f32 0.5, %v531_v52 }
 0x3e9   :  { %v974_v40 = vpop.permute.xlu0 %973 }
 0x3ea   :  { %v533_v61 = vsub.f32 1.5, %v532_v59  ;;  %v984_v8 = vsel %vm719_vm3, %v974_v40, 0 }
 0x3ec   :  { %v534_v1 = vmul.f32 %v5641_v51, %v533_v61 }
 0x3ee   :  { %v538_v5 = vsel %vm537_vm6, %v5641_v51, %v534_v1 }
 0x3ef   :  { %v553_v10 = vmul.f32 %v538_v5, %v6430_v2 }
 0x3f0   :  { %v716_v45 = vpop.permute.xlu1 %715 }
 0x3f1   :  { %v727_v46 = vsel %vm719_vm3, %v716_v45, 0  ;;  %v562_v13 = vmul.f32 %v6390_v56, %v553_v10 }
 0x3f2   :  { %739 = vmatpush.bf16.xpose.msrb.mxu1 %v727_v46  ;;  %v656_v46 = vadd.f32 %v655_v42, %v6440_v4 }
 0x3f3   :  { %v571_v18 = vadd.f32 %v6397_v21, %v562_v13 }
 0x3f4   :  { %v698_v51 = vpack.c.bf16 %v656_v46, %v656_v46 }
 0x3f8   :  { %v972_v2 = vpop.permute.xlu1 %971 }
 0x3f9   :  { %5025 = vmatmul.msk.bf16.vlgmr.msrb.gmra.mxu1 %vm719_vm3, %v6459_v37 }
 0x409   :  { %5026 = vmatmul.msk.bf16.gmra.mxu1 %vm719_vm3, %v6448_v22 }
 0x43b   :  { %v476_v53 = vpop.xlane.xlu2 %475 }
 0x43c   :  { %v482_v55 = vmul.f32 %v476_v53, %v6210_v54 }
 0x43e   :  { %v488_v58 = vadd.f32 1e-05, %v482_v55  ;;  %v753_v55 = vunpack.c.l.b16 %v698_v51 }
 0x440   :  { %5642 = vrsqrt.f32 %v488_v58  ;;  %vm545_vm8 = vweird.f32 %v488_v58 }
 0x443   :  { %v976_v62 = vpop.permute.xlu2 %975 }
 0x444   :  { %v987_v63 = vsel %vm719_vm3, %v976_v62, 0 }
 0x445   :  { %995 = vmatpush.bf16.xpose.msra.mxu1 %v987_v63 }
 0x446   :  { %v5643_v0 = vpop.eup %5642 }
 0x447   :  { %v540_v35 = vmul.f32 %v5643_v0, %v488_v58  ;;  %vm546_vm7 = vweird.f32 %v5643_v0 }
 0x448   :  { %vm547_vm9 = vmor %vm545_vm8, %vm546_vm7 }
 0x449   :  { %v541_v3 = vmul.f32 %v5643_v0, %v540_v35  ;;  %v680_v35 = vadd.f32 %v679_v29, %v6437_v26 }
 0x44b   :  { %v542_v7 = vmul.f32 0.5, %v541_v3  ;;  %v970_v16 = vpop.permute.xlu2 %969  ;;  %v704_v10 = vpack.c.bf16 %v680_v35, %v680_v35 }
 0x44d   :  { %v543_v28 = vsub.f32 1.5, %v542_v7  ;;  %996 = vmatpush.bf16.xpose.msra.mxu1 %v984_v8  ;;  %v933_v13 = vunpack.c.l.b16 %v704_v10 }
 0x44f   :  { %v544_v11 = vmul.f32 %v5643_v0, %v543_v28 }
 0x451   :  { %v548_v12 = vsel %vm547_vm9, %v5643_v0, %v544_v11 }
 0x452   :  { %v554_v9 = vmul.f32 %v548_v12, %v452_v43 }
 0x454   :  { %5033 = vmatmul.msk.bf16.vlgmr.msra.gmra.mxu1 %vm719_vm3, %v970_v16  ;;  %v563_v17 = vmul.f32 %v6390_v56, %v554_v9 }
 0x456   :  { %v572_v19 = vadd.f32 %v6397_v21, %v563_v17 }
 0x458   :  { %v575_v20 = vpack.c.bf16 %v572_v19, %v571_v18 }
 0x45a   :  { %5021 = vmatmul.msk.bf16.gmra.mxu2 %vm191_vm0, %v575_v20  ;;  %5024 = vmatmul.msk.bf16.gmra.mxu3 %vm191_vm0, %v575_v20 }
 0x464   :  { %5034 = vmatmul.msk.bf16.gmra.mxu1 %vm719_vm3, %v972_v2 }
 0x476   :  { %v741_v25 = vpop.f32.mrf.mxu1 }
 0x477   :  { %v792_v56 = vmul.f32 0.25, %v741_v25 }
 0x479   :  { %v798_v30 = vadd.f32 %v792_v56, %v6493_v33 }
 0x47b   :  { %v805_v21 = vsel %vm804_vm11, %v798_v30, -inf }
 0x47c   :  { %806 = vmax.xlane.f32.xlu1 %v805_v21 }
 0x47e   :  { %v743_v32 = vpop.f32.mrf.mxu1 }
 0x47f   :  { %v793_v27 = vmul.f32 0.25, %v743_v32 }
 0x486   :  { %v746_v34 = vpop.f32.mrf.mxu1 }
 0x487   :  { %v794_v2 = vmul.f32 0.25, %v746_v34 }
 0x489   :  { %v800_v14 = vadd.f32 %v794_v2, %v6493_v33 }
 0x48b   :  { %v811_v25 = vsel %vm804_vm11, %v800_v14, -inf }
 0x48e   :  { %v748_v36 = vpop.f32.mrf.mxu1 }
 0x4d1   :  { %v998_v43 = vpop.f32.mrf.mxu1 }
 0x4d2   :  { %v1045_v39 = vmul.f32 0.25, %v998_v43 }
 0x4d4   :  { %v6498_v41 = vadd.f32 %v1045_v39, %v6493_v33 }
 0x4d6   :  { %v1057_v44 = vsel %vm804_vm11, %v6498_v41, -inf }
 0x4d7   :  { %1058 = vmax.xlane.f32.xlu1 %v1057_v44 }
 0x4d9   :  { %v1000_v45 = vpop.f32.mrf.mxu1 }
 0x4da   :  { %v1046_v36 = vmul.f32 0.25, %v1000_v45 }
 0x4dc   :  { %v1052_v43 = vadd.f32 %v1046_v36, %v6493_v33 }
 0x4dd   :  { %v658_v47 = vpop.f32.mrf.mxu2  ;;  %v682_v50 = vpop.f32.mrf.mxu3 }
 0x4de   :  { %v659_v49 = vadd.f32 %v658_v47, %v6440_v4  ;;  %v683_v61 = vadd.f32 %v682_v50, %v6437_v26  ;;  %v1060_v32 = vsel %vm804_vm11, %v1052_v43, -inf }
 0x4e0   :  { %v699_v52 = vpack.c.bf16 %v659_v49, %v659_v49  ;;  %v705_v5 = vpack.c.bf16 %v683_v61, %v683_v61 }
 0x4e1   :  { %v1003_v53 = vpop.f32.mrf.mxu1 }
 0x4e2   :  { %v754_v58 = vunpack.c.l.b16 %v699_v52  ;;  %v934_v9 = vunpack.c.l.b16 %v705_v5  ;;  %v1047_v24 = vmul.f32 0.25, %v1003_v53 }
 0x4e4   :  { %v6504_v59 = vpack.c.b16 %v754_v58, %v753_v55  ;;  %v6520_v17 = vpack.c.b16 %v934_v9, %v933_v13  ;;  %v6530_v56 = vadd.f32 %v1047_v24, %v6493_v33 }
 0x4e5   :  { %v660_v62 = vpop.f32.mrf.mxu2  ;;  %v684_v63 = vpop.f32.mrf.mxu3 }
 0x4e6   :  { %v661_v0 = vadd.f32 %v660_v62, %v6440_v4  ;;  %v685_v1 = vadd.f32 %v684_v63, %v6437_v26  ;;  %758 = vrot.lane.b32.xlu2 %v6504_v59, %s5997_s3  ;;  %v1063_v21 = vsel %vm804_vm11, %v6530_v56, -inf }
 0x4e8   :  { %v700_v40 = vpack.c.bf16 %v661_v0, %v661_v0  ;;  %v706_v3 = vpack.c.bf16 %v685_v1, %v685_v1 }
 0x4e9   :  { %v1005_v7 = vpop.f32.mrf.mxu1 }
 0x4ea   :  { %v755_v8 = vunpack.c.l.b16 %v700_v40  ;;  %v935_v28 = vunpack.c.l.b16 %v706_v3 }
 0x4ec   :  { %v6512_v11 = vpack.c.b16 %v755_v8, %v755_v8  ;;  %v6514_v12 = vpack.c.b16 %v935_v28, %v935_v28 }
 0x4ee   :  { %760 = vrot.lane.b32.xlu0 %v6512_v11, %s5997_s3  ;;  %v946_v4 = vsel %vm900_vm2, %v6514_v12, 0 }
 0x4ef   :  { %954 = vmatpush.bf16.msrb.mxu0 %v946_v4  ;;  %v807_v26 = vpop.xlane.xlu1 %806 }
 0x4f0   :  { %v823_v16 = vsub.f32 %v798_v30, %v807_v26  ;;  %v799_v30 = vadd.f32 %v793_v27, %v6493_v33 }
 0x4f2   :  { %v829_v18 = vmul.f32 1.442695, %v823_v16  ;;  %v808_v34 = vsel %vm804_vm11, %v799_v30, -inf }
 0x4f3   :  { %955 = vmatpush.bf16.msrb.mxu0 %v6520_v17 }
 0x4f4   :  { %5644 = vpow2.f32 %v829_v18 }
 0x4fa   :  { %v6523_v19 = vpop.eup %5644 }
 0x4fb   :  { %v841_v20 = vsel %vm804_vm11, %v6523_v19, 0.0 }
 0x4fc   :  { %842 = vadd.xlane.f32.xlu1 %v841_v20 }
 0x50f   :  { %812 = vmax.xlane.f32.xlu2 %v811_v25 }
 0x515   :  { %1013 = vrot.lane.b32.xlu1 %v6512_v11, %s5998_s0 }
 0x517   :  { %1064 = vmax.xlane.f32.xlu2 %v1063_v21 }
 0x518   :  { %809 = vmax.xlane.f32.xlu0 %v808_v34 }
 0x51d   :  { %1137 = vrot.lane.b32.xlu1 %v6456_v31, %s5999_s4 }
 0x520   :  { %1061 = vmax.xlane.f32.xlu0 %v1060_v32 }
 0x525   :  { %1009 = vrot.lane.b32.xlu1 %v6512_v11, %s5999_s4 }
 0x52d   :  { %1296 = vrot.lane.b32.xlu1 %v6448_v22, %s8101_s30 }
 0x52f   :  { %1007 = vrot.lane.b32.xlu2 %v6504_v59, %s5999_s4 }
 0x534   :  { %1011 = vrot.lane.b32.xlu0 %v6504_v59, %s5998_s0 }
 0x535   :  { %1290 = vrot.lane.b32.xlu1 %v6459_v37, %s8099_s24 }
 0x540   :  { %v759_v29 = vpop.permute.xlu2 %758 }
 0x541   :  { %v769_v44 = vsel %vm719_vm3, %v759_v29, 0 }
 0x54a   :  { %v1059_v45 = vpop.xlane.xlu1 %1058 }
 0x54b   :  { %v1075_v51 = vsub.f32 %v6498_v41, %v1059_v45 }
 0x54d   :  { %v1081_v55 = vmul.f32 1.442695, %v1075_v51 }
 0x560   :  { %v761_v39 = vpop.permute.xlu0 %760 }
 0x561   :  { %v772_v42 = vsel %vm719_vm3, %v761_v39, 0 }
 0x562   :  { %780 = vmatpush.bf16.xpose.msrb.mxu2 %v772_v42 }
 0x56a   :  { %781 = vmatpush.bf16.xpose.msrb.mxu2 %v769_v44 }
 0x56f   :  { %v843_v46 = vpop.xlane.xlu1 %842 }
 0x571   :  { %5027 = vmatmul.msk.bf16.vlgmr.msrb.gmra.mxu2 %vm719_vm3, %v6504_v59 }
 0x581   :  { %5028 = vmatmul.msk.bf16.gmra.mxu2 %vm719_vm3, %v6512_v11 }
 0x582   :  { %v813_v47 = vpop.xlane.xlu2 %812 }
 0x583   :  { %v825_v50 = vsub.f32 %v800_v14, %v813_v47 }
 0x585   :  { %v833_v49 = vmul.f32 1.442695, %v825_v50 }
 0x587   :  { %5646 = vpow2.f32 %v833_v49  ;;  %v1014_v52 = vpop.permute.xlu1 %1013 }
 0x588   :  { %v1025_v53 = vsel %vm719_vm3, %v1014_v52, 0  ;;  %5648 = vpow2.f32 %v1081_v55 }
 0x589   :  { %1033 = vmatpush.bf16.xpose.msra.mxu2 %v1025_v53 }
 0x58a   :  { %v1065_v10 = vpop.xlane.xlu2 %1064 }
 0x58b   :  { %v810_v58 = vpop.xlane.xlu0 %809  ;;  %v1077_v18 = vsub.f32 %v6530_v56, %v1065_v10 }
 0x58c   :  { %v824_v61 = vsub.f32 %v799_v30, %v810_v58 }
 0x58d   :  { %v6560_v62 = vpop.eup %5646  ;;  %v1085_v20 = vmul.f32 1.442695, %v1077_v18 }
 0x58e   :  { %v831_v63 = vmul.f32 1.442695, %v824_v61  ;;  %v847_v0 = vsel %vm804_vm11, %v6560_v62, 0.0  ;;  %v6564_v1 = vpop.eup %5648 }
 0x58f   :  { %848 = vadd.xlane.f32.xlu2 %v847_v0  ;;  %v1093_v5 = vsel %vm804_vm11, %v6564_v1, 0.0  ;;  %v1138_v26 = vpop.permute.xlu1 %1137 }
 0x590   :  { %5650 = vpow2.f32 %v831_v63 }
 0x592   :  { %v1008_v13 = vpop.permute.xlu2 %1007 }
 0x593   :  { %v1062_v41 = vpop.xlane.xlu0 %1061 }
 0x594   :  { %v1076_v35 = vsub.f32 %v1052_v43, %v1062_v41 }
 0x596   :  { %v5651_v40 = vpop.eup %5650  ;;  %v1083_v3 = vmul.f32 1.442695, %v1076_v35 }
 0x597   :  { %1094 = vadd.xlane.f32.xlu2 %v1093_v5  ;;  %v844_v7 = vsel %vm804_vm11, %v5651_v40, 0.0  ;;  %v1010_v16 = vpop.permute.xlu1 %1009 }
 0x598   :  { %5652 = vpow2.f32 %v1083_v3  ;;  %845 = vadd.xlane.f32.xlu0 %v844_v7 }
 0x599   :  { %5654 = vpow2.f32 %v1085_v20 }
 0x59a   :  { %5656 = vrcp.f32 %v843_v46 }
 0x59e   :  { %v6569_v8 = vpop.eup %5652 }
 0x59f   :  { %v1096_v28 = vsel %vm804_vm11, %v6569_v8, 0.0  ;;  %v6583_v2 = vpop.eup %5654 }
 0x5a0   :  { %1097 = vadd.xlane.f32.xlu2 %v1096_v28  ;;  %v1099_v14 = vsel %vm804_vm11, %v6583_v2, 0.0  ;;  %v5657_v45 = vpop.eup %5656 }
 0x5a1   :  { %v865_v50 = vmul.f32 %v5657_v45, %v6523_v19  ;;  %v1297_v19 = vpop.permute.xlu1 %1296 }
 0x5a3   :  { %v871_v49 = vpack.c.bf16 %v865_v50, %v865_v50 }
 0x5a5   :  { %v880_v55 = vunpack.c.l.b16 %v871_v49 }
 0x5a6   :  { %v1012_v9 = vpop.permute.xlu0 %1011 }
 0x5a7   :  { %v1022_v4 = vsel %vm719_vm3, %v1012_v9, 0 }
 0x5a8   :  { %1034 = vmatpush.bf16.xpose.msra.mxu2 %v1022_v4 }
 0x5a9   :  { %v1291_v49 = vpop.permute.xlu1 %1290 }
 0x5ac   :  { %1139 = vrot.lane.b32.xlu0 %v6450_v23, %s5999_s4 }
 0x5af   :  { %5035 = vmatmul.msk.bf16.vlgmr.msra.gmra.mxu2 %vm719_vm3, %v1008_v13 }
 0x5b8   :  { %1294 = vrot.lane.b32.xlu2 %v6459_v37, %s8101_s30 }
 0x5bf   :  { %5036 = vmatmul.msk.bf16.gmra.mxu2 %vm719_vm3, %v1010_v16 }
 0x5c0   :  { %1292 = vrot.lane.b32.xlu2 %v6448_v22, %s8099_s24 }
 0x5d6   :  { %1100 = vadd.xlane.f32.xlu0 %v1099_v14 }
 0x5f4   :  { %v783_v24 = vpop.f32.mrf.mxu2 }
 0x5f5   :  { %v795_v25 = vmul.f32 0.25, %v783_v24 }
 0x5f7   :  { %v6588_v27 = vadd.f32 %v795_v25, %v6493_v33 }
 0x5f9   :  { %v814_v30 = vsel %vm804_vm11, %v6588_v27, -inf }
 0x5fa   :  { %815 = vmax.xlane.f32.xlu1 %v814_v30 }
 0x5fc   :  { %v785_v21 = vpop.f32.mrf.mxu2 }
 0x5fd   :  { %v796_v36 = vmul.f32 0.25, %v785_v21 }
 0x5ff   :  { %v6593_v56 = vadd.f32 %v796_v36, %v6493_v33 }
 0x601   :  { %v817_v34 = vsel %vm804_vm11, %v6593_v56, -inf }
 0x602   :  { %818 = vmax.xlane.f32.xlu2 %v817_v34  ;;  %v849_v29 = vpop.xlane.xlu2 %848 }
 0x604   :  { %v788_v43 = vpop.f32.mrf.mxu2 }
 0x605   :  { %v797_v32 = vmul.f32 0.25, %v788_v43 }
 0x607   :  { %v6598_v39 = vadd.f32 %v797_v32, %v6493_v33 }
 0x609   :  { %v820_v42 = vsel %vm804_vm11, %v6598_v39, -inf }
 0x60a   :  { %821 = vmax.xlane.f32.xlu0 %v820_v42  ;;  %v1095_v53 = vpop.xlane.xlu2 %1094 }
 0x60b   :  { %v846_v44 = vpop.xlane.xlu0 %845 }
 0x60c   :  { %5658 = vrcp.f32 %v846_v44  ;;  %v790_v47 = vpop.f32.mrf.mxu2 }
 0x60d   :  { %5660 = vrcp.f32 %v849_v29 }
 0x612   :  { %v5659_v51 = vpop.eup %5658 }
 0x613   :  { %v866_v52 = vmul.f32 %v5659_v51, %v5651_v40  ;;  %v5661_v63 = vpop.eup %5660  ;;  %v1098_v35 = vpop.xlane.xlu2 %1097  ;;  %v1308_v40 = vsel %vm719_vm3, %v1297_v19, 0 }
 0x614   :  { %v867_v0 = vmul.f32 %v5661_v63, %v6560_v62  ;;  %5662 = vrcp.f32 %v1098_v35 }
 0x615   :  { %v872_v46 = vpack.c.bf16 %v866_v52, %v866_v52  ;;  %5664 = vrcp.f32 %v1095_v53 }
 0x616   :  { %v873_v5 = vpack.c.bf16 %v867_v0, %v867_v0 }
 0x617   :  { %v881_v58 = vunpack.c.l.b16 %v872_v46 }
 0x618   :  { %v882_v7 = vunpack.c.l.b16 %v873_v5 }
 0x619   :  { %v883_v61 = vpack.c.b16 %v881_v58, %v880_v55 }
 0x61a   :  { %v884_v10 = vpack.c.b16 %v882_v7, %v882_v7  ;;  %v5663_v9 = vpop.eup %5662 }
 0x61b   :  { %5029 = vmatmul.msk.bf16.vlgmr.msrb.gmra.mxu3 %vm804_vm11, %v883_v61  ;;  %v1295_v28 = vpop.permute.xlu2 %1294  ;;  %v5665_v62 = vpop.eup %5664  ;;  %v1118_v13 = vmul.f32 %v5663_v9, %v6569_v8  ;;  %v5522_v9 = vld [vmem:[%s8074_s9 + $0x8] sm:$0xff] }
 0x61c   :  { %v1305_v4 = vsel %vm719_vm3, %v1295_v28, 0  ;;  %v1117_v16 = vmul.f32 %v5665_v62, %v6564_v1  ;;  %1234 = vmatpush.bf16.msrb.mxu1 %v5522_v9 }
 0x61d   :  { %v1124_v18 = vpack.c.bf16 %v1118_v13, %v1118_v13 }
 0x61e   :  { %v1140_v41 = vpop.permute.xlu0 %1139  ;;  %v1123_v14 = vpack.c.bf16 %v1117_v16, %v1117_v16 }
 0x61f   :  { %v1149_v3 = vsel %vm900_vm2, %v1140_v41, 0  ;;  %v1133_v24 = vunpack.c.l.b16 %v1124_v18 }
 0x620   :  { %1157 = vmatpush.bf16.msra.mxu3 %v1149_v3  ;;  %v1132_v30 = vunpack.c.l.b16 %v1123_v14 }
 0x622   :  { %v1135_v36 = vpack.c.b16 %v1133_v24, %v1132_v30 }
 0x623   :  { %v1293_v52 = vpop.permute.xlu2 %1292 }
 0x624   :  { %1158 = vmatpush.bf16.msra.mxu3 %v1138_v26 }
 0x628   :  { %1316 = vmatpush.bf16.xpose.msrb.mxu3 %v1308_v40 }
 0x62b   :  { %5030 = vmatmul.msk.bf16.gmra.mxu3 %vm804_vm11, %v884_v10 }
 0x630   :  { %1317 = vmatpush.bf16.xpose.msrb.mxu3 %v1305_v4 }
 0x632   :  { %v1036_v20 = vpop.f32.mrf.mxu2 }
 0x633   :  { %v1048_v26 = vmul.f32 0.25, %v1036_v20 }
 0x635   :  { %v1054_v25 = vadd.f32 %v1048_v26, %v6493_v33 }
 0x637   :  { %v1066_v21 = vsel %vm804_vm11, %v1054_v25, -inf }
 0x638   :  { %1067 = vmax.xlane.f32.xlu1 %v1066_v21 }
 0x63a   :  { %v1038_v34 = vpop.f32.mrf.mxu2 }
 0x63b   :  { %v1049_v43 = vmul.f32 0.25, %v1038_v34  ;;  %5037 = vmatmul.msk.bf16.vlgmr.msra.gmra.mxu3 %vm804_vm11, %v1135_v36 }
 0x63d   :  { %v1055_v8 = vadd.f32 %v1049_v43, %v6493_v33 }
 0x63f   :  { %v1069_v1 = vsel %vm804_vm11, %v1055_v8, -inf }
 0x640   :  { %1070 = vmax.xlane.f32.xlu2 %v1069_v1 }
 0x642   :  { %v1041_v32 = vpop.f32.mrf.mxu2 }
 0x643   :  { %v1050_v40 = vmul.f32 0.25, %v1041_v32 }
 0x649   :  { %v1101_v42 = vpop.xlane.xlu0 %1100 }
 0x64a   :  { %5666 = vrcp.f32 %v1101_v42  ;;  %v1043_v29 = vpop.f32.mrf.mxu2 }
 0x650   :  { %v5667_v44 = vpop.eup %5666 }
 0x651   :  { %v1119_v45 = vmul.f32 %v5667_v44, %v6583_v2 }
 0x653   :  { %v1125_v47 = vpack.c.bf16 %v1119_v45, %v1119_v45 }
 0x655   :  { %v1134_v50 = vunpack.c.l.b16 %v1125_v47 }
 0x657   :  { %v1136_v51 = vpack.c.b16 %v1134_v50, %v1134_v50 }
 0x658   :  { %1179 = vrot.lane.b32.xlu2 %v6514_v12, %s5999_s4 }
 0x659   :  { %5038 = vmatmul.msk.bf16.gmra.mxu3 %vm804_vm11, %v1136_v51 }
 0x669   :  { %5055 = vmatmul.msk.bf16.vlgmr.msrb.gmra.mxu3 %vm719_vm3, %v1291_v49 }
 0x66d   :  { %v816_v53 = vpop.xlane.xlu1 %815 }
 0x66e   :  { %v826_v46 = vsub.f32 %v6588_v27, %v816_v53 }
 0x670   :  { %v835_v55 = vmul.f32 1.442695, %v826_v46 }
 0x672   :  { %5668 = vpow2.f32 %v835_v55 }
 0x675   :  { %v819_v58 = vpop.xlane.xlu2 %818 }
 0x676   :  { %v827_v2 = vsub.f32 %v6593_v56, %v819_v58  ;;  %v5521_v56 = vld [vmem:[%s8074_s9] sm:$0xff] }
 0x677   :  { %1273 = vmatpush.bf16.msrb.mxu2 %v5521_v56 }
 0x678   :  { %v6623_v61 = vpop.eup %5668  ;;  %v837_v63 = vmul.f32 1.442695, %v827_v2 }
 0x679   :  { %5056 = vmatmul.msk.bf16.gmra.mxu3 %vm719_vm3, %v1293_v52  ;;  %v850_v0 = vsel %vm804_vm11, %v6623_v61, 0.0 }
 0x67a   :  { %5670 = vpow2.f32 %v837_v63  ;;  %851 = vadd.xlane.f32.xlu0 %v850_v0 }
 0x67d   :  { %v822_v41 = vpop.xlane.xlu0 %821 }
 0x67e   :  { %v828_v35 = vsub.f32 %v6598_v39, %v822_v41  ;;  %v6641_v39 = vadd.f32 %v1050_v40, %v6493_v33 }
 0x680   :  { %v6629_v3 = vpop.eup %5670  ;;  %v839_v27 = vmul.f32 1.442695, %v828_v35  ;;  %v1072_v28 = vsel %vm804_vm11, %v6641_v39, -inf }
 0x681   :  { %v853_v19 = vsel %vm804_vm11, %v6629_v3, 0.0 }
 0x682   :  { %5672 = vpow2.f32 %v839_v27  ;;  %854 = vadd.xlane.f32.xlu0 %v853_v19 }
 0x688   :  { %v6636_v5 = vpop.eup %5672 }
 0x689   :  { %v856_v7 = vsel %vm804_vm11, %v6636_v5, 0.0 }
 0x68a   :  { %857 = vadd.xlane.f32.xlu0 %v856_v7 }
 0x692   :  { %1073 = vmax.xlane.f32.xlu0 %v1072_v28 }
 0x69e   :  { %v913_v10 = vpop.f32.mrf.mxu3 }
 0x6a6   :  { %v915_v62 = vpop.f32.mrf.mxu3 }
 0x6a7   :  { %v966_v4 = vpack.c.bf16 %v915_v62, %v913_v10 }
 0x6a9   :  { %5052 = vmatmul.msk.bf16.vlgmr.msrb.gmra.mxu2 %vm719_vm3, %v966_v4 }
 0x6ab   :  { %v1068_v13 = vpop.xlane.xlu1 %1067 }
 0x6ac   :  { %v1078_v16 = vsub.f32 %v1054_v25, %v1068_v13 }
 0x6ae   :  { %v1087_v18 = vmul.f32 1.442695, %v1078_v16  ;;  %v6649_v20 = vpop.f32.mrf.mxu3 }
 0x6b0   :  { %5674 = vpow2.f32 %v1087_v18 }
 0x6b3   :  { %v1071_v14 = vpop.xlane.xlu2 %1070 }
 0x6b4   :  { %v1079_v26 = vsub.f32 %v1055_v8, %v1071_v14 }
 0x6b6   :  { %v6651_v24 = vpop.eup %5674  ;;  %v1089_v30 = vmul.f32 1.442695, %v1079_v26  ;;  %v920_v21 = vpop.f32.mrf.mxu3 }
 0x6b7   :  { %v1102_v36 = vsel %vm804_vm11, %v6651_v24, 0.0 }
 0x6b8   :  { %5676 = vpow2.f32 %v1089_v30  ;;  %1103 = vadd.xlane.f32.xlu0 %v1102_v36 }
 0x6bb   :  { %v1180_v34 = vpop.permute.xlu2 %1179 }
 0x6bc   :  { %v1189_v43 = vsel %vm900_vm2, %v1180_v34, 0 }
 0x6bd   :  { %1197 = vmatpush.bf16.msra.mxu0 %v1189_v43 }
 0x6be   :  { %v6656_v25 = vpop.eup %5676  ;;  %v1160_v1 = vpop.f32.mrf.mxu3 }
 0x6bf   :  { %v1105_v32 = vsel %vm804_vm11, %v6656_v25, 0.0 }
 0x6c0   :  { %1106 = vadd.xlane.f32.xlu1 %v1105_v32 }
 0x6c6   :  { %v1162_v8 = vpop.f32.mrf.mxu3 }
 0x6c7   :  { %v1209_v42 = vpack.c.bf16 %v1162_v8, %v1160_v1 }
 0x6c9   :  { %5045 = vmatmul.msk.bf16.vlgmr.msrb.gmra.mxu1 %vm719_vm3, %v1209_v42 }
 0x6dc   :  { %v6661_v29 = vpop.f32.mrf.mxu3 }
 0x6e4   :  { %v1167_v44 = vpop.f32.mrf.mxu3 }
 0x6ec   :  { %v1319_v45 = vpop.f32.mrf.mxu3 }
 0x6ed   :  { %v1366_v47 = vmul.f32 0.25, %v1319_v45  ;;  %v852_v50 = vpop.xlane.xlu0 %851 }
 0x6ee   :  { %5678 = vrcp.f32 %v852_v50 }
 0x6ef   :  { %v1372_v51 = vadd.f32 %v1366_v47, %v6493_v33 }
 0x6f1   :  { %v1378_v49 = vsel %vm804_vm11, %v1372_v51, -inf }
 0x6f2   :  { %1379 = vmax.xlane.f32.xlu1 %v1378_v49 }
 0x6f4   :  { %v1321_v52 = vpop.f32.mrf.mxu3  ;;  %v5679_v55 = vpop.eup %5678 }
 0x6f5   :  { %v1367_v53 = vmul.f32 0.25, %v1321_v52  ;;  %v855_v46 = vpop.xlane.xlu0 %854  ;;  %v868_v2 = vmul.f32 %v5679_v55, %v6623_v61 }
 0x6f6   :  { %5680 = vrcp.f32 %v855_v46 }
 0x6f7   :  { %v1373_v58 = vadd.f32 %v1367_v53, %v6493_v33  ;;  %v874_v35 = vpack.c.bf16 %v868_v2, %v868_v2 }
 0x6f9   :  { %v1381_v63 = vsel %vm804_vm11, %v1373_v58, -inf  ;;  %v925_v40 = vunpack.c.l.b16 %v874_v35 }
 0x6fa   :  { %1382 = vmax.xlane.f32.xlu2 %v1381_v63 }
 0x6fc   :  { %v5681_v0 = vpop.eup %5680  ;;  %v1324_v41 = vpop.f32.mrf.mxu3 }
 0x6fd   :  { %v869_v27 = vmul.f32 %v5681_v0, %v6629_v3  ;;  %v858_v19 = vpop.xlane.xlu0 %857  ;;  %v1368_v36 = vmul.f32 0.25, %v1324_v41 }
 0x6fe   :  { %5682 = vrcp.f32 %v858_v19 }
 0x6ff   :  { %v875_v56 = vpack.c.bf16 %v869_v27, %v869_v27  ;;  %v6689_v34 = vadd.f32 %v1368_v36, %v6493_v33 }
 0x701   :  { %v926_v7 = vunpack.c.l.b16 %v875_v56  ;;  %v1384_v32 = vsel %vm804_vm11, %v6689_v34, -inf }
 0x703   :  { %v928_v28 = vpack.c.b16 %v926_v7, %v925_v40 }
 0x704   :  { %v5683_v10 = vpop.eup %5682  ;;  %v1326_v9 = vpop.f32.mrf.mxu3 }
 0x705   :  { %5031 = vmatmul.msk.bf16.vlgmr.msrb.gmra.mxu0 %vm804_vm11, %v928_v28  ;;  %v1074_v62 = vpop.xlane.xlu0 %1073  ;;  %v870_v4 = vmul.f32 %v5683_v10, %v6636_v5 }
 0x706   :  { %v1080_v61 = vsub.f32 %v6641_v39, %v1074_v62 }
 0x707   :  { %v876_v3 = vpack.c.bf16 %v870_v4, %v870_v4 }
 0x708   :  { %v1091_v13 = vmul.f32 1.442695, %v1080_v61 }
 0x709   :  { %v927_v16 = vunpack.c.l.b16 %v876_v3 }
 0x70a   :  { %5684 = vpow2.f32 %v1091_v13 }
 0x70b   :  { %1177 = vrot.lane.b32.xlu1 %v6520_v17, %s5999_s4  ;;  %v929_v26 = vpack.c.b16 %v927_v16, %v927_v16 }
 0x710   :  { %v5685_v18 = vpop.eup %5684 }
 0x711   :  { %v1108_v14 = vsel %vm804_vm11, %v5685_v18, 0.0 }
 0x712   :  { %1332 = vrot.lane.b32.xlu2 %v6504_v59, %s8101_s30  ;;  %1109 = vadd.xlane.f32.xlu0 %v1108_v14 }
 0x715   :  { %5032 = vmatmul.msk.bf16.gmra.mxu0 %vm804_vm11, %v929_v26 }
 0x726   :  { %1334 = vrot.lane.b32.xlu0 %v6512_v11, %s8101_s30 }
 0x72b   :  { %v1104_v42 = vpop.xlane.xlu0 %1103 }
 0x72c   :  { %v1275_v5 = vpop.f32.mrf.mxu2 }
 0x72e   :  { %1328 = vrot.lane.b32.xlu0 %v6504_v59, %s8099_s24 }
 0x733   :  { %v1107_v21 = vpop.xlane.xlu1 %1106 }
 0x734   :  { %5686 = vrcp.f32 %v1107_v21 }
 0x736   :  { %1460 = vrot.lane.b32.xlu0 %v6450_v23, %s8099_s24 }
 0x73a   :  { %v5687_v47 = vpop.eup %5686 }
 0x73e   :  { %1458 = vrot.lane.b32.xlu0 %v6456_v31, %s8099_s24 }
 0x746   :  { %v1236_v39 = vpop.f32.mrf.mxu1 }
 0x747   :  { %v6686_v30 = vadd.f32 %v1275_v5, %v1236_v39 }
 0x765   :  { %v1380_v43 = vpop.xlane.xlu1 %1379 }
 0x766   :  { %v1396_v1 = vsub.f32 %v1372_v51, %v1380_v43  ;;  %v1121_v51 = vmul.f32 %v5687_v47, %v6656_v25 }
 0x768   :  { %v1402_v8 = vmul.f32 1.442695, %v1396_v1  ;;  %1385 = vmax.xlane.f32.xlu0 %v1384_v32  ;;  %v1127_v55 = vpack.c.bf16 %v1121_v51, %v1121_v51 }
 0x76a   :  { %5688 = vpow2.f32 %v1402_v8  ;;  %v1173_v0 = vunpack.c.l.b16 %v1127_v55 }
 0x76b   :  { %5690 = vrcp.f32 %v1104_v42 }
 0x76d   :  { %v1383_v44 = vpop.xlane.xlu2 %1382 }
 0x76e   :  { %v1397_v45 = vsub.f32 %v1373_v58, %v1383_v44 }
 0x770   :  { %v6693_v50 = vpop.eup %5688  ;;  %v1404_v49 = vmul.f32 1.442695, %v1397_v45 }
 0x771   :  { %v1414_v52 = vsel %vm804_vm11, %v6693_v50, 0.0  ;;  %v5691_v53 = vpop.eup %5690 }
 0x772   :  { %5692 = vpow2.f32 %v1404_v49  ;;  %1415 = vadd.xlane.f32.xlu1 %v1414_v52  ;;  %v1120_v46 = vmul.f32 %v5691_v53, %v6651_v24 }
 0x774   :  { %v1126_v63 = vpack.c.bf16 %v1120_v46, %v1120_v46 }
 0x775   :  { %v1333_v3 = vpop.permute.xlu2 %1332 }
 0x776   :  { %v1172_v41 = vunpack.c.l.b16 %v1126_v63 }
 0x778   :  { %v6699_v2 = vpop.eup %5692  ;;  %v1175_v27 = vpack.c.b16 %v1173_v0, %v1172_v41 }
 0x779   :  { %v1417_v58 = vsel %vm804_vm11, %v6699_v2, 0.0 }
 0x77a   :  { %1418 = vadd.xlane.f32.xlu2 %v1417_v58 }
 0x77c   :  { %1584 = vrot.lane.b32.xlu0 %v6448_v22, %s8097_s5 }
 0x77d   :  { %v1178_v35 = vpop.permute.xlu1 %1177 }
 0x77e   :  { %1198 = vmatpush.bf16.msra.mxu0 %v1178_v35 }
 0x781   :  { %5039 = vmatmul.msk.bf16.vlgmr.msra.gmra.mxu0 %vm804_vm11, %v1175_v27 }
 0x782   :  { %v957_v24 = vpop.f32.mrf.mxu0 }
 0x783   :  { %v967_v25 = vpack.c.bf16 %v957_v24, %v6649_v20 }
 0x785   :  { %5053 = vmatmul.msk.bf16.gmra.mxu2 %vm719_vm3, %v967_v25  ;;  %v1110_v19 = vpop.xlane.xlu0 %1109 }
 0x786   :  { %5694 = vrcp.f32 %v1110_v19 }
 0x78a   :  { %v959_v56 = vpop.f32.mrf.mxu0 }
 0x78b   :  { %1582 = vrot.lane.b32.xlu1 %v6459_v37, %s8097_s5 }
 0x78c   :  { %v5695_v40 = vpop.eup %5694 }
 0x78d   :  { %v1122_v7 = vmul.f32 %v5695_v40, %v5685_v18 }
 0x78f   :  { %v1128_v28 = vpack.c.bf16 %v1122_v7, %v1122_v7 }
 0x791   :  { %v1174_v10 = vunpack.c.l.b16 %v1128_v28 }
 0x792   :  { %1330 = vrot.lane.b32.xlu2 %v6512_v11, %s8099_s24  ;;  %v962_v9 = vpop.f32.mrf.mxu0 }
 0x793   :  { %v968_v62 = vpack.c.bf16 %v962_v9, %v959_v56  ;;  %1578 = vrot.lane.b32.xlu1 %v6459_v37, %s8095_s21  ;;  %v1176_v20 = vpack.c.b16 %v1174_v10, %v1174_v10  ;;  %v1343_v37 = vsel %vm719_vm3, %v1333_v3, 0 }
 0x795   :  { %5040 = vmatmul.msk.bf16.gmra.mxu0 %vm804_vm11, %v1176_v20  ;;  %5054 = vmatmul.msk.bf16.gmra.mxu2 %vm719_vm3, %v968_v62  ;;  %v6748_v62 = vpop.f32.mrf.mxu2 }
 0x798   :  { %v1335_v61 = vpop.permute.xlu0 %1334 }
 0x799   :  { %v1346_v4 = vsel %vm719_vm3, %v1335_v61, 0 }
 0x79a   :  { %1622 = vrot.lane.b32.xlu2 %v6512_v11, %s8097_s5  ;;  %v964_v13 = vpop.f32.mrf.mxu0  ;;  %1354 = vmatpush.bf16.xpose.msrb.mxu0 %v1346_v4 }
 0x79b   :  { %1620 = vrot.lane.b32.xlu1 %v6504_v59, %s8097_s5 }
 0x7a0   :  { %v1329_v16 = vpop.permute.xlu0 %1328 }
 0x7a2   :  { %1616 = vrot.lane.b32.xlu2 %v6504_v59, %s8095_s21  ;;  %1355 = vmatpush.bf16.xpose.msrb.mxu0 %v1343_v37 }
 0x7a3   :  { %1618 = vrot.lane.b32.xlu1 %v6512_v11, %s8095_s21 }
 0x7a8   :  { %v1461_v18 = vpop.permute.xlu0 %1460 }
 0x7a9   :  { %v1470_v14 = vsel %vm900_vm2, %v1461_v18, 0  ;;  %5057 = vmatmul.msk.bf16.vlgmr.msrb.gmra.mxu0 %vm719_vm3, %v1329_v16  ;;  %v5523_v16 = vld [vmem:[%s8074_s9 + $0x10] sm:$0xff] }
 0x7aa   :  { %1478 = vmatpush.bf16.msra.mxu3 %v1470_v14  ;;  %1555 = vmatpush.bf16.msra.mxu1 %v5523_v16 }
 0x7b0   :  { %v1459_v26 = vpop.permute.xlu0 %1458 }
 0x7b1   :  { %1479 = vmatpush.bf16.msra.mxu3 %v1459_v26 }
 0x7db   :  { %v1386_v5 = vpop.xlane.xlu0 %1385 }
 0x7dc   :  { %v1398_v39 = vsub.f32 %v6689_v34, %v1386_v5 }
 0x7de   :  { %v1406_v21 = vmul.f32 1.442695, %v1398_v39 }
 0x7e0   :  { %5696 = vpow2.f32 %v1406_v21 }
 0x7e5   :  { %v1416_v36 = vpop.xlane.xlu1 %1415 }
 0x7e6   :  { %v5697_v43 = vpop.eup %5696  ;;  %5698 = vrcp.f32 %v1416_v36 }
 0x7e7   :  { %v1420_v59 = vsel %vm804_vm11, %v5697_v43, 0.0 }
 0x7e8   :  { %1421 = vadd.xlane.f32.xlu0 %v1420_v59 }
 0x7ec   :  { %v5699_v1 = vpop.eup %5698 }
 0x7ed   :  { %v1419_v11 = vpop.xlane.xlu2 %1418  ;;  %v1438_v42 = vmul.f32 %v5699_v1, %v6693_v50 }
 0x7ee   :  { %5700 = vrcp.f32 %v1419_v11  ;;  %v1585_v32 = vpop.permute.xlu0 %1584 }
 0x7ef   :  { %v1596_v8 = vsel %vm719_vm3, %v1585_v32, 0  ;;  %v1444_v45 = vpack.c.bf16 %v1438_v42, %v1438_v42 }
 0x7f0   :  { %1604 = vmatpush.bf16.xpose.msra.mxu2 %v1596_v8 }
 0x7f1   :  { %v1453_v52 = vunpack.c.l.b16 %v1444_v45 }
 0x7f4   :  { %v5701_v44 = vpop.eup %5700 }
 0x7f5   :  { %v1439_v34 = vmul.f32 %v5701_v44, %v6699_v2  ;;  %v1331_v47 = vpop.permute.xlu2 %1330 }
 0x7f6   :  { %5058 = vmatmul.msk.bf16.gmra.mxu0 %vm719_vm3, %v1331_v47 }
 0x7f7   :  { %v1445_v49 = vpack.c.bf16 %v1439_v34, %v1439_v34 }
 0x7f9   :  { %v1454_v53 = vunpack.c.l.b16 %v1445_v49 }
 0x7fb   :  { %v1456_v51 = vpack.c.b16 %v1454_v53, %v1453_v52 }
 0x7fc   :  { %1580 = vrot.lane.b32.xlu0 %v6448_v22, %s8095_s21 }
 0x7fd   :  { %v1583_v46 = vpop.permute.xlu1 %1582  ;;  %v1623_v55 = vpop.permute.xlu2 %1622  ;;  %5059 = vmatmul.msk.bf16.vlgmr.msra.gmra.mxu3 %vm804_vm11, %v1456_v51 }
 0x7fe   :  { %v1634_v50 = vsel %vm719_vm3, %v1623_v55, 0  ;;  %v1200_v63 = vpop.f32.mrf.mxu0  ;;  %v1593_v58 = vsel %vm719_vm3, %v1583_v46, 0 }
 0x7ff   :  { %v1210_v2 = vpack.c.bf16 %v1200_v63, %v6661_v29  ;;  %1605 = vmatpush.bf16.xpose.msra.mxu2 %v1593_v58  ;;  %1642 = vmatpush.bf16.xpose.msrb.mxu3 %v1634_v50 }
 0x801   :  { %5046 = vmatmul.msk.bf16.gmra.mxu1 %vm719_vm3, %v1210_v2 }
 0x805   :  { %v1579_v0 = vpop.permute.xlu1 %1578  ;;  %v1617_v59 = vpop.permute.xlu2 %1616 }
 0x806   :  { %5070 = vmatmul.msk.bf16.vlgmr.msra.gmra.mxu2 %vm719_vm3, %v1579_v0  ;;  %v1202_v41 = vpop.f32.mrf.mxu0 }
 0x808   :  { %v6750_v4 = vpop.f32.mrf.mxu2 }
 0x80d   :  { %v1621_v22 = vpop.permute.xlu1 %1620 }
 0x80e   :  { %v1631_v35 = vsel %vm719_vm3, %v1621_v22, 0 }
 0x80f   :  { %1643 = vmatpush.bf16.xpose.msrb.mxu3 %v1631_v35 }
 0x810   :  { %v6756_v14 = vpop.f32.mrf.mxu2 }
 0x812   :  { %v1205_v27 = vpop.f32.mrf.mxu0 }
 0x813   :  { %v1211_v24 = vpack.c.bf16 %v1205_v27, %v1202_v41 }
 0x815   :  { %5047 = vmatmul.msk.bf16.gmra.mxu1 %vm719_vm3, %v1211_v24  ;;  %v1619_v45 = vpop.permute.xlu1 %1618 }
 0x818   :  { %v6760_v36 = vpop.f32.mrf.mxu2 }
 0x81a   :  { %v1207_v25 = vpop.f32.mrf.mxu0 }
 0x820   :  { %v6764_v32 = vpop.f32.mrf.mxu2 }
 0x826   :  { %v1357_v19 = vpop.f32.mrf.mxu0 }
 0x827   :  { %v1369_v56 = vmul.f32 0.25, %v1357_v19 }
 0x829   :  { %v1375_v29 = vadd.f32 %v1369_v56, %v6493_v33 }
 0x82b   :  { %v1387_v40 = vsel %vm804_vm11, %v1375_v29, -inf }
 0x82c   :  { %1388 = vmax.xlane.f32.xlu2 %v1387_v40 }
 0x82e   :  { %v1359_v7 = vpop.f32.mrf.mxu0 }
 0x82f   :  { %v1370_v28 = vmul.f32 0.25, %v1359_v7 }
 0x831   :  { %v1376_v10 = vadd.f32 %v1370_v28, %v6493_v33 }
 0x833   :  { %v1390_v9 = vsel %vm804_vm11, %v1376_v10, -inf }
 0x834   :  { %1391 = vmax.xlane.f32.xlu1 %v1390_v9 }
 0x85b   :  { %v1422_v20 = vpop.xlane.xlu0 %1421 }
 0x85c   :  { %5702 = vrcp.f32 %v1422_v20 }
 0x862   :  { %v5703_v61 = vpop.eup %5702 }
 0x863   :  { %v1440_v13 = vmul.f32 %v5703_v61, %v5697_v43 }
 0x865   :  { %v1446_v3 = vpack.c.bf16 %v1440_v13, %v1440_v13 }
 0x867   :  { %v1455_v37 = vunpack.c.l.b16 %v1446_v3 }
 0x869   :  { %v1457_v18 = vpack.c.b16 %v1455_v37, %v1455_v37 }
 0x86b   :  { %5060 = vmatmul.msk.bf16.gmra.mxu3 %vm804_vm11, %v1457_v18 }
 0x86e   :  { %v1581_v26 = vpop.permute.xlu0 %1580 }
 0x86f   :  { %5071 = vmatmul.msk.bf16.gmra.mxu2 %vm719_vm3, %v1581_v26 }
 0x873   :  { %v1362_v5 = vpop.f32.mrf.mxu0 }
 0x874   :  { %v1371_v39 = vmul.f32 0.25, %v1362_v5 }
 0x876   :  { %v1377_v21 = vadd.f32 %v1371_v39, %v6493_v33 }
 0x878   :  { %v1393_v43 = vsel %vm804_vm11, %v1377_v21, -inf }
 0x879   :  { %1394 = vmax.xlane.f32.xlu0 %v1393_v43 }
 0x87b   :  { %v1364_v11 = vpop.f32.mrf.mxu0  ;;  %5072 = vmatmul.msk.bf16.vlgmr.msrb.gmra.mxu3 %vm719_vm3, %v1617_v59 }
 0x880   :  { %v1481_v1 = vpop.f32.mrf.mxu3 }
 0x888   :  { %v1483_v8 = vpop.f32.mrf.mxu3 }
 0x889   :  { %v1530_v42 = vpack.c.bf16 %v1483_v8, %v1481_v1  ;;  %v1607_v44 = vpop.f32.mrf.mxu2 }
 0x88a   :  { %v1654_v34 = vmul.f32 0.25, %v1607_v44 }
 0x88b   :  { %5067 = vmatmul.msk.bf16.vlgmr.msra.gmra.mxu1 %vm719_vm3, %v1530_v42  ;;  %5073 = vmatmul.msk.bf16.gmra.mxu3 %vm719_vm3, %v1619_v45 }
 0x88c   :  { %v1660_v47 = vadd.f32 %v1654_v34, %v6493_v33 }
 0x88e   :  { %v1666_v49 = vsel %vm804_vm11, %v1660_v47, -inf }
 0x88f   :  { %1667 = vmax.xlane.f32.xlu2 %v1666_v49 }
 0x891   :  { %v1609_v52 = vpop.f32.mrf.mxu2 }
 0x892   :  { %v1655_v53 = vmul.f32 0.25, %v1609_v52 }
 0x894   :  { %v1661_v51 = vadd.f32 %v1655_v53, %v6493_v33 }
 0x896   :  { %v1669_v46 = vsel %vm804_vm11, %v1661_v51, -inf }
 0x897   :  { %1670 = vmax.xlane.f32.xlu1 %v1669_v46 }
 0x89f   :  { %v1389_v0 = vpop.xlane.xlu2 %1388 }
 0x8a0   :  { %v1399_v41 = vsub.f32 %v1375_v29, %v1389_v0 }
 0x8a2   :  { %v1408_v22 = vmul.f32 1.442695, %v1399_v41 }
 0x8a7   :  { %v1392_v55 = vpop.xlane.xlu1 %1391  ;;  %1500 = vrot.lane.b32.xlu2 %v6514_v12, %s8099_s24 }
 0x8a8   :  { %v1400_v50 = vsub.f32 %v1376_v10, %v1392_v55 }
 0x8aa   :  { %v1410_v63 = vmul.f32 1.442695, %v1400_v50 }
 0x8ac   :  { %5704 = vpow2.f32 %v1410_v63 }
 0x8ad   :  { %5706 = vpow2.f32 %v1408_v22 }
 0x8b2   :  { %v6774_v58 = vpop.eup %5704 }
 0x8b3   :  { %v1426_v2 = vsel %vm804_vm11, %v6774_v58, 0.0  ;;  %v5707_v35 = vpop.eup %5706 }
 0x8b4   :  { %1427 = vadd.xlane.f32.xlu0 %v1426_v2  ;;  %v1423_v27 = vsel %vm804_vm11, %v5707_v35, 0.0 }
 0x8c8   :  { %1498 = vrot.lane.b32.xlu0 %v6520_v17, %s8099_s24  ;;  %s4923_s24 = sshll.u32 %s8087_s22, 4  ;;  %s4924_s24 = int_to_ptr.hbm [resolvable:$true] %s4923_s24 }
 0x8d0   :  { %1424 = vadd.xlane.f32.xlu2 %v1423_v27 }
 0x8ec   :  { %v1395_v24 = vpop.xlane.xlu0 %1394 }
 0x8ed   :  { %v1401_v25 = vsub.f32 %v1377_v21, %v1395_v24 }
 0x8ee   :  { %v6781_v19 = vpop.f32.mrf.mxu3 }
 0x8ef   :  { %v1412_v56 = vmul.f32 1.442695, %v1401_v25 }
 0x8f1   :  { %5708 = vpow2.f32 %v1412_v56 }
 0x8f2   :  { %v1612_v40 = vpop.f32.mrf.mxu2 }
 0x8f3   :  { %v1656_v7 = vmul.f32 0.25, %v1612_v40 }
 0x8f5   :  { %v1662_v28 = vadd.f32 %v1656_v7, %v6493_v33 }
 0x8f6   :  { %v1488_v29 = vpop.f32.mrf.mxu3 }
 0x8f7   :  { %v1672_v10 = vsel %vm804_vm11, %v1662_v28, -inf  ;;  %v6785_v20 = vpop.eup %5708 }
 0x8f8   :  { %1673 = vmax.xlane.f32.xlu1 %v1672_v10  ;;  %v1429_v3 = vsel %vm804_vm11, %v6785_v20, 0.0 }
 0x8fa   :  { %v1614_v9 = vpop.f32.mrf.mxu2 }
 0x8fe   :  { %v1645_v61 = vpop.f32.mrf.mxu3 }
 0x8ff   :  { %v1657_v13 = vmul.f32 0.25, %v1645_v61 }
 0x900   :  { %1430 = vadd.xlane.f32.xlu1 %v1429_v3 }
 0x901   :  { %v1663_v16 = vadd.f32 %v1657_v13, %v6493_v33 }
 0x902   :  { %v1668_v37 = vpop.xlane.xlu2 %1667 }
 0x903   :  { %v1684_v18 = vsub.f32 %v1660_v47, %v1668_v37  ;;  %v1675_v26 = vsel %vm804_vm11, %v1663_v16, -inf }
 0x904   :  { %1676 = vmax.xlane.f32.xlu2 %v1675_v26 }
 0x905   :  { %v1690_v5 = vmul.f32 1.442695, %v1684_v18 }
 0x906   :  { %v1647_v39 = vpop.f32.mrf.mxu3 }
 0x907   :  { %5710 = vpow2.f32 %v1690_v5  ;;  %v1658_v42 = vmul.f32 0.25, %v1647_v39 }
 0x909   :  { %v1664_v34 = vadd.f32 %v1658_v42, %v6493_v33 }
 0x90a   :  { %v1501_v21 = vpop.permute.xlu2 %1500  ;;  %v1671_v43 = vpop.xlane.xlu1 %1670 }
 0x90b   :  { %v1510_v59 = vsel %vm900_vm2, %v1501_v21, 0  ;;  %v1685_v11 = vsub.f32 %v1661_v51, %v1671_v43  ;;  %v1678_v53 = vsel %vm804_vm11, %v1664_v34, -inf }
 0x90c   :  { %1518 = vmatpush.bf16.msra.mxu0 %v1510_v59 }
 0x90d   :  { %v6792_v1 = vpop.eup %5710  ;;  %v1692_v8 = vmul.f32 1.442695, %v1685_v11 }
 0x90e   :  { %v1650_v44 = vpop.f32.mrf.mxu3  ;;  %v1702_v45 = vsel %vm804_vm11, %v6792_v1, 0.0 }
 0x90f   :  { %5712 = vpow2.f32 %v1692_v8  ;;  %1703 = vadd.xlane.f32.xlu1 %v1702_v45  ;;  %v1659_v43 = vmul.f32 0.25, %v1650_v44 }
 0x911   :  { %v1665_v8 = vadd.f32 %v1659_v43, %v6493_v33 }
 0x915   :  { %v6797_v47 = vpop.eup %5712 }
 0x916   :  { %v1652_v49 = vpop.f32.mrf.mxu3  ;;  %v1705_v52 = vsel %vm804_vm11, %v6797_v47, 0.0 }
 0x917   :  { %1706 = vadd.xlane.f32.xlu0 %v1705_v52  ;;  %1679 = vmax.xlane.f32.xlu1 %v1678_v53 }
 0x91c   :  { %1746 = vrot.lane.b32.xlu2 %v6456_v31, %s8095_s21 }
 0x927   :  { %v1428_v51 = vpop.xlane.xlu0 %1427 }
 0x928   :  { %5714 = vrcp.f32 %v1428_v51 }
 0x92e   :  { %v5715_v50 = vpop.eup %5714 }
 0x92f   :  { %v1442_v63 = vmul.f32 %v5715_v50, %v6774_v58 }
 0x930   :  { %1748 = vrot.lane.b32.xlu1 %v6450_v23, %s8095_s21 }
 0x931   :  { %v1448_v0 = vpack.c.bf16 %v1442_v63, %v1442_v63 }
 0x933   :  { %v1494_v27 = vunpack.c.l.b16 %v1448_v0 }
 0x93a   :  { %v1499_v46 = vpop.permute.xlu0 %1498 }
 0x93b   :  { %1519 = vmatpush.bf16.msra.mxu0 %v1499_v46 }
 0x943   :  { %v1425_v55 = vpop.xlane.xlu2 %1424 }
 0x944   :  { %5716 = vrcp.f32 %v1425_v55 }
 0x94a   :  { %v5717_v2 = vpop.eup %5716 }
 0x94b   :  { %v1441_v41 = vmul.f32 %v5717_v2, %v5707_v35 }
 0x94d   :  { %v1447_v22 = vpack.c.bf16 %v1441_v41, %v1441_v41 }
 0x94f   :  { %v1493_v24 = vunpack.c.l.b16 %v1447_v22 }
 0x951   :  { %v1496_v25 = vpack.c.b16 %v1494_v27, %v1493_v24 }
 0x953   :  { %5061 = vmatmul.msk.bf16.vlgmr.msra.gmra.mxu0 %vm804_vm11, %v1496_v25 }
 0x96b   :  { %v1674_v31 = vpop.xlane.xlu1 %1673 }
 0x96c   :  { %v1686_v23 = vsub.f32 %v1662_v28, %v1674_v31 }
 0x96e   :  { %v1694_v56 = vmul.f32 1.442695, %v1686_v23 }
 0x970   :  { %5718 = vpow2.f32 %v1694_v56 }
 0x973   :  { %v1431_v40 = vpop.xlane.xlu1 %1430 }
 0x974   :  { %5720 = vrcp.f32 %v1431_v40 }
 0x976   :  { %v5719_v7 = vpop.eup %5718 }
 0x977   :  { %v1677_v29 = vpop.xlane.xlu2 %1676  ;;  %v1708_v10 = vsel %vm804_vm11, %v5719_v7, 0.0 }
 0x978   :  { %v1687_v58 = vsub.f32 %v1663_v16, %v1677_v29  ;;  %1709 = vadd.xlane.f32.xlu0 %v1708_v10 }
 0x97a   :  { %v5721_v9 = vpop.eup %5720  ;;  %v1696_v35 = vmul.f32 1.442695, %v1687_v58  ;;  %v5524_v58 = vld [vmem:[%s8074_s9 + $0x18] sm:$0xff] }
 0x97b   :  { %v1443_v61 = vmul.f32 %v5721_v9, %v6785_v20  ;;  %1843 = vmatpush.bf16.msrb.mxu1 %v5524_v58 }
 0x97c   :  { %5722 = vpow2.f32 %v1696_v35  ;;  %v1238_v35 = vpop.f32.mrf.mxu1 }
 0x97d   :  { %v1449_v13 = vpack.c.bf16 %v1443_v61, %v1443_v61 }
 0x97f   :  { %v1495_v3 = vunpack.c.l.b16 %v1449_v13  ;;  %v1747_v46 = vpop.permute.xlu2 %1746 }
 0x981   :  { %v1497_v37 = vpack.c.b16 %v1495_v3, %v1495_v3 }
 0x982   :  { %v5723_v18 = vpop.eup %5722  ;;  %v1704_v28 = vpop.xlane.xlu1 %1703 }
 0x983   :  { %5062 = vmatmul.msk.bf16.gmra.mxu0 %vm804_vm11, %v1497_v37  ;;  %v1711_v26 = vsel %vm804_vm11, %v5723_v18, 0.0 }
 0x984   :  { %1712 = vadd.xlane.f32.xlu2 %v1711_v26 }
 0x98a   :  { %v1680_v5 = vpop.xlane.xlu1 %1679  ;;  %v1707_v21 = vpop.xlane.xlu0 %1706 }
 0x98b   :  { %v1688_v39 = vsub.f32 %v1664_v34, %v1680_v5 }
 0x98c   :  { %1786 = vrot.lane.b32.xlu0 %v6520_v17, %s8095_s21  ;;  %v1681_v17 = vsel %vm804_vm11, %v1665_v8, -inf }
 0x98d   :  { %v1698_v16 = vmul.f32 1.442695, %v1688_v39 }
 0x98f   :  { %5724 = vpow2.f32 %v1698_v16 }
 0x990   :  { %5726 = vrcp.f32 %v1707_v21  ;;  %v1241_v21 = vpop.f32.mrf.mxu1 }
 0x991   :  { %5728 = vrcp.f32 %v1704_v28 }
 0x995   :  { %v5725_v20 = vpop.eup %5724 }
 0x996   :  { %v1714_v59 = vsel %vm804_vm11, %v5725_v20, 0.0  ;;  %v5727_v11 = vpop.eup %5726 }
 0x997   :  { %1715 = vadd.xlane.f32.xlu1 %v1714_v59  ;;  %v5729_v42 = vpop.eup %5728  ;;  %v1727_v45 = vmul.f32 %v5727_v11, %v6797_v47 }
 0x998   :  { %v1726_v34 = vmul.f32 %v5729_v42, %v6792_v1  ;;  %v1243_v59 = vpop.f32.mrf.mxu1 }
 0x999   :  { %v1733_v49 = vpack.c.bf16 %v1727_v45, %v1727_v45 }
 0x99a   :  { %v1732_v52 = vpack.c.bf16 %v1726_v34, %v1726_v34 }
 0x99b   :  { %v1742_v51 = vunpack.c.l.b16 %v1733_v49  ;;  %v1281_v49 = vadd.f32 %v6750_v4, %v1241_v21 }
 0x99c   :  { %1788 = vrot.lane.b32.xlu2 %v6514_v12, %s8095_s21  ;;  %v1741_v55 = vunpack.c.l.b16 %v1732_v52 }
 0x99e   :  { %v1744_v50 = vpack.c.b16 %v1742_v51, %v1741_v55 }
 0x99f   :  { %1682 = vmax.xlane.f32.xlu1 %v1681_v17 }
 0x9a0   :  { %v1246_v42 = vpop.f32.mrf.mxu1 }
 0x9a2   :  { %v1749_v44 = vpop.permute.xlu1 %1748 }
 0x9a3   :  { %v1758_v53 = vsel %vm900_vm2, %v1749_v44, 0 }
 0x9a4   :  { %1766 = vmatpush.bf16.msrb.mxu0 %v1758_v53 }
 0x9a8   :  { %1767 = vmatpush.bf16.msrb.mxu0 %v1747_v46  ;;  %v1286_v46 = vadd.f32 %v6760_v36, %v1246_v42 }
 0x9ab   :  { %5074 = vmatmul.msk.bf16.vlgmr.msrb.gmra.mxu0 %vm804_vm11, %v1744_v50 }
 0x9d0   :  { %v1521_v12 = vpop.f32.mrf.mxu0 }
 0x9d1   :  { %v1531_v47 = vpack.c.bf16 %v1521_v12, %v6781_v19 }
 0x9d3   :  { %5068 = vmatmul.msk.bf16.gmra.mxu1 %vm719_vm3, %v1531_v47 }
 0x9d8   :  { %v1523_v27 = vpop.f32.mrf.mxu0 }
 0x9eb   :  { %v1710_v1 = vpop.xlane.xlu0 %1709 }
 0x9ec   :  { %5730 = vrcp.f32 %v1710_v1 }
 0x9f2   :  { %v5731_v63 = vpop.eup %5730 }
 0x9f3   :  { %v1728_v2 = vmul.f32 %v5731_v63, %v5719_v7 }
 0x9f5   :  { %v1734_v0 = vpack.c.bf16 %v1728_v2, %v1728_v2 }
 0x9f7   :  { %v1713_v41 = vpop.xlane.xlu2 %1712  ;;  %v1743_v22 = vunpack.c.l.b16 %v1734_v0 }
 0x9f8   :  { %5732 = vrcp.f32 %v1713_v41 }
 0x9f9   :  { %v1745_v24 = vpack.c.b16 %v1743_v22, %v1743_v22 }
 0x9fb   :  { %5075 = vmatmul.msk.bf16.gmra.mxu0 %vm804_vm11, %v1745_v24  ;;  %v6848_v24 = vld [vmem:[%s8075_s10] ss:$0 sm:$0xff] }
 0x9fe   :  { %v1787_v19 = vpop.permute.xlu0 %1786  ;;  %v5733_v29 = vpop.eup %5732 }
 0x9ff   :  { %v1789_v25 = vpop.permute.xlu2 %1788  ;;  %v1729_v10 = vmul.f32 %v5733_v29, %v5723_v18 }
 0xa00   :  { %v1798_v31 = vsel %vm900_vm2, %v1789_v25, 0  ;;  %v1526_v23 = vpop.f32.mrf.mxu0 }
 0xa01   :  { %v1532_v56 = vpack.c.bf16 %v1526_v23, %v1523_v27  ;;  %1806 = vmatpush.bf16.msrb.mxu2 %v1798_v31  ;;  %v1735_v61 = vpack.c.bf16 %v1729_v10, %v1729_v10 }
 0xa03   :  { %5069 = vmatmul.msk.bf16.gmra.mxu1 %vm719_vm3, %v1532_v56  ;;  %v1781_v5 = vunpack.c.l.b16 %v1735_v61  ;;  %v1278_v56 = vadd.f32 %v6748_v62, %v1238_v35 }
 0xa05   :  { %1807 = vmatpush.bf16.msrb.mxu2 %v1787_v19 }
 0xa08   :  { %v1528_v40 = vpop.f32.mrf.mxu0 }
 0xa0a   :  { %v1716_v7 = vpop.xlane.xlu1 %1715 }
 0xa0b   :  { %5734 = vrcp.f32 %v1716_v7 }
 0xa11   :  { %v5735_v9 = vpop.eup %5734 }
 0xa12   :  { %v1730_v13 = vmul.f32 %v5735_v9, %v5725_v20  ;;  %v1683_v3 = vpop.xlane.xlu1 %1682 }
 0xa13   :  { %v1689_v37 = vsub.f32 %v1665_v8, %v1683_v3  ;;  %v6834_v8 = vpop.f32.mrf.mxu1 }
 0xa14   :  { %v1736_v28 = vpack.c.bf16 %v1730_v13, %v1730_v13  ;;  %v1283_v13 = vadd.f32 %v6756_v14, %v1243_v59 }
 0xa15   :  { %v1700_v26 = vmul.f32 1.442695, %v1689_v37 }
 0xa16   :  { %v1782_v39 = vunpack.c.l.b16 %v1736_v28 }
 0xa17   :  { %5736 = vpow2.f32 %v1700_v26 }
 0xa18   :  { %v1784_v16 = vpack.c.b16 %v1782_v39, %v1781_v5 }
 0xa1a   :  { %5076 = vmatmul.msk.bf16.vlgmr.msrb.gmra.mxu2 %vm804_vm11, %v1784_v16 }
 0xa1b   :  { %v1557_v17 = vpop.f32.mrf.mxu1 }
 0xa1c   :  { %v1572_v36 = vadd.f32 %v1557_v17, %v6686_v30 }
 0xa1d   :  { %v5737_v18 = vpop.eup %5736 }
 0xa1e   :  { %v1717_v43 = vsel %vm804_vm11, %v5737_v18, 0.0 }
 0xa1f   :  { %1718 = vadd.xlane.f32.xlu0 %v1717_v43 }
 0xa23   :  { %v1559_v34 = vpop.f32.mrf.mxu1 }
 0xa24   :  { %v1573_v40 = vadd.f32 %v1559_v34, %v1278_v56 }
 0xa28   :  { %v1769_v11 = vpop.f32.mrf.mxu0 }
 0xa30   :  { %v1771_v45 = vpop.f32.mrf.mxu0 }
 0xa31   :  { %v1818_v20 = vpack.c.bf16 %v1771_v45, %v1769_v11 }
 0xa33   :  { %5082 = vmatmul.msk.bf16.vlgmr.msrb.gmra.mxu1 %vm719_vm3, %v1818_v20 }
 0xa50   :  { %v1562_v44 = vpop.f32.mrf.mxu1 }
 0xa51   :  { %v1574_v52 = vadd.f32 %v1562_v44, %v1281_v49 }
 0xa58   :  { %v1564_v53 = vpop.f32.mrf.mxu1 }
 0xa59   :  { %v1575_v37 = vadd.f32 %v1564_v53, %v1283_v13 }
 0xa78   :  { %v1774_v51 = vpop.f32.mrf.mxu0 }
 0xa80   :  { %v1567_v55 = vpop.f32.mrf.mxu1  ;;  %v1776_v50 = vpop.f32.mrf.mxu0 }
 0xa81   :  { %v6838_v12 = vadd.f32 %v1567_v55, %v1286_v46  ;;  %v5532_v46 = vld [vmem:[%s8078_s13 + $0x34] sm:$0xf0]  ;;  %v5531_v55 = vld [vmem:[%s8078_s13 + $0x34] sm:$0xf] }
 0xa88   :  { %v6842_v27 = vpop.f32.mrf.mxu1 }
 0xa92   :  { %v1719_v47 = vpop.xlane.xlu0 %1718 }
 0xa93   :  { %5738 = vrcp.f32 %v1719_v47  ;;  %v5113_v47 = vld [vmem:[%s8078_s13 + $0x38] sm:$0xf0] }
 0xa99   :  { %v5739_v1 = vpop.eup %5738 }
 0xa9a   :  { %v1731_v63 = vmul.f32 %v5739_v1, %v5737_v18 }
 0xa9c   :  { %v1737_v2 = vpack.c.bf16 %v1731_v63, %v1731_v63  ;;  %v5116_v63 = vor.u32 %v5531_v55, %v5113_v47 }
 0xa9d   :  { %v1809_v0 = vpop.f32.mrf.mxu2 }
 0xa9e   :  { %v1819_v41 = vpack.c.bf16 %v1809_v0, %v1774_v51  ;;  %v1783_v22 = vunpack.c.l.b16 %v1737_v2  ;;  %v5111_v51 = vld [vmem:[%s8078_s13 + $0x30] sm:$0xf]  ;;  %2128 = vmatpush.bf16.msra.mxu0 %v5116_v63 }
 0xa9f   :  { %v5112_v50 = vor.u32 %v5532_v46, %v5111_v51 }
 0xaa0   :  { %5083 = vmatmul.msk.bf16.gmra.mxu1 %vm719_vm3, %v1819_v41  ;;  %v1785_v4 = vpack.c.b16 %v1783_v22, %v1783_v22  ;;  %v5103_v41 = vld [vmem:[%s8078_s13 + $0x20] sm:$0xf]  ;;  %v5530_v22 = vld [vmem:[%s8078_s13 + $0x24] sm:$0xf0] }
 0xaa1   :  { %2104 = vmatpush.bf16.msra.mxu3 %v5112_v50 }
 0xaa2   :  { %5077 = vmatmul.msk.bf16.gmra.mxu2 %vm804_vm11, %v1785_v4  ;;  %v5529_v4 = vld [vmem:[%s8078_s13 + $0x24] sm:$0xf] }
 0xaa5   :  { %v1811_v62 = vpop.f32.mrf.mxu2 }
 0xab0   :  { %v1845_v25 = vpop.f32.mrf.mxu1 }
 0xab1   :  { %v1860_v31 = vadd.f32 %v1845_v25, %v1572_v36  ;;  %v5104_v36 = vor.u32 %v5530_v22, %v5103_v41  ;;  %v5105_v25 = vld [vmem:[%s8078_s13 + $0x28] sm:$0xf0]  ;;  %v6980_v41 = vld [vmem:[%s8077_s12] ss:$0 sm:$0xff] }
 0xab3   :  { %v1870_v23 = vadd.f32 %v6848_v24, %v1860_v31  ;;  %2105 = vmatpush.bf16.msra.mxu3 %v5104_v36 }
 0xab5   :  { %v6853_v19 = vadd.f32 %v1870_v23, %v6261_v48  ;;  %v5108_v23 = vor.u32 %v5529_v4, %v5105_v25 }
 0xab7   :  { %v1884_v7 = vsel %vm191_vm0, %v6853_v19, 0.0  ;;  %2129 = vmatpush.bf16.msra.mxu0 %v5108_v23 }
 0xab8   :  { %1885 = vadd.xlane.f32.xlu2 %v1884_v7  ;;  %v1847_v30 = vpop.f32.mrf.mxu1  ;;  %v5095_v7 = vld [vmem:[%s8078_s13 + $0x10] sm:$0xf] }
 0xab9   :  { %v1861_v29 = vadd.f32 %v1847_v30, %v1573_v40  ;;  %v5528_v30 = vld [vmem:[%s8078_s13 + $0x14] sm:$0xf0] }
 0xabb   :  { %v1871_v10 = vadd.f32 %v6848_v24, %v1861_v29  ;;  %v5527_v29 = vld [vmem:[%s8078_s13 + $0x14] sm:$0xf] }
 0xabd   :  { %v6859_v58 = vadd.f32 %v1871_v10, %v6268_v60 }
 0xabf   :  { %v1887_v9 = vsel %vm191_vm0, %v6859_v58, 0.0 }
 0xac0   :  { %1888 = vadd.xlane.f32.xlu1 %v1887_v9  ;;  %v5096_v9 = vor.u32 %v5528_v30, %v5095_v7 }
 0xac2   :  { %2106 = vmatpush.bf16.msra.mxu3 %v5096_v9 }
 0xb1d   :  { %v1850_v35 = vpop.f32.mrf.mxu1 }
 0xb1e   :  { %v1862_v48 = vadd.f32 %v1850_v35, %v1574_v52 }
 0xb20   :  { %v1872_v61 = vadd.f32 %v6848_v24, %v1862_v48 }
 0xb22   :  { %v6866_v3 = vadd.f32 %v1872_v61, %v6275_v6 }
 0xb24   :  { %v1890_v28 = vsel %vm191_vm0, %v6866_v3, 0.0 }
 0xb25   :  { %1891 = vadd.xlane.f32.xlu1 %v1890_v28  ;;  %v1814_v60 = vpop.f32.mrf.mxu2  ;;  %v1852_v26 = vpop.f32.mrf.mxu1  ;;  %v5526_v28 = vld [vmem:[%s8078_s13 + $0x4] sm:$0xf0] }
 0xb26   :  { %v1820_v5 = vpack.c.bf16 %v1814_v60, %v1811_v62  ;;  %v1863_v39 = vadd.f32 %v1852_v26, %v1575_v37  ;;  %v5097_v62 = vld [vmem:[%s8078_s13 + $0x18] sm:$0xf0]  ;;  %v5525_v60 = vld [vmem:[%s8078_s13 + $0x4] sm:$0xf]  ;;  %v1288_v26 = vadd.f32 %v6764_v32, %v6834_v8 }
 0xb27   :  { %v5100_v48 = vor.u32 %v5527_v29, %v5097_v62 }
 0xb28   :  { %v1873_v16 = vadd.f32 %v6848_v24, %v1863_v39  ;;  %5084 = vmatmul.msk.bf16.gmra.mxu1 %vm719_vm3, %v1820_v5 }
 0xb29   :  { %2130 = vmatpush.bf16.msra.mxu0 %v5100_v48 }
 0xb2a   :  { %v6873_v21 = vadd.f32 %v1873_v16, %v6282_v15  ;;  %v5089_v16 = vld [vmem:[%s8078_s13 + $0x8] sm:$0xf0] }
 0xb2b   :  { %v1886_v14 = vpop.xlane.xlu2 %1885 }
 0xb2c   :  { %v1902_v6 = vmul.f32 %v1886_v14, %v6210_v54  ;;  %v1893_v18 = vsel %vm191_vm0, %v6873_v21, 0.0 }
 0xb2d   :  { %1894 = vadd.xlane.f32.xlu1 %v1893_v18  ;;  %v1816_v43 = vpop.f32.mrf.mxu2  ;;  %v1577_v18 = vadd.f32 %v6842_v27, %v1288_v26 }
 0xb2e   :  { %v6879_v59 = vsub.f32 %v6853_v19, %v1902_v6  ;;  %v5092_v6 = vor.u32 %v5525_v60, %v5089_v16 }
 0xb30   :  { %v1914_v11 = vmul.f32 %v6879_v59, %v6879_v59  ;;  %2131 = vmatpush.bf16.msra.mxu0 %v5092_v6 }
 0xb32   :  { %v1920_v15 = vsel %vm191_vm0, %v1914_v11, 0.0 }
 0xb33   :  { %v1889_v42 = vpop.xlane.xlu1 %1888 }
 0xb34   :  { %v1903_v45 = vmul.f32 %v1889_v42, %v6210_v54 }
 0xb35   :  { %1921 = vadd.xlane.f32.xlu1 %v1920_v15 }
 0xb36   :  { %v6886_v20 = vsub.f32 %v6859_v58, %v1903_v45 }
 0xb38   :  { %v1915_v17 = vmul.f32 %v6886_v20, %v6886_v20 }
 0xb3a   :  { %v1923_v34 = vsel %vm191_vm0, %v1915_v17, 0.0 }
 0xb3d   :  { %1924 = vadd.xlane.f32.xlu1 %v1923_v34 }
 0xb98   :  { %v1892_v49 = vpop.xlane.xlu1 %1891 }
 0xb99   :  { %v1904_v44 = vmul.f32 %v1892_v49, %v6210_v54 }
 0xb9b   :  { %v6893_v52 = vsub.f32 %v6866_v3, %v1904_v44 }
 0xb9d   :  { %v1916_v53 = vmul.f32 %v6893_v52, %v6893_v52 }
 0xb9f   :  { %v1926_v1 = vsel %vm191_vm0, %v1916_v53, 0.0 }
 0xba0   :  { %1927 = vadd.xlane.f32.xlu0 %v1926_v1  ;;  %v1895_v2 = vpop.xlane.xlu1 %1894  ;;  %v6974_v1 = vld [vmem:[%s8076_s11] ss:$0 sm:$0xff] }
 0xba1   :  { %v1905_v0 = vmul.f32 %v1895_v2, %v6210_v54 }
 0xba3   :  { %v6924_v31 = vsub.f32 %v6873_v21, %v1905_v0 }
 0xba5   :  { %v1855_v56 = vpop.f32.mrf.mxu1  ;;  %v1917_v40 = vmul.f32 %v6924_v31, %v6924_v31 }
 0xba6   :  { %v1864_v10 = vadd.f32 %v1855_v56, %v6838_v12  ;;  %v5087_v12 = vld [vmem:[%s8078_s13] sm:$0xf] }
 0xba7   :  { %v1929_v35 = vsel %vm191_vm0, %v1917_v40, 0.0  ;;  %v5088_v39 = vor.u32 %v5526_v28, %v5087_v12 }
 0xba8   :  { %v1874_v61 = vadd.f32 %v6848_v24, %v1864_v10  ;;  %1930 = vadd.xlane.f32.xlu2 %v1929_v35  ;;  %v1922_v13 = vpop.xlane.xlu1 %1921 }
 0xba9   :  { %v1938_v37 = vmul.f32 %v1922_v13, %v6210_v54  ;;  %2107 = vmatpush.bf16.msra.mxu3 %v5088_v39 }
 0xbaa   :  { %v6956_v5 = vadd.f32 %v1874_v61, %v6416_v38 }
 0xbab   :  { %v1944_v14 = vadd.f32 1e-05, %v1938_v37 }
 0xbac   :  { %v1896_v43 = vsel %vm191_vm0, %v6956_v5, 0.0 }
 0xbad   :  { %5740 = vrsqrt.f32 %v1944_v14  ;;  %1897 = vadd.xlane.f32.xlu1 %v1896_v43  ;;  %v1857_v11 = vpop.f32.mrf.mxu1  ;;  %vm1956_vm13 = vweird.f32 %v1944_v14 }
 0xbae   :  { %v1865_v32 = vadd.f32 %v1857_v11, %v1577_v18 }
 0xbb0   :  { %v1875_v38 = vadd.f32 %v6848_v24, %v1865_v32  ;;  %v1925_v8 = vpop.xlane.xlu1 %1924 }
 0xbb1   :  { %v1939_v42 = vmul.f32 %v1925_v8, %v6210_v54 }
 0xbb2   :  { %v6967_v45 = vadd.f32 %v1875_v38, %v6424_v57 }
 0xbb3   :  { %v5741_v15 = vpop.eup %5740  ;;  %v1945_v17 = vadd.f32 1e-05, %v1939_v42 }
 0xbb4   :  { %v1951_v27 = vmul.f32 %v5741_v15, %v1944_v14  ;;  %v1899_v34 = vsel %vm191_vm0, %v6967_v45, 0.0  ;;  %vm1957_vm12 = vweird.f32 %v5741_v15 }
 0xbb5   :  { %5742 = vrsqrt.f32 %v1945_v17  ;;  %1900 = vadd.xlane.f32.xlu0 %v1899_v34  ;;  %vm1958_vm14 = vmor %vm1956_vm13, %vm1957_vm12  ;;  %vm1966_vm1 = vweird.f32 %v1945_v17 }
 0xbb6   :  { %v1952_v49 = vmul.f32 %v5741_v15, %v1951_v27 }
 0xbb8   :  { %v1953_v44 = vmul.f32 0.5, %v1952_v49 }
 0xbba   :  { %v1954_v53 = vsub.f32 1.5, %v1953_v44 }
 0xbbb   :  { %v5743_v51 = vpop.eup %5742 }
 0xbbc   :  { %v1955_v46 = vmul.f32 %v5741_v15, %v1954_v53  ;;  %v1961_v24 = vmul.f32 %v5743_v51, %v1945_v17  ;;  %vm1967_vm15 = vweird.f32 %v5743_v51 }
 0xbbd   :  { %vm1968_vm4 = vmor %vm1966_vm1, %vm1967_vm15 }
 0xbbe   :  { %v1962_v55 = vmul.f32 %v5743_v51, %v1961_v24  ;;  %v1959_v57 = vsel %vm1958_vm14, %v5741_v15, %v1955_v46  ;;  %v5540_v46 = vld [vmem:[%s8080_s15 + $0x38] sm:$0xff]  ;;  %v5546_v24 = vld [vmem:[%s8080_s15 + $0x68] sm:$0xff] }
 0xbbf   :  { %v2010_v63 = vmul.f32 %v1959_v57, %v6879_v59  ;;  %2538 = vmatpush.bf16.msra.mxu2 %v5540_v46  ;;  %v2045_v57 = vld [vmem:[%s8079_s14] sm:$0x3] }
 0xbc0   :  { %v1963_v50 = vmul.f32 0.5, %v1962_v55  ;;  %v5539_v55 = vld [vmem:[%s8080_s15 + $0x30] sm:$0xff] }
 0xbc1   :  { %v2019_v22 = vmul.f32 %v6974_v1, %v2010_v63  ;;  %v7037_v63 = vperm.slane %v2045_v57, 1 }
 0xbc2   :  { %v1964_v47 = vsub.f32 1.5, %v1963_v50  ;;  %v5545_v50 = vld [vmem:[%s8080_s15 + $0x60] sm:$0xff] }
 0xbc3   :  { %v2028_v25 = vadd.f32 %v6980_v41, %v2019_v22  ;;  %2539 = vmatpush.bf16.msra.mxu2 %v5539_v55  ;;  %v5537_v22 = vld [vmem:[%s8080_s15 + $0x20] sm:$0xff] }
 0xbc4   :  { %v1965_v2 = vmul.f32 %v5743_v51, %v1964_v47  ;;  %v5538_v47 = vld [vmem:[%s8080_s15 + $0x28] sm:$0xff] }
 0xbc6   :  { %v1969_v0 = vsel %vm1968_vm4, %v5743_v51, %v1965_v2  ;;  %v5544_v2 = vld [vmem:[%s8080_s15 + $0x58] sm:$0xff] }
 0xbc7   :  { %v2011_v4 = vmul.f32 %v1969_v0, %v6886_v20  ;;  %2540 = vmatpush.bf16.msra.mxu2 %v5538_v47 }
 0xbc9   :  { %v2020_v36 = vmul.f32 %v6974_v1, %v2011_v4 }
 0xbcb   :  { %v2029_v23 = vadd.f32 %v6980_v41, %v2020_v36  ;;  %2541 = vmatpush.bf16.msra.mxu2 %v5537_v22  ;;  %v5543_v36 = vld [vmem:[%s8080_s15 + $0x50] sm:$0xff] }
 0xbcd   :  { %v2034_v59 = vpack.c.bf16 %v2029_v23, %v2028_v25  ;;  %v7052_v23 = vperm.slane %v2045_v57, 0 }
 0xbcf   :  { %5117 = vmatmul.msk.bf16.vlgmr.msra.gmra.mxu3 %vm191_vm0, %v2034_v59  ;;  %5120 = vmatmul.msk.bf16.vlgmr.msra.gmra.mxu0 %vm191_vm0, %v2034_v59  ;;  %v5536_v59 = vld [vmem:[%s8080_s15 + $0x18] sm:$0xff] }
 0xbd0   :  { %2542 = vmatpush.bf16.msra.mxu2 %v5536_v59 }
 0xc13   :  { %v1928_v56 = vpop.xlane.xlu0 %1927 }
 0xc14   :  { %v1940_v40 = vmul.f32 %v1928_v56, %v6210_v54 }
 0xc16   :  { %v1946_v7 = vadd.f32 1e-05, %v1940_v40 }
 0xc18   :  { %5744 = vrsqrt.f32 %v1946_v7  ;;  %vm1976_vm6 = vweird.f32 %v1946_v7 }
 0xc1b   :  { %v1931_v30 = vpop.xlane.xlu2 %1930 }
 0xc1c   :  { %v1941_v29 = vmul.f32 %v1931_v30, %v6210_v54 }
 0xc1e   :  { %v5745_v20 = vpop.eup %5744  ;;  %v1947_v10 = vadd.f32 1e-05, %v1941_v29 }
 0xc1f   :  { %v1971_v9 = vmul.f32 %v5745_v20, %v1946_v7  ;;  %vm1977_vm5 = vweird.f32 %v5745_v20  ;;  %v5542_v7 = vld [vmem:[%s8080_s15 + $0x48] sm:$0xff] }
 0xc20   :  { %5746 = vrsqrt.f32 %v1947_v10  ;;  %v1898_v62 = vpop.xlane.xlu1 %1897  ;;  %vm1978_vm7 = vmor %vm1976_vm6, %vm1977_vm5  ;;  %vm1986_vm9 = vweird.f32 %v1947_v10 }
 0xc21   :  { %v1972_v35 = vmul.f32 %v5745_v20, %v1971_v9  ;;  %v1906_v48 = vmul.f32 %v1898_v62, %v6210_v54  ;;  %v5541_v62 = vld [vmem:[%s8080_s15 + $0x40] sm:$0xff] }
 0xc23   :  { %v1973_v61 = vmul.f32 0.5, %v1972_v35  ;;  %v6993_v13 = vsub.f32 %v6956_v5, %v1906_v48 }
 0xc25   :  { %v1974_v37 = vsub.f32 1.5, %v1973_v61  ;;  %v1918_v12 = vmul.f32 %v6993_v13, %v6993_v13  ;;  %v5534_v61 = vld [vmem:[%s8080_s15 + $0x8] sm:$0xff] }
 0xc26   :  { %v5747_v28 = vpop.eup %5746 }
 0xc27   :  { %v1975_v60 = vmul.f32 %v5745_v20, %v1974_v37  ;;  %v1981_v26 = vmul.f32 %v5747_v28, %v1947_v10  ;;  %v1932_v39 = vsel %vm191_vm0, %v1918_v12, 0.0  ;;  %vm1987_vm8 = vweird.f32 %v5747_v28 }
 0xc28   :  { %1933 = vadd.xlane.f32.xlu2 %v1932_v39  ;;  %v1901_v16 = vpop.xlane.xlu0 %1900  ;;  %vm1988_vm10 = vmor %vm1986_vm9, %vm1987_vm8  ;;  %v5533_v39 = vld [vmem:[%s8080_s15] sm:$0xff] }
 0xc29   :  { %v1982_v14 = vmul.f32 %v5747_v28, %v1981_v26  ;;  %v1907_v6 = vmul.f32 %v1901_v16, %v6210_v54  ;;  %v1979_v18 = vsel %vm1978_vm7, %v5745_v20, %v1975_v60  ;;  %v5535_v20 = vld [vmem:[%s8080_s15 + $0x10] sm:$0xff] }
 0xc2a   :  { %v2012_v8 = vmul.f32 %v1979_v18, %v6893_v52  ;;  %v5548_v52 = vld [vmem:[%s8080_s15 + $0x78] sm:$0xff]  ;;  %2543 = vmatpush.bf16.msra.mxu2 %v5535_v20 }
 0xc2b   :  { %v1983_v43 = vmul.f32 0.5, %v1982_v14  ;;  %v7000_v11 = vsub.f32 %v6967_v45, %v1907_v6  ;;  %2562 = vmatpush.bf16.msra.mxu1 %v5548_v52 }
 0xc2c   :  { %v2021_v34 = vmul.f32 %v6974_v1, %v2012_v8 }
 0xc2d   :  { %v1984_v32 = vsub.f32 1.5, %v1983_v43  ;;  %v1919_v38 = vmul.f32 %v7000_v11, %v7000_v11 }
 0xc2e   :  { %v2030_v44 = vadd.f32 %v6980_v41, %v2021_v34  ;;  %2544 = vmatpush.bf16.msra.mxu2 %v5534_v61 }
 0xc2f   :  { %v1985_v42 = vmul.f32 %v5747_v28, %v1984_v32  ;;  %v1935_v15 = vsel %vm191_vm0, %v1919_v38, 0.0 }
 0xc30   :  { %1936 = vadd.xlane.f32.xlu1 %v1935_v15 }
 0xc31   :  { %v1989_v17 = vsel %vm1988_vm10, %v5747_v28, %v1985_v42 }
 0xc32   :  { %v2013_v27 = vmul.f32 %v1989_v17, %v6924_v31  ;;  %v5547_v31 = vld [vmem:[%s8080_s15 + $0x70] sm:$0xff]  ;;  %2545 = vmatpush.bf16.msra.mxu2 %v5533_v39 }
 0xc33   :  { %2563 = vmatpush.bf16.msra.mxu1 %v5547_v31 }
 0xc34   :  { %v2022_v49 = vmul.f32 %v6974_v1, %v2013_v27 }
 0xc36   :  { %v2031_v53 = vadd.f32 %v6980_v41, %v2022_v49 }
 0xc37   :  { %2564 = vmatpush.bf16.msra.mxu1 %v5546_v24 }
 0xc38   :  { %v2035_v51 = vpack.c.bf16 %v2031_v53, %v2030_v44 }
 0xc3a   :  { %5118 = vmatmul.msk.bf16.gmra.mxu3 %vm191_vm0, %v2035_v51  ;;  %5121 = vmatmul.msk.bf16.gmra.mxu0 %vm191_vm0, %v2035_v51 }
 0xc3b   :  { %2565 = vmatpush.bf16.msra.mxu1 %v5545_v50 }
 0xc3f   :  { %2566 = vmatpush.bf16.msra.mxu1 %v5544_v2 }
 0xc43   :  { %2567 = vmatpush.bf16.msra.mxu1 %v5543_v36 }
 0xc47   :  { %2568 = vmatpush.bf16.msra.mxu1 %v5542_v7 }
 0xc4b   :  { %2569 = vmatpush.bf16.msra.mxu1 %v5541_v62 }
 0xc4c   :  { %v2133_v0 = vpop.f32.mrf.mxu0 }
 0xc4d   :  { %v7046_v4 = vadd.f32 %v2133_v0, %v7037_v63 }
 0xc4f   :  { %v5124_v25 = vmul.f32 -1.702, %v7046_v4 }
 0xc51   :  { %v2174_v56 = vmul.f32 1.442695, %v5124_v25 }
 0xc52   :  { %v2109_v40 = vpop.f32.mrf.mxu3 }
 0xc53   :  { %5748 = vpow2.f32 %v2174_v56  ;;  %v7061_v30 = vadd.f32 %v2109_v40, %v7052_v23 }
 0xc54   :  { %v2135_v29 = vpop.f32.mrf.mxu0 }
 0xc55   :  { %v5123_v10 = vmul.f32 -1.702, %v7061_v30  ;;  %v7068_v9 = vadd.f32 %v2135_v29, %v7037_v63 }
 0xc57   :  { %v2172_v35 = vmul.f32 1.442695, %v5123_v10  ;;  %v5126_v48 = vmul.f32 -1.702, %v7068_v9 }
 0xc59   :  { %v5749_v37 = vpop.eup %5748  ;;  %5750 = vpow2.f32 %v2172_v35  ;;  %v2178_v12 = vmul.f32 1.442695, %v5126_v48 }
 0xc5a   :  { %v2197_v28 = vadd.f32 1.0, %v5749_v37  ;;  %v2111_v60 = vpop.f32.mrf.mxu3 }
 0xc5b   :  { %5752 = vpow2.f32 %v2178_v12  ;;  %v7078_v26 = vadd.f32 %v2111_v60, %v7052_v23 }
 0xc5c   :  { %5754 = vrcp.f32 %v2197_v28  ;;  %v2232_v53 = vand.u32 2147483647, %v2197_v28  ;;  %v2234_v46 = vand.u32 2147483648, %v2197_v28  ;;  %vm2228_vm13 = vweird.f32 %v2197_v28 }
 0xc5d   :  { %v5125_v16 = vmul.f32 -1.702, %v7078_v26 }
 0xc5e   :  { %vm2233_vm15 = vcmp.eq.f32.partialorder %v2232_v53, 8.507059e+37  ;;  %v2235_v36 = vor.u32 1.1754944e-38, %v2234_v46 }
 0xc5f   :  { %v5751_v14 = vpop.eup %5750  ;;  %v2176_v6 = vmul.f32 1.442695, %v5125_v16 }
 0xc60   :  { %v2196_v18 = vadd.f32 1.0, %v5751_v14 }
 0xc61   :  { %v5753_v43 = vpop.eup %5752  ;;  %5756 = vpow2.f32 %v2176_v6 }
 0xc62   :  { %v5755_v32 = vpop.eup %5754  ;;  %5758 = vrcp.f32 %v2196_v18  ;;  %v2199_v8 = vadd.f32 1.0, %v5753_v43  ;;  %vm2213_vm5 = vweird.f32 %v2196_v18  ;;  %v2219_v56 = vand.u32 2147483648, %v2196_v18 }
 0xc63   :  { %v2224_v38 = vmul.f32 %v5755_v32, %v2197_v28  ;;  %vm2229_vm12 = vweird.f32 %v5755_v32  ;;  %v2217_v29 = vand.u32 2147483647, %v2196_v18 }
 0xc64   :  { %5760 = vrcp.f32 %v2199_v8  ;;  %vm7084_vm14 = vmor %vm2228_vm13, %vm2229_vm12  ;;  %v2264_v50 = vand.u32 2147483648, %v2199_v8  ;;  %v2262_v22 = vand.u32 2147483647, %v2199_v8  ;;  %vm2258_vm6 = vweird.f32 %v2199_v8 }
 0xc65   :  { %v2225_v42 = vsub.f32 1.0, %v2224_v38  ;;  %v2220_v39 = vor.u32 1.1754944e-38, %v2219_v56  ;;  %vm2218_vm12 = vcmp.eq.f32.partialorder %v2217_v29, 8.507059e+37 }
 0xc66   :  { %v2265_v20 = vor.u32 1.1754944e-38, %v2264_v50  ;;  %vm2263_vm9 = vcmp.eq.f32.partialorder %v2262_v22, 8.507059e+37 }
 0xc67   :  { %v5757_v15 = vpop.eup %5756  ;;  %v2226_v27 = vmul.f32 %v5755_v32, %v2225_v42 }
 0xc68   :  { %v5759_v17 = vpop.eup %5758  ;;  %v2198_v34 = vadd.f32 1.0, %v5757_v15 }
 0xc69   :  { %v2209_v49 = vmul.f32 %v5759_v17, %v2196_v18  ;;  %v2227_v52 = vadd.f32 %v5755_v32, %v2226_v27  ;;  %vm2214_vm4 = vweird.f32 %v5759_v17 }
 0xc6a   :  { %5762 = vrcp.f32 %v2198_v34  ;;  %v5761_v44 = vpop.eup %5760  ;;  %vm7090_vm8 = vmor %vm2213_vm5, %vm2214_vm4  ;;  %v2247_v48 = vand.u32 2147483647, %v2198_v34  ;;  %v2249_v61 = vand.u32 2147483648, %v2198_v34  ;;  %vm2243_vm13 = vweird.f32 %v2198_v34 }
 0xc6b   :  { %v2210_v51 = vsub.f32 1.0, %v2209_v49  ;;  %v2254_v31 = vmul.f32 %v5761_v44, %v2199_v8  ;;  %v2231_v2 = vsel %vm7084_vm14, %v5755_v32, %v2227_v52  ;;  %vm2259_vm1 = vweird.f32 %v5761_v44 }
 0xc6c   :  { %v2236_v7 = vsel %vm2233_vm15, %v2235_v36, %v2231_v2  ;;  %vm2260_vm7 = vmor %vm2258_vm6, %vm2259_vm1  ;;  %v2250_v43 = vor.u32 1.1754944e-38, %v2249_v61  ;;  %vm2248_vm15 = vcmp.eq.f32.partialorder %v2247_v48, 8.507059e+37 }
 0xc6d   :  { %v2211_v24 = vmul.f32 %v5759_v17, %v2210_v51  ;;  %v2255_v55 = vsub.f32 1.0, %v2254_v31  ;;  %v2389_v60 = vmul.f32 %v2236_v7, %v7046_v4 }
 0xc6f   :  { %v2256_v0 = vmul.f32 %v5761_v44, %v2255_v55  ;;  %v2212_v25 = vadd.f32 %v5759_v17, %v2211_v24 }
 0xc70   :  { %v5763_v47 = vpop.eup %5762 }
 0xc71   :  { %v2239_v59 = vmul.f32 %v5763_v47, %v2198_v34  ;;  %v2257_v40 = vadd.f32 %v5761_v44, %v2256_v0  ;;  %v2216_v37 = vsel %vm7090_vm8, %v5759_v17, %v2212_v25  ;;  %vm2244_vm10 = vweird.f32 %v5763_v47 }
 0xc72   :  { %v2221_v6 = vsel %vm2218_vm12, %v2220_v39, %v2216_v37  ;;  %vm2245_vm14 = vmor %vm2243_vm13, %vm2244_vm10 }
 0xc73   :  { %v2240_v10 = vsub.f32 1.0, %v2239_v59  ;;  %v2261_v35 = vsel %vm2260_vm7, %v5761_v44, %v2257_v40  ;;  %v2388_v8 = vmul.f32 %v2221_v6, %v7061_v30 }
 0xc74   :  { %v2266_v12 = vsel %vm2263_vm9, %v2265_v20, %v2261_v35 }
 0xc75   :  { %v2241_v28 = vmul.f32 %v5763_v47, %v2240_v10  ;;  %v2391_v16 = vmul.f32 %v2266_v12, %v7068_v9 }
 0xc77   :  { %v2242_v14 = vadd.f32 %v5763_v47, %v2241_v28  ;;  %v2401_v18 = vpack.c.bf16 %v2391_v16, %v2389_v60 }
 0xc79   :  { %v2246_v32 = vsel %vm2245_vm14, %v5763_v47, %v2242_v14  ;;  %2570 = vmatmul.bf16.vlgmr.msra.gmra.mxu1 %v2401_v18 }
 0xc7a   :  { %v2251_v38 = vsel %vm2248_vm15, %v2250_v43, %v2246_v32 }
 0xc7b   :  { %v2390_v42 = vmul.f32 %v2251_v38, %v7078_v26 }
 0xc7d   :  { %v2400_v15 = vpack.c.bf16 %v2390_v42, %v2388_v8 }
 0xc7f   :  { %2546 = vmatmul.bf16.vlgmr.msra.gmra.mxu2 %v2400_v15 }
 0xc9b   :  { %v1934_v4 = vpop.xlane.xlu2 %1933 }
 0xc9c   :  { %v1942_v9 = vmul.f32 %v1934_v4, %v6210_v54 }
 0xc9e   :  { %v1948_v17 = vadd.f32 1e-05, %v1942_v9 }
 0xca0   :  { %5764 = vrsqrt.f32 %v1948_v17  ;;  %vm1996_vm4 = vweird.f32 %v1948_v17 }
 0xca3   :  { %v1937_v27 = vpop.xlane.xlu1 %1936 }
 0xca4   :  { %v1943_v34 = vmul.f32 %v1937_v27, %v6210_v54 }
 0xca6   :  { %v5765_v49 = vpop.eup %5764  ;;  %v1949_v44 = vadd.f32 1e-05, %v1943_v34 }
 0xca7   :  { %v1991_v53 = vmul.f32 %v5765_v49, %v1948_v17  ;;  %vm1997_vm1 = vweird.f32 %v5765_v49 }
 0xca8   :  { %5766 = vrsqrt.f32 %v1949_v44  ;;  %vm1998_vm5 = vmor %vm1996_vm4, %vm1997_vm1  ;;  %vm2006_vm7 = vweird.f32 %v1949_v44 }
 0xca9   :  { %v1992_v51 = vmul.f32 %v5765_v49, %v1991_v53 }
 0xcab   :  { %v1993_v52 = vmul.f32 0.5, %v1992_v51 }
 0xcad   :  { %v1994_v31 = vsub.f32 1.5, %v1993_v52 }
 0xcae   :  { %v5767_v30 = vpop.eup %5766 }
 0xcaf   :  { %v1995_v46 = vmul.f32 %v5765_v49, %v1994_v31  ;;  %v2001_v26 = vmul.f32 %v5767_v30, %v1949_v44  ;;  %vm2007_vm6 = vweird.f32 %v5767_v30 }
 0xcb0   :  { %vm2008_vm8 = vmor %vm2006_vm7, %vm2007_vm6 }
 0xcb1   :  { %v2002_v24 = vmul.f32 %v5767_v30, %v2001_v26  ;;  %v1999_v55 = vsel %vm1998_vm5, %v5765_v49, %v1995_v46 }
 0xcb2   :  { %v2014_v47 = vmul.f32 %v1999_v55, %v6993_v13 }
 0xcb3   :  { %v2003_v57 = vmul.f32 0.5, %v2002_v24 }
 0xcb4   :  { %v2023_v56 = vmul.f32 %v6974_v1, %v2014_v47 }
 0xcb5   :  { %v2004_v50 = vsub.f32 1.5, %v2003_v57 }
 0xcb6   :  { %v2032_v20 = vadd.f32 %v6980_v41, %v2023_v56 }
 0xcb7   :  { %v2005_v2 = vmul.f32 %v5767_v30, %v2004_v50  ;;  %v2138_v0 = vpop.f32.mrf.mxu0 }
 0xcb8   :  { %v7104_v22 = vadd.f32 %v2138_v0, %v7037_v63 }
 0xcb9   :  { %v2009_v36 = vsel %vm2008_vm8, %v5767_v30, %v2005_v2 }
 0xcba   :  { %v2015_v25 = vmul.f32 %v2009_v36, %v7000_v11  ;;  %v5128_v59 = vmul.f32 -1.702, %v7104_v22 }
 0xcbc   :  { %v2182_v40 = vmul.f32 1.442695, %v5128_v59  ;;  %v2024_v7 = vmul.f32 %v6974_v1, %v2015_v25 }
 0xcbd   :  { %v2114_v29 = vpop.f32.mrf.mxu3 }
 0xcbe   :  { %5768 = vpow2.f32 %v2182_v40  ;;  %v7111_v13 = vadd.f32 %v2114_v29, %v7052_v23  ;;  %v2033_v10 = vadd.f32 %v6980_v41, %v2024_v7 }
 0xcbf   :  { %v2140_v62 = vpop.f32.mrf.mxu0 }
 0xcc0   :  { %v5127_v35 = vmul.f32 -1.702, %v7111_v13  ;;  %v7117_v11 = vadd.f32 %v2140_v62, %v7037_v63  ;;  %v2036_v48 = vpack.c.bf16 %v2033_v10, %v2032_v20 }
 0xcc2   :  { %v2180_v61 = vmul.f32 1.442695, %v5127_v35  ;;  %v5130_v37 = vmul.f32 -1.702, %v7117_v11  ;;  %5119 = vmatmul.msk.bf16.gmra.mxu3 %vm191_vm0, %v2036_v48  ;;  %5122 = vmatmul.msk.bf16.gmra.mxu0 %vm191_vm0, %v2036_v48 }
 0xcc4   :  { %v5769_v1 = vpop.eup %5768  ;;  %5770 = vpow2.f32 %v2180_v61  ;;  %v2186_v12 = vmul.f32 1.442695, %v5130_v37 }
 0xcc5   :  { %v2201_v28 = vadd.f32 1.0, %v5769_v1  ;;  %v2116_v60 = vpop.f32.mrf.mxu3 }
 0xcc6   :  { %5772 = vpow2.f32 %v2186_v12  ;;  %v7123_v41 = vadd.f32 %v2116_v60, %v7052_v23 }
 0xcc7   :  { %5774 = vrcp.f32 %v2201_v28  ;;  %v2292_v34 = vand.u32 2147483647, %v2201_v28  ;;  %v2294_v51 = vand.u32 2147483648, %v2201_v28  ;;  %vm2288_vm10 = vweird.f32 %v2201_v28 }
 0xcc8   :  { %v5129_v39 = vmul.f32 -1.702, %v7123_v41 }
 0xcc9   :  { %vm2293_vm13 = vcmp.eq.f32.partialorder %v2292_v34, 8.507059e+37  ;;  %v2295_v50 = vor.u32 1.1754944e-38, %v2294_v51 }
 0xcca   :  { %v5771_v16 = vpop.eup %5770  ;;  %v2184_v14 = vmul.f32 1.442695, %v5129_v39 }
 0xccb   :  { %v2200_v6 = vadd.f32 1.0, %v5771_v16 }
 0xccc   :  { %v5773_v18 = vpop.eup %5772  ;;  %5776 = vpow2.f32 %v2184_v14 }
 0xccd   :  { %v5775_v43 = vpop.eup %5774  ;;  %5778 = vrcp.f32 %v2200_v6  ;;  %v2203_v38 = vadd.f32 1.0, %v5773_v18  ;;  %vm2273_vm1 = vweird.f32 %v2200_v6  ;;  %v2279_v0 = vand.u32 2147483648, %v2200_v6 }
 0xcce   :  { %v2284_v32 = vmul.f32 %v5775_v43, %v2201_v28  ;;  %vm2289_vm9 = vweird.f32 %v5775_v43  ;;  %v2277_v59 = vand.u32 2147483647, %v2200_v6 }
 0xccf   :  { %5780 = vrcp.f32 %v2203_v38  ;;  %vm7126_vm12 = vmor %vm2288_vm10, %vm2289_vm9  ;;  %v2324_v46 = vand.u32 2147483648, %v2203_v38  ;;  %v2322_v57 = vand.u32 2147483647, %v2203_v38  ;;  %vm2318_vm4 = vweird.f32 %v2203_v38 }
 0xcd0   :  { %v2285_v8 = vsub.f32 1.0, %v2284_v32  ;;  %v2280_v37 = vor.u32 1.1754944e-38, %v2279_v0  ;;  %vm2278_vm9 = vcmp.eq.f32.partialorder %v2277_v59, 8.507059e+37 }
 0xcd1   :  { %v2325_v56 = vor.u32 1.1754944e-38, %v2324_v46  ;;  %vm2323_vm7 = vcmp.eq.f32.partialorder %v2322_v57, 8.507059e+37 }
 0xcd2   :  { %v5777_v42 = vpop.eup %5776  ;;  %v2286_v4 = vmul.f32 %v5775_v43, %v2285_v8 }
 0xcd3   :  { %v5779_v15 = vpop.eup %5778  ;;  %v2202_v9 = vadd.f32 1.0, %v5777_v42 }
 0xcd4   :  { %v2269_v17 = vmul.f32 %v5779_v15, %v2200_v6  ;;  %v2287_v44 = vadd.f32 %v5775_v43, %v2286_v4  ;;  %vm2274_vm15 = vweird.f32 %v5779_v15 }
 0xcd5   :  { %5782 = vrcp.f32 %v2202_v9  ;;  %v5781_v27 = vpop.eup %5780  ;;  %vm7132_vm6 = vmor %vm2273_vm1, %vm2274_vm15  ;;  %v2307_v20 = vand.u32 2147483647, %v2202_v9  ;;  %v2309_v10 = vand.u32 2147483648, %v2202_v9  ;;  %vm2303_vm10 = vweird.f32 %v2202_v9 }
 0xcd6   :  { %v2270_v49 = vsub.f32 1.0, %v2269_v17  ;;  %v2314_v53 = vmul.f32 %v5781_v27, %v2203_v38  ;;  %v2291_v24 = vsel %vm7126_vm12, %v5775_v43, %v2287_v44  ;;  %vm2319_vm14 = vweird.f32 %v5781_v27 }
 0xcd7   :  { %v2296_v25 = vsel %vm2293_vm13, %v2295_v50, %v2291_v24  ;;  %vm2320_vm5 = vmor %vm2318_vm4, %vm2319_vm14  ;;  %v2310_v60 = vor.u32 1.1754944e-38, %v2309_v10  ;;  %vm2308_vm13 = vcmp.eq.f32.partialorder %v2307_v20, 8.507059e+37 }
 0xcd8   :  { %v2271_v52 = vmul.f32 %v5779_v15, %v2270_v49  ;;  %v2315_v31 = vsub.f32 1.0, %v2314_v53  ;;  %v2393_v61 = vmul.f32 %v2296_v25, %v7104_v22  ;;  %v7145_v22 = vld [vmem:[%s8081_s16] ss:$0 sm:$0xff] }
 0xcda   :  { %v2316_v55 = vmul.f32 %v5781_v27, %v2315_v31  ;;  %v2272_v47 = vadd.f32 %v5779_v15, %v2271_v52 }
 0xcdb   :  { %v5783_v26 = vpop.eup %5782 }
 0xcdc   :  { %v2299_v2 = vmul.f32 %v5783_v26, %v2202_v9  ;;  %v2317_v36 = vadd.f32 %v5781_v27, %v2316_v55  ;;  %v2276_v62 = vsel %vm7132_vm6, %v5779_v15, %v2272_v47  ;;  %vm2304_vm8 = vweird.f32 %v5783_v26 }
 0xcdd   :  { %v2281_v28 = vsel %vm2278_vm9, %v2280_v37, %v2276_v62  ;;  %vm2305_vm12 = vmor %vm2303_vm10, %vm2304_vm8 }
 0xcde   :  { %v2300_v40 = vsub.f32 1.0, %v2299_v2  ;;  %v2321_v29 = vsel %vm2320_vm5, %v5781_v27, %v2317_v36  ;;  %v2392_v6 = vmul.f32 %v2281_v28, %v7111_v13 }
 0xcdf   :  { %v2326_v35 = vsel %vm2323_vm7, %v2325_v56, %v2321_v29 }
 0xce0   :  { %v2301_v48 = vmul.f32 %v5783_v26, %v2300_v40  ;;  %v2395_v1 = vmul.f32 %v2326_v35, %v7117_v11 }
 0xce2   :  { %v2302_v12 = vadd.f32 %v5783_v26, %v2301_v48  ;;  %v2403_v39 = vpack.c.bf16 %v2395_v1, %v2393_v61 }
 0xce4   :  { %v2306_v16 = vsel %vm2305_vm12, %v5783_v26, %v2302_v12  ;;  %2575 = vmatmul.bf16.gmra.mxu1 %v2403_v39 }
 0xce5   :  { %v2311_v14 = vsel %vm2308_vm13, %v2310_v60, %v2306_v16 }
 0xce6   :  { %v2394_v18 = vmul.f32 %v2311_v14, %v7123_v41 }
 0xce8   :  { %v2402_v43 = vpack.c.bf16 %v2394_v18, %v2392_v6 }
 0xcea   :  { %2551 = vmatmul.bf16.gmra.mxu2 %v2402_v43 }
 0xcf6   :  { %v2571_v11 = vpop.f32.mrf.mxu1 }
 0xcfe   :  { %v2573_v4 = vpop.f32.mrf.mxu1 }
 0xd02   :  { %v2547_v32 = vpop.f32.mrf.mxu2 }
 0xd03   :  { %v2548_v38 = vadd.f32 %v7145_v22, %v2547_v32 }
 0xd05   :  { %v2572_v8 = vadd.f32 %v2571_v11, %v2548_v38 }
 0xd07   :  { %v7149_v42 = vadd.f32 %v2572_v8, %v6853_v19 }
 0xd09   :  { %v2596_v13 = vsel %vm191_vm0, %v7149_v42, 0.0 }
 0xd0a   :  { %v2549_v15 = vpop.f32.mrf.mxu2  ;;  %2597 = vadd.xlane.f32.xlu0 %v2596_v13 }
 0xd0b   :  { %v2550_v41 = vadd.f32 %v7145_v22, %v2549_v15 }
 0xd0d   :  { %v2574_v9 = vadd.f32 %v2573_v4, %v2550_v41 }
 0xd0f   :  { %v7155_v17 = vadd.f32 %v2574_v9, %v6859_v58  ;;  %v5553_v9 = vld [vmem:[%s8116_s2 + $0x64] sm:$0xf] }
 0xd11   :  { %v2599_v27 = vsel %vm191_vm0, %v7155_v17, 0.0 }
 0xd12   :  { %2600 = vadd.xlane.f32.xlu2 %v2599_v27 }
 0xd3f   :  { %v2143_v34 = vpop.f32.mrf.mxu0 }
 0xd40   :  { %v7160_v19 = vadd.f32 %v2143_v34, %v7037_v63 }
 0xd42   :  { %v5132_v49 = vmul.f32 -1.702, %v7160_v19 }
 0xd44   :  { %v2190_v44 = vmul.f32 1.442695, %v5132_v49 }
 0xd45   :  { %v2119_v53 = vpop.f32.mrf.mxu3 }
 0xd46   :  { %5784 = vpow2.f32 %v2190_v44  ;;  %v7164_v51 = vadd.f32 %v2119_v53, %v7052_v23 }
 0xd47   :  { %v2145_v52 = vpop.f32.mrf.mxu0 }
 0xd48   :  { %v5131_v58 = vmul.f32 -1.702, %v7164_v51  ;;  %v7168_v31 = vadd.f32 %v2145_v52, %v7037_v63 }
 0xd4a   :  { %v2188_v30 = vmul.f32 1.442695, %v5131_v58  ;;  %v5134_v46 = vmul.f32 -1.702, %v7168_v31 }
 0xd4c   :  { %v5785_v26 = vpop.eup %5784  ;;  %5786 = vpow2.f32 %v2188_v30  ;;  %v2194_v24 = vmul.f32 1.442695, %v5134_v46 }
 0xd4d   :  { %v2205_v55 = vadd.f32 1.0, %v5785_v26  ;;  %v2121_v57 = vpop.f32.mrf.mxu3 }
 0xd4e   :  { %5788 = vpow2.f32 %v2194_v24  ;;  %v7172_v50 = vadd.f32 %v2121_v57, %v7052_v23 }
 0xd4f   :  { %5790 = vrcp.f32 %v2205_v55  ;;  %v2352_v35 = vand.u32 2147483647, %v2205_v55  ;;  %v2354_v1 = vand.u32 2147483648, %v2205_v55  ;;  %vm2348_vm15 = vweird.f32 %v2205_v55 }
 0xd50   :  { %v5133_v47 = vmul.f32 -1.702, %v7172_v50 }
 0xd51   :  { %vm2353_vm4 = vcmp.eq.f32.partialorder %v2352_v35, 8.507059e+37  ;;  %v2355_v43 = vor.u32 1.1754944e-38, %v2354_v1 }
 0xd52   :  { %v5787_v2 = vpop.eup %5786  ;;  %v2192_v0 = vmul.f32 1.442695, %v5133_v47 }
 0xd53   :  { %v2204_v36 = vadd.f32 1.0, %v5787_v2 }
 0xd54   :  { %v5789_v63 = vpop.eup %5788  ;;  %5792 = vpow2.f32 %v2192_v0 }
 0xd55   :  { %v5791_v25 = vpop.eup %5790  ;;  %5794 = vrcp.f32 %v2204_v36  ;;  %v2207_v56 = vadd.f32 1.0, %v5789_v63  ;;  %vm2333_vm7 = vweird.f32 %v2204_v36  ;;  %v2339_v38 = vand.u32 2147483648, %v2204_v36 }
 0xd56   :  { %v2344_v59 = vmul.f32 %v5791_v25, %v2205_v55  ;;  %vm2349_vm14 = vweird.f32 %v5791_v25  ;;  %v2337_v15 = vand.u32 2147483647, %v2204_v36 }
 0xd57   :  { %5796 = vrcp.f32 %v2207_v56  ;;  %vm7175_vm1 = vmor %vm2348_vm15, %vm2349_vm14  ;;  %v2384_v39 = vand.u32 2147483648, %v2207_v56  ;;  %v2382_v18 = vand.u32 2147483647, %v2207_v56  ;;  %vm2378_vm8 = vweird.f32 %v2207_v56 }
 0xd58   :  { %v2345_v40 = vsub.f32 1.0, %v2344_v59  ;;  %v2340_v30 = vor.u32 1.1754944e-38, %v2339_v38  ;;  %vm2338_vm14 = vcmp.eq.f32.partialorder %v2337_v15, 8.507059e+37  ;;  %v5238_v38 = vld [vmem:[%s8116_s2 + $0x78] sm:$0xf0] }
 0xd59   :  { %v2385_v41 = vor.u32 1.1754944e-38, %v2384_v39  ;;  %vm2383_vm12 = vcmp.eq.f32.partialorder %v2382_v18, 8.507059e+37  ;;  %v5556_v18 = vld [vmem:[%s8116_s2 + $0x74] sm:$0xf0] }
 0xd5a   :  { %v5793_v7 = vpop.eup %5792  ;;  %v2346_v20 = vmul.f32 %v5791_v25, %v2345_v40 }
 0xd5b   :  { %v5795_v29 = vpop.eup %5794  ;;  %v2206_v10 = vadd.f32 1.0, %v5793_v7 }
 0xd5c   :  { %v2329_v23 = vmul.f32 %v5795_v29, %v2204_v36  ;;  %v2347_v61 = vadd.f32 %v5791_v25, %v2346_v20  ;;  %vm2334_vm6 = vweird.f32 %v5795_v29 }
 0xd5d   :  { %5798 = vrcp.f32 %v2206_v10  ;;  %v5797_v62 = vpop.eup %5796  ;;  %vm7181_vm10 = vmor %vm2333_vm7, %vm2334_vm6  ;;  %v2367_v34 = vand.u32 2147483647, %v2206_v10  ;;  %v2369_v49 = vand.u32 2147483648, %v2206_v10  ;;  %vm2363_vm15 = vweird.f32 %v2206_v10 }
 0xd5e   :  { %v2330_v48 = vsub.f32 1.0, %v2329_v23  ;;  %v2374_v37 = vmul.f32 %v5797_v62, %v2207_v56  ;;  %v2351_v14 = vsel %vm7175_vm1, %v5791_v25, %v2347_v61  ;;  %vm2379_vm5 = vweird.f32 %v5797_v62 }
 0xd5f   :  { %v2356_v13 = vsel %vm2353_vm4, %v2355_v43, %v2351_v14  ;;  %vm2380_vm9 = vmor %vm2378_vm8, %vm2379_vm5  ;;  %v2370_v55 = vor.u32 1.1754944e-38, %v2369_v49  ;;  %vm2368_vm4 = vcmp.eq.f32.partialorder %v2367_v34, 8.507059e+37  ;;  %v5230_v34 = vld [vmem:[%s8116_s2 + $0x68] sm:$0xf0] }
 0xd60   :  { %v2331_v12 = vmul.f32 %v5795_v29, %v2330_v48  ;;  %v2375_v28 = vsub.f32 1.0, %v2374_v37  ;;  %v2397_v58 = vmul.f32 %v2356_v13, %v7160_v19 }
 0xd61   :  { %v2576_v0 = vpop.f32.mrf.mxu1 }
 0xd62   :  { %v2376_v6 = vmul.f32 %v5797_v62, %v2375_v28  ;;  %v2332_v11 = vadd.f32 %v5795_v29, %v2331_v12 }
 0xd63   :  { %v5799_v16 = vpop.eup %5798 }
 0xd64   :  { %v2359_v32 = vmul.f32 %v5799_v16, %v2206_v10  ;;  %v2377_v8 = vadd.f32 %v5797_v62, %v2376_v6  ;;  %v2336_v44 = vsel %vm7181_vm10, %v5795_v29, %v2332_v11  ;;  %vm2364_vm13 = vweird.f32 %v5799_v16  ;;  %v5236_v6 = vld [vmem:[%s8116_s2 + $0x70] sm:$0xf] }
 0xd65   :  { %v2341_v24 = vsel %vm2338_vm14, %v2340_v30, %v2336_v44  ;;  %vm2365_vm1 = vmor %vm2363_vm15, %vm2364_vm13  ;;  %v5237_v11 = vor.u32 %v5556_v18, %v5236_v6 }
 0xd66   :  { %v2360_v4 = vsub.f32 1.0, %v2359_v32  ;;  %v2381_v27 = vsel %vm2380_vm9, %v5797_v62, %v2377_v8  ;;  %v2396_v63 = vmul.f32 %v2341_v24, %v7164_v51  ;;  %v5555_v32 = vld [vmem:[%s8116_s2 + $0x74] sm:$0xf] }
 0xd67   :  { %v2386_v53 = vsel %vm2383_vm12, %v2385_v41, %v2381_v27  ;;  %v5241_v13 = vor.u32 %v5555_v32, %v5238_v38  ;;  %2818 = vmatpush.bf16.msrb.mxu3 %v5237_v11  ;;  %v5228_v41 = vld [vmem:[%s8116_s2 + $0x60] sm:$0xf] }
 0xd68   :  { %v2361_v52 = vmul.f32 %v5799_v16, %v2360_v4  ;;  %v2399_v46 = vmul.f32 %v2386_v53, %v7168_v31  ;;  %v5554_v4 = vld [vmem:[%s8116_s2 + $0x64] sm:$0xf0]  ;;  %v7296_v32 = vld [vmem:[%s8117_s7 + $0x1] ss:$0 sm:$0xff] }
 0xd69   :  { %v2578_v20 = vpop.f32.mrf.mxu1  ;;  %2842 = vmatpush.bf16.msrb.mxu0 %v5241_v13  ;;  %v5229_v27 = vor.u32 %v5554_v4, %v5228_v41  ;;  %v7302_v41 = vld [vmem:[%s8118_s28 + $0x1] ss:$0 sm:$0xff] }
 0xd6a   :  { %v2362_v26 = vadd.f32 %v5799_v16, %v2361_v52  ;;  %v2405_v57 = vpack.c.bf16 %v2399_v46, %v2397_v58  ;;  %v5233_v52 = vor.u32 %v5553_v9, %v5230_v34  ;;  %v5220_v46 = vld [vmem:[%s8116_s2 + $0x50] sm:$0xf] }
 0xd6b   :  { %2819 = vmatpush.bf16.msrb.mxu3 %v5229_v27 }
 0xd6c   :  { %v2366_v47 = vsel %vm2365_vm1, %v5799_v16, %v2362_v26  ;;  %2580 = vmatmul.bf16.gmra.mxu1 %v2405_v57  ;;  %v5552_v26 = vld [vmem:[%s8116_s2 + $0x54] sm:$0xf0] }
 0xd6d   :  { %v2371_v2 = vsel %vm2368_vm4, %v2370_v55, %v2366_v47  ;;  %v2552_v36 = vpop.f32.mrf.mxu2  ;;  %2843 = vmatpush.bf16.msrb.mxu0 %v5233_v52  ;;  %v5221_v57 = vor.u32 %v5552_v26, %v5220_v46  ;;  %v5551_v47 = vld [vmem:[%s8116_s2 + $0x54] sm:$0xf] }
 0xd6e   :  { %v2398_v19 = vmul.f32 %v2371_v2, %v7172_v50  ;;  %v2553_v25 = vadd.f32 %v7145_v22, %v2552_v36  ;;  %v5222_v2 = vld [vmem:[%s8116_s2 + $0x58] sm:$0xf0] }
 0xd6f   :  { %v5225_v36 = vor.u32 %v5551_v47, %v5222_v2  ;;  %2820 = vmatpush.bf16.msrb.mxu3 %v5221_v57 }
 0xd70   :  { %v2577_v31 = vadd.f32 %v2576_v0, %v2553_v25  ;;  %v2404_v59 = vpack.c.bf16 %v2398_v19, %v2396_v63  ;;  %v5212_v25 = vld [vmem:[%s8116_s2 + $0x40] sm:$0xf] }
 0xd71   :  { %2844 = vmatpush.bf16.msrb.mxu0 %v5225_v36 }
 0xd72   :  { %v7193_v56 = vadd.f32 %v2577_v31, %v6866_v3  ;;  %2556 = vmatmul.bf16.gmra.mxu2 %v2404_v59  ;;  %v5550_v31 = vld [vmem:[%s8116_s2 + $0x44] sm:$0xf0] }
 0xd74   :  { %v2602_v40 = vsel %vm191_vm0, %v7193_v56, 0.0 }
 0xd75   :  { %v2554_v7 = vpop.f32.mrf.mxu2  ;;  %2603 = vadd.xlane.f32.xlu1 %v2602_v40  ;;  %v5213_v40 = vor.u32 %v5550_v31, %v5212_v25 }
 0xd76   :  { %v2555_v29 = vadd.f32 %v7145_v22, %v2554_v7  ;;  %v5214_v7 = vld [vmem:[%s8116_s2 + $0x48] sm:$0xf0] }
 0xd77   :  { %2821 = vmatpush.bf16.msrb.mxu3 %v5213_v40 }
 0xd78   :  { %v2579_v10 = vadd.f32 %v2578_v20, %v2555_v29 }
 0xd7a   :  { %v7199_v51 = vadd.f32 %v2579_v10, %v6873_v21 }
 0xd7c   :  { %v2605_v50 = vsel %vm191_vm0, %v7199_v51, 0.0 }
 0xd7d   :  { %2606 = vadd.xlane.f32.xlu0 %v2605_v50  ;;  %v2598_v23 = vpop.xlane.xlu0 %2597 }
 0xd7e   :  { %v2614_v3 = vmul.f32 %v2598_v23, %v6210_v54 }
 0xd80   :  { %v7205_v62 = vsub.f32 %v7149_v42, %v2614_v3 }
 0xd82   :  { %v2626_v35 = vmul.f32 %v7205_v62, %v7205_v62 }
 0xd84   :  { %v2632_v48 = vsel %vm191_vm0, %v2626_v35, 0.0 }
 0xd85   :  { %v2601_v61 = vpop.xlane.xlu2 %2600  ;;  %2633 = vadd.xlane.f32.xlu2 %v2632_v48 }
 0xd86   :  { %v2615_v21 = vmul.f32 %v2601_v61, %v6210_v54 }
 0xd88   :  { %v7212_v37 = vsub.f32 %v7155_v17, %v2615_v21 }
 0xd8a   :  { %v2627_v1 = vmul.f32 %v7212_v37, %v7212_v37 }
 0xd8c   :  { %v2635_v12 = vsel %vm191_vm0, %v2627_v1, 0.0 }
 0xd8d   :  { %2636 = vadd.xlane.f32.xlu1 %v2635_v12 }
 0xde8   :  { %v2604_v28 = vpop.xlane.xlu1 %2603 }
 0xde9   :  { %v2616_v60 = vmul.f32 %v2604_v28, %v6210_v54  ;;  %v2581_v49 = vpop.f32.mrf.mxu1 }
 0xdeb   :  { %v7219_v39 = vsub.f32 %v7193_v56, %v2616_v60 }
 0xded   :  { %v2628_v16 = vmul.f32 %v7219_v39, %v7219_v39 }
 0xdef   :  { %v2638_v14 = vsel %vm191_vm0, %v2628_v16, 0.0 }
 0xdf0   :  { %2639 = vadd.xlane.f32.xlu0 %v2638_v14  ;;  %v2607_v43 = vpop.xlane.xlu0 %2606 }
 0xdf1   :  { %v2617_v8 = vmul.f32 %v2607_v43, %v6210_v54  ;;  %v2583_v50 = vpop.f32.mrf.mxu1 }
 0xdf3   :  { %v7238_v15 = vsub.f32 %v7199_v51, %v2617_v8 }
 0xdf5   :  { %v2557_v44 = vpop.f32.mrf.mxu2  ;;  %v2629_v53 = vmul.f32 %v7238_v15, %v7238_v15 }
 0xdf6   :  { %v2558_v58 = vadd.f32 %v7145_v22, %v2557_v44 }
 0xdf7   :  { %v2641_v30 = vsel %vm191_vm0, %v2629_v53, 0.0 }
 0xdf8   :  { %v2582_v24 = vadd.f32 %v2581_v49, %v2558_v58  ;;  %v2634_v55 = vpop.xlane.xlu2 %2633  ;;  %2642 = vadd.xlane.f32.xlu2 %v2641_v30 }
 0xdf9   :  { %v2650_v0 = vmul.f32 %v2634_v55, %v6210_v54 }
 0xdfa   :  { %v7270_v63 = vadd.f32 %v2582_v24, %v6956_v5  ;;  %v5549_v5 = vld [vmem:[%s8116_s2 + $0x44] sm:$0xf] }
 0xdfb   :  { %v2656_v19 = vadd.f32 1e-05, %v2650_v0  ;;  %v5217_v20 = vor.u32 %v5549_v5, %v5214_v7 }
 0xdfc   :  { %v2608_v59 = vsel %vm191_vm0, %v7270_v63, 0.0 }
 0xdfd   :  { %5800 = vrsqrt.f32 %v2656_v19  ;;  %v2559_v29 = vpop.f32.mrf.mxu2  ;;  %2609 = vadd.xlane.f32.xlu1 %v2608_v59  ;;  %2845 = vmatpush.bf16.msrb.mxu0 %v5217_v20  ;;  %vm2668_vm6 = vweird.f32 %v2656_v19 }
 0xdfe   :  { %v2560_v10 = vadd.f32 %v7145_v22, %v2559_v29 }
 0xe00   :  { %v2584_v23 = vadd.f32 %v2583_v50, %v2560_v10  ;;  %v2637_v3 = vpop.xlane.xlu1 %2636 }
 0xe01   :  { %v2651_v35 = vmul.f32 %v2637_v3, %v6210_v54 }
 0xe02   :  { %v7289_v48 = vadd.f32 %v2584_v23, %v6967_v45 }
 0xe03   :  { %v5801_v61 = vpop.eup %5800  ;;  %v2657_v21 = vadd.f32 1e-05, %v2651_v35 }
 0xe04   :  { %v2663_v1 = vmul.f32 %v5801_v61, %v2656_v19  ;;  %v2611_v12 = vsel %vm191_vm0, %v7289_v48, 0.0  ;;  %vm2669_vm5 = vweird.f32 %v5801_v61 }
 0xe05   :  { %5802 = vrsqrt.f32 %v2657_v21  ;;  %2612 = vadd.xlane.f32.xlu0 %v2611_v12  ;;  %vm2670_vm7 = vmor %vm2668_vm6, %vm2669_vm5  ;;  %vm2678_vm9 = vweird.f32 %v2657_v21 }
 0xe06   :  { %v2664_v28 = vmul.f32 %v5801_v61, %v2663_v1 }
 0xe08   :  { %v2665_v22 = vmul.f32 0.5, %v2664_v28 }
 0xe0a   :  { %v2666_v60 = vsub.f32 1.5, %v2665_v22 }
 0xe0b   :  { %v5803_v16 = vpop.eup %5802 }
 0xe0c   :  { %v2667_v14 = vmul.f32 %v5801_v61, %v2666_v60  ;;  %v2673_v6 = vmul.f32 %v5803_v16, %v2657_v21  ;;  %vm2679_vm8 = vweird.f32 %v5803_v16 }
 0xe0d   :  { %vm2680_vm10 = vmor %vm2678_vm9, %vm2679_vm8 }
 0xe0e   :  { %v2674_v18 = vmul.f32 %v5803_v16, %v2673_v6  ;;  %v2671_v45 = vsel %vm2670_vm7, %v5801_v61, %v2667_v14 }
 0xe0f   :  { %v2722_v38 = vmul.f32 %v2671_v45, %v7205_v62 }
 0xe10   :  { %v2675_v43 = vmul.f32 0.5, %v2674_v18 }
 0xe11   :  { %v2731_v4 = vmul.f32 %v7296_v32, %v2722_v38 }
 0xe12   :  { %v2676_v11 = vsub.f32 1.5, %v2675_v43 }
 0xe13   :  { %v2740_v34 = vadd.f32 %v7302_v41, %v2731_v4 }
 0xe14   :  { %v2677_v8 = vmul.f32 %v5803_v16, %v2676_v11 }
 0xe16   :  { %v2681_v13 = vsel %vm2680_vm10, %v5803_v16, %v2677_v8 }
 0xe17   :  { %v2723_v9 = vmul.f32 %v2681_v13, %v7212_v37 }
 0xe19   :  { %v2732_v27 = vmul.f32 %v7296_v32, %v2723_v9 }
 0xe1b   :  { %v2741_v49 = vadd.f32 %v7302_v41, %v2732_v27 }
 0xe1d   :  { %v2746_v62 = vpack.c.bf16 %v2741_v49, %v2740_v34 }
 0xe1f   :  { %5242 = vmatmul.msk.bf16.vlgmr.msrb.gmra.mxu3 %vm191_vm0, %v2746_v62  ;;  %5245 = vmatmul.msk.bf16.vlgmr.msrb.gmra.mxu0 %vm191_vm0, %v2746_v62 }
 0xe63   :  { %v2640_v44 = vpop.xlane.xlu0 %2639 }
 0xe64   :  { %v2652_v53 = vmul.f32 %v2640_v44, %v6210_v54 }
 0xe66   :  { %v2658_v52 = vadd.f32 1e-05, %v2652_v53 }
 0xe68   :  { %5804 = vrsqrt.f32 %v2658_v52  ;;  %vm2688_vm13 = vweird.f32 %v2658_v52 }
 0xe6b   :  { %v2643_v58 = vpop.xlane.xlu2 %2642 }
 0xe6c   :  { %v2653_v30 = vmul.f32 %v2643_v58, %v6210_v54 }
 0xe6e   :  { %v5805_v37 = vpop.eup %5804  ;;  %v2659_v46 = vadd.f32 1e-05, %v2653_v30 }
 0xe6f   :  { %v2683_v26 = vmul.f32 %v5805_v37, %v2658_v52  ;;  %vm2689_vm12 = vweird.f32 %v5805_v37 }
 0xe70   :  { %5806 = vrsqrt.f32 %v2659_v46  ;;  %v2610_v24 = vpop.xlane.xlu1 %2609  ;;  %vm2690_vm14 = vmor %vm2688_vm13, %vm2689_vm12  ;;  %vm2698_vm1 = vweird.f32 %v2659_v46 }
 0xe71   :  { %v2684_v55 = vmul.f32 %v5805_v37, %v2683_v26  ;;  %v2618_v57 = vmul.f32 %v2610_v24, %v6210_v54 }
 0xe73   :  { %v2685_v47 = vmul.f32 0.5, %v2684_v55  ;;  %v7315_v2 = vsub.f32 %v7270_v63, %v2618_v57 }
 0xe75   :  { %v2686_v0 = vsub.f32 1.5, %v2685_v47  ;;  %v2630_v36 = vmul.f32 %v7315_v2, %v7315_v2 }
 0xe76   :  { %v5807_v19 = vpop.eup %5806 }
 0xe77   :  { %v2687_v25 = vmul.f32 %v5805_v37, %v2686_v0  ;;  %v2693_v31 = vmul.f32 %v5807_v19, %v2659_v46  ;;  %v2644_v59 = vsel %vm191_vm0, %v2630_v36, 0.0  ;;  %vm2699_vm15 = vweird.f32 %v5807_v19 }
 0xe78   :  { %2645 = vadd.xlane.f32.xlu2 %v2644_v59  ;;  %v2613_v40 = vpop.xlane.xlu0 %2612  ;;  %vm2700_vm4 = vmor %vm2698_vm1, %vm2699_vm15 }
 0xe79   :  { %v2694_v5 = vmul.f32 %v5807_v19, %v2693_v31  ;;  %v2619_v7 = vmul.f32 %v2613_v40, %v6210_v54  ;;  %v2691_v29 = vsel %vm2690_vm14, %v5805_v37, %v2687_v25 }
 0xe7a   :  { %v2724_v3 = vmul.f32 %v2691_v29, %v7219_v39  ;;  %v5209_v39 = vld [vmem:[%s8073_s8 + $0x2] sm:$0x3]  ;;  %s8131_s8 = smov 32  }
 0xe7b   :  { %v2695_v20 = vmul.f32 0.5, %v2694_v5  ;;  %v2625_v10 = vsub.f32 %v7289_v48, %v2619_v7  ;;  %v7334_v6 = vperm.slane %v5209_v39, 0 }
 0xe7c   :  { %v2733_v12 = vmul.f32 %v7296_v32, %v2724_v3  ;;  %v2762_v3 = vperm.slane %v5209_v39, 1 }
 0xe7d   :  { %v2696_v50 = vsub.f32 1.5, %v2695_v20  ;;  %v2631_v23 = vmul.f32 %v2625_v10, %v2625_v10 }
 0xe7e   :  { %v2742_v22 = vadd.f32 %v7302_v41, %v2733_v12 }
 0xe7f   :  { %v2697_v35 = vmul.f32 %v5807_v19, %v2696_v50  ;;  %v2647_v61 = vsel %vm191_vm0, %v2631_v23, 0.0 }
 0xe80   :  { %2648 = vadd.xlane.f32.xlu1 %v2647_v61 }
 0xe81   :  { %v2701_v21 = vsel %vm2700_vm4, %v5807_v19, %v2697_v35 }
 0xe82   :  { %v2725_v1 = vmul.f32 %v2701_v21, %v7238_v15 }
 0xe84   :  { %v2734_v28 = vmul.f32 %v7296_v32, %v2725_v1 }
 0xe86   :  { %v2743_v60 = vadd.f32 %v7302_v41, %v2734_v28 }
 0xe88   :  { %v2747_v16 = vpack.c.bf16 %v2743_v60, %v2742_v22 }
 0xe8a   :  { %5243 = vmatmul.msk.bf16.gmra.mxu3 %vm191_vm0, %v2747_v16  ;;  %5246 = vmatmul.msk.bf16.gmra.mxu0 %vm191_vm0, %v2747_v16 }
 0xea2   :  { %v2823_v14 = vpop.f32.mrf.mxu3 }
 0xea3   :  { %v2824_v15 = vadd.f32 %v2823_v14, %v7334_v6 }
 0xea5   :  { %v2871_v45 = vpack.c.bf16 %v2824_v15, %v2824_v15 }
 0xea7   :  { %v2886_v38 = vunpack.c.l.b16 %v2871_v45 }
 0xeaa   :  { %v2825_v18 = vpop.f32.mrf.mxu3 }
 0xeab   :  { %v2826_v43 = vadd.f32 %v2825_v18, %v7334_v6 }
 0xead   :  { %v2872_v11 = vpack.c.bf16 %v2826_v43, %v2826_v43 }
 0xeaf   :  { %v2887_v8 = vunpack.c.l.b16 %v2872_v11 }
 0xeb1   :  { %v7338_v13 = vpack.c.b16 %v2887_v8, %v2886_v38 }
 0xeb3   :  { %2891 = vrot.lane.b32.xlu2 %v7338_v13, %s5997_s3 }
 0xebb   :  { %3142 = vrot.lane.b32.xlu2 %v7338_v13, %s5999_s4 }
 0xeeb   :  { %v2646_v4 = vpop.xlane.xlu2 %2645 }
 0xeec   :  { %v2654_v9 = vmul.f32 %v2646_v4, %v6210_v54 }
 0xeee   :  { %v2660_v27 = vadd.f32 1e-05, %v2654_v9 }
 0xef0   :  { %5808 = vrsqrt.f32 %v2660_v27  ;;  %vm2708_vm6 = vweird.f32 %v2660_v27 }
 0xef3   :  { %v2649_v34 = vpop.xlane.xlu1 %2648 }
 0xef4   :  { %v2655_v49 = vmul.f32 %v2649_v34, %v6210_v54 }
 0xef6   :  { %v5809_v62 = vpop.eup %5808  ;;  %v2661_v44 = vadd.f32 1e-05, %v2655_v49 }
 0xef7   :  { %v2703_v53 = vmul.f32 %v5809_v62, %v2660_v27  ;;  %vm2709_vm5 = vweird.f32 %v5809_v62 }
 0xef8   :  { %5810 = vrsqrt.f32 %v2661_v44  ;;  %vm2710_vm7 = vmor %vm2708_vm6, %vm2709_vm5  ;;  %vm2718_vm9 = vweird.f32 %v2661_v44 }
 0xef9   :  { %v2704_v52 = vmul.f32 %v5809_v62, %v2703_v53 }
 0xefb   :  { %v2705_v58 = vmul.f32 0.5, %v2704_v52 }
 0xefd   :  { %v2706_v30 = vsub.f32 1.5, %v2705_v58 }
 0xefe   :  { %v5811_v37 = vpop.eup %5810 }
 0xeff   :  { %v2707_v46 = vmul.f32 %v5809_v62, %v2706_v30  ;;  %v2713_v26 = vmul.f32 %v5811_v37, %v2661_v44  ;;  %vm2719_vm8 = vweird.f32 %v5811_v37 }
 0xf00   :  { %vm2720_vm10 = vmor %vm2718_vm9, %vm2719_vm8 }
 0xf01   :  { %v2714_v24 = vmul.f32 %v5811_v37, %v2713_v26  ;;  %v2711_v55 = vsel %vm2710_vm7, %v5809_v62, %v2707_v46 }
 0xf02   :  { %v2726_v0 = vmul.f32 %v2711_v55, %v7315_v2 }
 0xf03   :  { %v2715_v57 = vmul.f32 0.5, %v2714_v24 }
 0xf04   :  { %v2735_v31 = vmul.f32 %v7296_v32, %v2726_v0 }
 0xf05   :  { %v2716_v47 = vsub.f32 1.5, %v2715_v57 }
 0xf06   :  { %v2744_v7 = vadd.f32 %v7302_v41, %v2735_v31 }
 0xf07   :  { %v2717_v36 = vmul.f32 %v5811_v37, %v2716_v47 }
 0xf09   :  { %v2721_v19 = vsel %vm2720_vm10, %v5811_v37, %v2717_v36 }
 0xf0a   :  { %v2727_v25 = vmul.f32 %v2721_v19, %v2625_v10 }
 0xf0c   :  { %v2736_v59 = vmul.f32 %v7296_v32, %v2727_v25  ;;  %v2847_v32 = vpop.f32.mrf.mxu0 }
 0xf0d   :  { %v2828_v40 = vpop.f32.mrf.mxu3  ;;  %v2848_v14 = vadd.f32 %v2847_v32, %v2762_v3  ;;  %v2892_v43 = vpop.permute.xlu2 %2891 }
 0xf0e   :  { %v2829_v5 = vadd.f32 %v2828_v40, %v7334_v6  ;;  %v2745_v29 = vadd.f32 %v7302_v41, %v2736_v59  ;;  %v2902_v4 = vsel %vm719_vm3, %v2892_v43, 0 }
 0xf0f   :  { %v2877_v39 = vpack.c.bf16 %v2848_v14, %v2848_v14 }
 0xf10   :  { %v2873_v20 = vpack.c.bf16 %v2829_v5, %v2829_v5  ;;  %v2748_v50 = vpack.c.bf16 %v2745_v29, %v2744_v7 }
 0xf11   :  { %v3062_v49 = vunpack.c.l.b16 %v2877_v39 }
 0xf12   :  { %v2888_v23 = vunpack.c.l.b16 %v2873_v20  ;;  %5244 = vmatmul.msk.bf16.gmra.mxu3 %vm191_vm0, %v2748_v50  ;;  %5247 = vmatmul.msk.bf16.gmra.mxu0 %vm191_vm0, %v2748_v50 }
 0xf14   :  { %v7354_v2 = vpack.c.b16 %v2888_v23, %v2888_v23  ;;  %v2849_v41 = vpop.f32.mrf.mxu0 }
 0xf15   :  { %v2850_v28 = vadd.f32 %v2849_v41, %v2762_v3  ;;  %v2830_v18 = vpop.f32.mrf.mxu3  ;;  %v3143_v37 = vpop.permute.xlu2 %3142 }
 0xf16   :  { %2893 = vrot.lane.b32.xlu0 %v7354_v2, %s5997_s3  ;;  %3148 = vrot.lane.b32.xlu1 %v7354_v2, %s5998_s0  ;;  %v2831_v27 = vadd.f32 %v2830_v18, %v7334_v6 }
 0xf17   :  { %v2878_v15 = vpack.c.bf16 %v2850_v28, %v2850_v28 }
 0xf18   :  { %v2874_v53 = vpack.c.bf16 %v2831_v27, %v2831_v27 }
 0xf19   :  { %v3063_v8 = vunpack.c.l.b16 %v2878_v15 }
 0xf1a   :  { %v2928_v55 = vunpack.c.l.b16 %v2874_v53 }
 0xf1b   :  { %v7373_v62 = vpack.c.b16 %v3063_v8, %v3062_v49 }
 0xf1c   :  { %v2852_v10 = vpop.f32.mrf.mxu0 }
 0xf1d   :  { %v2853_v35 = vadd.f32 %v2852_v10, %v2762_v3 }
 0xf1e   :  { %3146 = vrot.lane.b32.xlu0 %v7338_v13, %s5998_s0 }
 0xf1f   :  { %v2879_v61 = vpack.c.bf16 %v2853_v35, %v2853_v35 }
 0xf21   :  { %v3064_v16 = vunpack.c.l.b16 %v2879_v61 }
 0xf23   :  { %v7366_v45 = vpack.c.b16 %v3064_v16, %v3064_v16 }
 0xf24   :  { %v2854_v21 = vpop.f32.mrf.mxu0 }
 0xf25   :  { %v3075_v34 = vsel %vm900_vm2, %v7366_v45, 0  ;;  %v2855_v24 = vadd.f32 %v2854_v21, %v2762_v3 }
 0xf26   :  { %3144 = vrot.lane.b32.xlu0 %v7354_v2, %s5999_s4 }
 0xf27   :  { %v2880_v25 = vpack.c.bf16 %v2855_v24, %v2855_v24 }
 0xf29   :  { %v3106_v20 = vunpack.c.l.b16 %v2880_v25 }
 0xf88   :  { %v3149_v1 = vpop.permute.xlu1 %3148  ;;  %v2894_v12 = vpop.permute.xlu0 %2893 }
 0xf89   :  { %v3160_v22 = vsel %vm719_vm3, %v3149_v1, 0  ;;  %v2905_v60 = vsel %vm719_vm3, %v2894_v12, 0 }
 0xf8a   :  { %2913 = vmatpush.bf16.xpose.msrb.mxu2 %v2905_v60  ;;  %3168 = vmatpush.bf16.xpose.msra.mxu0 %v3160_v22 }
 0xf8f   :  { %v2857_v11 = vpop.f32.mrf.mxu0 }
 0xf90   :  { %v3147_v38 = vpop.permute.xlu0 %3146  ;;  %v2858_v58 = vadd.f32 %v2857_v11, %v2762_v3 }
 0xf91   :  { %v3157_v9 = vsel %vm719_vm3, %v3147_v38, 0 }
 0xf92   :  { %2914 = vmatpush.bf16.xpose.msrb.mxu2 %v2902_v4  ;;  %3169 = vmatpush.bf16.xpose.msra.mxu0 %v3157_v9  ;;  %v2881_v0 = vpack.c.bf16 %v2858_v58, %v2858_v58 }
 0xf94   :  { %v3107_v5 = vunpack.c.l.b16 %v2881_v0 }
 0xf95   :  { %v2833_v44 = vpop.f32.mrf.mxu3 }
 0xf96   :  { %v2834_v52 = vadd.f32 %v2833_v44, %v7334_v6  ;;  %v7389_v23 = vpack.c.b16 %v3107_v5, %v3106_v20 }
 0xf97   :  { %v2859_v30 = vpop.f32.mrf.mxu0 }
 0xf98   :  { %v2875_v46 = vpack.c.bf16 %v2834_v52, %v2834_v52  ;;  %v2860_v26 = vadd.f32 %v2859_v30, %v2762_v3 }
 0xf99   :  { %5256 = vmatmul.msk.bf16.vlgmr.msrb.gmra.mxu2 %vm719_vm3, %v7338_v13  ;;  %5264 = vmatmul.msk.bf16.vlgmr.msra.gmra.mxu0 %vm719_vm3, %v3143_v37 }
 0xf9a   :  { %3083 = vmatpush.bf16.msra.mxu2 %v3075_v34  ;;  %v2929_v57 = vunpack.c.l.b16 %v2875_v46  ;;  %v2882_v47 = vpack.c.bf16 %v2860_v26, %v2860_v26 }
 0xf9c   :  { %v7380_v36 = vpack.c.b16 %v2929_v57, %v2928_v55  ;;  %v3108_v19 = vunpack.c.l.b16 %v2882_v47 }
 0xf9d   :  { %v2835_v31 = vpop.f32.mrf.mxu3 }
 0xf9e   :  { %3084 = vmatpush.bf16.msra.mxu2 %v7373_v62  ;;  %v7382_v59 = vpack.c.b16 %v3108_v19, %v3108_v19  ;;  %v2836_v40 = vadd.f32 %v2835_v31, %v7334_v6  ;;  %2933 = vrot.lane.b32.xlu2 %v7380_v36, %s5997_s3  ;;  %v3145_v6 = vpop.permute.xlu0 %3144 }
 0xfa0   :  { %v2876_v7 = vpack.c.bf16 %v2836_v40, %v2836_v40  ;;  %v3119_v29 = vsel %vm900_vm2, %v7382_v59, 0 }
 0xfa1   :  { %3127 = vmatpush.bf16.msra.mxu3 %v3119_v29 }
 0xfa2   :  { %v2930_v50 = vunpack.c.l.b16 %v2876_v7 }
 0xfa4   :  { %v7391_v32 = vpack.c.b16 %v2930_v50, %v2930_v50 }
 0xfa5   :  { %3128 = vmatpush.bf16.msra.mxu3 %v7389_v23 }
 0xfa6   :  { %3186 = vrot.lane.b32.xlu0 %v7391_v32, %s5998_s0  ;;  %2935 = vrot.lane.b32.xlu1 %v7391_v32, %s5997_s3  ;;  %s8132_s3 = smov 96  }
 0xfa7   :  { %3180 = vrot.lane.b32.xlu2 %v7380_v36, %s5999_s4 }
 0xfa9   :  { %5257 = vmatmul.msk.bf16.gmra.mxu2 %vm719_vm3, %v7354_v2  ;;  %5265 = vmatmul.msk.bf16.gmra.mxu0 %vm719_vm3, %v3145_v6 }
 0xfae   :  { %3182 = vrot.lane.b32.xlu0 %v7391_v32, %s5999_s4  ;;  %3184 = vrot.lane.b32.xlu1 %v7380_v36, %s5998_s0 }
 0xff8   :  { %v2934_v21 = vpop.permute.xlu2 %2933 }
 0xff9   :  { %v2944_v22 = vsel %vm719_vm3, %v2934_v21, 0 }
0x1001   :  { %v3181_v55 = vpop.permute.xlu2 %3180 }
0x1016   :  { %v3171_v41 = vpop.f32.mrf.mxu0 }
0x1017   :  { %v3218_v60 = vmul.f32 0.25, %v3171_v41 }
0x1018   :  { %v2936_v10 = vpop.permute.xlu1 %2935  ;;  %v3187_v12 = vpop.permute.xlu0 %3186 }
0x1019   :  { %v2947_v3 = vsel %vm719_vm3, %v2936_v10, 0  ;;  %v3198_v14 = vsel %vm719_vm3, %v3187_v12, 0  ;;  %v3224_v18 = vadd.f32 %v3218_v60, %v6493_v33 }
0x101a   :  { %2955 = vmatpush.bf16.xpose.msrb.mxu1 %v2947_v3 }
0x101b   :  { %v3230_v9 = vsel %vm804_vm11, %v3224_v18, -inf }
0x101c   :  { %v2916_v35 = vpop.f32.mrf.mxu2 }
0x101d   :  { %v2967_v61 = vmul.f32 0.25, %v2916_v35 }
0x101e   :  { %v3173_v1 = vpop.f32.mrf.mxu0 }
0x101f   :  { %v2973_v28 = vadd.f32 %v2967_v61, %v6493_v33  ;;  %v3219_v8 = vmul.f32 0.25, %v3173_v1 }
0x1020   :  { %v3185_v11 = vpop.permute.xlu1 %3184  ;;  %v3183_v57 = vpop.permute.xlu0 %3182 }
0x1021   :  { %v2979_v16 = vsel %vm804_vm11, %v2973_v28, -inf  ;;  %v3195_v27 = vsel %vm719_vm3, %v3185_v11, 0  ;;  %v3225_v44 = vadd.f32 %v3219_v8, %v6493_v33 }
0x1022   :  { %2956 = vmatpush.bf16.xpose.msrb.mxu1 %v2944_v22  ;;  %2980 = vmax.xlane.f32.xlu1 %v2979_v16 }
0x1023   :  { %v3233_v37 = vsel %vm804_vm11, %v3225_v44, -inf }
0x1024   :  { %v2918_v15 = vpop.f32.mrf.mxu2 }
0x1025   :  { %v2968_v43 = vmul.f32 0.25, %v2918_v15 }
0x1026   :  { %v3176_v39 = vpop.f32.mrf.mxu0 }
0x1027   :  { %v2974_v38 = vadd.f32 %v2968_v43, %v6493_v33  ;;  %v3220_v58 = vmul.f32 0.25, %v3176_v39 }
0x1029   :  { %5258 = vmatmul.msk.bf16.vlgmr.msrb.gmra.mxu1 %vm719_vm3, %v7380_v36  ;;  %v2982_v4 = vsel %vm804_vm11, %v2974_v38, -inf  ;;  %v3226_v26 = vadd.f32 %v3220_v58, %v6493_v33 }
0x102a   :  { %3206 = vmatpush.bf16.xpose.msra.mxu1 %v3198_v14  ;;  %2983 = vmax.xlane.f32.xlu2 %v2982_v4 }
0x102b   :  { %3231 = vmax.xlane.f32.xlu1 %v3230_v9  ;;  %v3236_v24 = vsel %vm804_vm11, %v3226_v26, -inf }
0x102c   :  { %v2921_v34 = vpop.f32.mrf.mxu2 }
0x102d   :  { %v2969_v49 = vmul.f32 0.25, %v2921_v34 }
0x102e   :  { %v3178_v53 = vpop.f32.mrf.mxu0 }
0x102f   :  { %v2975_v52 = vadd.f32 %v2969_v49, %v6493_v33 }
0x1031   :  { %v2985_v30 = vsel %vm804_vm11, %v2975_v52, -inf }
0x1032   :  { %3207 = vmatpush.bf16.xpose.msra.mxu1 %v3195_v27  ;;  %2986 = vmax.xlane.f32.xlu0 %v2985_v30 }
0x1033   :  { %3234 = vmax.xlane.f32.xlu2 %v3233_v37 }
0x1034   :  { %v2923_v46 = vpop.f32.mrf.mxu2 }
0x1039   :  { %5259 = vmatmul.msk.bf16.gmra.mxu1 %vm719_vm3, %v7391_v32 }
0x103a   :  { %3237 = vmax.xlane.f32.xlu0 %v3236_v24 }
0x1049   :  { %5266 = vmatmul.msk.bf16.vlgmr.msra.gmra.mxu1 %vm719_vm3, %v3181_v55 }
0x1059   :  { %5267 = vmatmul.msk.bf16.gmra.mxu1 %vm719_vm3, %v3183_v57 }
0x1095   :  { %v2981_v47 = vpop.xlane.xlu1 %2980 }
0x1096   :  { %v2997_v40 = vsub.f32 %v2973_v28, %v2981_v47 }
0x1098   :  { %v3003_v5 = vmul.f32 1.442695, %v2997_v40 }
0x109d   :  { %v2984_v0 = vpop.xlane.xlu2 %2983 }
0x109e   :  { %v3232_v19 = vpop.xlane.xlu1 %3231  ;;  %v2998_v41 = vsub.f32 %v2974_v38, %v2984_v0 }
0x109f   :  { %v3248_v25 = vsub.f32 %v3224_v18, %v3232_v19 }
0x10a0   :  { %v3005_v21 = vmul.f32 1.442695, %v2998_v41 }
0x10a1   :  { %v3254_v31 = vmul.f32 1.442695, %v3248_v25 }
0x10a3   :  { %5812 = vpow2.f32 %v3254_v31 }
0x10a4   :  { %5814 = vpow2.f32 %v3003_v5 }
0x10a5   :  { %v2987_v29 = vpop.xlane.xlu0 %2986 }
0x10a6   :  { %v3235_v7 = vpop.xlane.xlu2 %3234  ;;  %v2999_v50 = vsub.f32 %v2975_v52, %v2987_v29  ;;  %v2958_v6 = vpop.f32.mrf.mxu1 }
0x10a7   :  { %v3249_v20 = vsub.f32 %v3225_v44, %v3235_v7  ;;  %v2970_v53 = vmul.f32 0.25, %v2958_v6 }
0x10a8   :  { %v3007_v3 = vmul.f32 1.442695, %v2999_v50 }
0x10a9   :  { %v3256_v10 = vmul.f32 1.442695, %v3249_v20  ;;  %v7429_v35 = vpop.eup %5812  ;;  %v7458_v52 = vadd.f32 %v2970_v53, %v6493_v33 }
0x10aa   :  { %v3266_v61 = vsel %vm804_vm11, %v7429_v35, 0.0  ;;  %v5815_v28 = vpop.eup %5814 }
0x10ab   :  { %5816 = vpow2.f32 %v3256_v10  ;;  %3267 = vadd.xlane.f32.xlu1 %v3266_v61  ;;  %v3015_v15 = vsel %vm804_vm11, %v5815_v28, 0.0  ;;  %v2988_v37 = vsel %vm804_vm11, %v7458_v52, -inf }
0x10ac   :  { %5818 = vpow2.f32 %v3007_v3 }
0x10ad   :  { %v3238_v1 = vpop.xlane.xlu0 %3237  ;;  %5820 = vpow2.f32 %v3005_v21 }
0x10ae   :  { %v2960_v12 = vpop.f32.mrf.mxu1  ;;  %v3250_v60 = vsub.f32 %v3226_v26, %v3238_v1 }
0x10af   :  { %v2971_v58 = vmul.f32 0.25, %v2960_v12 }
0x10b0   :  { %v3258_v43 = vmul.f32 1.442695, %v3250_v60 }
0x10b1   :  { %v7433_v22 = vpop.eup %5816  ;;  %v7463_v46 = vadd.f32 %v2971_v58, %v6493_v33 }
0x10b2   :  { %v7435_v16 = vpop.eup %5818  ;;  %v3269_v14 = vsel %vm804_vm11, %v7433_v22, 0.0  ;;  %5822 = vpow2.f32 %v3258_v43 }
0x10b3   :  { %3270 = vadd.xlane.f32.xlu2 %v3269_v14  ;;  %v3021_v18 = vsel %vm804_vm11, %v7435_v16, 0.0  ;;  %3016 = vadd.xlane.f32.xlu1 %v3015_v15  ;;  %v5821_v39 = vpop.eup %5820  ;;  %v2991_v55 = vsel %vm804_vm11, %v7463_v46, -inf }
0x10b4   :  { %3022 = vadd.xlane.f32.xlu0 %v3021_v18  ;;  %v3018_v38 = vsel %vm804_vm11, %v5821_v39, 0.0 }
0x10b6   :  { %v2963_v11 = vpop.f32.mrf.mxu1 }
0x10b7   :  { %v2972_v40 = vmul.f32 0.25, %v2963_v11 }
0x10b8   :  { %v7443_v8 = vpop.eup %5822 }
0x10b9   :  { %v3272_v9 = vsel %vm804_vm11, %v7443_v8, 0.0  ;;  %v7485_v5 = vadd.f32 %v2972_v40, %v6493_v33 }
0x10bb   :  { %3019 = vadd.xlane.f32.xlu2 %v3018_v38  ;;  %v2994_v7 = vsel %vm804_vm11, %v7485_v5, -inf }
0x10be   :  { %v2965_v4 = vpop.f32.mrf.mxu1 }
0x10c3   :  { %3273 = vadd.xlane.f32.xlu2 %v3272_v9 }
0x10c6   :  { %v3209_v27 = vpop.f32.mrf.mxu1 }
0x10c7   :  { %v3221_v30 = vmul.f32 0.25, %v3209_v27 }
0x10c8   :  { %3312 = vrot.lane.b32.xlu0 %v7366_v45, %s5999_s4 }
0x10c9   :  { %v7466_v26 = vadd.f32 %v3221_v30, %v6493_v33 }
0x10cb   :  { %v3239_v57 = vsel %vm804_vm11, %v7466_v26, -inf }
0x10cc   :  { %3310 = vrot.lane.b32.xlu1 %v7373_v62, %s5999_s4 }
0x10ce   :  { %v3211_v34 = vpop.f32.mrf.mxu1 }
0x10cf   :  { %v3222_v24 = vmul.f32 0.25, %v3211_v34 }
0x10d1   :  { %v7473_v47 = vadd.f32 %v3222_v24, %v6493_v33 }
0x10d3   :  { %v3242_v19 = vsel %vm804_vm11, %v7473_v47, -inf }
0x10d6   :  { %v3214_v49 = vpop.f32.mrf.mxu1 }
0x10d7   :  { %v3223_v0 = vmul.f32 0.25, %v3214_v49 }
0x10d9   :  { %v7478_v25 = vadd.f32 %v3223_v0, %v6493_v33 }
0x10db   :  { %3469 = vrot.lane.b32.xlu2 %v7354_v2, %s8131_s8  ;;  %v3245_v31 = vsel %vm804_vm11, %v7478_v25, -inf }
0x10de   :  { %v3216_v44 = vpop.f32.mrf.mxu1 }
0x10e3   :  { %3467 = vrot.lane.b32.xlu2 %v7338_v13, %s8131_s8 }
0x10eb   :  { %3463 = vrot.lane.b32.xlu2 %v7338_v13, %s8132_s3 }
0x10f2   :  { %2989 = vmax.xlane.f32.xlu0 %v2988_v37 }
0x10f6   :  { %2992 = vmax.xlane.f32.xlu1 %v2991_v55 }
0x10fa   :  { %3240 = vmax.xlane.f32.xlu0 %v3239_v57 }
0x10fe   :  { %3243 = vmax.xlane.f32.xlu1 %v3242_v19 }
0x1106   :  { %3246 = vmax.xlane.f32.xlu1 %v3245_v31 }
0x110e   :  { %3465 = vrot.lane.b32.xlu0 %v7354_v2, %s8132_s3 }
0x1114   :  { %2995 = vmax.xlane.f32.xlu2 %v2994_v7 }
0x111e   :  { %v3268_v29 = vpop.xlane.xlu1 %3267 }
0x1126   :  { %v3271_v20 = vpop.xlane.xlu2 %3270  ;;  %v3017_v50 = vpop.xlane.xlu1 %3016 }
0x1127   :  { %5824 = vrcp.f32 %v3017_v50  ;;  %v3023_v3 = vpop.xlane.xlu0 %3022 }
0x112d   :  { %v5825_v41 = vpop.eup %5824 }
0x112e   :  { %v3020_v6 = vpop.xlane.xlu2 %3019  ;;  %v3039_v10 = vmul.f32 %v5825_v41, %v5815_v28 }
0x112f   :  { %5826 = vrcp.f32 %v3020_v6 }
0x1130   :  { %v3045_v21 = vpack.c.bf16 %v3039_v10, %v3039_v10  ;;  %5828 = vrcp.f32 %v3023_v3 }
0x1131   :  { %5830 = vrcp.f32 %v3271_v20 }
0x1132   :  { %v3054_v14 = vunpack.c.l.b16 %v3045_v21  ;;  %5832 = vrcp.f32 %v3268_v29 }
0x1135   :  { %v5827_v61 = vpop.eup %5826 }
0x1136   :  { %v3040_v1 = vmul.f32 %v5827_v61, %v5821_v39  ;;  %v3274_v12 = vpop.xlane.xlu2 %3273  ;;  %v5829_v38 = vpop.eup %5828 }
0x1137   :  { %v3041_v27 = vmul.f32 %v5829_v38, %v7435_v16  ;;  %v5831_v58 = vpop.eup %5830  ;;  %5834 = vrcp.f32 %v3274_v12 }
0x1138   :  { %v3046_v60 = vpack.c.bf16 %v3040_v1, %v3040_v1  ;;  %v5833_v30 = vpop.eup %5832  ;;  %v3291_v37 = vmul.f32 %v5831_v58, %v7433_v22 }
0x1139   :  { %v3047_v39 = vpack.c.bf16 %v3041_v27, %v3041_v27  ;;  %v3290_v24 = vmul.f32 %v5833_v30, %v7429_v35 }
0x113a   :  { %v3055_v15 = vunpack.c.l.b16 %v3046_v60  ;;  %v3313_v18 = vpop.permute.xlu0 %3312  ;;  %v3297_v16 = vpack.c.bf16 %v3291_v37, %v3291_v37 }
0x113b   :  { %v3322_v43 = vsel %vm900_vm2, %v3313_v18, 0  ;;  %v3056_v44 = vunpack.c.l.b16 %v3047_v39  ;;  %v3296_v55 = vpack.c.bf16 %v3290_v24, %v3290_v24 }
0x113c   :  { %v3057_v11 = vpack.c.b16 %v3055_v15, %v3054_v14  ;;  %3330 = vmatpush.bf16.msrb.mxu2 %v3322_v43  ;;  %v3306_v57 = vunpack.c.l.b16 %v3297_v16 }
0x113d   :  { %v3058_v53 = vpack.c.b16 %v3056_v44, %v3056_v44  ;;  %v3305_v0 = vunpack.c.l.b16 %v3296_v55  ;;  %v5835_v31 = vpop.eup %5834 }
0x113e   :  { %5260 = vmatmul.msk.bf16.vlgmr.msra.gmra.mxu2 %vm804_vm11, %v3057_v11  ;;  %v3470_v4 = vpop.permute.xlu2 %3469  ;;  %v3311_v9 = vpop.permute.xlu1 %3310  ;;  %v3292_v40 = vmul.f32 %v5835_v31, %v7443_v8 }
0x113f   :  { %v3481_v28 = vsel %vm719_vm3, %v3470_v4, 0  ;;  %v3308_v19 = vpack.c.b16 %v3306_v57, %v3305_v0 }
0x1140   :  { %3331 = vmatpush.bf16.msrb.mxu2 %v3311_v9  ;;  %v3298_v7 = vpack.c.bf16 %v3292_v40, %v3292_v40 }
0x1142   :  { %v3307_v6 = vunpack.c.l.b16 %v3298_v7 }
0x1144   :  { %3489 = vmatpush.bf16.xpose.msra.mxu2 %v3481_v28  ;;  %v3309_v41 = vpack.c.b16 %v3307_v6, %v3307_v6 }
0x1146   :  { %v3468_v34 = vpop.permute.xlu2 %3467 }
0x1147   :  { %v3478_v49 = vsel %vm719_vm3, %v3468_v34, 0  ;;  %v5557_v34 = vld [vmem:[%s8074_s9 + $0x20] sm:$0xff] }
0x1148   :  { %3446 = vmatpush.bf16.msrb.mxu1 %v5557_v34 }
0x114c   :  { %3490 = vmatpush.bf16.xpose.msra.mxu2 %v3478_v49 }
0x114e   :  { %5261 = vmatmul.msk.bf16.gmra.mxu2 %vm804_vm11, %v3058_v53 }
0x115e   :  { %5268 = vmatmul.msk.bf16.vlgmr.msrb.gmra.mxu2 %vm804_vm11, %v3308_v19 }
0x1165   :  { %v2990_v29 = vpop.xlane.xlu0 %2989 }
0x1166   :  { %v3000_v20 = vsub.f32 %v7458_v52, %v2990_v29 }
0x1168   :  { %v3009_v50 = vmul.f32 1.442695, %v3000_v20 }
0x1169   :  { %v2993_v22 = vpop.xlane.xlu1 %2992 }
0x116a   :  { %5836 = vpow2.f32 %v3009_v50  ;;  %v3001_v35 = vsub.f32 %v7463_v46, %v2993_v22 }
0x116c   :  { %v3011_v10 = vmul.f32 1.442695, %v3001_v35 }
0x116d   :  { %v3241_v3 = vpop.xlane.xlu0 %3240 }
0x116e   :  { %v3251_v61 = vsub.f32 %v7466_v26, %v3241_v3  ;;  %5269 = vmatmul.msk.bf16.gmra.mxu2 %vm804_vm11, %v3309_v41  ;;  %5838 = vpow2.f32 %v3011_v10  ;;  %v3464_v26 = vpop.permute.xlu2 %3463 }
0x1170   :  { %v5837_v21 = vpop.eup %5836  ;;  %v3260_v8 = vmul.f32 1.442695, %v3251_v61 }
0x1171   :  { %v3024_v1 = vsel %vm804_vm11, %v5837_v21, 0.0  ;;  %v3244_v14 = vpop.xlane.xlu1 %3243 }
0x1172   :  { %5840 = vpow2.f32 %v3260_v8  ;;  %3025 = vadd.xlane.f32.xlu1 %v3024_v1  ;;  %v3252_v43 = vsub.f32 %v7473_v47, %v3244_v14 }
0x1174   :  { %v5839_v52 = vpop.eup %5838  ;;  %v3262_v4 = vmul.f32 1.442695, %v3252_v43 }
0x1175   :  { %v3027_v12 = vsel %vm804_vm11, %v5839_v52, 0.0 }
0x1176   :  { %3028 = vadd.xlane.f32.xlu0 %v3027_v12 }
0x1178   :  { %v7505_v60 = vpop.eup %5840 }
0x1179   :  { %v3275_v46 = vsel %vm804_vm11, %v7505_v60, 0.0  ;;  %v3247_v27 = vpop.xlane.xlu1 %3246 }
0x117a   :  { %3276 = vadd.xlane.f32.xlu2 %v3275_v46  ;;  %v3253_v39 = vsub.f32 %v7478_v25, %v3247_v27  ;;  %v5558_v25 = vld [vmem:[%s8074_s9 + $0x28] sm:$0xff] }
0x117b   :  { %3407 = vmatpush.bf16.msrb.mxu0 %v5558_v25 }
0x117c   :  { %v3264_v49 = vmul.f32 1.442695, %v3253_v39 }
0x117e   :  { %5286 = vmatmul.msk.bf16.vlgmr.msra.gmra.mxu2 %vm719_vm3, %v3464_v26 }
0x1180   :  { %v3466_v38 = vpop.permute.xlu0 %3465 }
0x1187   :  { %v2996_v15 = vpop.xlane.xlu2 %2995 }
0x1188   :  { %v3002_v18 = vsub.f32 %v7485_v5, %v2996_v15 }
0x118a   :  { %v3013_v11 = vmul.f32 1.442695, %v3002_v18  ;;  %3507 = vrot.lane.b32.xlu0 %v7391_v32, %s8131_s8 }
0x118c   :  { %5842 = vpow2.f32 %v3013_v11 }
0x118d   :  { %5844 = vpow2.f32 %v3262_v4 }
0x118e   :  { %5287 = vmatmul.msk.bf16.gmra.mxu2 %vm719_vm3, %v3466_v38  ;;  %5846 = vpow2.f32 %v3264_v49 }
0x1192   :  { %v7515_v9 = vpop.eup %5842  ;;  %3352 = vrot.lane.b32.xlu2 %v7382_v59, %s5999_s4 }
0x1193   :  { %v3030_v5 = vsel %vm804_vm11, %v7515_v9, 0.0  ;;  %v7521_v47 = vpop.eup %5844 }
0x1194   :  { %3031 = vadd.xlane.f32.xlu1 %v3030_v5  ;;  %v3278_v28 = vsel %vm804_vm11, %v7521_v47, 0.0  ;;  %v7531_v44 = vpop.eup %5846 }
0x1195   :  { %v3281_v53 = vsel %vm804_vm11, %v7531_v44, 0.0 }
0x119c   :  { %3279 = vadd.xlane.f32.xlu1 %v3278_v28 }
0x11b5   :  { %3350 = vrot.lane.b32.xlu1 %v7389_v23, %s5999_s4  ;;  %s8133_s4 = smov 16  }
0x11bb   :  { %3282 = vadd.xlane.f32.xlu2 %v3281_v53 }
0x11c1   :  { %v3086_v58 = vpop.f32.mrf.mxu2 }
0x11c9   :  { %v3088_v30 = vpop.f32.mrf.mxu2 }
0x11ca   :  { %v3139_v37 = vpack.c.bf16 %v3088_v30, %v3086_v58 }
0x11cc   :  { %5283 = vmatmul.msk.bf16.vlgmr.msrb.gmra.mxu1 %vm719_vm3, %v3139_v37 }
0x11d1   :  { %v7539_v24 = vpop.f32.mrf.mxu2 }
0x11d3   :  { %3505 = vrot.lane.b32.xlu2 %v7380_v36, %s8131_s8 }
0x11d9   :  { %v3093_v16 = vpop.f32.mrf.mxu2 }
0x11e1   :  { %v3333_v55 = vpop.f32.mrf.mxu2 }
0x11e5   :  { %v3026_v57 = vpop.xlane.xlu1 %3025 }
0x11e6   :  { %5848 = vrcp.f32 %v3026_v57 }
0x11e9   :  { %v3335_v0 = vpop.f32.mrf.mxu2  ;;  %v3029_v31 = vpop.xlane.xlu0 %3028 }
0x11ea   :  { %v3382_v19 = vpack.c.bf16 %v3335_v0, %v3333_v55  ;;  %5850 = vrcp.f32 %v3029_v31 }
0x11ec   :  { %v5849_v40 = vpop.eup %5848  ;;  %5276 = vmatmul.msk.bf16.vlgmr.msrb.gmra.mxu0 %vm719_vm3, %v3382_v19 }
0x11ed   :  { %v3277_v7 = vpop.xlane.xlu2 %3276  ;;  %v3042_v29 = vmul.f32 %v5849_v40, %v5837_v21 }
0x11ef   :  { %v3048_v6 = vpack.c.bf16 %v3042_v29, %v3042_v29 }
0x11f0   :  { %v5851_v20 = vpop.eup %5850 }
0x11f1   :  { %v7544_v50 = vpop.f32.mrf.mxu2  ;;  %v3043_v22 = vmul.f32 %v5851_v20, %v5839_v52  ;;  %v3098_v10 = vunpack.c.l.b16 %v3048_v6 }
0x11f3   :  { %v3049_v35 = vpack.c.bf16 %v3043_v22, %v3043_v22 }
0x11f5   :  { %v3353_v41 = vpop.permute.xlu2 %3352  ;;  %v3099_v3 = vunpack.c.l.b16 %v3049_v35 }
0x11f6   :  { %v3362_v61 = vsel %vm900_vm2, %v3353_v41, 0 }
0x11f7   :  { %3370 = vmatpush.bf16.msrb.mxu3 %v3362_v61  ;;  %v3101_v8 = vpack.c.b16 %v3099_v3, %v3098_v10 }
0x11f9   :  { %v3340_v1 = vpop.f32.mrf.mxu2  ;;  %5262 = vmatmul.msk.bf16.vlgmr.msra.gmra.mxu3 %vm804_vm11, %v3101_v8 }
0x11fc   :  { %v3508_v37 = vpop.permute.xlu0 %3507 }
0x11fd   :  { %v3519_v0 = vsel %vm719_vm3, %v3508_v37, 0 }
0x1201   :  { %v3492_v12 = vpop.f32.mrf.mxu2 }
0x1202   :  { %v3539_v46 = vmul.f32 0.25, %v3492_v12 }
0x1204   :  { %v7549_v21 = vadd.f32 %v3539_v46, %v6493_v33 }
0x1206   :  { %v3551_v26 = vsel %vm804_vm11, %v7549_v21, -inf }
0x1207   :  { %3552 = vmax.xlane.f32.xlu0 %v3551_v26  ;;  %v3032_v52 = vpop.xlane.xlu1 %3031 }
0x1208   :  { %5852 = vrcp.f32 %v3032_v52 }
0x1209   :  { %v3494_v14 = vpop.f32.mrf.mxu2 }
0x120a   :  { %v3540_v15 = vmul.f32 0.25, %v3494_v14 }
0x120c   :  { %v7554_v18 = vadd.f32 %v3540_v15, %v6493_v33 }
0x120e   :  { %v5853_v43 = vpop.eup %5852  ;;  %v3554_v11 = vsel %vm804_vm11, %v7554_v18, -inf }
0x120f   :  { %v3044_v38 = vmul.f32 %v5853_v43, %v7515_v9  ;;  %3555 = vmax.xlane.f32.xlu1 %v3554_v11  ;;  %v3280_v5 = vpop.xlane.xlu1 %3279 }
0x1210   :  { %5854 = vrcp.f32 %v3280_v5 }
0x1211   :  { %v3050_v4 = vpack.c.bf16 %v3044_v38, %v3044_v38  ;;  %v3497_v28 = vpop.f32.mrf.mxu2  ;;  %5856 = vrcp.f32 %v3277_v7 }
0x1212   :  { %v3541_v22 = vmul.f32 0.25, %v3497_v28 }
0x1213   :  { %v3100_v27 = vunpack.c.l.b16 %v3050_v4 }
0x1214   :  { %v3547_v35 = vadd.f32 %v3541_v22, %v6493_v33 }
0x1215   :  { %v3102_v39 = vpack.c.b16 %v3100_v27, %v3100_v27 }
0x1216   :  { %v5855_v49 = vpop.eup %5854  ;;  %v3557_v41 = vsel %vm804_vm11, %v3547_v35, -inf }
0x1217   :  { %5263 = vmatmul.msk.bf16.gmra.mxu3 %vm804_vm11, %v3102_v39  ;;  %v5857_v53 = vpop.eup %5856  ;;  %v3294_v58 = vmul.f32 %v5855_v49, %v7521_v47 }
0x1218   :  { %v3293_v9 = vmul.f32 %v5857_v53, %v7505_v60 }
0x1219   :  { %v3499_v34 = vpop.f32.mrf.mxu2  ;;  %v3300_v30 = vpack.c.bf16 %v3294_v58, %v3294_v58 }
0x121a   :  { %v3299_v25 = vpack.c.bf16 %v3293_v9, %v3293_v9 }
0x121b   :  { %3757 = vrot.lane.b32.xlu0 %v7354_v2, %s8133_s4  ;;  %v3346_v16 = vunpack.c.l.b16 %v3300_v30 }
0x121c   :  { %v3345_v55 = vunpack.c.l.b16 %v3299_v25 }
0x121e   :  { %v3348_v19 = vpack.c.b16 %v3346_v16, %v3345_v55 }
0x1223   :  { %3503 = vrot.lane.b32.xlu0 %v7391_v32, %s8132_s3 }
0x1227   :  { %v3351_v57 = vpop.permute.xlu1 %3350 }
0x1228   :  { %3501 = vrot.lane.b32.xlu1 %v7380_v36, %s8132_s3  ;;  %3371 = vmatpush.bf16.msrb.mxu3 %v3351_v57 }
0x122b   :  { %5270 = vmatmul.msk.bf16.vlgmr.msrb.gmra.mxu3 %vm804_vm11, %v3348_v19 }
0x122c   :  { %3527 = vmatpush.bf16.xpose.msra.mxu3 %v3519_v0 }
0x122e   :  { %v3283_v60 = vpop.xlane.xlu2 %3282 }
0x122f   :  { %5858 = vrcp.f32 %v3283_v60 }
0x1235   :  { %v5859_v47 = vpop.eup %5858 }
0x1236   :  { %v3295_v31 = vmul.f32 %v5859_v47, %v7531_v44  ;;  %v3506_v40 = vpop.permute.xlu2 %3505 }
0x1237   :  { %v3516_v7 = vsel %vm719_vm3, %v3506_v40, 0 }
0x1238   :  { %v3301_v29 = vpack.c.bf16 %v3295_v31, %v3295_v31  ;;  %3528 = vmatpush.bf16.xpose.msra.mxu3 %v3516_v7 }
0x123a   :  { %v3347_v20 = vunpack.c.l.b16 %v3301_v29 }
0x123c   :  { %v3349_v6 = vpack.c.b16 %v3347_v20, %v3347_v20 }
0x123e   :  { %5271 = vmatmul.msk.bf16.gmra.mxu3 %vm804_vm11, %v3349_v6 }
0x1249   :  { %v3448_v10 = vpop.f32.mrf.mxu1 }
0x124d   :  { %3558 = vmax.xlane.f32.xlu0 %v3557_v41 }
0x1261   :  { %3633 = vrot.lane.b32.xlu0 %v7366_v45, %s8132_s3 }
0x1269   :  { %v3409_v44 = vpop.f32.mrf.mxu0  ;;  %3631 = vrot.lane.b32.xlu0 %v7373_v62, %s8132_s3 }
0x126a   :  { %v7579_v3 = vadd.f32 %v3448_v10, %v3409_v44 }
0x1271   :  { %3751 = vrot.lane.b32.xlu0 %v7338_v13, %s8134_s29 }
0x1279   :  { %3793 = vrot.lane.b32.xlu0 %v7380_v36, %s8133_s4 }
0x127a   :  { %v3553_v61 = vpop.xlane.xlu0 %3552 }
0x127b   :  { %v3569_v8 = vsub.f32 %v7549_v21, %v3553_v61 }
0x127c   :  { %v3130_v12 = vpop.f32.mrf.mxu3 }
0x127d   :  { %v3575_v1 = vmul.f32 1.442695, %v3569_v8  ;;  %v3140_v46 = vpack.c.bf16 %v3130_v12, %v7539_v24  ;;  %v7613_v12 = vpop.f32.mrf.mxu1 }
0x127f   :  { %5860 = vpow2.f32 %v3575_v1  ;;  %5284 = vmatmul.msk.bf16.gmra.mxu1 %vm719_vm3, %v3140_v46 }
0x1281   :  { %3753 = vrot.lane.b32.xlu0 %v7354_v2, %s8134_s29 }
0x1282   :  { %v3556_v26 = vpop.xlane.xlu1 %3555 }
0x1283   :  { %v3570_v52 = vsub.f32 %v7554_v18, %v3556_v26  ;;  %v7616_v26 = vpop.f32.mrf.mxu0 }
0x1284   :  { %v3132_v4 = vpop.f32.mrf.mxu3 }
0x1285   :  { %v5861_v14 = vpop.eup %5860  ;;  %v3577_v15 = vmul.f32 1.442695, %v3570_v52 }
0x1286   :  { %v3587_v43 = vsel %vm804_vm11, %v5861_v14, 0.0 }
0x1287   :  { %5862 = vpow2.f32 %v3577_v15  ;;  %3588 = vadd.xlane.f32.xlu2 %v3587_v43 }
0x128d   :  { %v5863_v21 = vpop.eup %5862  ;;  %v3758_v11 = vpop.permute.xlu0 %3757 }
0x128e   :  { %v3769_v38 = vsel %vm719_vm3, %v3758_v11, 0  ;;  %v3590_v24 = vsel %vm804_vm11, %v5863_v21, 0.0 }
0x128f   :  { %3591 = vadd.xlane.f32.xlu1 %v3590_v24  ;;  %3777 = vmatpush.bf16.xpose.msra.mxu1 %v3769_v38 }
0x1295   :  { %v3504_v27 = vpop.permute.xlu0 %3503 }
0x129a   :  { %v3502_v5 = vpop.permute.xlu1 %3501  ;;  %v3135_v2 = vpop.f32.mrf.mxu3 }
0x129b   :  { %v3141_v28 = vpack.c.bf16 %v3135_v2, %v3132_v4  ;;  %5288 = vmatmul.msk.bf16.vlgmr.msra.gmra.mxu3 %vm719_vm3, %v3502_v5 }
0x129d   :  { %5285 = vmatmul.msk.bf16.gmra.mxu1 %vm719_vm3, %v3141_v28 }
0x129f   :  { %3755 = vrot.lane.b32.xlu2 %v7338_v13, %s8133_s4 }
0x12a2   :  { %v3137_v18 = vpop.f32.mrf.mxu3 }
0x12a7   :  { %3789 = vrot.lane.b32.xlu2 %v7380_v36, %s8134_s29 }
0x12ab   :  { %5289 = vmatmul.msk.bf16.gmra.mxu3 %vm719_vm3, %v3504_v27 }
0x12ae   :  { %v3373_v39 = vpop.f32.mrf.mxu3 }
0x12af   :  { %v3383_v34 = vpack.c.bf16 %v3373_v39, %v7544_v50 }
0x12b1   :  { %5277 = vmatmul.msk.bf16.gmra.mxu0 %vm719_vm3, %v3383_v34 }
0x12b6   :  { %v3375_v49 = vpop.f32.mrf.mxu3 }
0x12c0   :  { %v3559_v53 = vpop.xlane.xlu0 %3558 }
0x12c1   :  { %v3378_v58 = vpop.f32.mrf.mxu3  ;;  %v3571_v9 = vsub.f32 %v3547_v35, %v3559_v53 }
0x12c2   :  { %v3384_v30 = vpack.c.bf16 %v3378_v58, %v3375_v49 }
0x12c3   :  { %v3579_v25 = vmul.f32 1.442695, %v3571_v9 }
0x12c4   :  { %5278 = vmatmul.msk.bf16.gmra.mxu0 %vm719_vm3, %v3384_v30 }
0x12c5   :  { %5864 = vpow2.f32 %v3579_v25 }
0x12c9   :  { %v3380_v13 = vpop.f32.mrf.mxu3 }
0x12cb   :  { %v5865_v37 = vpop.eup %5864 }
0x12cc   :  { %v3593_v36 = vsel %vm804_vm11, %v5865_v37, 0.0 }
0x12cd   :  { %3594 = vadd.xlane.f32.xlu1 %v3593_v36 }
0x12d3   :  { %v3634_v16 = vpop.permute.xlu0 %3633 }
0x12d4   :  { %v3643_v55 = vsel %vm900_vm2, %v3634_v16, 0 }
0x12d5   :  { %3651 = vmatpush.bf16.msra.mxu0 %v3643_v55 }
0x12db   :  { %v3632_v50 = vpop.permute.xlu0 %3631 }
0x12dc   :  { %3652 = vmatpush.bf16.msra.mxu0 %v3632_v50 }
0x12e3   :  { %v3752_v31 = vpop.permute.xlu0 %3751 }
0x12e6   :  { %3795 = vrot.lane.b32.xlu1 %v7391_v32, %s8133_s4 }
0x12eb   :  { %v3794_v41 = vpop.permute.xlu0 %3793 }
0x12ec   :  { %v3804_v50 = vsel %vm719_vm3, %v3794_v41, 0 }
0x12f3   :  { %v3754_v44 = vpop.permute.xlu0 %3753 }
0x12fa   :  { %v3589_v57 = vpop.xlane.xlu2 %3588 }
0x12fb   :  { %5866 = vrcp.f32 %v3589_v57 }
0x12fc   :  { %v3453_v43 = vpop.f32.mrf.mxu1 }
0x1301   :  { %v5867_v60 = vpop.eup %5866 }
0x1302   :  { %v3592_v0 = vpop.xlane.xlu1 %3591  ;;  %v3756_v19 = vpop.permute.xlu2 %3755  ;;  %v3611_v40 = vmul.f32 %v5867_v60, %v5861_v14 }
0x1303   :  { %5868 = vrcp.f32 %v3592_v0  ;;  %v3766_v47 = vsel %vm719_vm3, %v3756_v19, 0 }
0x1304   :  { %3778 = vmatpush.bf16.xpose.msra.mxu1 %v3766_v47  ;;  %v3617_v29 = vpack.c.bf16 %v3611_v40, %v3611_v40  ;;  %v3455_v28 = vpop.f32.mrf.mxu1 }
0x1306   :  { %v3626_v22 = vunpack.c.l.b16 %v3617_v29 }
0x1309   :  { %v5869_v7 = vpop.eup %5868 }
0x130a   :  { %v3612_v20 = vmul.f32 %v5869_v7, %v5863_v21  ;;  %v3790_v57 = vpop.permute.xlu2 %3789 }
0x130b   :  { %5301 = vmatmul.msk.bf16.vlgmr.msra.gmra.mxu1 %vm719_vm3, %v3752_v31 }
0x130c   :  { %v3618_v6 = vpack.c.bf16 %v3612_v20, %v3612_v20 }
0x130e   :  { %v3627_v35 = vunpack.c.l.b16 %v3618_v6 }
0x1310   :  { %v3629_v10 = vpack.c.b16 %v3627_v35, %v3626_v22 }
0x1312   :  { %5290 = vmatmul.msk.bf16.vlgmr.msra.gmra.mxu0 %vm804_vm11, %v3629_v10 }
0x131a   :  { %v3458_v49 = vpop.f32.mrf.mxu1 }
0x131b   :  { %5302 = vmatmul.msk.bf16.gmra.mxu1 %vm719_vm3, %v3754_v44 }
0x131e   :  { %v3530_v61 = vpop.f32.mrf.mxu3 }
0x131f   :  { %v3542_v8 = vmul.f32 0.25, %v3530_v61 }
0x1321   :  { %v3548_v1 = vadd.f32 %v3542_v8, %v6493_v33 }
0x1322   :  { %v7643_v0 = vpop.f32.mrf.mxu1 }
0x1323   :  { %v3560_v46 = vsel %vm804_vm11, %v3548_v1, -inf }
0x1324   :  { %3561 = vmax.xlane.f32.xlu2 %v3560_v46 }
0x1326   :  { %v3532_v52 = vpop.f32.mrf.mxu3 }
0x1327   :  { %v3543_v14 = vmul.f32 0.25, %v3532_v52 }
0x1329   :  { %v7619_v15 = vadd.f32 %v3543_v14, %v6493_v33 }
0x132b   :  { %v3563_v21 = vsel %vm804_vm11, %v7619_v15, -inf }
0x132c   :  { %3564 = vmax.xlane.f32.xlu0 %v3563_v21 }
0x132e   :  { %v3414_v11 = vpop.f32.mrf.mxu0  ;;  %v3535_v38 = vpop.f32.mrf.mxu3 }
0x132f   :  { %v7623_v24 = vadd.f32 %v3453_v43, %v3414_v11  ;;  %v3544_v4 = vmul.f32 0.25, %v3535_v38 }
0x1331   :  { %v7626_v5 = vadd.f32 %v3544_v4, %v6493_v33 }
0x1333   :  { %v3566_v2 = vsel %vm804_vm11, %v7626_v5, -inf }
0x1334   :  { %3567 = vmax.xlane.f32.xlu1 %v3566_v2 }
0x1336   :  { %v3416_v18 = vpop.f32.mrf.mxu0  ;;  %v3537_v27 = vpop.f32.mrf.mxu3 }
0x1337   :  { %v7630_v39 = vadd.f32 %v3455_v28, %v3416_v18 }
0x1340   :  { %v3595_v34 = vpop.xlane.xlu1 %3594 }
0x1341   :  { %v3419_v53 = vpop.f32.mrf.mxu0  ;;  %5870 = vrcp.f32 %v3595_v34 }
0x1342   :  { %v7632_v58 = vadd.f32 %v3458_v49, %v3419_v53 }
0x1347   :  { %v5871_v9 = vpop.eup %5870 }
0x1348   :  { %v3613_v30 = vmul.f32 %v5871_v9, %v5865_v37  ;;  %v5559_v37 = vld [vmem:[%s8074_s9 + $0x30] sm:$0xff] }
0x1349   :  { %3728 = vmatpush.bf16.msrb.mxu3 %v5559_v37  ;;  %v7645_v19 = vpop.f32.mrf.mxu0 }
0x134a   :  { %v3619_v25 = vpack.c.bf16 %v3613_v30, %v3613_v30 }
0x134c   :  { %v3628_v13 = vunpack.c.l.b16 %v3619_v25 }
0x134d   :  { %3671 = vrot.lane.b32.xlu1 %v7389_v23, %s8132_s3 }
0x134e   :  { %v3630_v36 = vpack.c.b16 %v3628_v13, %v3628_v13 }
0x1350   :  { %5291 = vmatmul.msk.bf16.gmra.mxu0 %vm804_vm11, %v3630_v36 }
0x1358   :  { %v3796_v16 = vpop.permute.xlu1 %3795 }
0x1359   :  { %v3807_v55 = vsel %vm719_vm3, %v3796_v16, 0 }
0x135a   :  { %3815 = vmatpush.bf16.xpose.msrb.mxu0 %v3807_v55 }
0x1362   :  { %3816 = vmatpush.bf16.xpose.msrb.mxu0 %v3804_v50 }
0x1369   :  { %5303 = vmatmul.msk.bf16.vlgmr.msrb.gmra.mxu0 %vm719_vm3, %v3790_v57 }
0x1388   :  { %v3780_v60 = vpop.f32.mrf.mxu1 }
0x1389   :  { %v3827_v47 = vmul.f32 0.25, %v3780_v60 }
0x138b   :  { %v3833_v31 = vadd.f32 %v3827_v47, %v6493_v33 }
0x138d   :  { %v3839_v40 = vsel %vm804_vm11, %v3833_v31, -inf }
0x138e   :  { %3840 = vmax.xlane.f32.xlu2 %v3839_v40 }
0x138f   :  { %v3654_v7 = vpop.f32.mrf.mxu0 }
0x1390   :  { %v3782_v29 = vpop.f32.mrf.mxu1 }
0x1391   :  { %v3828_v20 = vmul.f32 0.25, %v3782_v29 }
0x1393   :  { %v3834_v6 = vadd.f32 %v3828_v20, %v6493_v33 }
0x1395   :  { %v3842_v22 = vsel %vm804_vm11, %v3834_v6, -inf }
0x1396   :  { %3843 = vmax.xlane.f32.xlu0 %v3842_v22 }
0x1397   :  { %v3562_v35 = vpop.xlane.xlu2 %3561  ;;  %v3656_v41 = vpop.f32.mrf.mxu0 }
0x1398   :  { %v3572_v10 = vsub.f32 %v3548_v1, %v3562_v35  ;;  %v3703_v44 = vpack.c.bf16 %v3656_v41, %v3654_v7  ;;  %v3785_v61 = vpop.f32.mrf.mxu1 }
0x1399   :  { %v3829_v8 = vmul.f32 0.25, %v3785_v61 }
0x139a   :  { %v3581_v46 = vmul.f32 1.442695, %v3572_v10  ;;  %5298 = vmatmul.msk.bf16.vlgmr.msrb.gmra.mxu3 %vm719_vm3, %v3703_v44 }
0x139b   :  { %v3835_v52 = vadd.f32 %v3829_v8, %v6493_v33 }
0x139c   :  { %5872 = vpow2.f32 %v3581_v46 }
0x139d   :  { %v3845_v14 = vsel %vm804_vm11, %v3835_v52, -inf }
0x139e   :  { %3846 = vmax.xlane.f32.xlu0 %v3845_v14 }
0x139f   :  { %v3565_v43 = vpop.xlane.xlu0 %3564 }
0x13a0   :  { %v3573_v21 = vsub.f32 %v7619_v15, %v3565_v43  ;;  %v3787_v11 = vpop.f32.mrf.mxu1 }
0x13a2   :  { %v5873_v38 = vpop.eup %5872  ;;  %v3583_v4 = vmul.f32 1.442695, %v3573_v21 }
0x13a3   :  { %v3596_v1 = vsel %vm804_vm11, %v5873_v38, 0.0 }
0x13a4   :  { %5874 = vpow2.f32 %v3583_v4  ;;  %3597 = vadd.xlane.f32.xlu2 %v3596_v1 }
0x13a7   :  { %v3568_v2 = vpop.xlane.xlu1 %3567 }
0x13a8   :  { %v3574_v28 = vsub.f32 %v7626_v5, %v3568_v2 }
0x13aa   :  { %v5875_v18 = vpop.eup %5874  ;;  %v3585_v27 = vmul.f32 1.442695, %v3574_v28 }
0x13ab   :  { %v3599_v34 = vsel %vm804_vm11, %v5875_v18, 0.0 }
0x13ac   :  { %5876 = vpow2.f32 %v3585_v27  ;;  %3600 = vadd.xlane.f32.xlu1 %v3599_v34 }
0x13b2   :  { %v5877_v49 = vpop.eup %5876 }
0x13b3   :  { %v3602_v53 = vsel %vm804_vm11, %v5877_v49, 0.0 }
0x13b4   :  { %3603 = vadd.xlane.f32.xlu0 %v3602_v53 }
0x13bc   :  { %3673 = vrot.lane.b32.xlu2 %v7382_v59, %s8132_s3 }
0x13bf   :  { %v3672_v22 = vpop.permute.xlu1 %3671 }
0x13cd   :  { %v7661_v15 = vpop.f32.mrf.mxu0 }
0x13d5   :  { %v3661_v9 = vpop.f32.mrf.mxu0 }
0x13e6   :  { %v3818_v30 = vpop.f32.mrf.mxu0 }
0x13e7   :  { %v3830_v25 = vmul.f32 0.25, %v3818_v30 }
0x13e9   :  { %v3836_v5 = vadd.f32 %v3830_v25, %v6493_v33 }
0x13eb   :  { %v3848_v13 = vsel %vm804_vm11, %v3836_v5, -inf }
0x13ec   :  { %3849 = vmax.xlane.f32.xlu1 %v3848_v13 }
0x13ee   :  { %v3820_v57 = vpop.f32.mrf.mxu0 }
0x13ef   :  { %v3831_v40 = vmul.f32 0.25, %v3820_v57 }
0x13f1   :  { %v3837_v29 = vadd.f32 %v3831_v40, %v6493_v33 }
0x13f3   :  { %v3851_v20 = vsel %vm804_vm11, %v3837_v29, -inf }
0x1401   :  { %v3841_v36 = vpop.xlane.xlu2 %3840 }
0x1402   :  { %v3857_v16 = vsub.f32 %v3833_v31, %v3841_v36 }
0x1404   :  { %v3863_v55 = vmul.f32 1.442695, %v3857_v16 }
0x1405   :  { %3919 = vrot.lane.b32.xlu1 %v7373_v62, %s8134_s29 }
0x1406   :  { %5878 = vpow2.f32 %v3863_v55 }
0x1409   :  { %v3844_v50 = vpop.xlane.xlu0 %3843 }
0x140a   :  { %v3858_v37 = vsub.f32 %v3834_v6, %v3844_v50 }
0x140c   :  { %v7667_v60 = vpop.eup %5878  ;;  %v3865_v47 = vmul.f32 1.442695, %v3858_v37 }
0x140d   :  { %v3875_v7 = vsel %vm804_vm11, %v7667_v60, 0.0 }
0x140e   :  { %5880 = vpow2.f32 %v3865_v47  ;;  %3876 = vadd.xlane.f32.xlu0 %v3875_v7 }
0x1411   :  { %v3847_v35 = vpop.xlane.xlu0 %3846 }
0x1412   :  { %v3859_v41 = vsub.f32 %v3835_v52, %v3847_v35 }
0x1414   :  { %v5881_v31 = vpop.eup %5880  ;;  %v3867_v46 = vmul.f32 1.442695, %v3859_v41 }
0x1415   :  { %v3878_v62 = vsel %vm804_vm11, %v5881_v31, 0.0 }
0x1416   :  { %3852 = vmax.xlane.f32.xlu0 %v3851_v20  ;;  %3879 = vadd.xlane.f32.xlu2 %v3878_v62 }
0x1417   :  { %v3598_v6 = vpop.xlane.xlu2 %3597 }
0x1418   :  { %5882 = vrcp.f32 %v3598_v6 }
0x141e   :  { %v5883_v61 = vpop.eup %5882 }
0x141f   :  { %v3674_v10 = vpop.permute.xlu2 %3673  ;;  %v3601_v44 = vpop.xlane.xlu1 %3600  ;;  %v3614_v14 = vmul.f32 %v5883_v61, %v5873_v38 }
0x1420   :  { %v3683_v8 = vsel %vm900_vm2, %v3674_v10, 0  ;;  %5884 = vrcp.f32 %v3601_v44 }
0x1421   :  { %3691 = vmatpush.bf16.msrb.mxu2 %v3683_v8  ;;  %5886 = vpow2.f32 %v3867_v46  ;;  %v3620_v21 = vpack.c.bf16 %v3614_v14, %v3614_v14 }
0x1423   :  { %v3666_v2 = vunpack.c.l.b16 %v3620_v21 }
0x1425   :  { %3692 = vmatpush.bf16.msrb.mxu2 %v3672_v22 }
0x1426   :  { %v5885_v43 = vpop.eup %5884 }
0x1427   :  { %v3615_v11 = vmul.f32 %v5885_v43, %v5875_v18  ;;  %v3604_v4 = vpop.xlane.xlu0 %3603  ;;  %v5887_v52 = vpop.eup %5886 }
0x1428   :  { %5888 = vrcp.f32 %v3604_v4  ;;  %v3881_v53 = vsel %vm804_vm11, %v5887_v52, 0.0 }
0x1429   :  { %v3621_v1 = vpack.c.bf16 %v3615_v11, %v3615_v11 }
0x142a   :  { %3921 = vrot.lane.b32.xlu0 %v7366_v45, %s8134_s29 }
0x142b   :  { %v3667_v28 = vunpack.c.l.b16 %v3621_v1 }
0x142d   :  { %v3669_v27 = vpack.c.b16 %v3667_v28, %v3666_v2 }
0x142e   :  { %v5889_v34 = vpop.eup %5888 }
0x142f   :  { %5292 = vmatmul.msk.bf16.vlgmr.msrb.gmra.mxu2 %vm804_vm11, %v3669_v27  ;;  %3882 = vadd.xlane.f32.xlu1 %v3881_v53  ;;  %v3616_v38 = vmul.f32 %v5889_v34, %v5877_v49  ;;  %v5560_v34 = vld [vmem:[%s8074_s9 + $0x38] sm:$0xff] }
0x1430   :  { %4016 = vmatpush.bf16.msra.mxu3 %v5560_v34 }
0x1431   :  { %v3622_v9 = vpack.c.bf16 %v3616_v38, %v3616_v38 }
0x1433   :  { %v3668_v30 = vunpack.c.l.b16 %v3622_v9 }
0x1435   :  { %v3670_v18 = vpack.c.b16 %v3668_v30, %v3668_v30 }
0x143f   :  { %5293 = vmatmul.msk.bf16.gmra.mxu2 %vm804_vm11, %v3670_v18 }
0x1448   :  { %3959 = vrot.lane.b32.xlu1 %v7389_v23, %s8134_s29 }
0x145f   :  { %v3850_v45 = vpop.xlane.xlu1 %3849 }
0x1460   :  { %v3860_v25 = vsub.f32 %v3836_v5, %v3850_v45 }
0x1462   :  { %v3869_v13 = vmul.f32 1.442695, %v3860_v25 }
0x1464   :  { %5890 = vpow2.f32 %v3869_v13 }
0x146a   :  { %v5891_v36 = vpop.eup %5890 }
0x146b   :  { %v3884_v16 = vsel %vm804_vm11, %v5891_v36, 0.0 }
0x146c   :  { %3885 = vadd.xlane.f32.xlu0 %v3884_v16 }
0x1477   :  { %v3920_v62 = vpop.permute.xlu1 %3919 }
0x1480   :  { %3791 = vrot.lane.b32.xlu0 %v7391_v32, %s8134_s29 }
0x1481   :  { %v3877_v49 = vpop.xlane.xlu0 %3876 }
0x1489   :  { %v3853_v55 = vpop.xlane.xlu0 %3852  ;;  %v3880_v50 = vpop.xlane.xlu2 %3879 }
0x148a   :  { %v3861_v57 = vsub.f32 %v3837_v29, %v3853_v55  ;;  %5892 = vrcp.f32 %v3880_v50 }
0x148c   :  { %v3871_v37 = vmul.f32 1.442695, %v3861_v57 }
0x148e   :  { %5894 = vpow2.f32 %v3871_v37 }
0x148f   :  { %5896 = vrcp.f32 %v3877_v49 }
0x1490   :  { %v5893_v23 = vpop.eup %5892 }
0x1491   :  { %v3900_v7 = vmul.f32 %v5893_v23, %v5881_v31 }
0x1493   :  { %v3906_v22 = vpack.c.bf16 %v3900_v7, %v3900_v7 }
0x1494   :  { %v5895_v47 = vpop.eup %5894 }
0x1495   :  { %v3887_v5 = vsel %vm804_vm11, %v5895_v47, 0.0  ;;  %v5897_v40 = vpop.eup %5896  ;;  %v3915_v29 = vunpack.c.l.b16 %v3906_v22 }
0x1496   :  { %3888 = vadd.xlane.f32.xlu2 %v3887_v5  ;;  %v3899_v20 = vmul.f32 %v5897_v40, %v7667_v60 }
0x1498   :  { %v3905_v6 = vpack.c.bf16 %v3899_v20, %v3899_v20 }
0x149a   :  { %v3914_v41 = vunpack.c.l.b16 %v3905_v6 }
0x149c   :  { %v3922_v32 = vpop.permute.xlu0 %3921  ;;  %v3917_v44 = vpack.c.b16 %v3915_v29, %v3914_v41 }
0x149d   :  { %v3931_v35 = vsel %vm900_vm2, %v3922_v32, 0 }
0x149e   :  { %3939 = vmatpush.bf16.msra.mxu2 %v3931_v35 }
0x14a2   :  { %v3883_v10 = vpop.xlane.xlu1 %3882  ;;  %3940 = vmatpush.bf16.msra.mxu2 %v3920_v62 }
0x14a3   :  { %5898 = vrcp.f32 %v3883_v10 }
0x14a5   :  { %5305 = vmatmul.msk.bf16.vlgmr.msra.gmra.mxu2 %vm804_vm11, %v3917_v44  ;;  %v3451_v44 = vadd.f32 %v7613_v12, %v7616_v26 }
0x14a9   :  { %v5899_v61 = vpop.eup %5898 }
0x14aa   :  { %v3901_v8 = vmul.f32 %v5899_v61, %v5887_v52 }
0x14ac   :  { %v3907_v31 = vpack.c.bf16 %v3901_v8, %v3901_v8 }
0x14ae   :  { %3961 = vrot.lane.b32.xlu2 %v7382_v59, %s8134_s29  ;;  %v3916_v60 = vunpack.c.l.b16 %v3907_v31 }
0x14b0   :  { %v3918_v43 = vpack.c.b16 %v3916_v60, %v3916_v60 }
0x14b2   :  { %v3694_v46 = vpop.f32.mrf.mxu2 }
0x14b3   :  { %v3704_v14 = vpack.c.bf16 %v3694_v46, %v7661_v15 }
0x14b5   :  { %5299 = vmatmul.msk.bf16.gmra.mxu3 %vm719_vm3, %v3704_v14  ;;  %5306 = vmatmul.msk.bf16.gmra.mxu2 %vm804_vm11, %v3918_v43 }
0x14ba   :  { %v3696_v21 = vpop.f32.mrf.mxu2  ;;  %v3960_v13 = vpop.permute.xlu1 %3959 }
0x14c2   :  { %v3699_v11 = vpop.f32.mrf.mxu2 }
0x14c3   :  { %v3705_v4 = vpack.c.bf16 %v3699_v11, %v3696_v21 }
0x14c5   :  { %5300 = vmatmul.msk.bf16.gmra.mxu3 %vm719_vm3, %v3705_v4 }
0x14ca   :  { %v3701_v1 = vpop.f32.mrf.mxu2 }
0x14df   :  { %v3886_v52 = vpop.xlane.xlu0 %3885 }
0x14e0   :  { %5900 = vrcp.f32 %v3886_v52 }
0x14e6   :  { %v5901_v28 = vpop.eup %5900 }
0x14e7   :  { %v3902_v15 = vmul.f32 %v5901_v28, %v5891_v36  ;;  %v3730_v36 = vpop.f32.mrf.mxu3 }
0x14e8   :  { %v3745_v41 = vadd.f32 %v3730_v36, %v7579_v3 }
0x14e9   :  { %v3908_v53 = vpack.c.bf16 %v3902_v15, %v3902_v15 }
0x14eb   :  { %v3954_v45 = vunpack.c.l.b16 %v3908_v53 }
0x14ef   :  { %v3732_v55 = vpop.f32.mrf.mxu3 }
0x14f0   :  { %v3746_v8 = vadd.f32 %v3732_v55, %v3451_v44 }
0x14f2   :  { %v3792_v2 = vpop.permute.xlu0 %3791 }
0x14f3   :  { %5304 = vmatmul.msk.bf16.gmra.mxu0 %vm719_vm3, %v3792_v2 }
0x1509   :  { %v3889_v59 = vpop.xlane.xlu2 %3888 }
0x150a   :  { %5902 = vrcp.f32 %v3889_v59 }
0x1510   :  { %v5903_v27 = vpop.eup %5902 }
0x1511   :  { %v3903_v38 = vmul.f32 %v5903_v27, %v5895_v47  ;;  %v3962_v9 = vpop.permute.xlu2 %3961 }
0x1512   :  { %v3971_v30 = vsel %vm900_vm2, %v3962_v9, 0 }
0x1513   :  { %v3909_v18 = vpack.c.bf16 %v3903_v38, %v3903_v38  ;;  %3979 = vmatpush.bf16.msrb.mxu1 %v3971_v30 }
0x1515   :  { %v3955_v25 = vunpack.c.l.b16 %v3909_v18 }
0x1517   :  { %v3957_v16 = vpack.c.b16 %v3955_v25, %v3954_v45  ;;  %3980 = vmatpush.bf16.msrb.mxu1 %v3960_v13 }
0x151a   :  { %5307 = vmatmul.msk.bf16.vlgmr.msrb.gmra.mxu1 %vm804_vm11, %v3957_v16 }
0x1528   :  { %v3942_v49 = vpop.f32.mrf.mxu2 }
0x1530   :  { %v3944_v50 = vpop.f32.mrf.mxu2 }
0x1531   :  { %v3991_v57 = vpack.c.bf16 %v3944_v50, %v3942_v49 }
0x1533   :  { %5313 = vmatmul.msk.bf16.vlgmr.msra.gmra.mxu3 %vm719_vm3, %v3991_v57  ;;  %v5354_v57 = vld [vmem:[%s8078_s13 + $0x70] sm:$0xf] }
0x1538   :  { %v3735_v37 = vpop.f32.mrf.mxu3  ;;  %v3947_v23 = vpop.f32.mrf.mxu2 }
0x1539   :  { %v3747_v47 = vadd.f32 %v3735_v37, %v7623_v24  ;;  %v7714_v24 = vld [vmem:[%s8075_s10 + $0x1] ss:$0 sm:$0xff]  ;;  %v5568_v37 = vld [vmem:[%s8078_s13 + $0x74] sm:$0xf0] }
0x1540   :  { %v3737_v5 = vpop.f32.mrf.mxu3  ;;  %v3949_v40 = vpop.f32.mrf.mxu2 }
0x1541   :  { %v3748_v7 = vadd.f32 %v3737_v5, %v7630_v39  ;;  %v5356_v5 = vld [vmem:[%s8078_s13 + $0x78] sm:$0xf0] }
0x1548   :  { %v3740_v20 = vpop.f32.mrf.mxu3 }
0x1549   :  { %v7705_v62 = vadd.f32 %v3740_v20, %v7632_v58 }
0x1550   :  { %v7708_v29 = vpop.f32.mrf.mxu3 }
0x1570   :  { %v3823_v22 = vpop.f32.mrf.mxu0 }
0x1578   :  { %v3825_v32 = vpop.f32.mrf.mxu0 }
0x1579   :  { %v5566_v32 = vld [vmem:[%s8078_s13 + $0x64] sm:$0xf0] }
0x1597   :  { %v3982_v6 = vpop.f32.mrf.mxu1 }
0x1598   :  { %v3992_v35 = vpack.c.bf16 %v3982_v6, %v3947_v23  ;;  %v5567_v23 = vld [vmem:[%s8078_s13 + $0x74] sm:$0xf] }
0x159a   :  { %5314 = vmatmul.msk.bf16.gmra.mxu3 %vm719_vm3, %v3992_v35 }
0x15b6   :  { %v4018_v39 = vpop.f32.mrf.mxu3 }
0x15b7   :  { %v4033_v10 = vadd.f32 %v4018_v39, %v3745_v41  ;;  %v5565_v41 = vld [vmem:[%s8078_s13 + $0x64] sm:$0xf]  ;;  %v5348_v39 = vld [vmem:[%s8078_s13 + $0x68] sm:$0xf0] }
0x15b9   :  { %v4044_v58 = vadd.f32 %v7714_v24, %v4033_v10 }
0x15bb   :  { %v7720_v61 = vadd.f32 %v4044_v58, %v7149_v42  ;;  %v5351_v58 = vor.u32 %v5565_v41, %v5348_v39 }
0x15bd   :  { %v4060_v31 = vsel %vm191_vm0, %v7720_v61, 0.0 }
0x15be   :  { %4061 = vadd.xlane.f32.xlu2 %v4060_v31  ;;  %v4020_v3 = vpop.f32.mrf.mxu3  ;;  %v5564_v31 = vld [vmem:[%s8078_s13 + $0x54] sm:$0xf0] }
0x15bf   :  { %v4034_v60 = vadd.f32 %v4020_v3, %v3746_v8  ;;  %v5338_v8 = vld [vmem:[%s8078_s13 + $0x50] sm:$0xf] }
0x15c1   :  { %v4045_v46 = vadd.f32 %v7714_v24, %v4034_v60  ;;  %v5339_v60 = vor.u32 %v5564_v31, %v5338_v8 }
0x15c3   :  { %v4051_v14 = vadd.f32 %v4045_v46, %v7155_v17  ;;  %v3832_v17 = vmul.f32 0.25, %v3823_v22  ;;  %v5346_v22 = vld [vmem:[%s8078_s13 + $0x60] sm:$0xf]  ;;  %v5563_v46 = vld [vmem:[%s8078_s13 + $0x54] sm:$0xf] }
0x15c4   :  { %v5347_v35 = vor.u32 %v5566_v32, %v5346_v22 }
0x15c5   :  { %v4063_v43 = vsel %vm191_vm0, %v4051_v14, 0.0  ;;  %v3838_v28 = vadd.f32 %v3832_v17, %v6493_v33 }
0x15c6   :  { %4064 = vadd.xlane.f32.xlu1 %v4063_v43 }
0x15c7   :  { %v3854_v34 = vsel %vm804_vm11, %v3838_v28, -inf }
0x161d   :  { %v4023_v21 = vpop.f32.mrf.mxu3 }
0x161e   :  { %v4035_v11 = vadd.f32 %v4023_v21, %v3747_v47  ;;  %v5355_v47 = vor.u32 %v5568_v37, %v5354_v57 }
0x1620   :  { %v4046_v12 = vadd.f32 %v7714_v24, %v4035_v11  ;;  %4282 = vmatpush.bf16.msra.mxu0 %v5355_v47  ;;  %v7827_v47 = vld [vmem:[%s8077_s12 + $0x1] ss:$0 sm:$0xff] }
0x1622   :  { %v4052_v42 = vadd.f32 %v4046_v12, %v7193_v56  ;;  %v5330_v12 = vld [vmem:[%s8078_s13 + $0x40] sm:$0xf] }
0x1624   :  { %v4066_v26 = vsel %vm191_vm0, %v4052_v42, 0.0  ;;  %4283 = vmatpush.bf16.msra.mxu0 %v5347_v35 }
0x1625   :  { %4067 = vadd.xlane.f32.xlu0 %v4066_v26  ;;  %v4025_v4 = vpop.f32.mrf.mxu3 }
0x1626   :  { %v4036_v1 = vadd.f32 %v4025_v4, %v3748_v7  ;;  %v5359_v7 = vor.u32 %v5567_v23, %v5356_v5  ;;  %v5561_v4 = vld [vmem:[%s8078_s13 + $0x44] sm:$0xf] }
0x1628   :  { %v4047_v52 = vadd.f32 %v7714_v24, %v4036_v1  ;;  %4306 = vmatpush.bf16.msrb.mxu2 %v5359_v7  ;;  %4284 = vmatpush.bf16.msra.mxu0 %v5339_v60  ;;  %v5332_v1 = vld [vmem:[%s8078_s13 + $0x48] sm:$0xf0] }
0x162a   :  { %v7732_v2 = vadd.f32 %v4047_v52, %v7199_v51  ;;  %v5335_v52 = vor.u32 %v5561_v4, %v5332_v1 }
0x162c   :  { %v4069_v59 = vsel %vm191_vm0, %v7732_v2, 0.0  ;;  %4307 = vmatpush.bf16.msrb.mxu2 %v5351_v58 }
0x162d   :  { %4070 = vadd.xlane.f32.xlu2 %v4069_v59 }
0x1631   :  { %v4062_v15 = vpop.xlane.xlu2 %4061 }
0x1632   :  { %v4078_v56 = vmul.f32 %v4062_v15, %v6210_v54 }
0x1634   :  { %v7739_v27 = vsub.f32 %v7720_v61, %v4078_v56 }
0x1635   :  { %3855 = vmax.xlane.f32.xlu2 %v3854_v34 }
0x1636   :  { %v4090_v51 = vmul.f32 %v7739_v27, %v7739_v27 }
0x1638   :  { %v4096_v53 = vsel %vm191_vm0, %v4090_v51, 0.0 }
0x1639   :  { %4097 = vadd.xlane.f32.xlu1 %v4096_v53  ;;  %v4065_v38 = vpop.xlane.xlu1 %4064 }
0x163a   :  { %v4079_v9 = vmul.f32 %v4065_v38, %v6210_v54 }
0x163c   :  { %v7746_v30 = vsub.f32 %v4051_v14, %v4079_v9  ;;  %v5340_v14 = vld [vmem:[%s8078_s13 + $0x58] sm:$0xf0] }
0x163d   :  { %v5343_v21 = vor.u32 %v5563_v46, %v5340_v14 }
0x163e   :  { %v4091_v33 = vmul.f32 %v7746_v30, %v7746_v30 }
0x163f   :  { %4308 = vmatpush.bf16.msrb.mxu2 %v5343_v21 }
0x1640   :  { %v4099_v18 = vsel %vm191_vm0, %v4091_v33, 0.0 }
0x1641   :  { %4100 = vadd.xlane.f32.xlu2 %v4099_v18 }
0x1643   :  { %4309 = vmatpush.bf16.msrb.mxu2 %v5335_v52 }
0x1698   :  { %v4068_v45 = vpop.xlane.xlu0 %4067 }
0x1699   :  { %v4080_v25 = vmul.f32 %v4068_v45, %v6210_v54 }
0x169b   :  { %v7752_v13 = vsub.f32 %v4052_v42, %v4080_v25  ;;  %v5562_v42 = vld [vmem:[%s8078_s13 + $0x44] sm:$0xf0] }
0x169c   :  { %v5331_v26 = vor.u32 %v5562_v42, %v5330_v12 }
0x169d   :  { %v4092_v16 = vmul.f32 %v7752_v13, %v7752_v13 }
0x169e   :  { %4285 = vmatpush.bf16.msra.mxu0 %v5331_v26 }
0x169f   :  { %v4102_v36 = vsel %vm191_vm0, %v4092_v16, 0.0 }
0x16a0   :  { %v4071_v49 = vpop.xlane.xlu2 %4070  ;;  %4103 = vadd.xlane.f32.xlu0 %v4102_v36 }
0x16a1   :  { %v4081_v55 = vmul.f32 %v4071_v49, %v6210_v54 }
0x16a3   :  { %v7759_v50 = vsub.f32 %v7732_v2, %v4081_v55  ;;  %v7821_v55 = vld [vmem:[%s8076_s11 + $0x1] ss:$0 sm:$0xff] }
0x16a5   :  { %v4093_v40 = vmul.f32 %v7759_v50, %v7759_v50 }
0x16a7   :  { %v4105_v20 = vsel %vm191_vm0, %v4093_v40, 0.0 }
0x16a8   :  { %4106 = vadd.xlane.f32.xlu1 %v4105_v20  ;;  %v3856_v6 = vpop.xlane.xlu2 %3855 }
0x16a9   :  { %v3862_v10 = vsub.f32 %v3838_v28, %v3856_v6 }
0x16ab   :  { %v3873_v44 = vmul.f32 1.442695, %v3862_v10 }
0x16ac   :  { %v4098_v3 = vpop.xlane.xlu1 %4097 }
0x16ad   :  { %5904 = vpow2.f32 %v3873_v44  ;;  %v4114_v43 = vmul.f32 %v4098_v3, %v6210_v54 }
0x16af   :  { %v4120_v11 = vadd.f32 1e-05, %v4114_v43 }
0x16b1   :  { %5906 = vrsqrt.f32 %v4120_v11  ;;  %vm4132_vm12 = vweird.f32 %v4120_v11 }
0x16b3   :  { %v7813_v17 = vpop.eup %5904 }
0x16b4   :  { %v4101_v59 = vpop.xlane.xlu2 %4100  ;;  %v3890_v28 = vsel %vm804_vm11, %v7813_v17, 0.0 }
0x16b5   :  { %v4115_v15 = vmul.f32 %v4101_v59, %v6210_v54  ;;  %3891 = vadd.xlane.f32.xlu2 %v3890_v28 }
0x16b7   :  { %v5907_v56 = vpop.eup %5906  ;;  %v4121_v34 = vadd.f32 1e-05, %v4115_v15 }
0x16b8   :  { %v4127_v51 = vmul.f32 %v5907_v56, %v4120_v11  ;;  %vm4133_vm2 = vweird.f32 %v5907_v56 }
0x16b9   :  { %5908 = vrsqrt.f32 %v4121_v34  ;;  %vm4134_vm13 = vmor %vm4132_vm12, %vm4133_vm2  ;;  %vm4142_vm15 = vweird.f32 %v4121_v34 }
0x16ba   :  { %v4128_v53 = vmul.f32 %v5907_v56, %v4127_v51 }
0x16bc   :  { %v4129_v38 = vmul.f32 0.5, %v4128_v53 }
0x16be   :  { %v4130_v9 = vsub.f32 1.5, %v4129_v38 }
0x16bf   :  { %v5909_v33 = vpop.eup %5908 }
0x16c0   :  { %v4131_v18 = vmul.f32 %v5907_v56, %v4130_v9  ;;  %v4137_v45 = vmul.f32 %v5909_v33, %v4121_v34  ;;  %vm4143_vm14 = vweird.f32 %v5909_v33  ;;  %v5574_v9 = vld [vmem:[%s8080_s15 + $0xa8] sm:$0xff] }
0x16c1   :  { %vm4144_vm1 = vmor %vm4142_vm15, %vm4143_vm14 }
0x16c2   :  { %v4138_v25 = vmul.f32 %v5909_v33, %v4137_v45  ;;  %v4135_v16 = vsel %vm4134_vm13, %v5907_v56, %v4131_v18  ;;  %v5573_v18 = vld [vmem:[%s8080_s15 + $0xa0] sm:$0xff] }
0x16c3   :  { %v4186_v57 = vmul.f32 %v4135_v16, %v7739_v27 }
0x16c4   :  { %v4139_v36 = vmul.f32 0.5, %v4138_v25  ;;  %v5572_v25 = vld [vmem:[%s8080_s15 + $0x98] sm:$0xff] }
0x16c5   :  { %v4195_v5 = vmul.f32 %v7821_v55, %v4186_v57 }
0x16c6   :  { %v4140_v49 = vsub.f32 1.5, %v4139_v36 }
0x16c7   :  { %v4204_v20 = vadd.f32 %v7827_v47, %v4195_v5 }
0x16c8   :  { %v4141_v37 = vmul.f32 %v5909_v33, %v4140_v49  ;;  %v5571_v49 = vld [vmem:[%s8080_s15 + $0x90] sm:$0xff] }
0x16ca   :  { %v4145_v23 = vsel %vm4144_vm1, %v5909_v33, %v4141_v37  ;;  %v7860_v33 = vld [vmem:[%s8079_s14 + $0x2] sm:$0x3] }
0x16cb   :  { %v4187_v40 = vmul.f32 %v4145_v23, %v7746_v30  ;;  %v7866_v45 = vperm.slane %v7860_v33, 0  ;;  %v5570_v23 = vld [vmem:[%s8080_s15 + $0x88] sm:$0xff] }
0x16cd   :  { %v4196_v7 = vmul.f32 %v7821_v55, %v4187_v40 }
0x16cf   :  { %v4205_v22 = vadd.f32 %v7827_v47, %v4196_v7  ;;  %v5569_v7 = vld [vmem:[%s8080_s15 + $0x80] sm:$0xff] }
0x16d1   :  { %v4210_v27 = vpack.c.bf16 %v4205_v22, %v4204_v20 }
0x16d3   :  { %5360 = vmatmul.msk.bf16.vlgmr.msra.gmra.mxu0 %vm191_vm0, %v4210_v27  ;;  %5363 = vmatmul.msk.bf16.vlgmr.msrb.gmra.mxu2 %vm191_vm0, %v4210_v27 }
0x1713   :  { %v4104_v32 = vpop.xlane.xlu0 %4103 }
0x1714   :  { %v4116_v6 = vmul.f32 %v4104_v32, %v6210_v54 }
0x1716   :  { %v4122_v35 = vadd.f32 1e-05, %v4116_v6  ;;  %v5584_v6 = vld [vmem:[%s8080_s15 + $0xf8] sm:$0xff] }
0x1717   :  { %4738 = vmatpush.bf16.msrb.mxu3 %v5584_v6 }
0x1718   :  { %5910 = vrsqrt.f32 %v4122_v35  ;;  %vm4152_vm5 = vweird.f32 %v4122_v35 }
0x171b   :  { %v4107_v41 = vpop.xlane.xlu1 %4106 }
0x171c   :  { %v4117_v39 = vmul.f32 %v4107_v41, %v6210_v54 }
0x171e   :  { %v5911_v30 = vpop.eup %5910  ;;  %v4123_v10 = vadd.f32 1e-05, %v4117_v39 }
0x171f   :  { %v4147_v58 = vmul.f32 %v5911_v30, %v4122_v35  ;;  %vm4153_vm4 = vweird.f32 %v5911_v30  ;;  %v5583_v35 = vld [vmem:[%s8080_s15 + $0xf0] sm:$0xff] }
0x1720   :  { %5912 = vrsqrt.f32 %v4123_v10  ;;  %vm4154_vm6 = vmor %vm4152_vm5, %vm4153_vm4  ;;  %vm4162_vm8 = vweird.f32 %v4123_v10  ;;  %4739 = vmatpush.bf16.msrb.mxu3 %v5583_v35 }
0x1721   :  { %v4148_v44 = vmul.f32 %v5911_v30, %v4147_v58  ;;  %v5582_v58 = vld [vmem:[%s8080_s15 + $0xe8] sm:$0xff] }
0x1723   :  { %v4149_v8 = vmul.f32 0.5, %v4148_v44 }
0x1724   :  { %4740 = vmatpush.bf16.msrb.mxu3 %v5582_v58 }
0x1725   :  { %v4150_v31 = vsub.f32 1.5, %v4149_v8 }
0x1726   :  { %v5913_v3 = vpop.eup %5912 }
0x1727   :  { %v4151_v60 = vmul.f32 %v5911_v30, %v4150_v31  ;;  %v4157_v46 = vmul.f32 %v5913_v3, %v4123_v10  ;;  %vm4163_vm7 = vweird.f32 %v5913_v3 }
0x1728   :  { %v3892_v14 = vpop.xlane.xlu2 %3891  ;;  %vm4164_vm9 = vmor %vm4162_vm8, %vm4163_vm7 }
0x1729   :  { %v4158_v43 = vmul.f32 %v5913_v3, %v4157_v46  ;;  %5914 = vrcp.f32 %v3892_v14  ;;  %v4155_v21 = vsel %vm4154_vm6, %v5911_v30, %v4151_v60 }
0x172a   :  { %v4188_v42 = vmul.f32 %v4155_v21, %v7752_v13 }
0x172b   :  { %v4159_v11 = vmul.f32 0.5, %v4158_v43 }
0x172c   :  { %v4197_v15 = vmul.f32 %v7821_v55, %v4188_v42 }
0x172d   :  { %v4160_v12 = vsub.f32 1.5, %v4159_v11 }
0x172e   :  { %v4206_v53 = vadd.f32 %v7827_v47, %v4197_v15 }
0x172f   :  { %v5915_v26 = vpop.eup %5914  ;;  %v4161_v4 = vmul.f32 %v5913_v3, %v4160_v12 }
0x1730   :  { %v3904_v1 = vmul.f32 %v5915_v26, %v7813_v17  ;;  %v5575_v17 = vld [vmem:[%s8080_s15 + $0xb0] sm:$0xff] }
0x1731   :  { %v4165_v52 = vsel %vm4164_vm9, %v5913_v3, %v4161_v4 }
0x1732   :  { %v4189_v59 = vmul.f32 %v4165_v52, %v7759_v50  ;;  %v3910_v28 = vpack.c.bf16 %v3904_v1, %v3904_v1  ;;  %v5576_v50 = vld [vmem:[%s8080_s15 + $0xb8] sm:$0xff] }
0x1733   :  { %4718 = vmatpush.bf16.msra.mxu1 %v5576_v50 }
0x1734   :  { %v3956_v56 = vunpack.c.l.b16 %v3910_v28  ;;  %v4198_v34 = vmul.f32 %v7821_v55, %v4189_v59 }
0x1736   :  { %v3958_v51 = vpack.c.b16 %v3956_v56, %v3956_v56  ;;  %v4207_v13 = vadd.f32 %v7827_v47, %v4198_v34 }
0x1737   :  { %4719 = vmatpush.bf16.msra.mxu1 %v5575_v17 }
0x1738   :  { %5308 = vmatmul.msk.bf16.gmra.mxu1 %vm804_vm11, %v3958_v51  ;;  %v4211_v38 = vpack.c.bf16 %v4207_v13, %v4206_v53  ;;  %v7892_v13 = vperm.slane %v7860_v33, 1  ;;  %v5580_v33 = vld [vmem:[%s8080_s15 + $0xd8] sm:$0xff] }
0x173a   :  { %5361 = vmatmul.msk.bf16.gmra.mxu0 %vm191_vm0, %v4211_v38  ;;  %5364 = vmatmul.msk.bf16.gmra.mxu2 %vm191_vm0, %v4211_v38 }
0x173b   :  { %4720 = vmatpush.bf16.msra.mxu1 %v5574_v9 }
0x173f   :  { %4721 = vmatpush.bf16.msra.mxu1 %v5573_v18 }
0x1743   :  { %4722 = vmatpush.bf16.msra.mxu1 %v5572_v25 }
0x1747   :  { %4723 = vmatpush.bf16.msra.mxu1 %v5571_v49  ;;  %v5579_v49 = vld [vmem:[%s8080_s15 + $0xd0] sm:$0xff] }
0x174b   :  { %4724 = vmatpush.bf16.msra.mxu1 %v5570_v23 }
0x174f   :  { %4725 = vmatpush.bf16.msra.mxu1 %v5569_v7 }
0x1750   :  { %v4287_v16 = vpop.f32.mrf.mxu0 }
0x1751   :  { %v4288_v36 = vadd.f32 %v4287_v16, %v7866_v45  ;;  %v5581_v16 = vld [vmem:[%s8080_s15 + $0xe0] sm:$0xff] }
0x1752   :  { %4741 = vmatpush.bf16.msrb.mxu3 %v5581_v16 }
0x1753   :  { %v5366_v57 = vmul.f32 -1.702, %v4288_v36 }
0x1755   :  { %v4350_v37 = vmul.f32 1.442695, %v5366_v57 }
0x1756   :  { %v4311_v51 = vpop.f32.mrf.mxu2  ;;  %4742 = vmatpush.bf16.msrb.mxu3 %v5580_v33 }
0x1757   :  { %5916 = vpow2.f32 %v4350_v37  ;;  %v7898_v50 = vadd.f32 %v4311_v51, %v7892_v13 }
0x1758   :  { %v4289_v5 = vpop.f32.mrf.mxu0 }
0x1759   :  { %v4290_v40 = vadd.f32 %v4289_v5, %v7866_v45  ;;  %v5367_v9 = vmul.f32 -1.702, %v7898_v50  ;;  %v5578_v5 = vld [vmem:[%s8080_s15 + $0xc8] sm:$0xff] }
0x175a   :  { %4743 = vmatpush.bf16.msrb.mxu3 %v5579_v49 }
0x175b   :  { %v5368_v20 = vmul.f32 -1.702, %v4290_v40  ;;  %v4352_v25 = vmul.f32 1.442695, %v5367_v9 }
0x175d   :  { %v5917_v22 = vpop.eup %5916  ;;  %v4354_v27 = vmul.f32 1.442695, %v5368_v20 }
0x175e   :  { %v4374_v32 = vadd.f32 1.0, %v5917_v22  ;;  %v4313_v53 = vpop.f32.mrf.mxu2  ;;  %4744 = vmatpush.bf16.msrb.mxu3 %v5578_v5 }
0x175f   :  { %5918 = vpow2.f32 %v4354_v27  ;;  %v7895_v38 = vadd.f32 %v4313_v53, %v7892_v13  ;;  %v3984_v27 = vpop.f32.mrf.mxu1 }
0x1760   :  { %5920 = vrcp.f32 %v4374_v32  ;;  %v4397_v46 = vand.u32 2147483648, %v4374_v32  ;;  %vm4391_vm10 = vweird.f32 %v4374_v32  ;;  %v4395_v14 = vand.u32 2147483647, %v4374_v32 }
0x1761   :  { %v5369_v17 = vmul.f32 -1.702, %v7895_v38 }
0x1762   :  { %v4398_v26 = vor.u32 1.1754944e-38, %v4397_v46  ;;  %vm4396_vm13 = vcmp.eq.f32.partialorder %v4395_v14, 8.507059e+37 }
0x1763   :  { %v4356_v18 = vmul.f32 1.442695, %v5369_v17 }
0x1765   :  { %v5919_v41 = vpop.eup %5918 }
0x1766   :  { %v5921_v39 = vpop.eup %5920  ;;  %v4376_v10 = vadd.f32 1.0, %v5919_v41 }
0x1767   :  { %v4387_v30 = vmul.f32 %v5921_v39, %v4374_v32  ;;  %vm4392_vm11 = vweird.f32 %v5921_v39 }
0x1768   :  { %5922 = vrcp.f32 %v4376_v10  ;;  %vm4393_vm2 = vmor %vm4391_vm10, %vm4392_vm11  ;;  %v4427_v21 = vand.u32 2147483648, %v4376_v10  ;;  %v4425_v42 = vand.u32 2147483647, %v4376_v10  ;;  %vm4421_vm14 = vweird.f32 %v4376_v10 }
0x1769   :  { %v4388_v44 = vsub.f32 1.0, %v4387_v30  ;;  %5924 = vpow2.f32 %v4356_v18 }
0x176a   :  { %v4428_v52 = vor.u32 1.1754944e-38, %v4427_v21  ;;  %vm4426_vm1 = vcmp.eq.f32.partialorder %v4425_v42, 8.507059e+37  ;;  %5926 = vpow2.f32 %v4352_v25 }
0x176b   :  { %v4389_v8 = vmul.f32 %v5921_v39, %v4388_v44 }
0x176d   :  { %v4390_v3 = vadd.f32 %v5921_v39, %v4389_v8 }
0x176e   :  { %v5923_v31 = vpop.eup %5922 }
0x176f   :  { %v4417_v60 = vmul.f32 %v5923_v31, %v4376_v10  ;;  %v4394_v11 = vsel %vm4393_vm2, %v5921_v39, %v4390_v3  ;;  %vm4422_vm12 = vweird.f32 %v5923_v31 }
0x1770   :  { %v4399_v1 = vsel %vm4396_vm13, %v4398_v26, %v4394_v11  ;;  %vm4423_vm15 = vmor %vm4421_vm14, %vm4422_vm12 }
0x1771   :  { %v4418_v43 = vsub.f32 1.0, %v4417_v60  ;;  %v4566_v15 = vmul.f32 %v4399_v1, %v4288_v36  ;;  %v5925_v36 = vpop.eup %5924 }
0x1772   :  { %v5927_v57 = vpop.eup %5926  ;;  %v4377_v37 = vadd.f32 1.0, %v5925_v36 }
0x1773   :  { %v4419_v12 = vmul.f32 %v5923_v31, %v4418_v43  ;;  %v4375_v23 = vadd.f32 1.0, %v5927_v57 }
0x1774   :  { %5928 = vrcp.f32 %v4377_v37  ;;  %vm4436_vm6 = vweird.f32 %v4377_v37  ;;  %v4440_v60 = vand.u32 2147483647, %v4377_v37 }
0x1775   :  { %v4420_v4 = vadd.f32 %v5923_v31, %v4419_v12  ;;  %5930 = vrcp.f32 %v4375_v23  ;;  %v4412_v14 = vand.u32 2147483648, %v4375_v23  ;;  %vm4406_vm8 = vweird.f32 %v4375_v23 }
0x1776   :  { %v4410_v43 = vand.u32 2147483647, %v4375_v23  ;;  %vm4441_vm11 = vcmp.eq.f32.partialorder %v4440_v60, 8.507059e+37 }
0x1777   :  { %v4424_v59 = vsel %vm4423_vm15, %v5923_v31, %v4420_v4  ;;  %v4442_v31 = vand.u32 2147483648, %v4377_v37 }
0x1778   :  { %v4429_v28 = vsel %vm4426_vm1, %v4428_v52, %v4424_v59  ;;  %v4413_v52 = vor.u32 1.1754944e-38, %v4412_v14 }
0x1779   :  { %v4568_v56 = vmul.f32 %v4429_v28, %v4290_v40  ;;  %v5577_v40 = vld [vmem:[%s8080_s15 + $0xc0] sm:$0xff]  ;;  %v4443_v12 = vor.u32 1.1754944e-38, %v4442_v31 }
0x177a   :  { %4745 = vmatpush.bf16.msrb.mxu3 %v5577_v40  ;;  %v5929_v7 = vpop.eup %5928 }
0x177b   :  { %v4578_v34 = vpack.c.bf16 %v4568_v56, %v4566_v15  ;;  %v5931_v20 = vpop.eup %5930  ;;  %v4432_v22 = vmul.f32 %v5929_v7, %v4377_v37  ;;  %vm4437_vm4 = vweird.f32 %v5929_v7 }
0x177c   :  { %v4402_v32 = vmul.f32 %v5931_v20, %v4375_v23  ;;  %vm4407_vm5 = vweird.f32 %v5931_v20  ;;  %vm4438_vm7 = vmor %vm4436_vm6, %vm4437_vm4 }
0x177d   :  { %4726 = vmatmul.bf16.vlgmr.msra.gmra.mxu1 %v4578_v34  ;;  %v4433_v6 = vsub.f32 1.0, %v4432_v22  ;;  %vm4408_vm9 = vmor %vm4406_vm8, %vm4407_vm5 }
0x177e   :  { %v4403_v35 = vsub.f32 1.0, %v4402_v32 }
0x177f   :  { %v4434_v41 = vmul.f32 %v5929_v7, %v4433_v6 }
0x1780   :  { %v4404_v30 = vmul.f32 %v5931_v20, %v4403_v35 }
0x1781   :  { %v4435_v44 = vadd.f32 %v5929_v7, %v4434_v41 }
0x1782   :  { %v4405_v3 = vadd.f32 %v5931_v20, %v4404_v30 }
0x1783   :  { %v4439_v21 = vsel %vm4438_vm7, %v5929_v7, %v4435_v44 }
0x1784   :  { %v4409_v4 = vsel %vm4408_vm9, %v5931_v20, %v4405_v3  ;;  %v4444_v59 = vsel %vm4441_vm11, %v4443_v12, %v4439_v21 }
0x1785   :  { %v4569_v51 = vmul.f32 %v4444_v59, %v7895_v38 }
0x17b5   :  { %v3987_v39 = vpop.f32.mrf.mxu1 }
0x17b6   :  { %v3993_v10 = vpack.c.bf16 %v3987_v39, %v3984_v27 }
0x17b7   :  { %v4292_v58 = vpop.f32.mrf.mxu0 }
0x17b8   :  { %v7918_v8 = vadd.f32 %v4292_v58, %v7866_v45  ;;  %5315 = vmatmul.msk.bf16.gmra.mxu3 %vm719_vm3, %v3993_v10  ;;  %vm4411_vm3 = vcmp.eq.f32.partialorder %v4410_v43, 8.507059e+37 }
0x17b9   :  { %v4414_v34 = vsel %vm4411_vm3, %v4413_v52, %v4409_v4 }
0x17ba   :  { %v5370_v46 = vmul.f32 -1.702, %v7918_v8  ;;  %v4567_v18 = vmul.f32 %v4414_v34, %v7898_v50 }
0x17bc   :  { %v4358_v11 = vmul.f32 1.442695, %v5370_v46  ;;  %v4579_v36 = vpack.c.bf16 %v4569_v51, %v4567_v18 }
0x17bd   :  { %v3989_v42 = vpop.f32.mrf.mxu1  ;;  %v4316_v26 = vpop.f32.mrf.mxu2 }
0x17be   :  { %5932 = vpow2.f32 %v4358_v11  ;;  %v7923_v1 = vadd.f32 %v4316_v26, %v7892_v13 }
0x17bf   :  { %v4294_v28 = vpop.f32.mrf.mxu0 }
0x17c0   :  { %v5371_v15 = vmul.f32 -1.702, %v7923_v1  ;;  %v7927_v56 = vadd.f32 %v4294_v28, %v7866_v45 }
0x17c2   :  { %v4360_v53 = vmul.f32 1.442695, %v5371_v15  ;;  %v5372_v17 = vmul.f32 -1.702, %v7927_v56 }
0x17c4   :  { %v5933_v9 = vpop.eup %5932  ;;  %5934 = vpow2.f32 %v4360_v53  ;;  %v4362_v25 = vmul.f32 1.442695, %v5372_v17 }
0x17c5   :  { %v4378_v16 = vadd.f32 1.0, %v5933_v9  ;;  %v4318_v33 = vpop.f32.mrf.mxu2 }
0x17c6   :  { %5936 = vpow2.f32 %v4362_v25  ;;  %v7933_v49 = vadd.f32 %v4318_v33, %v7892_v13 }
0x17c7   :  { %5938 = vrcp.f32 %v4378_v16  ;;  %v4455_v39 = vand.u32 2147483647, %v4378_v16  ;;  %v4457_v44 = vand.u32 2147483648, %v4378_v16  ;;  %vm4451_vm2 = vweird.f32 %v4378_v16 }
0x17c8   :  { %v5373_v57 = vmul.f32 -1.702, %v7933_v49  ;;  %4746 = vmatmul.bf16.vlgmr.msrb.gmra.mxu3 %v4579_v36 }
0x17c9   :  { %vm4456_vm13 = vcmp.eq.f32.partialorder %v4455_v39, 8.507059e+37  ;;  %v4458_v12 = vor.u32 1.1754944e-38, %v4457_v44 }
0x17ca   :  { %v5935_v38 = vpop.eup %5934  ;;  %v4364_v37 = vmul.f32 1.442695, %v5373_v57 }
0x17cb   :  { %v4379_v23 = vadd.f32 1.0, %v5935_v38 }
0x17cc   :  { %v5937_v5 = vpop.eup %5936  ;;  %5940 = vpow2.f32 %v4364_v37 }
0x17cd   :  { %v5939_v40 = vpop.eup %5938  ;;  %5942 = vrcp.f32 %v4379_v23  ;;  %v4380_v7 = vadd.f32 1.0, %v5937_v5  ;;  %vm4466_vm1 = vweird.f32 %v4379_v23  ;;  %v4472_v4 = vand.u32 2147483648, %v4379_v23 }
0x17ce   :  { %v4447_v50 = vmul.f32 %v5939_v40, %v4378_v16  ;;  %vm4452_vm10 = vweird.f32 %v5939_v40  ;;  %v4470_v28 = vand.u32 2147483647, %v4379_v23 }
0x17cf   :  { %5944 = vrcp.f32 %v4380_v7  ;;  %vm7936_vm12 = vmor %vm4451_vm2, %vm4452_vm10  ;;  %v4487_v46 = vand.u32 2147483648, %v4380_v7  ;;  %v4485_v11 = vand.u32 2147483647, %v4380_v7  ;;  %vm4481_vm4 = vweird.f32 %v4380_v7 }
0x17d0   :  { %v4448_v20 = vsub.f32 1.0, %v4447_v50  ;;  %v4473_v36 = vor.u32 1.1754944e-38, %v4472_v4  ;;  %vm4471_vm9 = vcmp.eq.f32.partialorder %v4470_v28, 8.507059e+37  ;;  %vm4765_vm2 = vcmask 1041409  }
0x17d1   :  { %v4488_v15 = vor.u32 1.1754944e-38, %v4487_v46  ;;  %vm4486_vm7 = vcmp.eq.f32.partialorder %v4485_v11, 8.507059e+37 }
0x17d2   :  { %v5941_v22 = vpop.eup %5940  ;;  %v4449_v32 = vmul.f32 %v5939_v40, %v4448_v20 }
0x17d3   :  { %v5943_v27 = vpop.eup %5942  ;;  %v4381_v6 = vadd.f32 1.0, %v5941_v22 }
0x17d4   :  { %v4462_v35 = vmul.f32 %v5943_v27, %v4379_v23  ;;  %v4450_v10 = vadd.f32 %v5939_v40, %v4449_v32  ;;  %vm4467_vm15 = vweird.f32 %v5943_v27 }
0x17d5   :  { %5946 = vrcp.f32 %v4381_v6  ;;  %v5945_v41 = vpop.eup %5944  ;;  %vm7942_vm6 = vmor %vm4466_vm1, %vm4467_vm15  ;;  %v4500_v17 = vand.u32 2147483647, %v4381_v6  ;;  %v4502_v9 = vand.u32 2147483648, %v4381_v6  ;;  %vm4496_vm11 = vweird.f32 %v4381_v6 }
0x17d6   :  { %v4463_v30 = vsub.f32 1.0, %v4462_v35  ;;  %v4477_v58 = vmul.f32 %v5945_v41, %v4380_v7  ;;  %v4454_v43 = vsel %vm7936_vm12, %v5939_v40, %v4450_v10  ;;  %vm4482_vm14 = vweird.f32 %v5945_v41 }
0x17d7   :  { %v4459_v59 = vsel %vm4456_vm13, %v4458_v12, %v4454_v43  ;;  %vm4483_vm5 = vmor %vm4481_vm4, %vm4482_vm14  ;;  %v4503_v23 = vor.u32 1.1754944e-38, %v4502_v9  ;;  %vm4501_vm10 = vcmp.eq.f32.partialorder %v4500_v17, 8.507059e+37  ;;  %v3461_v35 = vadd.f32 %v7643_v0, %v7645_v19 }
0x17d8   :  { %v4464_v31 = vmul.f32 %v5943_v27, %v4463_v30  ;;  %v4478_v3 = vsub.f32 1.0, %v4477_v58  ;;  %v4570_v33 = vmul.f32 %v4459_v59, %v7918_v8  ;;  %vm4768_vm12 = vcmask 517120  }
0x17d9   :  { %v3750_v39 = vadd.f32 %v7708_v29, %v3461_v35 }
0x17da   :  { %v4479_v21 = vmul.f32 %v5945_v41, %v4478_v3  ;;  %v4465_v42 = vadd.f32 %v5943_v27, %v4464_v31 }
0x17db   :  { %v5947_v14 = vpop.eup %5946 }
0x17dc   :  { %v4492_v26 = vmul.f32 %v5947_v14, %v4381_v6  ;;  %v4480_v52 = vadd.f32 %v5945_v41, %v4479_v21  ;;  %v4469_v18 = vsel %vm7942_vm6, %v5943_v27, %v4465_v42  ;;  %vm4497_vm8 = vweird.f32 %v5947_v14 }
0x17dd   :  { %v4474_v37 = vsel %vm4471_vm9, %v4473_v36, %v4469_v18  ;;  %vm4498_vm3 = vmor %vm4496_vm11, %vm4497_vm8 }
0x17de   :  { %v4493_v34 = vsub.f32 1.0, %v4492_v26  ;;  %v4484_v53 = vsel %vm4483_vm5, %v5945_v41, %v4480_v52  ;;  %v4571_v7 = vmul.f32 %v4474_v37, %v7923_v1 }
0x17df   :  { %v4489_v25 = vsel %vm4486_vm7, %v4488_v15, %v4484_v53 }
0x17e0   :  { %v4494_v16 = vmul.f32 %v5947_v14, %v4493_v34  ;;  %v4572_v57 = vmul.f32 %v4489_v25, %v7927_v56 }
0x17e2   :  { %v4495_v38 = vadd.f32 %v5947_v14, %v4494_v16  ;;  %v4580_v5 = vpack.c.bf16 %v4572_v57, %v4570_v33 }
0x17e4   :  { %v4499_v40 = vsel %vm4498_vm3, %v5947_v14, %v4495_v38  ;;  %4730 = vmatmul.bf16.gmra.mxu1 %v4580_v5 }
0x17e5   :  { %v4504_v50 = vsel %vm4501_vm10, %v4503_v23, %v4499_v40 }
0x17e6   :  { %v4573_v20 = vmul.f32 %v4504_v50, %v7933_v49 }
0x17e8   :  { %v4581_v22 = vpack.c.bf16 %v4573_v20, %v4571_v7 }
0x17ea   :  { %4750 = vmatmul.bf16.gmra.mxu3 %v4581_v22 }
0x17fa   :  { %v4727_v8 = vpop.f32.mrf.mxu1 }
0x1802   :  { %v4729_v27 = vpop.f32.mrf.mxu1 }
0x183b   :  { %v4028_v56 = vpop.f32.mrf.mxu3 }
0x183c   :  { %v4037_v32 = vadd.f32 %v4028_v56, %v7705_v62 }
0x183e   :  { %v4048_v6 = vadd.f32 %v7714_v24, %v4037_v32 }
0x1840   :  { %v4054_v41 = vadd.f32 %v4048_v6, %v7270_v63  ;;  %v5614_v63 = vld [vmem:[%s8081_s16 + $0x1] ss:$0 sm:$0xff] }
0x1841   :  { %v4728_v29 = vadd.f32 %v5614_v63, %v4727_v8 }
0x1842   :  { %v4072_v1 = vsel %vm191_vm0, %v4054_v41, 0.0 }
0x1843   :  { %v4030_v30 = vpop.f32.mrf.mxu3  ;;  %4073 = vadd.xlane.f32.xlu0 %v4072_v1 }
0x1844   :  { %v4038_v49 = vadd.f32 %v4030_v30, %v3750_v39 }
0x1846   :  { %v4049_v10 = vadd.f32 %v7714_v24, %v4038_v49 }
0x1848   :  { %v4055_v58 = vadd.f32 %v4049_v10, %v7289_v48 }
0x184a   :  { %v4075_v62 = vsel %vm191_vm0, %v4055_v58, 0.0 }
0x184b   :  { %v4747_v44 = vpop.f32.mrf.mxu3  ;;  %4076 = vadd.xlane.f32.xlu1 %v4075_v62 }
0x184c   :  { %v4748_v14 = vadd.f32 %v4747_v44, %v4728_v29 }
0x184e   :  { %v4758_v48 = vadd.f32 %v4748_v14, %v7720_v61 }
0x1853   :  { %v4749_v31 = vpop.f32.mrf.mxu3 }
0x1861   :  { %v4731_v3 = vpop.f32.mrf.mxu1 }
0x1869   :  { %v4732_v19 = vpop.f32.mrf.mxu1 }
0x186a   :  { %v4733_v60 = vadd.f32 %v5614_v63, %v4732_v19  ;;  %v5588_v63 = vld [vmem:[%s8084_s19 + $0x18] sm:$0xff]  ;;  %v5587_v19 = vld [vmem:[%s8084_s19 + $0x10] sm:$0xff] }
0x186b   :  { %4865 = vmatpush.bf16.msrb.mxu0 %v5588_v63 }
0x186d   :  { %v4751_v0 = vpop.f32.mrf.mxu3 }
0x186f   :  { %4866 = vmatpush.bf16.msrb.mxu0 %v5587_v19 }
0x1875   :  { %v4752_v46 = vpop.f32.mrf.mxu3 }
0x1876   :  { %v4753_v43 = vadd.f32 %v4752_v46, %v4733_v60  ;;  %v5585_v46 = vld [vmem:[%s8084_s19] sm:$0xff] }
0x1878   :  { %v4759_v24 = vadd.f32 %v4753_v43, %v7732_v2 }
0x187a   :  { %v4764_v21 = vrot.slane %v4759_v24, 7 }
0x187c   :  { %v4766_v11 = vsel %vm4765_vm2, %v4764_v21, %v4758_v48 }
0x187d   :  { %v4769_v12 = vsel %vm4768_vm12, %v4766_v11, 0.0 }
0x187e   :  { %4770 = vadd.xlane.f32.xlu2 %v4769_v12 }
0x18b6   :  { %v4074_v42 = vpop.xlane.xlu0 %4073 }
0x18b7   :  { %v4082_v26 = vmul.f32 %v4074_v42, %v6210_v54  ;;  %v5616_v42 = vld [vmem:[%s8083_s18] ss:$0 sm:$0xff] }
0x18b9   :  { %v4088_v4 = vsub.f32 %v4054_v41, %v4082_v26 }
0x18bb   :  { %v4094_v52 = vmul.f32 %v4088_v4, %v4088_v4 }
0x18bd   :  { %v4108_v59 = vsel %vm191_vm0, %v4094_v52, 0.0 }
0x18be   :  { %v4077_v28 = vpop.xlane.xlu1 %4076  ;;  %4109 = vadd.xlane.f32.xlu0 %v4108_v59 }
0x18bf   :  { %v4083_v2 = vmul.f32 %v4077_v28, %v6210_v54 }
0x18c1   :  { %v4089_v15 = vsub.f32 %v4055_v58, %v4083_v2 }
0x18c3   :  { %v4095_v61 = vmul.f32 %v4089_v15, %v4089_v15 }
0x18c5   :  { %v4111_v34 = vsel %vm191_vm0, %v4095_v61, 0.0 }
0x18c6   :  { %4112 = vadd.xlane.f32.xlu1 %v4111_v34 }
0x18f1   :  { %v4771_v51 = vpop.xlane.xlu2 %4770 }
0x18f2   :  { %v4772_v53 = vmul.f32 %v4771_v51, %v6210_v54 }
0x18f4   :  { %v4774_v17 = vrot.slane %v4772_v53, 1  ;;  %v7974_v9 = vsub.f32 %v4758_v48, %v4772_v53 }
0x18f6   :  { %v7976_v18 = vsub.f32 %v4759_v24, %v4774_v17  ;;  %v4779_v16 = vmul.f32 %v7974_v9, %v7974_v9 }
0x18f8   :  { %v4780_v25 = vmul.f32 %v7976_v18, %v7976_v18 }
0x18fa   :  { %v4783_v33 = vrot.slane %v4780_v25, 7 }
0x18fc   :  { %v4784_v36 = vsel %vm4765_vm2, %v4783_v33, %v4779_v16 }
0x18fd   :  { %v4786_v57 = vsel %vm4768_vm12, %v4784_v36, 0.0 }
0x18fe   :  { %4787 = vadd.xlane.f32.xlu2 %v4786_v57 }
0x1931   :  { %v4110_v38 = vpop.xlane.xlu0 %4109 }
0x1932   :  { %v4118_v37 = vmul.f32 %v4110_v38, %v6210_v54 }
0x1934   :  { %v4124_v23 = vadd.f32 1e-05, %v4118_v37 }
0x1936   :  { %5948 = vrsqrt.f32 %v4124_v23  ;;  %vm4172_vm14 = vweird.f32 %v4124_v23 }
0x1939   :  { %v4113_v5 = vpop.xlane.xlu1 %4112 }
0x193a   :  { %v4119_v40 = vmul.f32 %v4113_v5, %v6210_v54 }
0x193c   :  { %v5949_v50 = vpop.eup %5948  ;;  %v4125_v7 = vadd.f32 1e-05, %v4119_v40 }
0x193d   :  { %v4167_v20 = vmul.f32 %v5949_v50, %v4124_v23  ;;  %vm4173_vm13 = vweird.f32 %v5949_v50 }
0x193e   :  { %5950 = vrsqrt.f32 %v4125_v7  ;;  %vm4174_vm15 = vmor %vm4172_vm14, %vm4173_vm13  ;;  %vm4182_vm4 = vweird.f32 %v4125_v7 }
0x193f   :  { %v4168_v22 = vmul.f32 %v5949_v50, %v4167_v20 }
0x1941   :  { %v4169_v8 = vmul.f32 0.5, %v4168_v22 }
0x1943   :  { %v4170_v27 = vsub.f32 1.5, %v4169_v8 }
0x1944   :  { %v5951_v56 = vpop.eup %5950 }
0x1945   :  { %v4171_v32 = vmul.f32 %v5949_v50, %v4170_v27  ;;  %v4177_v6 = vmul.f32 %v5951_v56, %v4125_v7  ;;  %vm4183_vm1 = vweird.f32 %v5951_v56 }
0x1946   :  { %vm4184_vm5 = vmor %vm4182_vm4, %vm4183_vm1 }
0x1947   :  { %v4178_v35 = vmul.f32 %v5951_v56, %v4177_v6  ;;  %v4175_v41 = vsel %vm4174_vm15, %v5949_v50, %v4171_v32 }
0x1948   :  { %v4190_v30 = vmul.f32 %v4175_v41, %v4088_v4 }
0x1949   :  { %v4179_v39 = vmul.f32 0.5, %v4178_v35 }
0x194a   :  { %v4199_v62 = vmul.f32 %v7821_v55, %v4190_v30 }
0x194b   :  { %v4180_v1 = vsub.f32 1.5, %v4179_v39 }
0x194c   :  { %v4208_v31 = vadd.f32 %v7827_v47, %v4199_v62 }
0x194d   :  { %v4181_v49 = vmul.f32 %v5951_v56, %v4180_v1 }
0x194f   :  { %v4185_v10 = vsel %vm4184_vm5, %v5951_v56, %v4181_v49 }
0x1950   :  { %v4191_v58 = vmul.f32 %v4185_v10, %v4089_v15 }
0x1952   :  { %v4200_v44 = vmul.f32 %v7821_v55, %v4191_v58 }
0x1954   :  { %v4209_v3 = vadd.f32 %v7827_v47, %v4200_v44  ;;  %v5586_v47 = vld [vmem:[%s8084_s19 + $0x8] sm:$0xff] }
0x1955   :  { %4867 = vmatpush.bf16.msrb.mxu0 %v5586_v47  ;;  %v5589_v47 = vld [vmem:[%s8085_s20] sm:$0xff] }
0x1956   :  { %v4212_v0 = vpack.c.bf16 %v4209_v3, %v4208_v31 }
0x1958   :  { %5362 = vmatmul.msk.bf16.gmra.mxu0 %vm191_vm0, %v4212_v0  ;;  %5365 = vmatmul.msk.bf16.gmra.mxu2 %vm191_vm0, %v4212_v0 }
0x1959   :  { %4868 = vmatpush.bf16.msrb.mxu0 %v5585_v46 }
0x1971   :  { %v4788_v55 = vpop.xlane.xlu2 %4787 }
0x1972   :  { %v4789_v29 = vmul.f32 %v4788_v55, %v6210_v54  ;;  %v5615_v54 = vld [vmem:[%s8082_s17] ss:$0 sm:$0xff] }
0x1974   :  { %v4790_v60 = vadd.f32 1e-05, %v4789_v29 }
0x1976   :  { %5952 = vrsqrt.f32 %v4790_v60  ;;  %vm4797_vm7 = vweird.f32 %v4790_v60 }
0x197c   :  { %v5953_v14 = vpop.eup %5952 }
0x197d   :  { %v4792_v43 = vmul.f32 %v5953_v14, %v4790_v60  ;;  %vm4798_vm6 = vweird.f32 %v5953_v14 }
0x197e   :  { %vm4799_vm8 = vmor %vm4797_vm7, %vm4798_vm6 }
0x197f   :  { %v4793_v24 = vmul.f32 %v5953_v14, %v4792_v43 }
0x1981   :  { %v4794_v48 = vmul.f32 0.5, %v4793_v24 }
0x1983   :  { %v4795_v21 = vsub.f32 1.5, %v4794_v48 }
0x1985   :  { %v4796_v11 = vmul.f32 %v5953_v14, %v4795_v21 }
0x1987   :  { %v4800_v12 = vsel %vm4799_vm8, %v5953_v14, %v4796_v11 }
0x1988   :  { %v4802_v26 = vrot.slane %v4800_v12, 1  ;;  %v4805_v4 = vmul.f32 %v4800_v12, %v7974_v9 }
0x198a   :  { %v4806_v52 = vmul.f32 %v4802_v26, %v7976_v18  ;;  %v4810_v59 = vmul.f32 %v5615_v54, %v4805_v4 }
0x198c   :  { %v4811_v28 = vmul.f32 %v5615_v54, %v4806_v52  ;;  %v4815_v2 = vadd.f32 %v5616_v42, %v4810_v59 }
0x198e   :  { %v4816_v15 = vadd.f32 %v5616_v42, %v4811_v28  ;;  %v4817_v61 = vpack.c.bf16 %v4815_v2, %v4815_v2 }
0x1990   :  { %v4818_v34 = vpack.c.bf16 %v4816_v15, %v4816_v15  ;;  %v4829_v53 = vunpack.c.l.b16 %v4817_v61 }
0x1992   :  { %v4830_v51 = vunpack.c.l.b16 %v4818_v34 }
0x1994   :  { %v4831_v17 = vrot.slane %v4830_v51, 7 }
0x1996   :  { %v4832_v25 = vsel %vm4765_vm2, %v4831_v17, %v4829_v53 }
0x1997   :  { %v4833_v16 = vpack.c.b16 %v4832_v25, %v4832_v25 }
0x1999   :  { %5491 = vmatmul.msk.bf16.vlgmr.msrb.gmra.mxu0 %vm191_vm0, %v4833_v16 }
0x19d5   :  { %v4297_v33 = vpop.f32.mrf.mxu0 }
0x19d6   :  { %v8016_v36 = vadd.f32 %v4297_v33, %v7866_v45 }
0x19d8   :  { %v5374_v9 = vmul.f32 -1.702, %v8016_v36 }
0x19da   :  { %v4366_v18 = vmul.f32 1.442695, %v5374_v9 }
0x19db   :  { %v4321_v57 = vpop.f32.mrf.mxu2 }
0x19dc   :  { %5954 = vpow2.f32 %v4366_v18  ;;  %v8020_v38 = vadd.f32 %v4321_v57, %v7892_v13 }
0x19dd   :  { %v4299_v37 = vpop.f32.mrf.mxu0 }
0x19de   :  { %v5375_v23 = vmul.f32 -1.702, %v8020_v38  ;;  %v8024_v5 = vadd.f32 %v4299_v37, %v7866_v45  ;;  %v5590_v45 = vld [vmem:[%s8085_s20 + $0x8] sm:$0xff]  ;;  %s6005_s20 = smov [#allocation3]  }
0x19df   :  { %4907 = vmatpush.bf16.msra.mxu2 %v5590_v45  ;;  %s4921_s12 = sshll.u32 %s6005_s20, 4  ;;  %s4922_s12 = int_to_ptr.vmem [resolvable:$true] %s4921_s12 }
0x19e0   :  { %v4368_v40 = vmul.f32 1.442695, %v5375_v23  ;;  %v5376_v50 = vmul.f32 -1.702, %v8024_v5 }
0x19e2   :  { %v5955_v7 = vpop.eup %5954  ;;  %5956 = vpow2.f32 %v4368_v40  ;;  %v4370_v20 = vmul.f32 1.442695, %v5376_v50 }
0x19e3   :  { %v4382_v22 = vadd.f32 1.0, %v5955_v7  ;;  %v4323_v8 = vpop.f32.mrf.mxu2  ;;  %4908 = vmatpush.bf16.msra.mxu2 %v5589_v47 }
0x19e4   :  { %5958 = vpow2.f32 %v4370_v20  ;;  %v8028_v27 = vadd.f32 %v4323_v8, %v7892_v13 }
0x19e5   :  { %5960 = vrcp.f32 %v4382_v22  ;;  %v4515_v3 = vand.u32 2147483647, %v4382_v22  ;;  %v4517_v55 = vand.u32 2147483648, %v4382_v22  ;;  %vm4511_vm9 = vweird.f32 %v4382_v22 }
0x19e6   :  { %v5377_v56 = vmul.f32 -1.702, %v8028_v27 }
0x19e7   :  { %vm8041_vm3 = vcmp.eq.f32.partialorder %v4515_v3, 8.507059e+37  ;;  %v4518_v54 = vor.u32 1.1754944e-38, %v4517_v55 }
0x19e8   :  { %v5957_v32 = vpop.eup %5956  ;;  %v4372_v6 = vmul.f32 1.442695, %v5377_v56 }
0x19e9   :  { %v4383_v35 = vadd.f32 1.0, %v5957_v32 }
0x19ea   :  { %v5959_v41 = vpop.eup %5958  ;;  %5962 = vpow2.f32 %v4372_v6  ;;  %v5617_v6 = vld [vmem:[#allocation2] ss:$0 sm:$0xff] }
0x19eb   :  { %v5961_v39 = vpop.eup %5960  ;;  %5964 = vrcp.f32 %v4383_v35  ;;  %v4384_v30 = vadd.f32 1.0, %v5959_v41  ;;  %vm4526_vm12 = vweird.f32 %v4383_v35  ;;  %v4532_v26 = vand.u32 2147483648, %v4383_v35 }
0x19ec   :  { %v4507_v1 = vmul.f32 %v5961_v39, %v4382_v22  ;;  %vm4512_vm0 = vweird.f32 %v5961_v39  ;;  %v4530_v59 = vand.u32 2147483647, %v4383_v35 }
0x19ed   :  { %5966 = vrcp.f32 %v4384_v30  ;;  %vm8037_vm11 = vmor %vm4511_vm9, %vm4512_vm0  ;;  %v4547_v43 = vand.u32 2147483648, %v4384_v30  ;;  %v4545_v11 = vand.u32 2147483647, %v4384_v30  ;;  %vm4541_vm13 = vweird.f32 %v4384_v30 }
0x19ee   :  { %v4508_v49 = vsub.f32 1.0, %v4507_v1  ;;  %v4533_v33 = vor.u32 1.1754944e-38, %v4532_v26  ;;  %vm4531_vm5 = vcmp.eq.f32.partialorder %v4530_v59, 8.507059e+37  ;;  %vm4874_vm0 = vcmask 254976  }
0x19ef   :  { %v4548_v28 = vor.u32 1.1754944e-38, %v4547_v43  ;;  %vm4546_vm1 = vcmp.eq.f32.partialorder %v4545_v11, 8.507059e+37  ;;  %vm4897_vm9 = vcmask 261120  }
0x19f0   :  { %v5963_v13 = vpop.eup %5962  ;;  %v4509_v58 = vmul.f32 %v5961_v39, %v4508_v49 }
0x19f1   :  { %v5965_v10 = vpop.eup %5964  ;;  %v4385_v62 = vadd.f32 1.0, %v5963_v13 }
0x19f2   :  { %v4522_v44 = vmul.f32 %v5965_v10, %v4383_v35  ;;  %v4510_v63 = vadd.f32 %v5961_v39, %v4509_v58  ;;  %vm4527_vm2 = vweird.f32 %v5965_v10 }
0x19f3   :  { %5968 = vrcp.f32 %v4385_v62  ;;  %v5967_v31 = vpop.eup %5966  ;;  %vm8049_vm15 = vmor %vm4526_vm12, %vm4527_vm2  ;;  %v4560_v34 = vand.u32 2147483647, %v4385_v62  ;;  %v4562_v51 = vand.u32 2147483648, %v4385_v62  ;;  %vm4556_vm6 = vweird.f32 %v4385_v62 }
0x19f4   :  { %v4523_v0 = vsub.f32 1.0, %v4522_v44  ;;  %v4537_v19 = vmul.f32 %v5967_v31, %v4384_v30  ;;  %v4514_v48 = vsel %vm8037_vm11, %v5961_v39, %v4510_v63  ;;  %vm4542_vm10 = vweird.f32 %v5967_v31 }
0x19f5   :  { %v4519_v52 = vsel %vm8041_vm3, %v4518_v54, %v4514_v48  ;;  %vm4543_vm14 = vmor %vm4541_vm13, %vm4542_vm10  ;;  %v4563_v37 = vor.u32 1.1754944e-38, %v4562_v51  ;;  %vm4561_vm8 = vcmp.eq.f32.partialorder %v4560_v34, 8.507059e+37  ;;  %vm4914_vm11 = vcmask 1024  }
0x19f6   :  { %v4524_v29 = vmul.f32 %v5965_v10, %v4523_v0  ;;  %v4538_v60 = vsub.f32 1.0, %v4537_v19  ;;  %v4574_v16 = vmul.f32 %v4519_v52, %v8016_v36 }
0x19f8   :  { %v4539_v21 = vmul.f32 %v5967_v31, %v4538_v60  ;;  %v4525_v12 = vadd.f32 %v5965_v10, %v4524_v29 }
0x19f9   :  { %v5969_v24 = vpop.eup %5968 }
0x19fa   :  { %v4552_v42 = vmul.f32 %v5969_v24, %v4385_v62  ;;  %v4540_v4 = vadd.f32 %v5967_v31, %v4539_v21  ;;  %v4529_v53 = vsel %vm8049_vm15, %v5965_v10, %v4525_v12  ;;  %vm4557_vm4 = vweird.f32 %v5969_v24 }
0x19fb   :  { %v4534_v57 = vsel %vm4531_vm5, %v4533_v33, %v4529_v53  ;;  %vm4558_vm7 = vmor %vm4556_vm6, %vm4557_vm4 }
0x19fc   :  { %v4553_v2 = vsub.f32 1.0, %v4552_v42  ;;  %v4544_v61 = vsel %vm4543_vm14, %v5967_v31, %v4540_v4  ;;  %v4575_v7 = vmul.f32 %v4534_v57, %v8020_v38 }
0x19fd   :  { %v4549_v17 = vsel %vm4546_vm1, %v4548_v28, %v4544_v61 }
0x19fe   :  { %v4554_v25 = vmul.f32 %v5969_v24, %v4553_v2  ;;  %v4576_v9 = vmul.f32 %v4549_v17, %v8024_v5 }
0x1a00   :  { %v4555_v18 = vadd.f32 %v5969_v24, %v4554_v25  ;;  %v4582_v23 = vpack.c.bf16 %v4576_v9, %v4574_v16 }
0x1a02   :  { %v4559_v40 = vsel %vm4558_vm7, %v5969_v24, %v4555_v18  ;;  %4734 = vmatmul.bf16.gmra.mxu1 %v4582_v23 }
0x1a03   :  { %v4564_v50 = vsel %vm4561_vm8, %v4563_v37, %v4559_v40 }
0x1a04   :  { %v4577_v20 = vmul.f32 %v4564_v50, %v8028_v27 }
0x1a06   :  { %v4583_v22 = vpack.c.bf16 %v4577_v20, %v4575_v7 }
0x1a08   :  { %4754 = vmatmul.bf16.gmra.mxu3 %v4583_v22 }
0x1a16   :  { %v4870_v36 = vpop.f32.mrf.mxu0 }
0x1a17   :  { %4875 = vst.msk [vmem:[#allocation3] sm:$0x3] %vm4874_vm0, %v4870_v36  ;;  %v4876_v5 = vpack.c.bf16 %v4870_v36, %v4870_v36 }
0x1a18   :  { %4926 = dma.vmem_to_hbm [thread:$0]  %s4922_s12, 32, %s4924_s24, [#allocation4]  }
0x1a19   :  { %5500 = vmatmul.msk.bf16.vlgmr.msra.gmra.mxu2 %vm4897_vm9, %v4876_v5 }
0x1a1e   :  { %v4872_v8 = vpop.f32.mrf.mxu0 }
0x1a7f   :  { %v4735_v38 = vpop.f32.mrf.mxu1 }
0x1a87   :  { %v4736_v27 = vpop.f32.mrf.mxu1 }
0x1a8b   :  { %v4755_v56 = vpop.f32.mrf.mxu3 }
0x1a93   :  { %v4756_v32 = vpop.f32.mrf.mxu3 }
0x1a9c   :  { %v4910_v45 = vpop.f32.mrf.mxu2 }
0x1a9d   :  { %v4911_v35 = vadd.f32 %v5617_v6, %v4910_v45 }
0x1a9f   :  { %4915 = vst.msk [vmem:[%s8088_s23] sm:$0x3] %vm4914_vm11, %v4911_v35 }
0x1aa4   :  { %v4912_v41 = vpop.f32.mrf.mxu2 }
0x1aa5   :  { %5994 = dma.done.wait [#allocation4], 32  }
0x1aa6   :  { %5995 = vsyncadd [#allocation4], 4294967264 }
0x1aa7   :  { %4935 = vsyncpa [#allocation4], 1 }

</bundles_post_ra>
